<compile_context>
chip_gen: v6e
topology: v6e:2x2x1
jax: 0.10.0
libtpu: 0.0.40
codegen_flags: <defaults>
</compile_context>

<pallas_src>
import numpy as np
import jax
import jax.numpy as jnp
from jax.experimental import pallas as pl
from jax.experimental.pallas import tpu as pltpu

_MiB = 1024 * 1024


# --------------------------------------------------------------------------------
# Small helpers
# --------------------------------------------------------------------------------
def _ntuple6(p):
    if isinstance(p, (tuple, list)):
        assert len(p) == 6, "padding must be an int or a 6-tuple"
        return tuple(int(v) for v in p)
    return (int(p),) * 6


def _pad_pairs(pad):
    # Same pair construction as ReflectionPadNd: pairs for dims (D, H, W).
    return tuple((a, b) for a, b in zip(pad[:-1:2], pad[1::2]))[::-1]


def _ceil_to(x, m):
    return ((x + m - 1) // m) * m


def _padded_tile_elems(rows, cols, itemsize):
    """Elements of a (rows, cols) tile once padded to TPU (sublane, lane) granularity."""
    sub = max(8, 32 // itemsize)          # f32: 8, bf16: 16, int8/fp8: 32
    return _ceil_to(rows, sub) * _ceil_to(cols, 128)


def _tpu_topology():
    """(TensorCores sharing one Pallas grid, physical VMEM bytes) with safe fallbacks."""
    num_tc = 1
    vmem_cap = 64 * _MiB                  # conservative default: v7x has the smallest VMEM
    try:
        info = pltpu.get_tpu_info()
        cap = getattr(info, "vmem_capacity_bytes", None)
        if cap:
            vmem_cap = int(cap)
        for attr in ("num_tensorcores", "tensorcores_per_chip", "num_cores",
                     "cores_per_chip"):
            v = getattr(info, attr, None)
            if v:
                num_tc = max(num_tc, int(v))
                break
    except Exception:
        pass
    try:
        kind = jax.devices()[0].device_kind.lower()
        if "v7" in kind or "v4" in kind:  # megacore: 2 TCs behind one Pallas grid
            num_tc = max(num_tc, 2)
    except Exception:
        pass
    return num_tc, vmem_cap


# --------------------------------------------------------------------------------
# Kernels
# --------------------------------------------------------------------------------
def _hw_pad_store_4d(o_ref, x_ref, od0, oD, xd0, H, W, ph_l, ph_r, pw_l, pw_r):
    """Write the H/W-symmetric-padded version of x_ref planes [xd0, xd0+oD) into
    o_ref planes [od0, od0+oD).  4-D refs: (TNC, D*, H(_out), W(_out))."""
    od = slice(od0, od0 + oD)
    xd = slice(xd0, xd0 + oD)
    # Core (H, W) block of every plane, straight from the input ref (no intermediate).
    o_ref[:, od, ph_l:ph_l + H, pw_l:pw_l + W] = x_ref[:, xd, :, :]
    # W (lane) borders of the core rows: 1-wide column stores from the input edges.
    for i in range(pw_l):
        o_ref[:, od, ph_l:ph_l + H, pw_l - 1 - i:pw_l - i] = x_ref[:, xd, :, i:i + 1]
    for j in range(pw_r):
        o_ref[:, od, ph_l:ph_l + H, pw_l + W + j:pw_l + W + j + 1] = \
            x_ref[:, xd, :, W - 1 - j:W - j]
    # H (sublane) borders: copy whole already-padded output rows (VMEM resident).
    for i in range(ph_l):
        o_ref[:, od, ph_l - 1 - i:ph_l - i, :] = o_ref[:, od, ph_l + i:ph_l + i + 1, :]
    for j in range(ph_r):
        o_ref[:, od, ph_l + H + j:ph_l + H + j + 1, :] = \
            o_ref[:, od, ph_l + H - 1 - j:ph_l + H - j, :]


def _make_block_kernel_4d(D, H, W, pairs):
    """Whole-volume block kernel on (TNC, D, H, W) -> (TNC, D_out, H_out, W_out)."""
    (pd_l, pd_r), (ph_l, ph_r), (pw_l, pw_r) = pairs

    def kernel(x_ref, o_ref):
        _hw_pad_store_4d(o_ref, x_ref, pd_l, D, 0, H, W, ph_l, ph_r, pw_l, pw_r)
        # D borders: copy whole already-padded output planes.
        for i in range(pd_l):
            o_ref[:, pd_l - 1 - i:pd_l - i, :, :] = o_ref[:, pd_l + i:pd_l + i + 1, :, :]
        for j in range(pd_r):
            o_ref[:, pd_l + D + j:pd_l + D + j + 1, :, :] = \
                o_ref[:, pd_l + D - 1 - j:pd_l + D - j, :, :]

    return kernel


def _make_block_kernel_flat(D, H, W, pairs):
    """Lane-dense block kernel on (TNC, D, H*W) -> (TNC, D_out, H_out*W_out).
    All offsets are static, so every store lowers to aligned/rotated vst, and the
    H-row / D-plane border copies are wide contiguous lane copies."""
    (pd_l, pd_r), (ph_l, ph_r), (pw_l, pw_r) = pairs
    W_out = W + pw_l + pw_r

    def kernel(x_ref, o_ref):
        od = slice(pd_l, pd_l + D)
        if ph_l == 0 and ph_r == 0 and pw_l == 0 and pw_r == 0:
            o_ref[:, od, :] = x_ref[:, :, :]
        else:
            for h in range(H):
                xo = h * W
                oo = (ph_l + h) * W_out
                # Core row (W contiguous lanes).
                o_ref[:, od, oo + pw_l:oo + pw_l + W] = x_ref[:, :, xo:xo + W]
                # W borders of this row (tiny static single-lane stores).
                for i in range(pw_l):
                    o_ref[:, od, oo + pw_l - 1 - i:oo + pw_l - i] = \
                        x_ref[:, :, xo + i:xo + i + 1]
                for j in range(pw_r):
                    o_ref[:, od, oo + pw_l + W + j:oo + pw_l + W + j + 1] = \
                        x_ref[:, :, xo + W - 1 - j:xo + W - j]
            # H borders: copy whole already-padded W_out-lane rows.
            for i in range(ph_l):
                do_ = (ph_l - 1 - i) * W_out
                so_ = (ph_l + i) * W_out
                o_ref[:, od, do_:do_ + W_out] = o_ref[:, od, so_:so_ + W_out]
            for j in range(ph_r):
                do_ = (ph_l + H + j) * W_out
                so_ = (ph_l + H - 1 - j) * W_out
                o_ref[:, od, do_:do_ + W_out] = o_ref[:, od, so_:so_ + W_out]
        # D borders: whole padded planes (H_out*W_out contiguous lanes).
        for i in range(pd_l):
            o_ref[:, pd_l - 1 - i:pd_l - i, :] = o_ref[:, pd_l + i:pd_l + i + 1, :]
        for j in range(pd_r):
            o_ref[:, pd_l + D + j:pd_l + D + j + 1, :] = \
                o_ref[:, pd_l + D - 1 - j:pd_l + D - j, :]

    return kernel


def _make_plane_kernel(H, W, ph_l, ph_r, pw_l, pw_r):
    """Per-output-D-plane fallback kernel; the D reflection is done by the scalar-
    prefetched source-plane map in the input index_map."""

    def kernel(dsrc_ref, x_ref, o_ref):
        del dsrc_ref  # consumed by the index_maps only
        _hw_pad_store_4d(o_ref, x_ref, 0, 1, 0, H, W, ph_l, ph_r, pw_l, pw_r)

    return kernel


# --------------------------------------------------------------------------------
# Wrapper
# --------------------------------------------------------------------------------
def _block_split(NC, per_step_unit_bytes, num_tc, vmem_ceiling):
    """Pick (units-per-step, num_blocks, vmem_limit_bytes) from the padded footprint."""
    target_step = 8 * _MiB if num_tc >= 2 else 16 * _MiB   # bigger tiles on 1-TC parts
    target_step = min(target_step, vmem_ceiling // 4)       # keep double-buffer in budget
    t = max(1, min(NC, target_step // max(1, per_step_unit_bytes)))
    num_blocks = pl.cdiv(NC, t)
    if num_tc > 1 and NC > 1:
        # Balanced block count that is a multiple of the core count (megacore sharding).
        num_blocks = min(_ceil_to(max(num_blocks, num_tc), num_tc), NC)
        t = pl.cdiv(NC, num_blocks)
        num_blocks = pl.cdiv(NC, t)
    step_bytes = t * per_step_unit_bytes
    # Double-buffered in+out per step, 25% + 4 MiB headroom for Mosaic scratch,
    # clamped to the per-generation ceiling (<= 48 MiB on v7x's 64 MiB VMEM).
    vmem_limit = int(min(max(2 * step_bytes * 5 // 4 + 4 * _MiB, 32 * _MiB), vmem_ceiling))
    return t, num_blocks, vmem_limit


def reflection_pad3d(x, padding, *, _force_plane_grid=False):
    """Pallas equivalent of ReflectionPad3d(padding).forward(x); x: (N, C, D, H, W)."""
    pad = _ntuple6(padding)
    (pd_l, pd_r), (ph_l, ph_r), (pw_l, pw_r) = _pad_pairs(pad)

    N, C, D, H, W = x.shape
    assert all(p >= 0 for p in pad), "negative padding not supported"
    assert pd_l <= D and pd_r <= D, "D padding larger than D"
    assert ph_l <= H and ph_r <= H, "H padding larger than H"
    assert pw_l <= W and pw_r <= W, "W padding larger than W"

    D_out, H_out, W_out = D + pd_l + pd_r, H + ph_l + ph_r, W + pw_l + pw_r
    NC = N * C
    itemsize = jnp.dtype(x.dtype).itemsize
    pairs = ((pd_l, pd_r), (ph_l, ph_r), (pw_l, pw_r))

    num_tc, vmem_cap = _tpu_topology()
    vmem_ceiling = max(32 * _MiB, min(vmem_cap - 16 * _MiB, 112 * _MiB))

    total_bytes = NC * (D * H * W + D_out * H_out * W_out) * itemsize
    cost = pl.CostEstimate(flops=0, transcendentals=0, bytes_accessed=total_bytes)

    # ---- layout choice ---------------------------------------------------------
    # Flatten (H, W) into one lane axis (free reshape) when W_out is lane-sparse;
    # cap the per-row unroll so code size stays bounded for very tall planes.
    use_flat = (W_out < 128) and (H * (1 + pw_l + pw_r) + ph_l + ph_r <= 512)

    if use_flat:
        per_ch_padded = (_padded_tile_elems(D, H * W, itemsize)
                         + _padded_tile_elems(D_out, H_out * W_out, itemsize)) * itemsize
    else:
        per_ch_padded = (D * _padded_tile_elems(H, W, itemsize)
                         + D_out * _padded_tile_elems(H_out, W_out, itemsize)) * itemsize

    # ---- fallback: one channel volume too big to double-buffer ------------------
    use_plane_grid = _force_plane_grid or (2 * per_ch_padded > (vmem_ceiling * 4) // 5)

    if use_plane_grid:
        x4 = x.reshape(NC, D, H, W)
        per_plane = (_padded_tile_elems(H, W, itemsize)
                     + _padded_tile_elems(H_out, W_out, itemsize)) * itemsize
        tnc, num_blocks, vmem_limit = _block_split(NC, per_plane, num_tc, vmem_ceiling)

        # Output-D-plane -> source-input-D-plane map (symmetric, edge-inclusive).
        dsrc = np.empty((D_out,), dtype=np.int32)
        for d in range(D_out):
            if d < pd_l:
                dsrc[d] = pd_l - 1 - d
            elif d < pd_l + D:
                dsrc[d] = d - pd_l
            else:
                dsrc[d] = 2 * D + pd_l - 1 - d
        dsrc = jnp.asarray(dsrc)

        out4 = pl.pallas_call(
            _make_plane_kernel(H, W, ph_l, ph_r, pw_l, pw_r),
            out_shape=jax.ShapeDtypeStruct((NC, D_out, H_out, W_out), x.dtype),
            grid_spec=pltpu.PrefetchScalarGridSpec(
                num_scalar_prefetch=1,
                grid=(num_blocks, D_out),
                in_specs=[pl.BlockSpec((tnc, 1, H, W),
                                       lambda i, d, dmap: (i, dmap[d], 0, 0))],
                out_specs=pl.BlockSpec((tnc, 1, H_out, W_out),
                                       lambda i, d, dmap: (i, d, 0, 0)),
            ),
            compiler_params=pltpu.CompilerParams(
                dimension_semantics=("parallel", "arbitrary"),
                vmem_limit_bytes=vmem_limit,
            ),
            cost_estimate=cost,
        )(dsrc, x.reshape(NC, D, H, W) if False else x4)
        return out4.reshape(N, C, D_out, H_out, W_out)

    # ---- main path: whole-volume blocks over the NC axis ------------------------
    tnc, num_blocks, vmem_limit = _block_split(NC, per_ch_padded, num_tc, vmem_ceiling)

    if use_flat:
        x_in = x.reshape(NC, D, H * W)                       # free: trailing dims merge
        kernel = _make_block_kernel_flat(D, H, W, pairs)
        in_spec = pl.BlockSpec((tnc, D, H * W), lambda i: (i, 0, 0))
        out_spec = pl.BlockSpec((tnc, D_out, H_out * W_out), lambda i: (i, 0, 0))
        out_shape = jax.ShapeDtypeStruct((NC, D_out, H_out * W_out), x.dtype)
    else:
        x_in = x.reshape(NC, D, H, W)
        kernel = _make_block_kernel_4d(D, H, W, pairs)
        in_spec = pl.BlockSpec((tnc, D, H, W), lambda i: (i, 0, 0, 0))
        out_spec = pl.BlockSpec((tnc, D_out, H_out, W_out), lambda i: (i, 0, 0, 0))
        out_shape = jax.ShapeDtypeStruct((NC, D_out, H_out, W_out), x.dtype)

    out = pl.pallas_call(
        kernel,
        out_shape=out_shape,
        grid=(num_blocks,),
        in_specs=[in_spec],
        out_specs=out_spec,
        compiler_params=pltpu.CompilerParams(
            dimension_semantics=("parallel",),
            vmem_limit_bytes=vmem_limit,
        ),
        cost_estimate=cost,
    )(x_in)

    return out.reshape(N, C, D_out, H_out, W_out)


# --------------------------------------------------------------------------------
# Reference + self-test
# --------------------------------------------------------------------------------
def _reference(x, padding):
    pad = _ntuple6(padding)
    (pd_l, pd_r), (ph_l, ph_r), (pw_l, pw_r) = _pad_pairs(pad)
    return jnp.pad(
        x,
        ((0, 0), (0, 0), (pd_l, pd_r), (ph_l, ph_r), (pw_l, pw_r)),
        mode="symmetric",
    )


if __name__ == "__main__":
    key = jax.random.PRNGKey(0)
    x = jax.random.normal(key, (2, 4, 8, 16, 16), dtype=jnp.float32)

    # 1) ReflectionPad3d(2): pad 2 on every side of D, H, W (lane-dense flat path).
    y = jax.block_until_ready(reflection_pad3d(x, 2))
    assert y.shape == (2, 4, 12, 20, 20), y.shape
    np.testing.assert_array_equal(np.asarray(y), np.asarray(_reference(x, 2)))

    # 2) Asymmetric 6-tuple (W_l, W_r, H_l, H_r, D_l, D_r).
    pad6 = (1, 2, 1, 2, 1, 2)
    y2 = jax.block_until_ready(reflection_pad3d(x, pad6))
    assert y2.shape == (2, 4, 11, 19, 19), y2.shape
    np.testing.assert_array_equal(np.asarray(y2), np.asarray(_reference(x, pad6)))

    # 3) Per-D-plane fallback grid (used when a channel volume would overflow VMEM).
    y3 = jax.block_until_ready(reflection_pad3d(x, 2, _force_plane_grid=True))
    np.testing.assert_array_equal(np.asarray(y3), np.asarray(_reference(x, 2)))

    # 4) Lane-dense input (W >= 128) exercises the plain 4-D block kernel.
    x2 = jax.random.normal(jax.random.PRNGKey(0), (1, 2, 4, 8, 128), dtype=jnp.float32)
    y4 = jax.block_until_ready(reflection_pad3d(x2, 1))
    assert y4.shape == (1, 2, 6, 10, 130), y4.shape
    np.testing.assert_array_equal(np.asarray(y4), np.asarray(_reference(x2, 1)))

    print("KERNEL_OK")
</pallas_src>

<mosaic_0001>
module attributes {stable_mosaic.version = 11 : i64} {
  func.func @kernel(%arg0: i32, %arg1: memref<8x8x256xf32, #tpu.memory_space<vmem>>, %arg2: memref<8x12x400xf32, #tpu.memory_space<vmem>>) attributes {dimension_semantics = [#tpu.dimension_semantics<parallel>], iteration_bounds = array<i64: 1>, scalar_prefetch = 0 : i64, scratch_operands = 0 : i64, tpu.core_type = #tpu.core_type<tc>, window_params = [{transform_indices = @transform_0, window_bounds = array<i64: 8, 8, 256>}, {transform_indices = @transform_1, window_bounds = array<i64: 8, 12, 400>}]} {
    %c0 = arith.constant 0 : index
    %c0_0 = arith.constant 0 : index
    %c0_1 = arith.constant 0 : index
    %0 = vector.load %arg1[%c0, %c0_0, %c0_1] : memref<8x8x256xf32, #tpu.memory_space<vmem>>, vector<8x8x16xf32>
    %c0_2 = arith.constant 0 : index
    %c2 = arith.constant 2 : index
    %c42 = arith.constant 42 : index
    %1 = vector.load %arg2[%c0_2, %c2, %c42] : memref<8x12x400xf32, #tpu.memory_space<vmem>>, vector<8x8x16xf32>
    tpu.vector_store %arg2[%c0_2, %c2, %c42], %0 {strides = array<i32>} : memref<8x12x400xf32, #tpu.memory_space<vmem>>, vector<8x8x16xf32>,
    %c0_3 = arith.constant 0 : index
    %c0_4 = arith.constant 0 : index
    %c0_5 = arith.constant 0 : index
    %2 = vector.load %arg1[%c0_3, %c0_4, %c0_5] : memref<8x8x256xf32, #tpu.memory_space<vmem>>, vector<8x8x1xf32>
    %c0_6 = arith.constant 0 : index
    %c2_7 = arith.constant 2 : index
    %c41 = arith.constant 41 : index
    %3 = vector.load %arg2[%c0_6, %c2_7, %c41] : memref<8x12x400xf32, #tpu.memory_space<vmem>>, vector<8x8x1xf32>
    tpu.vector_store %arg2[%c0_6, %c2_7, %c41], %2 {strides = array<i32>} : memref<8x12x400xf32, #tpu.memory_space<vmem>>, vector<8x8x1xf32>,
    %c0_8 = arith.constant 0 : index
    %c0_9 = arith.constant 0 : index
    %c1 = arith.constant 1 : index
    %4 = vector.load %arg1[%c0_8, %c0_9, %c1] : memref<8x8x256xf32, #tpu.memory_space<vmem>>, vector<8x8x1xf32>
    %c0_10 = arith.constant 0 : index
    %c2_11 = arith.constant 2 : index
    %c40 = arith.constant 40 : index
    %5 = vector.load %arg2[%c0_10, %c2_11, %c40] : memref<8x12x400xf32, #tpu.memory_space<vmem>>, vector<8x8x1xf32>
    tpu.vector_store %arg2[%c0_10, %c2_11, %c40], %4 {strides = array<i32>} : memref<8x12x400xf32, #tpu.memory_space<vmem>>, vector<8x8x1xf32>,
    %c0_12 = arith.constant 0 : index
    %c0_13 = arith.constant 0 : index
    %c15 = arith.constant 15 : index
    %6 = vector.load %arg1[%c0_12, %c0_13, %c15] : memref<8x8x256xf32, #tpu.memory_space<vmem>>, vector<8x8x1xf32>
    %c0_14 = arith.constant 0 : index
    %c2_15 = arith.constant 2 : index
    %c58 = arith.constant 58 : index
    %7 = vector.load %arg2[%c0_14, %c2_15, %c58] : memref<8x12x400xf32, #tpu.memory_space<vmem>>, vector<8x8x1xf32>
    tpu.vector_store %arg2[%c0_14, %c2_15, %c58], %6 {strides = array<i32>} : memref<8x12x400xf32, #tpu.memory_space<vmem>>, vector<8x8x1xf32>,
    %c0_16 = arith.constant 0 : index
    %c0_17 = arith.constant 0 : index
    %c14 = arith.constant 14 : index
    %8 = vector.load %arg1[%c0_16, %c0_17, %c14] : memref<8x8x256xf32, #tpu.memory_space<vmem>>, vector<8x8x1xf32>
    %c0_18 = arith.constant 0 : index
    %c2_19 = arith.constant 2 : index
    %c59 = arith.constant 59 : index
    %9 = vector.load %arg2[%c0_18, %c2_19, %c59] : memref<8x12x400xf32, #tpu.memory_space<vmem>>, vector<8x8x1xf32>
    tpu.vector_store %arg2[%c0_18, %c2_19, %c59], %8 {strides = array<i32>} : memref<8x12x400xf32, #tpu.memory_space<vmem>>, vector<8x8x1xf32>,
    %c0_20 = arith.constant 0 : index
    %c0_21 = arith.constant 0 : index
    %c16 = arith.constant 16 : index
    %10 = vector.load %arg1[%c0_20, %c0_21, %c16] : memref<8x8x256xf32, #tpu.memory_space<vmem>>, vector<8x8x16xf32>
    %c0_22 = arith.constant 0 : index
    %c2_23 = arith.constant 2 : index
    %c62 = arith.constant 62 : index
    %11 = vector.load %arg2[%c0_22, %c2_23, %c62] : memref<8x12x400xf32, #tpu.memory_space<vmem>>, vector<8x8x16xf32>
    tpu.vector_store %arg2[%c0_22, %c2_23, %c62], %10 {strides = array<i32>} : memref<8x12x400xf32, #tpu.memory_space<vmem>>, vector<8x8x16xf32>,
    %c0_24 = arith.constant 0 : index
    %c0_25 = arith.constant 0 : index
    %c16_26 = arith.constant 16 : index
    %12 = vector.load %arg1[%c0_24, %c0_25, %c16_26] : memref<8x8x256xf32, #tpu.memory_space<vmem>>, vector<8x8x1xf32>
    %c0_27 = arith.constant 0 : index
    %c2_28 = arith.constant 2 : index
    %c61 = arith.constant 61 : index
    %13 = vector.load %arg2[%c0_27, %c2_28, %c61] : memref<8x12x400xf32, #tpu.memory_space<vmem>>, vector<8x8x1xf32>
    tpu.vector_store %arg2[%c0_27, %c2_28, %c61], %12 {strides = array<i32>} : memref<8x12x400xf32, #tpu.memory_space<vmem>>, vector<8x8x1xf32>,
    %c0_29 = arith.constant 0 : index
    %c0_30 = arith.constant 0 : index
    %c17 = arith.constant 17 : index
    %14 = vector.load %arg1[%c0_29, %c0_30, %c17] : memref<8x8x256xf32, #tpu.memory_space<vmem>>, vector<8x8x1xf32>
    %c0_31 = arith.constant 0 : index
    %c2_32 = arith.constant 2 : index
    %c60 = arith.constant 60 : index
    %15 = vector.load %arg2[%c0_31, %c2_32, %c60] : memref<8x12x400xf32, #tpu.memory_space<vmem>>, vector<8x8x1xf32>
    tpu.vector_store %arg2[%c0_31, %c2_32, %c60], %14 {strides = array<i32>} : memref<8x12x400xf32, #tpu.memory_space<vmem>>, vector<8x8x1xf32>,
    %c0_33 = arith.constant 0 : index
    %c0_34 = arith.constant 0 : index
    %c31 = arith.constant 31 : index
    %16 = vector.load %arg1[%c0_33, %c0_34, %c31] : memref<8x8x256xf32, #tpu.memory_space<vmem>>, vector<8x8x1xf32>
    %c0_35 = arith.constant 0 : index
    %c2_36 = arith.constant 2 : index
    %c78 = arith.constant 78 : index
    %17 = vector.load %arg2[%c0_35, %c2_36, %c78] : memref<8x12x400xf32, #tpu.memory_space<vmem>>, vector<8x8x1xf32>
    tpu.vector_store %arg2[%c0_35, %c2_36, %c78], %16 {strides = array<i32>} : memref<8x12x400xf32, #tpu.memory_space<vmem>>, vector<8x8x1xf32>,
    %c0_37 = arith.constant 0 : index
    %c0_38 = arith.constant 0 : index
    %c30 = arith.constant 30 : index
    %18 = vector.load %arg1[%c0_37, %c0_38, %c30] : memref<8x8x256xf32, #tpu.memory_space<vmem>>, vector<8x8x1xf32>
    %c0_39 = arith.constant 0 : index
    %c2_40 = arith.constant 2 : index
    %c79 = arith.constant 79 : index
    %19 = vector.load %arg2[%c0_39, %c2_40, %c79] : memref<8x12x400xf32, #tpu.memory_space<vmem>>, vector<8x8x1xf32>
    tpu.vector_store %arg2[%c0_39, %c2_40, %c79], %18 {strides = array<i32>} : memref<8x12x400xf32, #tpu.memory_space<vmem>>, vector<8x8x1xf32>,
    %c0_41 = arith.constant 0 : index
    %c0_42 = arith.constant 0 : index
    %c32 = arith.constant 32 : index
    %20 = vector.load %arg1[%c0_41, %c0_42, %c32] : memref<8x8x256xf32, #tpu.memory_space<vmem>>, vector<8x8x16xf32>
    %c0_43 = arith.constant 0 : index
    %c2_44 = arith.constant 2 : index
    %c82 = arith.constant 82 : index
    %21 = vector.load %arg2[%c0_43, %c2_44, %c82] : memref<8x12x400xf32, #tpu.memory_space<vmem>>, vector<8x8x16xf32>
    tpu.vector_store %arg2[%c0_43, %c2_44, %c82], %20 {strides = array<i32>} : memref<8x12x400xf32, #tpu.memory_space<vmem>>, vector<8x8x16xf32>,
    %c0_45 = arith.constant 0 : index
    %c0_46 = arith.constant 0 : index
    %c32_47 = arith.constant 32 : index
    %22 = vector.load %arg1[%c0_45, %c0_46, %c32_47] : memref<8x8x256xf32, #tpu.memory_space<vmem>>, vector<8x8x1xf32>
    %c0_48 = arith.constant 0 : index
    %c2_49 = arith.constant 2 : index
    %c81 = arith.constant 81 : index
    %23 = vector.load %arg2[%c0_48, %c2_49, %c81] : memref<8x12x400xf32, #tpu.memory_space<vmem>>, vector<8x8x1xf32>
    tpu.vector_store %arg2[%c0_48, %c2_49, %c81], %22 {strides = array<i32>} : memref<8x12x400xf32, #tpu.memory_space<vmem>>, vector<8x8x1xf32>,
    %c0_50 = arith.constant 0 : index
    %c0_51 = arith.constant 0 : index
    %c33 = arith.constant 33 : index
    %24 = vector.load %arg1[%c0_50, %c0_51, %c33] : memref<8x8x256xf32, #tpu.memory_space<vmem>>, vector<8x8x1xf32>
    %c0_52 = arith.constant 0 : index
    %c2_53 = arith.constant 2 : index
    %c80 = arith.constant 80 : index
    %25 = vector.load %arg2[%c0_52, %c2_53, %c80] : memref<8x12x400xf32, #tpu.memory_space<vmem>>, vector<8x8x1xf32>
    tpu.vector_store %arg2[%c0_52, %c2_53, %c80], %24 {strides = array<i32>} : memref<8x12x400xf32, #tpu.memory_space<vmem>>, vector<8x8x1xf32>,
    %c0_54 = arith.constant 0 : index
    %c0_55 = arith.constant 0 : index
    %c47 = arith.constant 47 : index
    %26 = vector.load %arg1[%c0_54, %c0_55, %c47] : memref<8x8x256xf32, #tpu.memory_space<vmem>>, vector<8x8x1xf32>
    %c0_56 = arith.constant 0 : index
    %c2_57 = arith.constant 2 : index
    %c98 = arith.constant 98 : index
    %27 = vector.load %arg2[%c0_56, %c2_57, %c98] : memref<8x12x400xf32, #tpu.memory_space<vmem>>, vector<8x8x1xf32>
    tpu.vector_store %arg2[%c0_56, %c2_57, %c98], %26 {strides = array<i32>} : memref<8x12x400xf32, #tpu.memory_space<vmem>>, vector<8x8x1xf32>,
    %c0_58 = arith.constant 0 : index
    %c0_59 = arith.constant 0 : index
    %c46 = arith.constant 46 : index
    %28 = vector.load %arg1[%c0_58, %c0_59, %c46] : memref<8x8x256xf32, #tpu.memory_space<vmem>>, vector<8x8x1xf32>
    %c0_60 = arith.constant 0 : index
    %c2_61 = arith.constant 2 : index
    %c99 = arith.constant 99 : index
    %29 = vector.load %arg2[%c0_60, %c2_61, %c99] : memref<8x12x400xf32, #tpu.memory_space<vmem>>, vector<8x8x1xf32>
    tpu.vector_store %arg2[%c0_60, %c2_61, %c99], %28 {strides = array<i32>} : memref<8x12x400xf32, #tpu.memory_space<vmem>>, vector<8x8x1xf32>,
    %c0_62 = arith.constant 0 : index
    %c0_63 = arith.constant 0 : index
    %c48 = arith.constant 48 : index
    %30 = vector.load %arg1[%c0_62, %c0_63, %c48] : memref<8x8x256xf32, #tpu.memory_space<vmem>>, vector<8x8x16xf32>
    %c0_64 = arith.constant 0 : index
    %c2_65 = arith.constant 2 : index
    %c102 = arith.constant 102 : index
    %31 = vector.load %arg2[%c0_64, %c2_65, %c102] : memref<8x12x400xf32, #tpu.memory_space<vmem>>, vector<8x8x16xf32>
    tpu.vector_store %arg2[%c0_64, %c2_65, %c102], %30 {strides = array<i32>} : memref<8x12x400xf32, #tpu.memory_space<vmem>>, vector<8x8x16xf32>,
    %c0_66 = arith.constant 0 : index
    %c0_67 = arith.constant 0 : index
    %c48_68 = arith.constant 48 : index
    %32 = vector.load %arg1[%c0_66, %c0_67, %c48_68] : memref<8x8x256xf32, #tpu.memory_space<vmem>>, vector<8x8x1xf32>
    %c0_69 = arith.constant 0 : index
    %c2_70 = arith.constant 2 : index
    %c101 = arith.constant 101 : index
    %33 = vector.load %arg2[%c0_69, %c2_70, %c101] : memref<8x12x400xf32, #tpu.memory_space<vmem>>, vector<8x8x1xf32>
    tpu.vector_store %arg2[%c0_69, %c2_70, %c101], %32 {strides = array<i32>} : memref<8x12x400xf32, #tpu.memory_space<vmem>>, vector<8x8x1xf32>,
    %c0_71 = arith.constant 0 : index
    %c0_72 = arith.constant 0 : index
    %c49 = arith.constant 49 : index
    %34 = vector.load %arg1[%c0_71, %c0_72, %c49] : memref<8x8x256xf32, #tpu.memory_space<vmem>>, vector<8x8x1xf32>
    %c0_73 = arith.constant 0 : index
    %c2_74 = arith.constant 2 : index
    %c100 = arith.constant 100 : index
    %35 = vector.load %arg2[%c0_73, %c2_74, %c100] : memref<8x12x400xf32, #tpu.memory_space<vmem>>, vector<8x8x1xf32>
    tpu.vector_store %arg2[%c0_73, %c2_74, %c100], %34 {strides = array<i32>} : memref<8x12x400xf32, #tpu.memory_space<vmem>>, vector<8x8x1xf32>,
    %c0_75 = arith.constant 0 : index
    %c0_76 = arith.constant 0 : index
    %c63 = arith.constant 63 : index
    %36 = vector.load %arg1[%c0_75, %c0_76, %c63] : memref<8x8x256xf32, #tpu.memory_space<vmem>>, vector<8x8x1xf32>
    %c0_77 = arith.constant 0 : index
    %c2_78 = arith.constant 2 : index
    %c118 = arith.constant 118 : index
    %37 = vector.load %arg2[%c0_77, %c2_78, %c118] : memref<8x12x400xf32, #tpu.memory_space<vmem>>, vector<8x8x1xf32>
    tpu.vector_store %arg2[%c0_77, %c2_78, %c118], %36 {strides = array<i32>} : memref<8x12x400xf32, #tpu.memory_space<vmem>>, vector<8x8x1xf32>,
    %c0_79 = arith.constant 0 : index
    %c0_80 = arith.constant 0 : index
    %c62_81 = arith.constant 62 : index
    %38 = vector.load %arg1[%c0_79, %c0_80, %c62_81] : memref<8x8x256xf32, #tpu.memory_space<vmem>>, vector<8x8x1xf32>
    %c0_82 = arith.constant 0 : index
    %c2_83 = arith.constant 2 : index
    %c119 = arith.constant 119 : index
    %39 = vector.load %arg2[%c0_82, %c2_83, %c119] : memref<8x12x400xf32, #tpu.memory_space<vmem>>, vector<8x8x1xf32>
    tpu.vector_store %arg2[%c0_82, %c2_83, %c119], %38 {strides = array<i32>} : memref<8x12x400xf32, #tpu.memory_space<vmem>>, vector<8x8x1xf32>,
    %c0_84 = arith.constant 0 : index
    %c0_85 = arith.constant 0 : index
    %c64 = arith.constant 64 : index
    %40 = vector.load %arg1[%c0_84, %c0_85, %c64] : memref<8x8x256xf32, #tpu.memory_space<vmem>>, vector<8x8x16xf32>
    %c0_86 = arith.constant 0 : index
    %c2_87 = arith.constant 2 : index
    %c122 = arith.constant 122 : index
    %41 = vector.load %arg2[%c0_86, %c2_87, %c122] : memref<8x12x400xf32, #tpu.memory_space<vmem>>, vector<8x8x16xf32>
    tpu.vector_store %arg2[%c0_86, %c2_87, %c122], %40 {strides = array<i32>} : memref<8x12x400xf32, #tpu.memory_space<vmem>>, vector<8x8x16xf32>,
    %c0_88 = arith.constant 0 : index
    %c0_89 = arith.constant 0 : index
    %c64_90 = arith.constant 64 : index
    %42 = vector.load %arg1[%c0_88, %c0_89, %c64_90] : memref<8x8x256xf32, #tpu.memory_space<vmem>>, vector<8x8x1xf32>
    %c0_91 = arith.constant 0 : index
    %c2_92 = arith.constant 2 : index
    %c121 = arith.constant 121 : index
    %43 = vector.load %arg2[%c0_91, %c2_92, %c121] : memref<8x12x400xf32, #tpu.memory_space<vmem>>, vector<8x8x1xf32>
    tpu.vector_store %arg2[%c0_91, %c2_92, %c121], %42 {strides = array<i32>} : memref<8x12x400xf32, #tpu.memory_space<vmem>>, vector<8x8x1xf32>,
    %c0_93 = arith.constant 0 : index
    %c0_94 = arith.constant 0 : index
    %c65 = arith.constant 65 : index
    %44 = vector.load %arg1[%c0_93, %c0_94, %c65] : memref<8x8x256xf32, #tpu.memory_space<vmem>>, vector<8x8x1xf32>
    %c0_95 = arith.constant 0 : index
    %c2_96 = arith.constant 2 : index
    %c120 = arith.constant 120 : index
    %45 = vector.load %arg2[%c0_95, %c2_96, %c120] : memref<8x12x400xf32, #tpu.memory_space<vmem>>, vector<8x8x1xf32>
    tpu.vector_store %arg2[%c0_95, %c2_96, %c120], %44 {strides = array<i32>} : memref<8x12x400xf32, #tpu.memory_space<vmem>>, vector<8x8x1xf32>,
    %c0_97 = arith.constant 0 : index
    %c0_98 = arith.constant 0 : index
    %c79_99 = arith.constant 79 : index
    %46 = vector.load %arg1[%c0_97, %c0_98, %c79_99] : memref<8x8x256xf32, #tpu.memory_space<vmem>>, vector<8x8x1xf32>
    %c0_100 = arith.constant 0 : index
    %c2_101 = arith.constant 2 : index
    %c138 = arith.constant 138 : index
    %47 = vector.load %arg2[%c0_100, %c2_101, %c138] : memref<8x12x400xf32, #tpu.memory_space<vmem>>, vector<8x8x1xf32>
    tpu.vector_store %arg2[%c0_100, %c2_101, %c138], %46 {strides = array<i32>} : memref<8x12x400xf32, #tpu.memory_space<vmem>>, vector<8x8x1xf32>,
    %c0_102 = arith.constant 0 : index
    %c0_103 = arith.constant 0 : index
    %c78_104 = arith.constant 78 : index
    %48 = vector.load %arg1[%c0_102, %c0_103, %c78_104] : memref<8x8x256xf32, #tpu.memory_space<vmem>>, vector<8x8x1xf32>
    %c0_105 = arith.constant 0 : index
    %c2_106 = arith.constant 2 : index
    %c139 = arith.constant 139 : index
    %49 = vector.load %arg2[%c0_105, %c2_106, %c139] : memref<8x12x400xf32, #tpu.memory_space<vmem>>, vector<8x8x1xf32>
    tpu.vector_store %arg2[%c0_105, %c2_106, %c139], %48 {strides = array<i32>} : memref<8x12x400xf32, #tpu.memory_space<vmem>>, vector<8x8x1xf32>,
    %c0_107 = arith.constant 0 : index
    %c0_108 = arith.constant 0 : index
    %c80_109 = arith.constant 80 : index
    %50 = vector.load %arg1[%c0_107, %c0_108, %c80_109] : memref<8x8x256xf32, #tpu.memory_space<vmem>>, vector<8x8x16xf32>
    %c0_110 = arith.constant 0 : index
    %c2_111 = arith.constant 2 : index
    %c142 = arith.constant 142 : index
    %51 = vector.load %arg2[%c0_110, %c2_111, %c142] : memref<8x12x400xf32, #tpu.memory_space<vmem>>, vector<8x8x16xf32>
    tpu.vector_store %arg2[%c0_110, %c2_111, %c142], %50 {strides = array<i32>} : memref<8x12x400xf32, #tpu.memory_space<vmem>>, vector<8x8x16xf32>,
    %c0_112 = arith.constant 0 : index
    %c0_113 = arith.constant 0 : index
    %c80_114 = arith.constant 80 : index
    %52 = vector.load %arg1[%c0_112, %c0_113, %c80_114] : memref<8x8x256xf32, #tpu.memory_space<vmem>>, vector<8x8x1xf32>
    %c0_115 = arith.constant 0 : index
    %c2_116 = arith.constant 2 : index
    %c141 = arith.constant 141 : index
    %53 = vector.load %arg2[%c0_115, %c2_116, %c141] : memref<8x12x400xf32, #tpu.memory_space<vmem>>, vector<8x8x1xf32>
    tpu.vector_store %arg2[%c0_115, %c2_116, %c141], %52 {strides = array<i32>} : memref<8x12x400xf32, #tpu.memory_space<vmem>>, vector<8x8x1xf32>,
    %c0_117 = arith.constant 0 : index
    %c0_118 = arith.constant 0 : index
    %c81_119 = arith.constant 81 : index
    %54 = vector.load %arg1[%c0_117, %c0_118, %c81_119] : memref<8x8x256xf32, #tpu.memory_space<vmem>>, vector<8x8x1xf32>
    %c0_120 = arith.constant 0 : index
    %c2_121 = arith.constant 2 : index
    %c140 = arith.constant 140 : index
    %55 = vector.load %arg2[%c0_120, %c2_121, %c140] : memref<8x12x400xf32, #tpu.memory_space<vmem>>, vector<8x8x1xf32>
    tpu.vector_store %arg2[%c0_120, %c2_121, %c140], %54 {strides = array<i32>} : memref<8x12x400xf32, #tpu.memory_space<vmem>>, vector<8x8x1xf32>,
    %c0_122 = arith.constant 0 : index
    %c0_123 = arith.constant 0 : index
    %c95 = arith.constant 95 : index
    %56 = vector.load %arg1[%c0_122, %c0_123, %c95] : memref<8x8x256xf32, #tpu.memory_space<vmem>>, vector<8x8x1xf32>
    %c0_124 = arith.constant 0 : index
    %c2_125 = arith.constant 2 : index
    %c158 = arith.constant 158 : index
    %57 = vector.load %arg2[%c0_124, %c2_125, %c158] : memref<8x12x400xf32, #tpu.memory_space<vmem>>, vector<8x8x1xf32>
    tpu.vector_store %arg2[%c0_124, %c2_125, %c158], %56 {strides = array<i32>} : memref<8x12x400xf32, #tpu.memory_space<vmem>>, vector<8x8x1xf32>,
    %c0_126 = arith.constant 0 : index
    %c0_127 = arith.constant 0 : index
    %c94 = arith.constant 94 : index
    %58 = vector.load %arg1[%c0_126, %c0_127, %c94] : memref<8x8x256xf32, #tpu.memory_space<vmem>>, vector<8x8x1xf32>
    %c0_128 = arith.constant 0 : index
    %c2_129 = arith.constant 2 : index
    %c159 = arith.constant 159 : index
    %59 = vector.load %arg2[%c0_128, %c2_129, %c159] : memref<8x12x400xf32, #tpu.memory_space<vmem>>, vector<8x8x1xf32>
    tpu.vector_store %arg2[%c0_128, %c2_129, %c159], %58 {strides = array<i32>} : memref<8x12x400xf32, #tpu.memory_space<vmem>>, vector<8x8x1xf32>,
    %c0_130 = arith.constant 0 : index
    %c0_131 = arith.constant 0 : index
    %c96 = arith.constant 96 : index
    %60 = vector.load %arg1[%c0_130, %c0_131, %c96] : memref<8x8x256xf32, #tpu.memory_space<vmem>>, vector<8x8x16xf32>
    %c0_132 = arith.constant 0 : index
    %c2_133 = arith.constant 2 : index
    %c162 = arith.constant 162 : index
    %61 = vector.load %arg2[%c0_132, %c2_133, %c162] : memref<8x12x400xf32, #tpu.memory_space<vmem>>, vector<8x8x16xf32>
    tpu.vector_store %arg2[%c0_132, %c2_133, %c162], %60 {strides = array<i32>} : memref<8x12x400xf32, #tpu.memory_space<vmem>>, vector<8x8x16xf32>,
    %c0_134 = arith.constant 0 : index
    %c0_135 = arith.constant 0 : index
    %c96_136 = arith.constant 96 : index
    %62 = vector.load %arg1[%c0_134, %c0_135, %c96_136] : memref<8x8x256xf32, #tpu.memory_space<vmem>>, vector<8x8x1xf32>
    %c0_137 = arith.constant 0 : index
    %c2_138 = arith.constant 2 : index
    %c161 = arith.constant 161 : index
    %63 = vector.load %arg2[%c0_137, %c2_138, %c161] : memref<8x12x400xf32, #tpu.memory_space<vmem>>, vector<8x8x1xf32>
    tpu.vector_store %arg2[%c0_137, %c2_138, %c161], %62 {strides = array<i32>} : memref<8x12x400xf32, #tpu.memory_space<vmem>>, vector<8x8x1xf32>,
    %c0_139 = arith.constant 0 : index
    %c0_140 = arith.constant 0 : index
    %c97 = arith.constant 97 : index
    %64 = vector.load %arg1[%c0_139, %c0_140, %c97] : memref<8x8x256xf32, #tpu.memory_space<vmem>>, vector<8x8x1xf32>
    %c0_141 = arith.constant 0 : index
    %c2_142 = arith.constant 2 : index
    %c160 = arith.constant 160 : index
    %65 = vector.load %arg2[%c0_141, %c2_142, %c160] : memref<8x12x400xf32, #tpu.memory_space<vmem>>, vector<8x8x1xf32>
    tpu.vector_store %arg2[%c0_141, %c2_142, %c160], %64 {strides = array<i32>} : memref<8x12x400xf32, #tpu.memory_space<vmem>>, vector<8x8x1xf32>,
    %c0_143 = arith.constant 0 : index
    %c0_144 = arith.constant 0 : index
    %c111 = arith.constant 111 : index
    %66 = vector.load %arg1[%c0_143, %c0_144, %c111] : memref<8x8x256xf32, #tpu.memory_space<vmem>>, vector<8x8x1xf32>
    %c0_145 = arith.constant 0 : index
    %c2_146 = arith.constant 2 : index
    %c178 = arith.constant 178 : index
    %67 = vector.load %arg2[%c0_145, %c2_146, %c178] : memref<8x12x400xf32, #tpu.memory_space<vmem>>, vector<8x8x1xf32>
    tpu.vector_store %arg2[%c0_145, %c2_146, %c178], %66 {strides = array<i32>} : memref<8x12x400xf32, #tpu.memory_space<vmem>>, vector<8x8x1xf32>,
    %c0_147 = arith.constant 0 : index
    %c0_148 = arith.constant 0 : index
    %c110 = arith.constant 110 : index
    %68 = vector.load %arg1[%c0_147, %c0_148, %c110] : memref<8x8x256xf32, #tpu.memory_space<vmem>>, vector<8x8x1xf32>
    %c0_149 = arith.constant 0 : index
    %c2_150 = arith.constant 2 : index
    %c179 = arith.constant 179 : index
    %69 = vector.load %arg2[%c0_149, %c2_150, %c179] : memref<8x12x400xf32, #tpu.memory_space<vmem>>, vector<8x8x1xf32>
    tpu.vector_store %arg2[%c0_149, %c2_150, %c179], %68 {strides = array<i32>} : memref<8x12x400xf32, #tpu.memory_space<vmem>>, vector<8x8x1xf32>,
    %c0_151 = arith.constant 0 : index
    %c0_152 = arith.constant 0 : index
    %c112 = arith.constant 112 : index
    %70 = vector.load %arg1[%c0_151, %c0_152, %c112] : memref<8x8x256xf32, #tpu.memory_space<vmem>>, vector<8x8x16xf32>
    %c0_153 = arith.constant 0 : index
    %c2_154 = arith.constant 2 : index
    %c182 = arith.constant 182 : index
    %71 = vector.load %arg2[%c0_153, %c2_154, %c182] : memref<8x12x400xf32, #tpu.memory_space<vmem>>, vector<8x8x16xf32>
    tpu.vector_store %arg2[%c0_153, %c2_154, %c182], %70 {strides = array<i32>} : memref<8x12x400xf32, #tpu.memory_space<vmem>>, vector<8x8x16xf32>,
    %c0_155 = arith.constant 0 : index
    %c0_156 = arith.constant 0 : index
    %c112_157 = arith.constant 112 : index
    %72 = vector.load %arg1[%c0_155, %c0_156, %c112_157] : memref<8x8x256xf32, #tpu.memory_space<vmem>>, vector<8x8x1xf32>
    %c0_158 = arith.constant 0 : index
    %c2_159 = arith.constant 2 : index
    %c181 = arith.constant 181 : index
    %73 = vector.load %arg2[%c0_158, %c2_159, %c181] : memref<8x12x400xf32, #tpu.memory_space<vmem>>, vector<8x8x1xf32>
    tpu.vector_store %arg2[%c0_158, %c2_159, %c181], %72 {strides = array<i32>} : memref<8x12x400xf32, #tpu.memory_space<vmem>>, vector<8x8x1xf32>,
    %c0_160 = arith.constant 0 : index
    %c0_161 = arith.constant 0 : index
    %c113 = arith.constant 113 : index
    %74 = vector.load %arg1[%c0_160, %c0_161, %c113] : memref<8x8x256xf32, #tpu.memory_space<vmem>>, vector<8x8x1xf32>
    %c0_162 = arith.constant 0 : index
    %c2_163 = arith.constant 2 : index
    %c180 = arith.constant 180 : index
    %75 = vector.load %arg2[%c0_162, %c2_163, %c180] : memref<8x12x400xf32, #tpu.memory_space<vmem>>, vector<8x8x1xf32>
    tpu.vector_store %arg2[%c0_162, %c2_163, %c180], %74 {strides = array<i32>} : memref<8x12x400xf32, #tpu.memory_space<vmem>>, vector<8x8x1xf32>,
    %c0_164 = arith.constant 0 : index
    %c0_165 = arith.constant 0 : index
    %c127 = arith.constant 127 : index
    %76 = vector.load %arg1[%c0_164, %c0_165, %c127] : memref<8x8x256xf32, #tpu.memory_space<vmem>>, vector<8x8x1xf32>
    %c0_166 = arith.constant 0 : index
    %c2_167 = arith.constant 2 : index
    %c198 = arith.constant 198 : index
    %77 = vector.load %arg2[%c0_166, %c2_167, %c198] : memref<8x12x400xf32, #tpu.memory_space<vmem>>, vector<8x8x1xf32>
    tpu.vector_store %arg2[%c0_166, %c2_167, %c198], %76 {strides = array<i32>} : memref<8x12x400xf32, #tpu.memory_space<vmem>>, vector<8x8x1xf32>,
    %c0_168 = arith.constant 0 : index
    %c0_169 = arith.constant 0 : index
    %c126 = arith.constant 126 : index
    %78 = vector.load %arg1[%c0_168, %c0_169, %c126] : memref<8x8x256xf32, #tpu.memory_space<vmem>>, vector<8x8x1xf32>
    %c0_170 = arith.constant 0 : index
    %c2_171 = arith.constant 2 : index
    %c199 = arith.constant 199 : index
    %79 = vector.load %arg2[%c0_170, %c2_171, %c199] : memref<8x12x400xf32, #tpu.memory_space<vmem>>, vector<8x8x1xf32>
    tpu.vector_store %arg2[%c0_170, %c2_171, %c199], %78 {strides = array<i32>} : memref<8x12x400xf32, #tpu.memory_space<vmem>>, vector<8x8x1xf32>,
    %c0_172 = arith.constant 0 : index
    %c0_173 = arith.constant 0 : index
    %c128 = arith.constant 128 : index
    %80 = vector.load %arg1[%c0_172, %c0_173, %c128] : memref<8x8x256xf32, #tpu.memory_space<vmem>>, vector<8x8x16xf32>
    %c0_174 = arith.constant 0 : index
    %c2_175 = arith.constant 2 : index
    %c202 = arith.constant 202 : index
    %81 = vector.load %arg2[%c0_174, %c2_175, %c202] : memref<8x12x400xf32, #tpu.memory_space<vmem>>, vector<8x8x16xf32>
    tpu.vector_store %arg2[%c0_174, %c2_175, %c202], %80 {strides = array<i32>} : memref<8x12x400xf32, #tpu.memory_space<vmem>>, vector<8x8x16xf32>,
    %c0_176 = arith.constant 0 : index
    %c0_177 = arith.constant 0 : index
    %c128_178 = arith.constant 128 : index
    %82 = vector.load %arg1[%c0_176, %c0_177, %c128_178] : memref<8x8x256xf32, #tpu.memory_space<vmem>>, vector<8x8x1xf32>
    %c0_179 = arith.constant 0 : index
    %c2_180 = arith.constant 2 : index
    %c201 = arith.constant 201 : index
    %83 = vector.load %arg2[%c0_179, %c2_180, %c201] : memref<8x12x400xf32, #tpu.memory_space<vmem>>, vector<8x8x1xf32>
    tpu.vector_store %arg2[%c0_179, %c2_180, %c201], %82 {strides = array<i32>} : memref<8x12x400xf32, #tpu.memory_space<vmem>>, vector<8x8x1xf32>,
    %c0_181 = arith.constant 0 : index
    %c0_182 = arith.constant 0 : index
    %c129 = arith.constant 129 : index
    %84 = vector.load %arg1[%c0_181, %c0_182, %c129] : memref<8x8x256xf32, #tpu.memory_space<vmem>>, vector<8x8x1xf32>
    %c0_183 = arith.constant 0 : index
    %c2_184 = arith.constant 2 : index
    %c200 = arith.constant 200 : index
    %85 = vector.load %arg2[%c0_183, %c2_184, %c200] : memref<8x12x400xf32, #tpu.memory_space<vmem>>, vector<8x8x1xf32>
    tpu.vector_store %arg2[%c0_183, %c2_184, %c200], %84 {strides = array<i32>} : memref<8x12x400xf32, #tpu.memory_space<vmem>>, vector<8x8x1xf32>,
    %c0_185 = arith.constant 0 : index
    %c0_186 = arith.constant 0 : index
    %c143 = arith.constant 143 : index
    %86 = vector.load %arg1[%c0_185, %c0_186, %c143] : memref<8x8x256xf32, #tpu.memory_space<vmem>>, vector<8x8x1xf32>
    %c0_187 = arith.constant 0 : index
    %c2_188 = arith.constant 2 : index
    %c218 = arith.constant 218 : index
    %87 = vector.load %arg2[%c0_187, %c2_188, %c218] : memref<8x12x400xf32, #tpu.memory_space<vmem>>, vector<8x8x1xf32>
    tpu.vector_store %arg2[%c0_187, %c2_188, %c218], %86 {strides = array<i32>} : memref<8x12x400xf32, #tpu.memory_space<vmem>>, vector<8x8x1xf32>,
    %c0_189 = arith.constant 0 : index
    %c0_190 = arith.constant 0 : index
    %c142_191 = arith.constant 142 : index
    %88 = vector.load %arg1[%c0_189, %c0_190, %c142_191] : memref<8x8x256xf32, #tpu.memory_space<vmem>>, vector<8x8x1xf32>
    %c0_192 = arith.constant 0 : index
    %c2_193 = arith.constant 2 : index
    %c219 = arith.constant 219 : index
    %89 = vector.load %arg2[%c0_192, %c2_193, %c219] : memref<8x12x400xf32, #tpu.memory_space<vmem>>, vector<8x8x1xf32>
    tpu.vector_store %arg2[%c0_192, %c2_193, %c219], %88 {strides = array<i32>} : memref<8x12x400xf32, #tpu.memory_space<vmem>>, vector<8x8x1xf32>,
    %c0_194 = arith.constant 0 : index
    %c0_195 = arith.constant 0 : index
    %c144 = arith.constant 144 : index
    %90 = vector.load %arg1[%c0_194, %c0_195, %c144] : memref<8x8x256xf32, #tpu.memory_space<vmem>>, vector<8x8x16xf32>
    %c0_196 = arith.constant 0 : index
    %c2_197 = arith.constant 2 : index
    %c222 = arith.constant 222 : index
    %91 = vector.load %arg2[%c0_196, %c2_197, %c222] : memref<8x12x400xf32, #tpu.memory_space<vmem>>, vector<8x8x16xf32>
    tpu.vector_store %arg2[%c0_196, %c2_197, %c222], %90 {strides = array<i32>} : memref<8x12x400xf32, #tpu.memory_space<vmem>>, vector<8x8x16xf32>,
    %c0_198 = arith.constant 0 : index
    %c0_199 = arith.constant 0 : index
    %c144_200 = arith.constant 144 : index
    %92 = vector.load %arg1[%c0_198, %c0_199, %c144_200] : memref<8x8x256xf32, #tpu.memory_space<vmem>>, vector<8x8x1xf32>
    %c0_201 = arith.constant 0 : index
    %c2_202 = arith.constant 2 : index
    %c221 = arith.constant 221 : index
    %93 = vector.load %arg2[%c0_201, %c2_202, %c221] : memref<8x12x400xf32, #tpu.memory_space<vmem>>, vector<8x8x1xf32>
    tpu.vector_store %arg2[%c0_201, %c2_202, %c221], %92 {strides = array<i32>} : memref<8x12x400xf32, #tpu.memory_space<vmem>>, vector<8x8x1xf32>,
    %c0_203 = arith.constant 0 : index
    %c0_204 = arith.constant 0 : index
    %c145 = arith.constant 145 : index
    %94 = vector.load %arg1[%c0_203, %c0_204, %c145] : memref<8x8x256xf32, #tpu.memory_space<vmem>>, vector<8x8x1xf32>
    %c0_205 = arith.constant 0 : index
    %c2_206 = arith.constant 2 : index
    %c220 = arith.constant 220 : index
    %95 = vector.load %arg2[%c0_205, %c2_206, %c220] : memref<8x12x400xf32, #tpu.memory_space<vmem>>, vector<8x8x1xf32>
    tpu.vector_store %arg2[%c0_205, %c2_206, %c220], %94 {strides = array<i32>} : memref<8x12x400xf32, #tpu.memory_space<vmem>>, vector<8x8x1xf32>,
    %c0_207 = arith.constant 0 : index
    %c0_208 = arith.constant 0 : index
    %c159_209 = arith.constant 159 : index
    %96 = vector.load %arg1[%c0_207, %c0_208, %c159_209] : memref<8x8x256xf32, #tpu.memory_space<vmem>>, vector<8x8x1xf32>
    %c0_210 = arith.constant 0 : index
    %c2_211 = arith.constant 2 : index
    %c238 = arith.constant 238 : index
    %97 = vector.load %arg2[%c0_210, %c2_211, %c238] : memref<8x12x400xf32, #tpu.memory_space<vmem>>, vector<8x8x1xf32>
    tpu.vector_store %arg2[%c0_210, %c2_211, %c238], %96 {strides = array<i32>} : memref<8x12x400xf32, #tpu.memory_space<vmem>>, vector<8x8x1xf32>,
    %c0_212 = arith.constant 0 : index
    %c0_213 = arith.constant 0 : index
    %c158_214 = arith.constant 158 : index
    %98 = vector.load %arg1[%c0_212, %c0_213, %c158_214] : memref<8x8x256xf32, #tpu.memory_space<vmem>>, vector<8x8x1xf32>
    %c0_215 = arith.constant 0 : index
    %c2_216 = arith.constant 2 : index
    %c239 = arith.constant 239 : index
    %99 = vector.load %arg2[%c0_215, %c2_216, %c239] : memref<8x12x400xf32, #tpu.memory_space<vmem>>, vector<8x8x1xf32>
    tpu.vector_store %arg2[%c0_215, %c2_216, %c239], %98 {strides = array<i32>} : memref<8x12x400xf32, #tpu.memory_space<vmem>>, vector<8x8x1xf32>,
    %c0_217 = arith.constant 0 : index
    %c0_218 = arith.constant 0 : index
    %c160_219 = arith.constant 160 : index
    %100 = vector.load %arg1[%c0_217, %c0_218, %c160_219] : memref<8x8x256xf32, #tpu.memory_space<vmem>>, vector<8x8x16xf32>
    %c0_220 = arith.constant 0 : index
    %c2_221 = arith.constant 2 : index
    %c242 = arith.constant 242 : index
    %101 = vector.load %arg2[%c0_220, %c2_221, %c242] : memref<8x12x400xf32, #tpu.memory_space<vmem>>, vector<8x8x16xf32>
    tpu.vector_store %arg2[%c0_220, %c2_221, %c242], %100 {strides = array<i32>} : memref<8x12x400xf32, #tpu.memory_space<vmem>>, vector<8x8x16xf32>,
    %c0_222 = arith.constant 0 : index
    %c0_223 = arith.constant 0 : index
    %c160_224 = arith.constant 160 : index
    %102 = vector.load %arg1[%c0_222, %c0_223, %c160_224] : memref<8x8x256xf32, #tpu.memory_space<vmem>>, vector<8x8x1xf32>
    %c0_225 = arith.constant 0 : index
    %c2_226 = arith.constant 2 : index
    %c241 = arith.constant 241 : index
    %103 = vector.load %arg2[%c0_225, %c2_226, %c241] : memref<8x12x400xf32, #tpu.memory_space<vmem>>, vector<8x8x1xf32>
    tpu.vector_store %arg2[%c0_225, %c2_226, %c241], %102 {strides = array<i32>} : memref<8x12x400xf32, #tpu.memory_space<vmem>>, vector<8x8x1xf32>,
    %c0_227 = arith.constant 0 : index
    %c0_228 = arith.constant 0 : index
    %c161_229 = arith.constant 161 : index
    %104 = vector.load %arg1[%c0_227, %c0_228, %c161_229] : memref<8x8x256xf32, #tpu.memory_space<vmem>>, vector<8x8x1xf32>
    %c0_230 = arith.constant 0 : index
    %c2_231 = arith.constant 2 : index
    %c240 = arith.constant 240 : index
    %105 = vector.load %arg2[%c0_230, %c2_231, %c240] : memref<8x12x400xf32, #tpu.memory_space<vmem>>, vector<8x8x1xf32>
    tpu.vector_store %arg2[%c0_230, %c2_231, %c240], %104 {strides = array<i32>} : memref<8x12x400xf32, #tpu.memory_space<vmem>>, vector<8x8x1xf32>,
    %c0_232 = arith.constant 0 : index
    %c0_233 = arith.constant 0 : index
    %c175 = arith.constant 175 : index
    %106 = vector.load %arg1[%c0_232, %c0_233, %c175] : memref<8x8x256xf32, #tpu.memory_space<vmem>>, vector<8x8x1xf32>
    %c0_234 = arith.constant 0 : index
    %c2_235 = arith.constant 2 : index
    %c258 = arith.constant 258 : index
    %107 = vector.load %arg2[%c0_234, %c2_235, %c258] : memref<8x12x400xf32, #tpu.memory_space<vmem>>, vector<8x8x1xf32>
    tpu.vector_store %arg2[%c0_234, %c2_235, %c258], %106 {strides = array<i32>} : memref<8x12x400xf32, #tpu.memory_space<vmem>>, vector<8x8x1xf32>,
    %c0_236 = arith.constant 0 : index
    %c0_237 = arith.constant 0 : index
    %c174 = arith.constant 174 : index
    %108 = vector.load %arg1[%c0_236, %c0_237, %c174] : memref<8x8x256xf32, #tpu.memory_space<vmem>>, vector<8x8x1xf32>
    %c0_238 = arith.constant 0 : index
    %c2_239 = arith.constant 2 : index
    %c259 = arith.constant 259 : index
    %109 = vector.load %arg2[%c0_238, %c2_239, %c259] : memref<8x12x400xf32, #tpu.memory_space<vmem>>, vector<8x8x1xf32>
    tpu.vector_store %arg2[%c0_238, %c2_239, %c259], %108 {strides = array<i32>} : memref<8x12x400xf32, #tpu.memory_space<vmem>>, vector<8x8x1xf32>,
    %c0_240 = arith.constant 0 : index
    %c0_241 = arith.constant 0 : index
    %c176 = arith.constant 176 : index
    %110 = vector.load %arg1[%c0_240, %c0_241, %c176] : memref<8x8x256xf32, #tpu.memory_space<vmem>>, vector<8x8x16xf32>
    %c0_242 = arith.constant 0 : index
    %c2_243 = arith.constant 2 : index
    %c262 = arith.constant 262 : index
    %111 = vector.load %arg2[%c0_242, %c2_243, %c262] : memref<8x12x400xf32, #tpu.memory_space<vmem>>, vector<8x8x16xf32>
    tpu.vector_store %arg2[%c0_242, %c2_243, %c262], %110 {strides = array<i32>} : memref<8x12x400xf32, #tpu.memory_space<vmem>>, vector<8x8x16xf32>,
    %c0_244 = arith.constant 0 : index
    %c0_245 = arith.constant 0 : index
    %c176_246 = arith.constant 176 : index
    %112 = vector.load %arg1[%c0_244, %c0_245, %c176_246] : memref<8x8x256xf32, #tpu.memory_space<vmem>>, vector<8x8x1xf32>
    %c0_247 = arith.constant 0 : index
    %c2_248 = arith.constant 2 : index
    %c261 = arith.constant 261 : index
    %113 = vector.load %arg2[%c0_247, %c2_248, %c261] : memref<8x12x400xf32, #tpu.memory_space<vmem>>, vector<8x8x1xf32>
    tpu.vector_store %arg2[%c0_247, %c2_248, %c261], %112 {strides = array<i32>} : memref<8x12x400xf32, #tpu.memory_space<vmem>>, vector<8x8x1xf32>,
    %c0_249 = arith.constant 0 : index
    %c0_250 = arith.constant 0 : index
    %c177 = arith.constant 177 : index
    %114 = vector.load %arg1[%c0_249, %c0_250, %c177] : memref<8x8x256xf32, #tpu.memory_space<vmem>>, vector<8x8x1xf32>
    %c0_251 = arith.constant 0 : index
    %c2_252 = arith.constant 2 : index
    %c260 = arith.constant 260 : index
    %115 = vector.load %arg2[%c0_251, %c2_252, %c260] : memref<8x12x400xf32, #tpu.memory_space<vmem>>, vector<8x8x1xf32>
    tpu.vector_store %arg2[%c0_251, %c2_252, %c260], %114 {strides = array<i32>} : memref<8x12x400xf32, #tpu.memory_space<vmem>>, vector<8x8x1xf32>,
    %c0_253 = arith.constant 0 : index
    %c0_254 = arith.constant 0 : index
    %c191 = arith.constant 191 : index
    %116 = vector.load %arg1[%c0_253, %c0_254, %c191] : memref<8x8x256xf32, #tpu.memory_space<vmem>>, vector<8x8x1xf32>
    %c0_255 = arith.constant 0 : index
    %c2_256 = arith.constant 2 : index
    %c278 = arith.constant 278 : index
    %117 = vector.load %arg2[%c0_255, %c2_256, %c278] : memref<8x12x400xf32, #tpu.memory_space<vmem>>, vector<8x8x1xf32>
    tpu.vector_store %arg2[%c0_255, %c2_256, %c278], %116 {strides = array<i32>} : memref<8x12x400xf32, #tpu.memory_space<vmem>>, vector<8x8x1xf32>,
    %c0_257 = arith.constant 0 : index
    %c0_258 = arith.constant 0 : index
    %c190 = arith.constant 190 : index
    %118 = vector.load %arg1[%c0_257, %c0_258, %c190] : memref<8x8x256xf32, #tpu.memory_space<vmem>>, vector<8x8x1xf32>
    %c0_259 = arith.constant 0 : index
    %c2_260 = arith.constant 2 : index
    %c279 = arith.constant 279 : index
    %119 = vector.load %arg2[%c0_259, %c2_260, %c279] : memref<8x12x400xf32, #tpu.memory_space<vmem>>, vector<8x8x1xf32>
    tpu.vector_store %arg2[%c0_259, %c2_260, %c279], %118 {strides = array<i32>} : memref<8x12x400xf32, #tpu.memory_space<vmem>>, vector<8x8x1xf32>,
    %c0_261 = arith.constant 0 : index
    %c0_262 = arith.constant 0 : index
    %c192 = arith.constant 192 : index
    %120 = vector.load %arg1[%c0_261, %c0_262, %c192] : memref<8x8x256xf32, #tpu.memory_space<vmem>>, vector<8x8x16xf32>
    %c0_263 = arith.constant 0 : index
    %c2_264 = arith.constant 2 : index
    %c282 = arith.constant 282 : index
    %121 = vector.load %arg2[%c0_263, %c2_264, %c282] : memref<8x12x400xf32, #tpu.memory_space<vmem>>, vector<8x8x16xf32>
    tpu.vector_store %arg2[%c0_263, %c2_264, %c282], %120 {strides = array<i32>} : memref<8x12x400xf32, #tpu.memory_space<vmem>>, vector<8x8x16xf32>,
    %c0_265 = arith.constant 0 : index
    %c0_266 = arith.constant 0 : index
    %c192_267 = arith.constant 192 : index
    %122 = vector.load %arg1[%c0_265, %c0_266, %c192_267] : memref<8x8x256xf32, #tpu.memory_space<vmem>>, vector<8x8x1xf32>
    %c0_268 = arith.constant 0 : index
    %c2_269 = arith.constant 2 : index
    %c281 = arith.constant 281 : index
    %123 = vector.load %arg2[%c0_268, %c2_269, %c281] : memref<8x12x400xf32, #tpu.memory_space<vmem>>, vector<8x8x1xf32>
    tpu.vector_store %arg2[%c0_268, %c2_269, %c281], %122 {strides = array<i32>} : memref<8x12x400xf32, #tpu.memory_space<vmem>>, vector<8x8x1xf32>,
    %c0_270 = arith.constant 0 : index
    %c0_271 = arith.constant 0 : index
    %c193 = arith.constant 193 : index
    %124 = vector.load %arg1[%c0_270, %c0_271, %c193] : memref<8x8x256xf32, #tpu.memory_space<vmem>>, vector<8x8x1xf32>
    %c0_272 = arith.constant 0 : index
    %c2_273 = arith.constant 2 : index
    %c280 = arith.constant 280 : index
    %125 = vector.load %arg2[%c0_272, %c2_273, %c280] : memref<8x12x400xf32, #tpu.memory_space<vmem>>, vector<8x8x1xf32>
    tpu.vector_store %arg2[%c0_272, %c2_273, %c280], %124 {strides = array<i32>} : memref<8x12x400xf32, #tpu.memory_space<vmem>>, vector<8x8x1xf32>,
    %c0_274 = arith.constant 0 : index
    %c0_275 = arith.constant 0 : index
    %c207 = arith.constant 207 : index
    %126 = vector.load %arg1[%c0_274, %c0_275, %c207] : memref<8x8x256xf32, #tpu.memory_space<vmem>>, vector<8x8x1xf32>
    %c0_276 = arith.constant 0 : index
    %c2_277 = arith.constant 2 : index
    %c298 = arith.constant 298 : index
    %127 = vector.load %arg2[%c0_276, %c2_277, %c298] : memref<8x12x400xf32, #tpu.memory_space<vmem>>, vector<8x8x1xf32>
    tpu.vector_store %arg2[%c0_276, %c2_277, %c298], %126 {strides = array<i32>} : memref<8x12x400xf32, #tpu.memory_space<vmem>>, vector<8x8x1xf32>,
    %c0_278 = arith.constant 0 : index
    %c0_279 = arith.constant 0 : index
    %c206 = arith.constant 206 : index
    %128 = vector.load %arg1[%c0_278, %c0_279, %c206] : memref<8x8x256xf32, #tpu.memory_space<vmem>>, vector<8x8x1xf32>
    %c0_280 = arith.constant 0 : index
    %c2_281 = arith.constant 2 : index
    %c299 = arith.constant 299 : index
    %129 = vector.load %arg2[%c0_280, %c2_281, %c299] : memref<8x12x400xf32, #tpu.memory_space<vmem>>, vector<8x8x1xf32>
    tpu.vector_store %arg2[%c0_280, %c2_281, %c299], %128 {strides = array<i32>} : memref<8x12x400xf32, #tpu.memory_space<vmem>>, vector<8x8x1xf32>,
    %c0_282 = arith.constant 0 : index
    %c0_283 = arith.constant 0 : index
    %c208 = arith.constant 208 : index
    %130 = vector.load %arg1[%c0_282, %c0_283, %c208] : memref<8x8x256xf32, #tpu.memory_space<vmem>>, vector<8x8x16xf32>
    %c0_284 = arith.constant 0 : index
    %c2_285 = arith.constant 2 : index
    %c302 = arith.constant 302 : index
    %131 = vector.load %arg2[%c0_284, %c2_285, %c302] : memref<8x12x400xf32, #tpu.memory_space<vmem>>, vector<8x8x16xf32>
    tpu.vector_store %arg2[%c0_284, %c2_285, %c302], %130 {strides = array<i32>} : memref<8x12x400xf32, #tpu.memory_space<vmem>>, vector<8x8x16xf32>,
    %c0_286 = arith.constant 0 : index
    %c0_287 = arith.constant 0 : index
    %c208_288 = arith.constant 208 : index
    %132 = vector.load %arg1[%c0_286, %c0_287, %c208_288] : memref<8x8x256xf32, #tpu.memory_space<vmem>>, vector<8x8x1xf32>
    %c0_289 = arith.constant 0 : index
    %c2_290 = arith.constant 2 : index
    %c301 = arith.constant 301 : index
    %133 = vector.load %arg2[%c0_289, %c2_290, %c301] : memref<8x12x400xf32, #tpu.memory_space<vmem>>, vector<8x8x1xf32>
    tpu.vector_store %arg2[%c0_289, %c2_290, %c301], %132 {strides = array<i32>} : memref<8x12x400xf32, #tpu.memory_space<vmem>>, vector<8x8x1xf32>,
    %c0_291 = arith.constant 0 : index
    %c0_292 = arith.constant 0 : index
    %c209 = arith.constant 209 : index
    %134 = vector.load %arg1[%c0_291, %c0_292, %c209] : memref<8x8x256xf32, #tpu.memory_space<vmem>>, vector<8x8x1xf32>
    %c0_293 = arith.constant 0 : index
    %c2_294 = arith.constant 2 : index
    %c300 = arith.constant 300 : index
    %135 = vector.load %arg2[%c0_293, %c2_294, %c300] : memref<8x12x400xf32, #tpu.memory_space<vmem>>, vector<8x8x1xf32>
    tpu.vector_store %arg2[%c0_293, %c2_294, %c300], %134 {strides = array<i32>} : memref<8x12x400xf32, #tpu.memory_space<vmem>>, vector<8x8x1xf32>,
    %c0_295 = arith.constant 0 : index
    %c0_296 = arith.constant 0 : index
    %c223 = arith.constant 223 : index
    %136 = vector.load %arg1[%c0_295, %c0_296, %c223] : memref<8x8x256xf32, #tpu.memory_space<vmem>>, vector<8x8x1xf32>
    %c0_297 = arith.constant 0 : index
    %c2_298 = arith.constant 2 : index
    %c318 = arith.constant 318 : index
    %137 = vector.load %arg2[%c0_297, %c2_298, %c318] : memref<8x12x400xf32, #tpu.memory_space<vmem>>, vector<8x8x1xf32>
    tpu.vector_store %arg2[%c0_297, %c2_298, %c318], %136 {strides = array<i32>} : memref<8x12x400xf32, #tpu.memory_space<vmem>>, vector<8x8x1xf32>,
    %c0_299 = arith.constant 0 : index
    %c0_300 = arith.constant 0 : index
    %c222_301 = arith.constant 222 : index
    %138 = vector.load %arg1[%c0_299, %c0_300, %c222_301] : memref<8x8x256xf32, #tpu.memory_space<vmem>>, vector<8x8x1xf32>
    %c0_302 = arith.constant 0 : index
    %c2_303 = arith.constant 2 : index
    %c319 = arith.constant 319 : index
    %139 = vector.load %arg2[%c0_302, %c2_303, %c319] : memref<8x12x400xf32, #tpu.memory_space<vmem>>, vector<8x8x1xf32>
    tpu.vector_store %arg2[%c0_302, %c2_303, %c319], %138 {strides = array<i32>} : memref<8x12x400xf32, #tpu.memory_space<vmem>>, vector<8x8x1xf32>,
    %c0_304 = arith.constant 0 : index
    %c0_305 = arith.constant 0 : index
    %c224 = arith.constant 224 : index
    %140 = vector.load %arg1[%c0_304, %c0_305, %c224] : memref<8x8x256xf32, #tpu.memory_space<vmem>>, vector<8x8x16xf32>
    %c0_306 = arith.constant 0 : index
    %c2_307 = arith.constant 2 : index
    %c322 = arith.constant 322 : index
    %141 = vector.load %arg2[%c0_306, %c2_307, %c322] : memref<8x12x400xf32, #tpu.memory_space<vmem>>, vector<8x8x16xf32>
    tpu.vector_store %arg2[%c0_306, %c2_307, %c322], %140 {strides = array<i32>} : memref<8x12x400xf32, #tpu.memory_space<vmem>>, vector<8x8x16xf32>,
    %c0_308 = arith.constant 0 : index
    %c0_309 = arith.constant 0 : index
    %c224_310 = arith.constant 224 : index
    %142 = vector.load %arg1[%c0_308, %c0_309, %c224_310] : memref<8x8x256xf32, #tpu.memory_space<vmem>>, vector<8x8x1xf32>
    %c0_311 = arith.constant 0 : index
    %c2_312 = arith.constant 2 : index
    %c321 = arith.constant 321 : index
    %143 = vector.load %arg2[%c0_311, %c2_312, %c321] : memref<8x12x400xf32, #tpu.memory_space<vmem>>, vector<8x8x1xf32>
    tpu.vector_store %arg2[%c0_311, %c2_312, %c321], %142 {strides = array<i32>} : memref<8x12x400xf32, #tpu.memory_space<vmem>>, vector<8x8x1xf32>,
    %c0_313 = arith.constant 0 : index
    %c0_314 = arith.constant 0 : index
    %c225 = arith.constant 225 : index
    %144 = vector.load %arg1[%c0_313, %c0_314, %c225] : memref<8x8x256xf32, #tpu.memory_space<vmem>>, vector<8x8x1xf32>
    %c0_315 = arith.constant 0 : index
    %c2_316 = arith.constant 2 : index
    %c320 = arith.constant 320 : index
    %145 = vector.load %arg2[%c0_315, %c2_316, %c320] : memref<8x12x400xf32, #tpu.memory_space<vmem>>, vector<8x8x1xf32>
    tpu.vector_store %arg2[%c0_315, %c2_316, %c320], %144 {strides = array<i32>} : memref<8x12x400xf32, #tpu.memory_space<vmem>>, vector<8x8x1xf32>,
    %c0_317 = arith.constant 0 : index
    %c0_318 = arith.constant 0 : index
    %c239_319 = arith.constant 239 : index
    %146 = vector.load %arg1[%c0_317, %c0_318, %c239_319] : memref<8x8x256xf32, #tpu.memory_space<vmem>>, vector<8x8x1xf32>
    %c0_320 = arith.constant 0 : index
    %c2_321 = arith.constant 2 : index
    %c338 = arith.constant 338 : index
    %147 = vector.load %arg2[%c0_320, %c2_321, %c338] : memref<8x12x400xf32, #tpu.memory_space<vmem>>, vector<8x8x1xf32>
    tpu.vector_store %arg2[%c0_320, %c2_321, %c338], %146 {strides = array<i32>} : memref<8x12x400xf32, #tpu.memory_space<vmem>>, vector<8x8x1xf32>,
    %c0_322 = arith.constant 0 : index
    %c0_323 = arith.constant 0 : index
    %c238_324 = arith.constant 238 : index
    %148 = vector.load %arg1[%c0_322, %c0_323, %c238_324] : memref<8x8x256xf32, #tpu.memory_space<vmem>>, vector<8x8x1xf32>
    %c0_325 = arith.constant 0 : index
    %c2_326 = arith.constant 2 : index
    %c339 = arith.constant 339 : index
    %149 = vector.load %arg2[%c0_325, %c2_326, %c339] : memref<8x12x400xf32, #tpu.memory_space<vmem>>, vector<8x8x1xf32>
    tpu.vector_store %arg2[%c0_325, %c2_326, %c339], %148 {strides = array<i32>} : memref<8x12x400xf32, #tpu.memory_space<vmem>>, vector<8x8x1xf32>,
    %c0_327 = arith.constant 0 : index
    %c0_328 = arith.constant 0 : index
    %c240_329 = arith.constant 240 : index
    %150 = vector.load %arg1[%c0_327, %c0_328, %c240_329] : memref<8x8x256xf32, #tpu.memory_space<vmem>>, vector<8x8x16xf32>
    %c0_330 = arith.constant 0 : index
    %c2_331 = arith.constant 2 : index
    %c342 = arith.constant 342 : index
    %151 = vector.load %arg2[%c0_330, %c2_331, %c342] : memref<8x12x400xf32, #tpu.memory_space<vmem>>, vector<8x8x16xf32>
    tpu.vector_store %arg2[%c0_330, %c2_331, %c342], %150 {strides = array<i32>} : memref<8x12x400xf32, #tpu.memory_space<vmem>>, vector<8x8x16xf32>,
    %c0_332 = arith.constant 0 : index
    %c0_333 = arith.constant 0 : index
    %c240_334 = arith.constant 240 : index
    %152 = vector.load %arg1[%c0_332, %c0_333, %c240_334] : memref<8x8x256xf32, #tpu.memory_space<vmem>>, vector<8x8x1xf32>
    %c0_335 = arith.constant 0 : index
    %c2_336 = arith.constant 2 : index
    %c341 = arith.constant 341 : index
    %153 = vector.load %arg2[%c0_335, %c2_336, %c341] : memref<8x12x400xf32, #tpu.memory_space<vmem>>, vector<8x8x1xf32>
    tpu.vector_store %arg2[%c0_335, %c2_336, %c341], %152 {strides = array<i32>} : memref<8x12x400xf32, #tpu.memory_space<vmem>>, vector<8x8x1xf32>,
    %c0_337 = arith.constant 0 : index
    %c0_338 = arith.constant 0 : index
    %c241_339 = arith.constant 241 : index
    %154 = vector.load %arg1[%c0_337, %c0_338, %c241_339] : memref<8x8x256xf32, #tpu.memory_space<vmem>>, vector<8x8x1xf32>
    %c0_340 = arith.constant 0 : index
    %c2_341 = arith.constant 2 : index
    %c340 = arith.constant 340 : index
    %155 = vector.load %arg2[%c0_340, %c2_341, %c340] : memref<8x12x400xf32, #tpu.memory_space<vmem>>, vector<8x8x1xf32>
    tpu.vector_store %arg2[%c0_340, %c2_341, %c340], %154 {strides = array<i32>} : memref<8x12x400xf32, #tpu.memory_space<vmem>>, vector<8x8x1xf32>,
    %c0_342 = arith.constant 0 : index
    %c0_343 = arith.constant 0 : index
    %c255 = arith.constant 255 : index
    %156 = vector.load %arg1[%c0_342, %c0_343, %c255] : memref<8x8x256xf32, #tpu.memory_space<vmem>>, vector<8x8x1xf32>
    %c0_344 = arith.constant 0 : index
    %c2_345 = arith.constant 2 : index
    %c358 = arith.constant 358 : index
    %157 = vector.load %arg2[%c0_344, %c2_345, %c358] : memref<8x12x400xf32, #tpu.memory_space<vmem>>, vector<8x8x1xf32>
    tpu.vector_store %arg2[%c0_344, %c2_345, %c358], %156 {strides = array<i32>} : memref<8x12x400xf32, #tpu.memory_space<vmem>>, vector<8x8x1xf32>,
    %c0_346 = arith.constant 0 : index
    %c0_347 = arith.constant 0 : index
    %c254 = arith.constant 254 : index
    %158 = vector.load %arg1[%c0_346, %c0_347, %c254] : memref<8x8x256xf32, #tpu.memory_space<vmem>>, vector<8x8x1xf32>
    %c0_348 = arith.constant 0 : index
    %c2_349 = arith.constant 2 : index
    %c359 = arith.constant 359 : index
    %159 = vector.load %arg2[%c0_348, %c2_349, %c359] : memref<8x12x400xf32, #tpu.memory_space<vmem>>, vector<8x8x1xf32>
    tpu.vector_store %arg2[%c0_348, %c2_349, %c359], %158 {strides = array<i32>} : memref<8x12x400xf32, #tpu.memory_space<vmem>>, vector<8x8x1xf32>,
    %c0_350 = arith.constant 0 : index
    %c2_351 = arith.constant 2 : index
    %c40_352 = arith.constant 40 : index
    %160 = vector.load %arg2[%c0_350, %c2_351, %c40_352] : memref<8x12x400xf32, #tpu.memory_space<vmem>>, vector<8x8x20xf32>
    %c0_353 = arith.constant 0 : index
    %c2_354 = arith.constant 2 : index
    %c20 = arith.constant 20 : index
    %161 = vector.load %arg2[%c0_353, %c2_354, %c20] : memref<8x12x400xf32, #tpu.memory_space<vmem>>, vector<8x8x20xf32>
    tpu.vector_store %arg2[%c0_353, %c2_354, %c20], %160 {strides = array<i32>} : memref<8x12x400xf32, #tpu.memory_space<vmem>>, vector<8x8x20xf32>,
    %c0_355 = arith.constant 0 : index
    %c2_356 = arith.constant 2 : index
    %c60_357 = arith.constant 60 : index
    %162 = vector.load %arg2[%c0_355, %c2_356, %c60_357] : memref<8x12x400xf32, #tpu.memory_space<vmem>>, vector<8x8x20xf32>
    %c0_358 = arith.constant 0 : index
    %c2_359 = arith.constant 2 : index
    %c0_360 = arith.constant 0 : index
    %163 = vector.load %arg2[%c0_358, %c2_359, %c0_360] : memref<8x12x400xf32, #tpu.memory_space<vmem>>, vector<8x8x20xf32>
    tpu.vector_store %arg2[%c0_358, %c2_359, %c0_360], %162 {strides = array<i32>} : memref<8x12x400xf32, #tpu.memory_space<vmem>>, vector<8x8x20xf32>,
    %c0_361 = arith.constant 0 : index
    %c2_362 = arith.constant 2 : index
    %c340_363 = arith.constant 340 : index
    %164 = vector.load %arg2[%c0_361, %c2_362, %c340_363] : memref<8x12x400xf32, #tpu.memory_space<vmem>>, vector<8x8x20xf32>
    %c0_364 = arith.constant 0 : index
    %c2_365 = arith.constant 2 : index
    %c360 = arith.constant 360 : index
    %165 = vector.load %arg2[%c0_364, %c2_365, %c360] : memref<8x12x400xf32, #tpu.memory_space<vmem>>, vector<8x8x20xf32>
    tpu.vector_store %arg2[%c0_364, %c2_365, %c360], %164 {strides = array<i32>} : memref<8x12x400xf32, #tpu.memory_space<vmem>>, vector<8x8x20xf32>,
    %c0_366 = arith.constant 0 : index
    %c2_367 = arith.constant 2 : index
    %c320_368 = arith.constant 320 : index
    %166 = vector.load %arg2[%c0_366, %c2_367, %c320_368] : memref<8x12x400xf32, #tpu.memory_space<vmem>>, vector<8x8x20xf32>
    %c0_369 = arith.constant 0 : index
    %c2_370 = arith.constant 2 : index
    %c380 = arith.constant 380 : index
    %167 = vector.load %arg2[%c0_369, %c2_370, %c380] : memref<8x12x400xf32, #tpu.memory_space<vmem>>, vector<8x8x20xf32>
    tpu.vector_store %arg2[%c0_369, %c2_370, %c380], %166 {strides = array<i32>} : memref<8x12x400xf32, #tpu.memory_space<vmem>>, vector<8x8x20xf32>,
    %c0_371 = arith.constant 0 : index
    %c2_372 = arith.constant 2 : index
    %c0_373 = arith.constant 0 : index
    %168 = vector.load %arg2[%c0_371, %c2_372, %c0_373] : memref<8x12x400xf32, #tpu.memory_space<vmem>>, vector<8x1x400xf32>
    %c0_374 = arith.constant 0 : index
    %c1_375 = arith.constant 1 : index
    %c0_376 = arith.constant 0 : index
    %169 = vector.load %arg2[%c0_374, %c1_375, %c0_376] : memref<8x12x400xf32, #tpu.memory_space<vmem>>, vector<8x1x400xf32>
    tpu.vector_store %arg2[%c0_374, %c1_375, %c0_376], %168 {strides = array<i32>} : memref<8x12x400xf32, #tpu.memory_space<vmem>>, vector<8x1x400xf32>,
    %c0_377 = arith.constant 0 : index
    %c3 = arith.constant 3 : index
    %c0_378 = arith.constant 0 : index
    %170 = vector.load %arg2[%c0_377, %c3, %c0_378] : memref<8x12x400xf32, #tpu.memory_space<vmem>>, vector<8x1x400xf32>
    %c0_379 = arith.constant 0 : index
    %c0_380 = arith.constant 0 : index
    %c0_381 = arith.constant 0 : index
    %171 = vector.load %arg2[%c0_379, %c0_380, %c0_381] : memref<8x12x400xf32, #tpu.memory_space<vmem>>, vector<8x1x400xf32>
    tpu.vector_store %arg2[%c0_379, %c0_380, %c0_381], %170 {strides = array<i32>} : memref<8x12x400xf32, #tpu.memory_space<vmem>>, vector<8x1x400xf32>,
    %c0_382 = arith.constant 0 : index
    %c9 = arith.constant 9 : index
    %c0_383 = arith.constant 0 : index
    %172 = vector.load %arg2[%c0_382, %c9, %c0_383] : memref<8x12x400xf32, #tpu.memory_space<vmem>>, vector<8x1x400xf32>
    %c0_384 = arith.constant 0 : index
    %c10 = arith.constant 10 : index
    %c0_385 = arith.constant 0 : index
    %173 = vector.load %arg2[%c0_384, %c10, %c0_385] : memref<8x12x400xf32, #tpu.memory_space<vmem>>, vector<8x1x400xf32>
    tpu.vector_store %arg2[%c0_384, %c10, %c0_385], %172 {strides = array<i32>} : memref<8x12x400xf32, #tpu.memory_space<vmem>>, vector<8x1x400xf32>,
    %c0_386 = arith.constant 0 : index
    %c8 = arith.constant 8 : index
    %c0_387 = arith.constant 0 : index
    %174 = vector.load %arg2[%c0_386, %c8, %c0_387] : memref<8x12x400xf32, #tpu.memory_space<vmem>>, vector<8x1x400xf32>
    %c0_388 = arith.constant 0 : index
    %c11 = arith.constant 11 : index
    %c0_389 = arith.constant 0 : index
    %175 = vector.load %arg2[%c0_388, %c11, %c0_389] : memref<8x12x400xf32, #tpu.memory_space<vmem>>, vector<8x1x400xf32>
    tpu.vector_store %arg2[%c0_388, %c11, %c0_389], %174 {strides = array<i32>} : memref<8x12x400xf32, #tpu.memory_space<vmem>>, vector<8x1x400xf32>,
    return
  }
  func.func @transform_0(%arg0: i32) -> (i32, i32, i32) {
    %c0_i32 = arith.constant 0 : i32
    %c0_i32_0 = arith.constant 0 : i32
    %c0_i32_1 = arith.constant 0 : i32
    return %arg0, %c0_i32, %c0_i32_0 : i32, i32, i32
  }
  func.func @transform_1(%arg0: i32) -> (i32, i32, i32) {
    %c0_i32 = arith.constant 0 : i32
    %c0_i32_0 = arith.constant 0 : i32
    %c0_i32_1 = arith.constant 0 : i32
    return %arg0, %c0_i32, %c0_i32_0 : i32, i32, i32
  }
}

</mosaic_0001>

<bundles_post_ra>
// kernel: tpu_custom_call.1
= control target key start
LH: loop header
LB: loop body
LE: loop exit
PB: predicated region body
PF: predicated region fallthrough
CT: control target
= control target key end

     0   :  { %6 = vsyncpa [#allocation3], 0  ;;  %s6058_s6 = smov [#allocation2]   ;;  %s13468_s0 = inlined_call_operand.hbm [shape: f32[8,8,256], index: 0, kind: input, shape index: {}]   ;;  %s13469_s1 = inlined_call_operand.vmem [shape: f32[8,12,400], index: 1, kind: output, shape index: {}]  }
   0x1   :  { %s12_s7 = sshll.u32 %s6058_s6, 4  ;;  %s13_s7 = int_to_ptr.vmem [resolvable:$true] %s12_s7 }
   0x2   :  { %s6044_s8 = scalar_lea.vmem %s13_s7, 2048  ;;  %p6049_p1 = scmp.lt.s32.totalorder %s13_s7, %s13_s7 }
   0x3   :  { %p6045_p0 = scmp.ne.s32.totalorder %s13_s7, %s6044_s8  ;;  %p6050_p2 = scmp.lt.s32.totalorder %s6044_s8, %s6044_s8 }
   0x5   :  { %p6051_p3 = por %p6050_p2, %p6049_p1 }
   0x7   :  { %p6052_p4 = pnand %p6051_p3, %p6045_p0 }
   0x9   :  { %6055 = shalt.err (!%p6052_p4)
}
   0xa   :  { %s6059_s9 = smov 256   ;;  %s6060_s10 = smov 16  }
   0xb   :  { %18 = dma.hbm_to_vmem [thread:$0]  %s13468_s0, 2048, %s13_s7, [#allocation3], %s6059_s9, %s6059_s9, %s6060_s10  }
   0xc   :  { %6056 = dma.done.wait [#allocation3], 2048  }
   0xd   :  { %6057 = vsyncadd [#allocation3], 4294965248  ;;  %v24_v0 = vld [vmem:[#allocation2 + $0x20] sm:$0xff]  ;;  %v25_v2 = vld [vmem:[#allocation2 + $0x30] sm:$0xff]  ;;  %s6061_s13 = smov 42   ;;  %s6062_s0 = smov 41  }
   0xe   :  { %v22_v1 = vld [vmem:[#allocation2] sm:$0xff]  ;;  %v6128_v3 = vrot.slane %v24_v0, 6  ;;  %v23_v5 = vld [vmem:[#allocation2 + $0x10] sm:$0xff]  ;;  %v6134_v6 = vrot.slane %v25_v2, 6  ;;  %s6063_s14 = smov 39   ;;  %s6064_s15 = smov 43  }
   0xf   :  { %v6130_v4 = vrot.slane %v22_v1, 6  ;;  %v6136_v7 = vrot.slane %v23_v5, 6  ;;  %v27_v8 = vld [vmem:[#allocation2 + $0x50] sm:$0xff]  ;;  %v26_v9 = vld [vmem:[#allocation2 + $0x40] sm:$0xff]  ;;  %s6065_s16 = smov 45   ;;  %s6066_s17 = smov 46  }
  0x10   :  { %50 = vrot.lane.b32.xlu1 %v6128_v3, %s6061_s13  ;;  %v6140_v10 = vrot.slane %v27_v8, 6  ;;  %v6142_v11 = vrot.slane %v26_v9, 6  ;;  %v29_v12 = vld [vmem:[#allocation2 + $0x70] sm:$0xff]  ;;  %v28_v13 = vld [vmem:[#allocation2 + $0x60] sm:$0xff]  ;;  %vm70_vm0 = vcmask 474450   ;;  %vm72_vm1 = vcmask 468304  }
  0x11   :  { %46 = vrot.lane.b32.xlu0 %v6130_v4, %s6061_s13  ;;  %v6146_v14 = vrot.slane %v29_v12, 6  ;;  %v6148_v15 = vrot.slane %v28_v13, 6  ;;  %s6067_s20 = smov 47   ;;  %vm136_vm2 = vcmask 343370   ;;  %vm138_vm3 = vcmask 337224   ;;  %s6068_s24 = smov 49  }
  0x12   :  { %vm202_vm4 = vcmask 335170   ;;  %vm204_vm5 = vcmask 329024   ;;  %s6069_s29 = smov 50   ;;  %vm268_vm6 = vcmask 482770   ;;  %vm270_vm7 = vcmask 476624   ;;  %s6070_s10 = smov 51  }
  0x13   :  { %vm334_vm8 = vcmask 490970   ;;  %vm336_vm9 = vcmask 484824   ;;  %vm400_vm10 = vcmask 638450   ;;  %vm402_vm11 = vcmask 632304   ;;  %v946_v5 = vld [vmem:[#allocation2] sm:$0xff]  ;;  %s6072_s19 = smov 54  }
  0x14   :  { %52 = vrot.lane.b32.xlu1 %v6134_v6, %s6061_s13  ;;  %vm466_vm12 = vcmask 507370   ;;  %vm468_vm13 = vcmask 501224   ;;  %v6746_v9 = vrot.slane %v946_v5, 6  ;;  %vm532_vm14 = vcmask 499170   ;;  %s6073_s2 = smov 55   ;;  %s6074_s5 = smov 57  }
  0x15   :  { %48 = vrot.lane.b32.xlu0 %v6136_v7, %s6061_s13  ;;  %vm534_vm15 = vcmask 493024   ;;  %s6075_s9 = smov 58   ;;  %s6076_s21 = smov 59  }
  0x16   :  { %s6077_s25 = smov 61   ;;  %s6078_s30 = smov 62  }
  0x17   :  { %s6081_s23 = smov 66   ;;  %s6084_s12 = smov 70  }
  0x18   :  { %56 = vrot.lane.b32.xlu1 %v6140_v10, %s6061_s13  ;;  %s6085_s26 = smov 71   ;;  %s6086_s28 = smov 73  }
  0x19   :  { %54 = vrot.lane.b32.xlu0 %v6142_v11, %s6061_s13  ;;  %s6089_s18 = smov 77   ;;  %s6091_s6 = smov 79  }
  0x1a   :  { %s6094_s27 = smov 83   ;;  %s6104_s4 = smov 97  }
  0x1b   :  { %s6107_s22 = smov 101   ;;  %s6109_s8 = smov 103  }
  0x1c   :  { %60 = vrot.lane.b32.xlu1 %v6146_v14, %s6061_s13 }
  0x1d   :  { %58 = vrot.lane.b32.xlu0 %v6148_v15, %s6061_s13  ;;  %s6093_s13 = smov 82  }
  0x20   :  { %114 = vrot.lane.b32.xlu1 %v6136_v7, %s6062_s0 }
  0x21   :  { %112 = vrot.lane.b32.xlu0 %v6130_v4, %s6062_s0 }
  0x24   :  { %118 = vrot.lane.b32.xlu1 %v6134_v6, %s6062_s0 }
  0x25   :  { %116 = vrot.lane.b32.xlu0 %v6128_v3, %s6062_s0 }
  0x28   :  { %122 = vrot.lane.b32.xlu1 %v6140_v10, %s6062_s0 }
  0x29   :  { %120 = vrot.lane.b32.xlu0 %v6142_v11, %s6062_s0 }
  0x2c   :  { %126 = vrot.lane.b32.xlu1 %v6146_v14, %s6062_s0 }
  0x2d   :  { %124 = vrot.lane.b32.xlu0 %v6148_v15, %s6062_s0  ;;  %s6071_s0 = smov 53  }
  0x30   :  { %180 = vrot.lane.b32.xlu1 %v6136_v7, %s6063_s14 }
  0x31   :  { %178 = vrot.lane.b32.xlu0 %v6130_v4, %s6063_s14 }
  0x34   :  { %184 = vrot.lane.b32.xlu1 %v6134_v6, %s6063_s14 }
  0x35   :  { %182 = vrot.lane.b32.xlu0 %v6128_v3, %s6063_s14 }
  0x38   :  { %188 = vrot.lane.b32.xlu1 %v6140_v10, %s6063_s14 }
  0x39   :  { %186 = vrot.lane.b32.xlu0 %v6142_v11, %s6063_s14 }
  0x3c   :  { %192 = vrot.lane.b32.xlu1 %v6146_v14, %s6063_s14 }
  0x3d   :  { %190 = vrot.lane.b32.xlu0 %v6148_v15, %s6063_s14  ;;  %s6088_s14 = smov 75  }
  0x40   :  { %246 = vrot.lane.b32.xlu1 %v6136_v7, %s6064_s15 }
  0x41   :  { %244 = vrot.lane.b32.xlu0 %v6130_v4, %s6064_s15 }
  0x44   :  { %250 = vrot.lane.b32.xlu1 %v6134_v6, %s6064_s15 }
  0x45   :  { %248 = vrot.lane.b32.xlu0 %v6128_v3, %s6064_s15 }
  0x48   :  { %254 = vrot.lane.b32.xlu1 %v6140_v10, %s6064_s15 }
  0x49   :  { %252 = vrot.lane.b32.xlu0 %v6142_v11, %s6064_s15 }
  0x4c   :  { %258 = vrot.lane.b32.xlu1 %v6146_v14, %s6064_s15 }
  0x4d   :  { %256 = vrot.lane.b32.xlu0 %v6148_v15, %s6064_s15 }
  0x50   :  { %312 = vrot.lane.b32.xlu1 %v6136_v7, %s6065_s16 }
  0x51   :  { %310 = vrot.lane.b32.xlu0 %v6130_v4, %s6065_s16 }
  0x54   :  { %316 = vrot.lane.b32.xlu1 %v6134_v6, %s6065_s16 }
  0x55   :  { %314 = vrot.lane.b32.xlu0 %v6128_v3, %s6065_s16 }
  0x58   :  { %320 = vrot.lane.b32.xlu1 %v6140_v10, %s6065_s16 }
  0x59   :  { %318 = vrot.lane.b32.xlu0 %v6142_v11, %s6065_s16 }
  0x5c   :  { %324 = vrot.lane.b32.xlu1 %v6146_v14, %s6065_s16 }
  0x5d   :  { %322 = vrot.lane.b32.xlu0 %v6148_v15, %s6065_s16 }
  0x60   :  { %378 = vrot.lane.b32.xlu1 %v6136_v7, %s6066_s17 }
  0x61   :  { %376 = vrot.lane.b32.xlu0 %v6130_v4, %s6066_s17 }
  0x64   :  { %382 = vrot.lane.b32.xlu1 %v6134_v6, %s6066_s17 }
  0x65   :  { %380 = vrot.lane.b32.xlu0 %v6128_v3, %s6066_s17 }
  0x68   :  { %386 = vrot.lane.b32.xlu1 %v6140_v10, %s6066_s17 }
  0x69   :  { %384 = vrot.lane.b32.xlu0 %v6142_v11, %s6066_s17 }
  0x6c   :  { %390 = vrot.lane.b32.xlu1 %v6146_v14, %s6066_s17 }
  0x6d   :  { %388 = vrot.lane.b32.xlu0 %v6148_v15, %s6066_s17 }
  0x70   :  { %444 = vrot.lane.b32.xlu1 %v6136_v7, %s6065_s16 }
  0x71   :  { %442 = vrot.lane.b32.xlu0 %v6130_v4, %s6065_s16 }
  0x74   :  { %448 = vrot.lane.b32.xlu1 %v6134_v6, %s6065_s16 }
  0x75   :  { %446 = vrot.lane.b32.xlu0 %v6128_v3, %s6065_s16 }
  0x78   :  { %452 = vrot.lane.b32.xlu1 %v6140_v10, %s6065_s16 }
  0x79   :  { %450 = vrot.lane.b32.xlu0 %v6142_v11, %s6065_s16 }
  0x7c   :  { %456 = vrot.lane.b32.xlu1 %v6146_v14, %s6065_s16 }
  0x7d   :  { %454 = vrot.lane.b32.xlu0 %v6148_v15, %s6065_s16  ;;  %s6102_s16 = smov 94  }
  0x80   :  { %510 = vrot.lane.b32.xlu1 %v6136_v7, %s6064_s15 }
  0x81   :  { %508 = vrot.lane.b32.xlu0 %v6130_v4, %s6064_s15 }
  0x82   :  { %v51_v16 = vpop.permute.xlu1 %50 }
  0x83   :  { %v47_v17 = vpop.permute.xlu0 %46  ;;  %76 = vst.msk [vmem:[%s13469_s1 + $0x80] sm:$0xfc] %vm70_vm0, %v51_v16 }
  0x84   :  { %77 = vst.msk [vmem:[%s13469_s1 + $0xa0] sm:$0x3] %vm72_vm1, %v51_v16  ;;  %73 = vst.msk [vmem:[%s13469_s1 + $0x20] sm:$0x3] %vm72_vm1, %v47_v17  ;;  %514 = vrot.lane.b32.xlu1 %v6134_v6, %s6064_s15  ;;  %v951_v16 = vld [vmem:[#allocation2 + $0x50] sm:$0xff] }
  0x85   :  { %71 = vst.msk [vmem:[%s13469_s1] sm:$0xfc] %vm70_vm0, %v47_v17  ;;  %512 = vrot.lane.b32.xlu0 %v6128_v3, %s6064_s15  ;;  %v950_v17 = vld [vmem:[#allocation2 + $0x40] sm:$0xff] }
  0x86   :  { %v53_v18 = vpop.permute.xlu1 %52 }
  0x87   :  { %v49_v19 = vpop.permute.xlu0 %48  ;;  %78 = vst.msk [vmem:[%s13469_s1 + $0xc0] sm:$0xfc] %vm70_vm0, %v53_v18 }
  0x88   :  { %79 = vst.msk [vmem:[%s13469_s1 + $0xe0] sm:$0x3] %vm72_vm1, %v53_v18  ;;  %75 = vst.msk [vmem:[%s13469_s1 + $0x60] sm:$0x3] %vm72_vm1, %v49_v19  ;;  %518 = vrot.lane.b32.xlu1 %v6140_v10, %s6064_s15 }
  0x89   :  { %74 = vst.msk [vmem:[%s13469_s1 + $0x40] sm:$0xfc] %vm70_vm0, %v49_v19  ;;  %516 = vrot.lane.b32.xlu0 %v6142_v11, %s6064_s15 }
  0x8a   :  { %v57_v20 = vpop.permute.xlu1 %56 }
  0x8b   :  { %v55_v21 = vpop.permute.xlu0 %54  ;;  %82 = vst.msk [vmem:[%s13469_s1 + $0x140] sm:$0xfc] %vm70_vm0, %v57_v20 }
  0x8c   :  { %83 = vst.msk [vmem:[%s13469_s1 + $0x160] sm:$0x3] %vm72_vm1, %v57_v20  ;;  %81 = vst.msk [vmem:[%s13469_s1 + $0x120] sm:$0x3] %vm72_vm1, %v55_v21  ;;  %522 = vrot.lane.b32.xlu1 %v6146_v14, %s6064_s15  ;;  %v6792_v20 = vrot.slane %v951_v16, 6 }
  0x8d   :  { %80 = vst.msk [vmem:[%s13469_s1 + $0x100] sm:$0xfc] %vm70_vm0, %v55_v21  ;;  %520 = vrot.lane.b32.xlu0 %v6148_v15, %s6064_s15  ;;  %v6794_v21 = vrot.slane %v950_v17, 6  ;;  %s6106_s15 = smov 99  }
  0x8e   :  { %v61_v22 = vpop.permute.xlu1 %60 }
  0x8f   :  { %v59_v23 = vpop.permute.xlu0 %58  ;;  %86 = vst.msk [vmem:[%s13469_s1 + $0x1c0] sm:$0xfc] %vm70_vm0, %v61_v22 }
  0x90   :  { %87 = vst.msk [vmem:[%s13469_s1 + $0x1e0] sm:$0x3] %vm72_vm1, %v61_v22  ;;  %85 = vst.msk [vmem:[%s13469_s1 + $0x1a0] sm:$0x3] %vm72_vm1, %v59_v23  ;;  %576 = vrot.lane.b32.xlu1 %v6136_v7, %s6067_s20  ;;  %v953_v22 = vld [vmem:[#allocation2 + $0x70] sm:$0xff]  ;;  %vm600_vm1 = vcmask 640624  }
  0x91   :  { %84 = vst.msk [vmem:[%s13469_s1 + $0x180] sm:$0xfc] %vm70_vm0, %v59_v23  ;;  %574 = vrot.lane.b32.xlu0 %v6130_v4, %s6067_s20  ;;  %v952_v23 = vld [vmem:[#allocation2 + $0x60] sm:$0xff]  ;;  %vm598_vm0 = vcmask 646770  }
  0x92   :  { %v115_v24 = vpop.permute.xlu1 %114 }
  0x93   :  { %v113_v25 = vpop.permute.xlu0 %112  ;;  %140 = vst.msk [vmem:[%s13469_s1 + $0x40] sm:$0xfc] %vm136_vm2, %v115_v24 }
  0x94   :  { %141 = vst.msk [vmem:[%s13469_s1 + $0x60] sm:$0x3] %vm138_vm3, %v115_v24  ;;  %139 = vst.msk [vmem:[%s13469_s1 + $0x20] sm:$0x3] %vm138_vm3, %v113_v25  ;;  %580 = vrot.lane.b32.xlu1 %v6134_v6, %s6067_s20 }
  0x95   :  { %137 = vst.msk [vmem:[%s13469_s1] sm:$0xfc] %vm136_vm2, %v113_v25  ;;  %578 = vrot.lane.b32.xlu0 %v6128_v3, %s6067_s20 }
  0x96   :  { %v119_v26 = vpop.permute.xlu1 %118 }
  0x97   :  { %v117_v27 = vpop.permute.xlu0 %116  ;;  %144 = vst.msk [vmem:[%s13469_s1 + $0xc0] sm:$0xfc] %vm136_vm2, %v119_v26 }
  0x98   :  { %145 = vst.msk [vmem:[%s13469_s1 + $0xe0] sm:$0x3] %vm138_vm3, %v119_v26  ;;  %143 = vst.msk [vmem:[%s13469_s1 + $0xa0] sm:$0x3] %vm138_vm3, %v117_v27  ;;  %584 = vrot.lane.b32.xlu1 %v6140_v10, %s6067_s20  ;;  %v6816_v26 = vrot.slane %v953_v22, 6 }
  0x99   :  { %142 = vst.msk [vmem:[%s13469_s1 + $0x80] sm:$0xfc] %vm136_vm2, %v117_v27  ;;  %582 = vrot.lane.b32.xlu0 %v6142_v11, %s6067_s20  ;;  %v6818_v27 = vrot.slane %v952_v23, 6 }
  0x9a   :  { %v123_v28 = vpop.permute.xlu1 %122 }
  0x9b   :  { %v121_v29 = vpop.permute.xlu0 %120  ;;  %148 = vst.msk [vmem:[%s13469_s1 + $0x140] sm:$0xfc] %vm136_vm2, %v123_v28 }
  0x9c   :  { %149 = vst.msk [vmem:[%s13469_s1 + $0x160] sm:$0x3] %vm138_vm3, %v123_v28  ;;  %147 = vst.msk [vmem:[%s13469_s1 + $0x120] sm:$0x3] %vm138_vm3, %v121_v29  ;;  %588 = vrot.lane.b32.xlu1 %v6146_v14, %s6067_s20 }
  0x9d   :  { %146 = vst.msk [vmem:[%s13469_s1 + $0x100] sm:$0xfc] %vm136_vm2, %v121_v29  ;;  %586 = vrot.lane.b32.xlu0 %v6148_v15, %s6067_s20 }
  0x9e   :  { %v127_v30 = vpop.permute.xlu1 %126 }
  0x9f   :  { %v125_v31 = vpop.permute.xlu0 %124  ;;  %152 = vst.msk [vmem:[%s13469_s1 + $0x1c0] sm:$0xfc] %vm136_vm2, %v127_v30 }
  0xa0   :  { %153 = vst.msk [vmem:[%s13469_s1 + $0x1e0] sm:$0x3] %vm138_vm3, %v127_v30  ;;  %151 = vst.msk [vmem:[%s13469_s1 + $0x1a0] sm:$0x3] %vm138_vm3, %v125_v31  ;;  %642 = vrot.lane.b32.xlu1 %v6136_v7, %s6068_s24  ;;  %vm666_vm3 = vcmask 648824  }
  0xa1   :  { %150 = vst.msk [vmem:[%s13469_s1 + $0x180] sm:$0xfc] %vm136_vm2, %v125_v31  ;;  %640 = vrot.lane.b32.xlu0 %v6130_v4, %s6068_s24  ;;  %vm664_vm2 = vcmask 654970  }
  0xa2   :  { %v181_v32 = vpop.permute.xlu1 %180 }
  0xa3   :  { %v179_v33 = vpop.permute.xlu0 %178  ;;  %206 = vst.msk [vmem:[%s13469_s1 + $0x40] sm:$0xfc] %vm202_vm4, %v181_v32 }
  0xa4   :  { %207 = vst.msk [vmem:[%s13469_s1 + $0x60] sm:$0x3] %vm204_vm5, %v181_v32  ;;  %205 = vst.msk [vmem:[%s13469_s1 + $0x20] sm:$0x3] %vm204_vm5, %v179_v33  ;;  %646 = vrot.lane.b32.xlu1 %v6134_v6, %s6068_s24 }
  0xa5   :  { %203 = vst.msk [vmem:[%s13469_s1] sm:$0xfc] %vm202_vm4, %v179_v33  ;;  %644 = vrot.lane.b32.xlu0 %v6128_v3, %s6068_s24 }
  0xa6   :  { %v185_v34 = vpop.permute.xlu1 %184 }
  0xa7   :  { %v183_v35 = vpop.permute.xlu0 %182  ;;  %210 = vst.msk [vmem:[%s13469_s1 + $0xc0] sm:$0xfc] %vm202_vm4, %v185_v34 }
  0xa8   :  { %211 = vst.msk [vmem:[%s13469_s1 + $0xe0] sm:$0x3] %vm204_vm5, %v185_v34  ;;  %209 = vst.msk [vmem:[%s13469_s1 + $0xa0] sm:$0x3] %vm204_vm5, %v183_v35  ;;  %650 = vrot.lane.b32.xlu1 %v6140_v10, %s6068_s24 }
  0xa9   :  { %208 = vst.msk [vmem:[%s13469_s1 + $0x80] sm:$0xfc] %vm202_vm4, %v183_v35  ;;  %648 = vrot.lane.b32.xlu0 %v6142_v11, %s6068_s24 }
  0xaa   :  { %v189_v36 = vpop.permute.xlu1 %188 }
  0xab   :  { %v187_v37 = vpop.permute.xlu0 %186  ;;  %214 = vst.msk [vmem:[%s13469_s1 + $0x140] sm:$0xfc] %vm202_vm4, %v189_v36 }
  0xac   :  { %215 = vst.msk [vmem:[%s13469_s1 + $0x160] sm:$0x3] %vm204_vm5, %v189_v36  ;;  %213 = vst.msk [vmem:[%s13469_s1 + $0x120] sm:$0x3] %vm204_vm5, %v187_v37  ;;  %654 = vrot.lane.b32.xlu1 %v6146_v14, %s6068_s24 }
  0xad   :  { %212 = vst.msk [vmem:[%s13469_s1 + $0x100] sm:$0xfc] %vm202_vm4, %v187_v37  ;;  %652 = vrot.lane.b32.xlu0 %v6148_v15, %s6068_s24 }
  0xae   :  { %v193_v38 = vpop.permute.xlu1 %192 }
  0xaf   :  { %v191_v39 = vpop.permute.xlu0 %190  ;;  %218 = vst.msk [vmem:[%s13469_s1 + $0x1c0] sm:$0xfc] %vm202_vm4, %v193_v38 }
  0xb0   :  { %219 = vst.msk [vmem:[%s13469_s1 + $0x1e0] sm:$0x3] %vm204_vm5, %v193_v38  ;;  %217 = vst.msk [vmem:[%s13469_s1 + $0x1a0] sm:$0x3] %vm204_vm5, %v191_v39  ;;  %708 = vrot.lane.b32.xlu1 %v6136_v7, %s6069_s29  ;;  %vm732_vm5 = vcmask 796304  }
  0xb1   :  { %216 = vst.msk [vmem:[%s13469_s1 + $0x180] sm:$0xfc] %vm202_vm4, %v191_v39  ;;  %706 = vrot.lane.b32.xlu0 %v6130_v4, %s6069_s29  ;;  %vm730_vm4 = vcmask 802450  }
  0xb2   :  { %v247_v40 = vpop.permute.xlu1 %246 }
  0xb3   :  { %v245_v41 = vpop.permute.xlu0 %244  ;;  %272 = vst.msk [vmem:[%s13469_s1 + $0x40] sm:$0xfc] %vm268_vm6, %v247_v40 }
  0xb4   :  { %273 = vst.msk [vmem:[%s13469_s1 + $0x60] sm:$0x3] %vm270_vm7, %v247_v40  ;;  %271 = vst.msk [vmem:[%s13469_s1 + $0x20] sm:$0x3] %vm270_vm7, %v245_v41  ;;  %712 = vrot.lane.b32.xlu1 %v6134_v6, %s6069_s29 }
  0xb5   :  { %269 = vst.msk [vmem:[%s13469_s1] sm:$0xfc] %vm268_vm6, %v245_v41  ;;  %710 = vrot.lane.b32.xlu0 %v6128_v3, %s6069_s29 }
  0xb6   :  { %v251_v42 = vpop.permute.xlu1 %250 }
  0xb7   :  { %v249_v43 = vpop.permute.xlu0 %248  ;;  %276 = vst.msk [vmem:[%s13469_s1 + $0xc0] sm:$0xfc] %vm268_vm6, %v251_v42 }
  0xb8   :  { %277 = vst.msk [vmem:[%s13469_s1 + $0xe0] sm:$0x3] %vm270_vm7, %v251_v42  ;;  %275 = vst.msk [vmem:[%s13469_s1 + $0xa0] sm:$0x3] %vm270_vm7, %v249_v43  ;;  %716 = vrot.lane.b32.xlu1 %v6140_v10, %s6069_s29 }
  0xb9   :  { %274 = vst.msk [vmem:[%s13469_s1 + $0x80] sm:$0xfc] %vm268_vm6, %v249_v43  ;;  %714 = vrot.lane.b32.xlu0 %v6142_v11, %s6069_s29 }
  0xba   :  { %v255_v44 = vpop.permute.xlu1 %254 }
  0xbb   :  { %v253_v45 = vpop.permute.xlu0 %252  ;;  %280 = vst.msk [vmem:[%s13469_s1 + $0x140] sm:$0xfc] %vm268_vm6, %v255_v44 }
  0xbc   :  { %281 = vst.msk [vmem:[%s13469_s1 + $0x160] sm:$0x3] %vm270_vm7, %v255_v44  ;;  %279 = vst.msk [vmem:[%s13469_s1 + $0x120] sm:$0x3] %vm270_vm7, %v253_v45  ;;  %720 = vrot.lane.b32.xlu1 %v6146_v14, %s6069_s29 }
  0xbd   :  { %278 = vst.msk [vmem:[%s13469_s1 + $0x100] sm:$0xfc] %vm268_vm6, %v253_v45  ;;  %718 = vrot.lane.b32.xlu0 %v6148_v15, %s6069_s29  ;;  %s6087_s29 = smov 74  }
  0xbe   :  { %v259_v46 = vpop.permute.xlu1 %258 }
  0xbf   :  { %v257_v47 = vpop.permute.xlu0 %256  ;;  %284 = vst.msk [vmem:[%s13469_s1 + $0x1c0] sm:$0xfc] %vm268_vm6, %v259_v46 }
  0xc0   :  { %285 = vst.msk [vmem:[%s13469_s1 + $0x1e0] sm:$0x3] %vm270_vm7, %v259_v46  ;;  %283 = vst.msk [vmem:[%s13469_s1 + $0x1a0] sm:$0x3] %vm270_vm7, %v257_v47  ;;  %774 = vrot.lane.b32.xlu1 %v6136_v7, %s6068_s24  ;;  %vm798_vm7 = vcmask 665224  }
  0xc1   :  { %282 = vst.msk [vmem:[%s13469_s1 + $0x180] sm:$0xfc] %vm268_vm6, %v257_v47  ;;  %772 = vrot.lane.b32.xlu0 %v6130_v4, %s6068_s24  ;;  %vm796_vm6 = vcmask 671370  }
  0xc2   :  { %v313_v48 = vpop.permute.xlu1 %312 }
  0xc3   :  { %v311_v49 = vpop.permute.xlu0 %310  ;;  %338 = vst.msk [vmem:[%s13469_s1 + $0x40] sm:$0xfc] %vm334_vm8, %v313_v48 }
  0xc4   :  { %339 = vst.msk [vmem:[%s13469_s1 + $0x60] sm:$0x3] %vm336_vm9, %v313_v48  ;;  %337 = vst.msk [vmem:[%s13469_s1 + $0x20] sm:$0x3] %vm336_vm9, %v311_v49  ;;  %778 = vrot.lane.b32.xlu1 %v6134_v6, %s6068_s24 }
  0xc5   :  { %335 = vst.msk [vmem:[%s13469_s1] sm:$0xfc] %vm334_vm8, %v311_v49  ;;  %776 = vrot.lane.b32.xlu0 %v6128_v3, %s6068_s24 }
  0xc6   :  { %v317_v50 = vpop.permute.xlu1 %316 }
  0xc7   :  { %v315_v51 = vpop.permute.xlu0 %314  ;;  %342 = vst.msk [vmem:[%s13469_s1 + $0xc0] sm:$0xfc] %vm334_vm8, %v317_v50 }
  0xc8   :  { %343 = vst.msk [vmem:[%s13469_s1 + $0xe0] sm:$0x3] %vm336_vm9, %v317_v50  ;;  %341 = vst.msk [vmem:[%s13469_s1 + $0xa0] sm:$0x3] %vm336_vm9, %v315_v51  ;;  %782 = vrot.lane.b32.xlu1 %v6140_v10, %s6068_s24 }
  0xc9   :  { %340 = vst.msk [vmem:[%s13469_s1 + $0x80] sm:$0xfc] %vm334_vm8, %v315_v51  ;;  %780 = vrot.lane.b32.xlu0 %v6142_v11, %s6068_s24 }
  0xca   :  { %v321_v52 = vpop.permute.xlu1 %320 }
  0xcb   :  { %v319_v53 = vpop.permute.xlu0 %318  ;;  %346 = vst.msk [vmem:[%s13469_s1 + $0x140] sm:$0xfc] %vm334_vm8, %v321_v52 }
  0xcc   :  { %347 = vst.msk [vmem:[%s13469_s1 + $0x160] sm:$0x3] %vm336_vm9, %v321_v52  ;;  %345 = vst.msk [vmem:[%s13469_s1 + $0x120] sm:$0x3] %vm336_vm9, %v319_v53  ;;  %786 = vrot.lane.b32.xlu1 %v6146_v14, %s6068_s24 }
  0xcd   :  { %344 = vst.msk [vmem:[%s13469_s1 + $0x100] sm:$0xfc] %vm334_vm8, %v319_v53  ;;  %784 = vrot.lane.b32.xlu0 %v6148_v15, %s6068_s24  ;;  %s6083_s24 = smov 69  }
  0xce   :  { %v325_v54 = vpop.permute.xlu1 %324 }
  0xcf   :  { %v323_v55 = vpop.permute.xlu0 %322  ;;  %350 = vst.msk [vmem:[%s13469_s1 + $0x1c0] sm:$0xfc] %vm334_vm8, %v325_v54 }
  0xd0   :  { %351 = vst.msk [vmem:[%s13469_s1 + $0x1e0] sm:$0x3] %vm336_vm9, %v325_v54  ;;  %349 = vst.msk [vmem:[%s13469_s1 + $0x1a0] sm:$0x3] %vm336_vm9, %v323_v55  ;;  %840 = vrot.lane.b32.xlu1 %v6136_v7, %s6067_s20  ;;  %vm864_vm9 = vcmask 657024  }
  0xd1   :  { %348 = vst.msk [vmem:[%s13469_s1 + $0x180] sm:$0xfc] %vm334_vm8, %v323_v55  ;;  %838 = vrot.lane.b32.xlu0 %v6130_v4, %s6067_s20  ;;  %vm862_vm8 = vcmask 663170  }
  0xd2   :  { %v379_v56 = vpop.permute.xlu1 %378 }
  0xd3   :  { %v377_v57 = vpop.permute.xlu0 %376  ;;  %404 = vst.msk [vmem:[%s13469_s1 + $0x40] sm:$0xfc] %vm400_vm10, %v379_v56 }
  0xd4   :  { %405 = vst.msk [vmem:[%s13469_s1 + $0x60] sm:$0x3] %vm402_vm11, %v379_v56  ;;  %403 = vst.msk [vmem:[%s13469_s1 + $0x20] sm:$0x3] %vm402_vm11, %v377_v57  ;;  %844 = vrot.lane.b32.xlu1 %v6134_v6, %s6067_s20 }
  0xd5   :  { %401 = vst.msk [vmem:[%s13469_s1] sm:$0xfc] %vm400_vm10, %v377_v57  ;;  %842 = vrot.lane.b32.xlu0 %v6128_v3, %s6067_s20 }
  0xd6   :  { %v383_v58 = vpop.permute.xlu1 %382 }
  0xd7   :  { %v381_v59 = vpop.permute.xlu0 %380  ;;  %408 = vst.msk [vmem:[%s13469_s1 + $0xc0] sm:$0xfc] %vm400_vm10, %v383_v58 }
  0xd8   :  { %409 = vst.msk [vmem:[%s13469_s1 + $0xe0] sm:$0x3] %vm402_vm11, %v383_v58  ;;  %407 = vst.msk [vmem:[%s13469_s1 + $0xa0] sm:$0x3] %vm402_vm11, %v381_v59  ;;  %848 = vrot.lane.b32.xlu1 %v6140_v10, %s6067_s20 }
  0xd9   :  { %406 = vst.msk [vmem:[%s13469_s1 + $0x80] sm:$0xfc] %vm400_vm10, %v381_v59  ;;  %846 = vrot.lane.b32.xlu0 %v6142_v11, %s6067_s20 }
  0xda   :  { %v387_v60 = vpop.permute.xlu1 %386 }
  0xdb   :  { %v385_v61 = vpop.permute.xlu0 %384  ;;  %412 = vst.msk [vmem:[%s13469_s1 + $0x140] sm:$0xfc] %vm400_vm10, %v387_v60 }
  0xdc   :  { %413 = vst.msk [vmem:[%s13469_s1 + $0x160] sm:$0x3] %vm402_vm11, %v387_v60  ;;  %411 = vst.msk [vmem:[%s13469_s1 + $0x120] sm:$0x3] %vm402_vm11, %v385_v61  ;;  %852 = vrot.lane.b32.xlu1 %v6146_v14, %s6067_s20 }
  0xdd   :  { %410 = vst.msk [vmem:[%s13469_s1 + $0x100] sm:$0xfc] %vm400_vm10, %v385_v61  ;;  %850 = vrot.lane.b32.xlu0 %v6148_v15, %s6067_s20 }
  0xde   :  { %v391_v62 = vpop.permute.xlu1 %390 }
  0xdf   :  { %v389_v63 = vpop.permute.xlu0 %388  ;;  %416 = vst.msk [vmem:[%s13469_s1 + $0x1c0] sm:$0xfc] %vm400_vm10, %v391_v62 }
  0xe0   :  { %417 = vst.msk [vmem:[%s13469_s1 + $0x1e0] sm:$0x3] %vm402_vm11, %v391_v62  ;;  %415 = vst.msk [vmem:[%s13469_s1 + $0x1a0] sm:$0x3] %vm402_vm11, %v389_v63  ;;  %906 = vrot.lane.b32.xlu1 %v6136_v7, %s6070_s10  ;;  %vm930_vm11 = vcmask 804624  }
  0xe1   :  { %414 = vst.msk [vmem:[%s13469_s1 + $0x180] sm:$0xfc] %vm400_vm10, %v389_v63  ;;  %904 = vrot.lane.b32.xlu0 %v6130_v4, %s6070_s10  ;;  %vm928_vm10 = vcmask 810770  }
  0xe2   :  { %v445_v0 = vpop.permute.xlu1 %444 }
  0xe3   :  { %v443_v1 = vpop.permute.xlu0 %442  ;;  %470 = vst.msk [vmem:[%s13469_s1 + $0x40] sm:$0xfc] %vm466_vm12, %v445_v0 }
  0xe4   :  { %471 = vst.msk [vmem:[%s13469_s1 + $0x60] sm:$0x3] %vm468_vm13, %v445_v0  ;;  %469 = vst.msk [vmem:[%s13469_s1 + $0x20] sm:$0x3] %vm468_vm13, %v443_v1  ;;  %910 = vrot.lane.b32.xlu1 %v6134_v6, %s6070_s10 }
  0xe5   :  { %467 = vst.msk [vmem:[%s13469_s1] sm:$0xfc] %vm466_vm12, %v443_v1  ;;  %908 = vrot.lane.b32.xlu0 %v6128_v3, %s6070_s10  ;;  %v947_v3 = vld [vmem:[#allocation2 + $0x10] sm:$0xff] }
  0xe6   :  { %v449_v2 = vpop.permute.xlu1 %448  ;;  %v6744_v8 = vrot.slane %v947_v3, 6 }
  0xe7   :  { %v447_v4 = vpop.permute.xlu0 %446  ;;  %474 = vst.msk [vmem:[%s13469_s1 + $0xc0] sm:$0xfc] %vm466_vm12, %v449_v2 }
  0xe8   :  { %475 = vst.msk [vmem:[%s13469_s1 + $0xe0] sm:$0x3] %vm468_vm13, %v449_v2  ;;  %473 = vst.msk [vmem:[%s13469_s1 + $0xa0] sm:$0x3] %vm468_vm13, %v447_v4  ;;  %914 = vrot.lane.b32.xlu1 %v6140_v10, %s6070_s10  ;;  %v949_v10 = vld [vmem:[#allocation2 + $0x30] sm:$0xff] }
  0xe9   :  { %472 = vst.msk [vmem:[%s13469_s1 + $0x80] sm:$0xfc] %vm466_vm12, %v447_v4  ;;  %912 = vrot.lane.b32.xlu0 %v6142_v11, %s6070_s10  ;;  %v948_v11 = vld [vmem:[#allocation2 + $0x20] sm:$0xff] }
  0xea   :  { %v453_v6 = vpop.permute.xlu1 %452 }
  0xeb   :  { %v451_v7 = vpop.permute.xlu0 %450  ;;  %478 = vst.msk [vmem:[%s13469_s1 + $0x140] sm:$0xfc] %vm466_vm12, %v453_v6 }
  0xec   :  { %479 = vst.msk [vmem:[%s13469_s1 + $0x160] sm:$0x3] %vm468_vm13, %v453_v6  ;;  %477 = vst.msk [vmem:[%s13469_s1 + $0x120] sm:$0x3] %vm468_vm13, %v451_v7  ;;  %918 = vrot.lane.b32.xlu1 %v6146_v14, %s6070_s10  ;;  %v6768_v14 = vrot.slane %v949_v10, 6 }
  0xed   :  { %476 = vst.msk [vmem:[%s13469_s1 + $0x100] sm:$0xfc] %vm466_vm12, %v451_v7  ;;  %916 = vrot.lane.b32.xlu0 %v6148_v15, %s6070_s10  ;;  %v6770_v15 = vrot.slane %v948_v11, 6 }
  0xee   :  { %v457_v12 = vpop.permute.xlu1 %456 }
  0xef   :  { %v455_v13 = vpop.permute.xlu0 %454  ;;  %482 = vst.msk [vmem:[%s13469_s1 + $0x1c0] sm:$0xfc] %vm466_vm12, %v457_v12 }
  0xf0   :  { %483 = vst.msk [vmem:[%s13469_s1 + $0x1e0] sm:$0x3] %vm468_vm13, %v457_v12  ;;  %481 = vst.msk [vmem:[%s13469_s1 + $0x1a0] sm:$0x3] %vm468_vm13, %v455_v13  ;;  %972 = vrot.lane.b32.xlu1 %v6744_v8, %s6071_s0  ;;  %vm996_vm13 = vcmask 812824  }
  0xf1   :  { %480 = vst.msk [vmem:[%s13469_s1 + $0x180] sm:$0xfc] %vm466_vm12, %v455_v13  ;;  %970 = vrot.lane.b32.xlu0 %v6746_v9, %s6071_s0  ;;  %vm994_vm12 = vcmask 818970  }
  0xf2   :  { %v511_v18 = vpop.permute.xlu1 %510 }
  0xf3   :  { %v509_v19 = vpop.permute.xlu0 %508  ;;  %536 = vst.msk [vmem:[%s13469_s1 + $0x40] sm:$0xfc] %vm532_vm14, %v511_v18 }
  0xf4   :  { %537 = vst.msk [vmem:[%s13469_s1 + $0x60] sm:$0x3] %vm534_vm15, %v511_v18  ;;  %535 = vst.msk [vmem:[%s13469_s1 + $0x20] sm:$0x3] %vm534_vm15, %v509_v19  ;;  %976 = vrot.lane.b32.xlu1 %v6768_v14, %s6071_s0 }
  0xf5   :  { %533 = vst.msk [vmem:[%s13469_s1] sm:$0xfc] %vm532_vm14, %v509_v19  ;;  %974 = vrot.lane.b32.xlu0 %v6770_v15, %s6071_s0 }
  0xf6   :  { %v515_v24 = vpop.permute.xlu1 %514 }
  0xf7   :  { %v513_v25 = vpop.permute.xlu0 %512  ;;  %540 = vst.msk [vmem:[%s13469_s1 + $0xc0] sm:$0xfc] %vm532_vm14, %v515_v24 }
  0xf8   :  { %541 = vst.msk [vmem:[%s13469_s1 + $0xe0] sm:$0x3] %vm534_vm15, %v515_v24  ;;  %539 = vst.msk [vmem:[%s13469_s1 + $0xa0] sm:$0x3] %vm534_vm15, %v513_v25  ;;  %980 = vrot.lane.b32.xlu1 %v6792_v20, %s6071_s0 }
  0xf9   :  { %538 = vst.msk [vmem:[%s13469_s1 + $0x80] sm:$0xfc] %vm532_vm14, %v513_v25  ;;  %978 = vrot.lane.b32.xlu0 %v6794_v21, %s6071_s0 }
  0xfa   :  { %v519_v28 = vpop.permute.xlu1 %518 }
  0xfb   :  { %v517_v29 = vpop.permute.xlu0 %516  ;;  %544 = vst.msk [vmem:[%s13469_s1 + $0x140] sm:$0xfc] %vm532_vm14, %v519_v28 }
  0xfc   :  { %545 = vst.msk [vmem:[%s13469_s1 + $0x160] sm:$0x3] %vm534_vm15, %v519_v28  ;;  %543 = vst.msk [vmem:[%s13469_s1 + $0x120] sm:$0x3] %vm534_vm15, %v517_v29  ;;  %984 = vrot.lane.b32.xlu1 %v6816_v26, %s6071_s0 }
  0xfd   :  { %542 = vst.msk [vmem:[%s13469_s1 + $0x100] sm:$0xfc] %vm532_vm14, %v517_v29  ;;  %982 = vrot.lane.b32.xlu0 %v6818_v27, %s6071_s0 }
  0xfe   :  { %v523_v30 = vpop.permute.xlu1 %522 }
  0xff   :  { %v521_v31 = vpop.permute.xlu0 %520  ;;  %548 = vst.msk [vmem:[%s13469_s1 + $0x1c0] sm:$0xfc] %vm532_vm14, %v523_v30 }
 0x100   :  { %549 = vst.msk [vmem:[%s13469_s1 + $0x1e0] sm:$0x3] %vm534_vm15, %v523_v30  ;;  %547 = vst.msk [vmem:[%s13469_s1 + $0x1a0] sm:$0x3] %vm534_vm15, %v521_v31  ;;  %1038 = vrot.lane.b32.xlu1 %v6744_v8, %s6072_s19  ;;  %vm1062_vm15 = vcmask 960304  }
 0x101   :  { %546 = vst.msk [vmem:[%s13469_s1 + $0x180] sm:$0xfc] %vm532_vm14, %v521_v31  ;;  %1036 = vrot.lane.b32.xlu0 %v6746_v9, %s6072_s19  ;;  %vm1060_vm14 = vcmask 966450  }
 0x102   :  { %v577_v32 = vpop.permute.xlu1 %576 }
 0x103   :  { %v575_v33 = vpop.permute.xlu0 %574  ;;  %602 = vst.msk [vmem:[%s13469_s1 + $0x40] sm:$0xfc] %vm598_vm0, %v577_v32 }
 0x104   :  { %603 = vst.msk [vmem:[%s13469_s1 + $0x60] sm:$0x3] %vm600_vm1, %v577_v32  ;;  %601 = vst.msk [vmem:[%s13469_s1 + $0x20] sm:$0x3] %vm600_vm1, %v575_v33  ;;  %1042 = vrot.lane.b32.xlu1 %v6768_v14, %s6072_s19 }
 0x105   :  { %599 = vst.msk [vmem:[%s13469_s1] sm:$0xfc] %vm598_vm0, %v575_v33  ;;  %1040 = vrot.lane.b32.xlu0 %v6770_v15, %s6072_s19 }
 0x106   :  { %v581_v34 = vpop.permute.xlu1 %580 }
 0x107   :  { %v579_v35 = vpop.permute.xlu0 %578  ;;  %606 = vst.msk [vmem:[%s13469_s1 + $0xc0] sm:$0xfc] %vm598_vm0, %v581_v34 }
 0x108   :  { %607 = vst.msk [vmem:[%s13469_s1 + $0xe0] sm:$0x3] %vm600_vm1, %v581_v34  ;;  %605 = vst.msk [vmem:[%s13469_s1 + $0xa0] sm:$0x3] %vm600_vm1, %v579_v35  ;;  %1046 = vrot.lane.b32.xlu1 %v6792_v20, %s6072_s19 }
 0x109   :  { %604 = vst.msk [vmem:[%s13469_s1 + $0x80] sm:$0xfc] %vm598_vm0, %v579_v35  ;;  %1044 = vrot.lane.b32.xlu0 %v6794_v21, %s6072_s19 }
 0x10a   :  { %v585_v36 = vpop.permute.xlu1 %584 }
 0x10b   :  { %v583_v37 = vpop.permute.xlu0 %582  ;;  %610 = vst.msk [vmem:[%s13469_s1 + $0x140] sm:$0xfc] %vm598_vm0, %v585_v36 }
 0x10c   :  { %611 = vst.msk [vmem:[%s13469_s1 + $0x160] sm:$0x3] %vm600_vm1, %v585_v36  ;;  %609 = vst.msk [vmem:[%s13469_s1 + $0x120] sm:$0x3] %vm600_vm1, %v583_v37  ;;  %1050 = vrot.lane.b32.xlu1 %v6816_v26, %s6072_s19 }
 0x10d   :  { %608 = vst.msk [vmem:[%s13469_s1 + $0x100] sm:$0xfc] %vm598_vm0, %v583_v37  ;;  %1048 = vrot.lane.b32.xlu0 %v6818_v27, %s6072_s19  ;;  %s6090_s19 = smov 78  }
 0x10e   :  { %v589_v38 = vpop.permute.xlu1 %588 }
 0x10f   :  { %v587_v39 = vpop.permute.xlu0 %586  ;;  %614 = vst.msk [vmem:[%s13469_s1 + $0x1c0] sm:$0xfc] %vm598_vm0, %v589_v38 }
 0x110   :  { %615 = vst.msk [vmem:[%s13469_s1 + $0x1e0] sm:$0x3] %vm600_vm1, %v589_v38  ;;  %613 = vst.msk [vmem:[%s13469_s1 + $0x1a0] sm:$0x3] %vm600_vm1, %v587_v39  ;;  %1104 = vrot.lane.b32.xlu1 %v6744_v8, %s6071_s0  ;;  %vm1128_vm1 = vcmask 829224  }
 0x111   :  { %612 = vst.msk [vmem:[%s13469_s1 + $0x180] sm:$0xfc] %vm598_vm0, %v587_v39  ;;  %1102 = vrot.lane.b32.xlu0 %v6746_v9, %s6071_s0  ;;  %vm1126_vm0 = vcmask 835370  }
 0x112   :  { %v643_v40 = vpop.permute.xlu1 %642 }
 0x113   :  { %v641_v41 = vpop.permute.xlu0 %640  ;;  %668 = vst.msk [vmem:[%s13469_s1 + $0x40] sm:$0xfc] %vm664_vm2, %v643_v40 }
 0x114   :  { %669 = vst.msk [vmem:[%s13469_s1 + $0x60] sm:$0x3] %vm666_vm3, %v643_v40  ;;  %667 = vst.msk [vmem:[%s13469_s1 + $0x20] sm:$0x3] %vm666_vm3, %v641_v41  ;;  %1108 = vrot.lane.b32.xlu1 %v6768_v14, %s6071_s0 }
 0x115   :  { %665 = vst.msk [vmem:[%s13469_s1] sm:$0xfc] %vm664_vm2, %v641_v41  ;;  %1106 = vrot.lane.b32.xlu0 %v6770_v15, %s6071_s0 }
 0x116   :  { %v647_v42 = vpop.permute.xlu1 %646 }
 0x117   :  { %v645_v43 = vpop.permute.xlu0 %644  ;;  %672 = vst.msk [vmem:[%s13469_s1 + $0xc0] sm:$0xfc] %vm664_vm2, %v647_v42 }
 0x118   :  { %673 = vst.msk [vmem:[%s13469_s1 + $0xe0] sm:$0x3] %vm666_vm3, %v647_v42  ;;  %671 = vst.msk [vmem:[%s13469_s1 + $0xa0] sm:$0x3] %vm666_vm3, %v645_v43  ;;  %1112 = vrot.lane.b32.xlu1 %v6792_v20, %s6071_s0 }
 0x119   :  { %670 = vst.msk [vmem:[%s13469_s1 + $0x80] sm:$0xfc] %vm664_vm2, %v645_v43  ;;  %1110 = vrot.lane.b32.xlu0 %v6794_v21, %s6071_s0 }
 0x11a   :  { %v651_v44 = vpop.permute.xlu1 %650 }
 0x11b   :  { %v649_v45 = vpop.permute.xlu0 %648  ;;  %676 = vst.msk [vmem:[%s13469_s1 + $0x140] sm:$0xfc] %vm664_vm2, %v651_v44 }
 0x11c   :  { %677 = vst.msk [vmem:[%s13469_s1 + $0x160] sm:$0x3] %vm666_vm3, %v651_v44  ;;  %675 = vst.msk [vmem:[%s13469_s1 + $0x120] sm:$0x3] %vm666_vm3, %v649_v45  ;;  %1116 = vrot.lane.b32.xlu1 %v6816_v26, %s6071_s0 }
 0x11d   :  { %674 = vst.msk [vmem:[%s13469_s1 + $0x100] sm:$0xfc] %vm664_vm2, %v649_v45  ;;  %1114 = vrot.lane.b32.xlu0 %v6818_v27, %s6071_s0 }
 0x11e   :  { %v655_v46 = vpop.permute.xlu1 %654 }
 0x11f   :  { %v653_v47 = vpop.permute.xlu0 %652  ;;  %680 = vst.msk [vmem:[%s13469_s1 + $0x1c0] sm:$0xfc] %vm664_vm2, %v655_v46 }
 0x120   :  { %681 = vst.msk [vmem:[%s13469_s1 + $0x1e0] sm:$0x3] %vm666_vm3, %v655_v46  ;;  %679 = vst.msk [vmem:[%s13469_s1 + $0x1a0] sm:$0x3] %vm666_vm3, %v653_v47  ;;  %1170 = vrot.lane.b32.xlu1 %v6744_v8, %s6070_s10  ;;  %vm1194_vm3 = vcmask 821024  }
 0x121   :  { %678 = vst.msk [vmem:[%s13469_s1 + $0x180] sm:$0xfc] %vm664_vm2, %v653_v47  ;;  %1168 = vrot.lane.b32.xlu0 %v6746_v9, %s6070_s10  ;;  %vm1192_vm2 = vcmask 827170  }
 0x122   :  { %v709_v48 = vpop.permute.xlu1 %708 }
 0x123   :  { %v707_v49 = vpop.permute.xlu0 %706  ;;  %734 = vst.msk [vmem:[%s13469_s1 + $0x40] sm:$0xfc] %vm730_vm4, %v709_v48 }
 0x124   :  { %735 = vst.msk [vmem:[%s13469_s1 + $0x60] sm:$0x3] %vm732_vm5, %v709_v48  ;;  %733 = vst.msk [vmem:[%s13469_s1 + $0x20] sm:$0x3] %vm732_vm5, %v707_v49  ;;  %1174 = vrot.lane.b32.xlu1 %v6768_v14, %s6070_s10 }
 0x125   :  { %731 = vst.msk [vmem:[%s13469_s1] sm:$0xfc] %vm730_vm4, %v707_v49  ;;  %1172 = vrot.lane.b32.xlu0 %v6770_v15, %s6070_s10 }
 0x126   :  { %v713_v50 = vpop.permute.xlu1 %712 }
 0x127   :  { %v711_v51 = vpop.permute.xlu0 %710  ;;  %738 = vst.msk [vmem:[%s13469_s1 + $0xc0] sm:$0xfc] %vm730_vm4, %v713_v50 }
 0x128   :  { %739 = vst.msk [vmem:[%s13469_s1 + $0xe0] sm:$0x3] %vm732_vm5, %v713_v50  ;;  %737 = vst.msk [vmem:[%s13469_s1 + $0xa0] sm:$0x3] %vm732_vm5, %v711_v51  ;;  %1178 = vrot.lane.b32.xlu1 %v6792_v20, %s6070_s10 }
 0x129   :  { %736 = vst.msk [vmem:[%s13469_s1 + $0x80] sm:$0xfc] %vm730_vm4, %v711_v51  ;;  %1176 = vrot.lane.b32.xlu0 %v6794_v21, %s6070_s10 }
 0x12a   :  { %v717_v52 = vpop.permute.xlu1 %716 }
 0x12b   :  { %v715_v53 = vpop.permute.xlu0 %714  ;;  %742 = vst.msk [vmem:[%s13469_s1 + $0x140] sm:$0xfc] %vm730_vm4, %v717_v52 }
 0x12c   :  { %743 = vst.msk [vmem:[%s13469_s1 + $0x160] sm:$0x3] %vm732_vm5, %v717_v52  ;;  %741 = vst.msk [vmem:[%s13469_s1 + $0x120] sm:$0x3] %vm732_vm5, %v715_v53  ;;  %1182 = vrot.lane.b32.xlu1 %v6816_v26, %s6070_s10  ;;  %v1693_v52 = vld [vmem:[#allocation2 + $0x30] sm:$0xff] }
 0x12d   :  { %740 = vst.msk [vmem:[%s13469_s1 + $0x100] sm:$0xfc] %vm730_vm4, %v715_v53  ;;  %1180 = vrot.lane.b32.xlu0 %v6818_v27, %s6070_s10  ;;  %v1692_v53 = vld [vmem:[#allocation2 + $0x20] sm:$0xff]  ;;  %s6095_s10 = smov 85  }
 0x12e   :  { %v721_v54 = vpop.permute.xlu1 %720 }
 0x12f   :  { %v719_v55 = vpop.permute.xlu0 %718  ;;  %746 = vst.msk [vmem:[%s13469_s1 + $0x1c0] sm:$0xfc] %vm730_vm4, %v721_v54 }
 0x130   :  { %747 = vst.msk [vmem:[%s13469_s1 + $0x1e0] sm:$0x3] %vm732_vm5, %v721_v54  ;;  %745 = vst.msk [vmem:[%s13469_s1 + $0x1a0] sm:$0x3] %vm732_vm5, %v719_v55  ;;  %1236 = vrot.lane.b32.xlu1 %v6744_v8, %s6073_s2  ;;  %vm1260_vm5 = vcmask 968624  }
 0x131   :  { %744 = vst.msk [vmem:[%s13469_s1 + $0x180] sm:$0xfc] %vm730_vm4, %v719_v55  ;;  %1234 = vrot.lane.b32.xlu0 %v6746_v9, %s6073_s2  ;;  %vm1258_vm4 = vcmask 974770  }
 0x132   :  { %v775_v56 = vpop.permute.xlu1 %774 }
 0x133   :  { %v773_v57 = vpop.permute.xlu0 %772  ;;  %800 = vst.msk [vmem:[%s13469_s1 + $0x40] sm:$0xfc] %vm796_vm6, %v775_v56 }
 0x134   :  { %801 = vst.msk [vmem:[%s13469_s1 + $0x60] sm:$0x3] %vm798_vm7, %v775_v56  ;;  %799 = vst.msk [vmem:[%s13469_s1 + $0x20] sm:$0x3] %vm798_vm7, %v773_v57  ;;  %1240 = vrot.lane.b32.xlu1 %v6768_v14, %s6073_s2  ;;  %v1695_v56 = vld [vmem:[#allocation2 + $0x50] sm:$0xff] }
 0x135   :  { %797 = vst.msk [vmem:[%s13469_s1] sm:$0xfc] %vm796_vm6, %v773_v57  ;;  %1238 = vrot.lane.b32.xlu0 %v6770_v15, %s6073_s2  ;;  %v1694_v57 = vld [vmem:[#allocation2 + $0x40] sm:$0xff] }
 0x136   :  { %v779_v58 = vpop.permute.xlu1 %778 }
 0x137   :  { %v777_v59 = vpop.permute.xlu0 %776  ;;  %804 = vst.msk [vmem:[%s13469_s1 + $0xc0] sm:$0xfc] %vm796_vm6, %v779_v58 }
 0x138   :  { %805 = vst.msk [vmem:[%s13469_s1 + $0xe0] sm:$0x3] %vm798_vm7, %v779_v58  ;;  %803 = vst.msk [vmem:[%s13469_s1 + $0xa0] sm:$0x3] %vm798_vm7, %v777_v59  ;;  %1244 = vrot.lane.b32.xlu1 %v6792_v20, %s6073_s2 }
 0x139   :  { %802 = vst.msk [vmem:[%s13469_s1 + $0x80] sm:$0xfc] %vm796_vm6, %v777_v59  ;;  %1242 = vrot.lane.b32.xlu0 %v6794_v21, %s6073_s2 }
 0x13a   :  { %v783_v60 = vpop.permute.xlu1 %782 }
 0x13b   :  { %v781_v61 = vpop.permute.xlu0 %780  ;;  %808 = vst.msk [vmem:[%s13469_s1 + $0x140] sm:$0xfc] %vm796_vm6, %v783_v60 }
 0x13c   :  { %809 = vst.msk [vmem:[%s13469_s1 + $0x160] sm:$0x3] %vm798_vm7, %v783_v60  ;;  %807 = vst.msk [vmem:[%s13469_s1 + $0x120] sm:$0x3] %vm798_vm7, %v781_v61  ;;  %1248 = vrot.lane.b32.xlu1 %v6816_v26, %s6073_s2  ;;  %v7672_v60 = vrot.slane %v1695_v56, 6 }
 0x13d   :  { %806 = vst.msk [vmem:[%s13469_s1 + $0x100] sm:$0xfc] %vm796_vm6, %v781_v61  ;;  %1246 = vrot.lane.b32.xlu0 %v6818_v27, %s6073_s2  ;;  %v7674_v61 = vrot.slane %v1694_v57, 6 }
 0x13e   :  { %v787_v62 = vpop.permute.xlu1 %786 }
 0x13f   :  { %v785_v63 = vpop.permute.xlu0 %784  ;;  %812 = vst.msk [vmem:[%s13469_s1 + $0x1c0] sm:$0xfc] %vm796_vm6, %v787_v62 }
 0x140   :  { %813 = vst.msk [vmem:[%s13469_s1 + $0x1e0] sm:$0x3] %vm798_vm7, %v787_v62  ;;  %811 = vst.msk [vmem:[%s13469_s1 + $0x1a0] sm:$0x3] %vm798_vm7, %v785_v63  ;;  %1302 = vrot.lane.b32.xlu1 %v6744_v8, %s6074_s5  ;;  %v1697_v62 = vld [vmem:[#allocation2 + $0x70] sm:$0xff]  ;;  %vm1326_vm7 = vcmask 976824  }
 0x141   :  { %810 = vst.msk [vmem:[%s13469_s1 + $0x180] sm:$0xfc] %vm796_vm6, %v785_v63  ;;  %1300 = vrot.lane.b32.xlu0 %v6746_v9, %s6074_s5  ;;  %v1696_v63 = vld [vmem:[#allocation2 + $0x60] sm:$0xff]  ;;  %vm1324_vm6 = vcmask 982970  }
 0x142   :  { %v841_v0 = vpop.permute.xlu1 %840 }
 0x143   :  { %v839_v1 = vpop.permute.xlu0 %838  ;;  %866 = vst.msk [vmem:[%s13469_s1 + $0x40] sm:$0xfc] %vm862_vm8, %v841_v0 }
 0x144   :  { %867 = vst.msk [vmem:[%s13469_s1 + $0x60] sm:$0x3] %vm864_vm9, %v841_v0  ;;  %865 = vst.msk [vmem:[%s13469_s1 + $0x20] sm:$0x3] %vm864_vm9, %v839_v1  ;;  %1306 = vrot.lane.b32.xlu1 %v6768_v14, %s6074_s5 }
 0x145   :  { %863 = vst.msk [vmem:[%s13469_s1] sm:$0xfc] %vm862_vm8, %v839_v1  ;;  %1304 = vrot.lane.b32.xlu0 %v6770_v15, %s6074_s5 }
 0x146   :  { %v845_v2 = vpop.permute.xlu1 %844 }
 0x147   :  { %v843_v4 = vpop.permute.xlu0 %842  ;;  %870 = vst.msk [vmem:[%s13469_s1 + $0xc0] sm:$0xfc] %vm862_vm8, %v845_v2 }
 0x148   :  { %871 = vst.msk [vmem:[%s13469_s1 + $0xe0] sm:$0x3] %vm864_vm9, %v845_v2  ;;  %869 = vst.msk [vmem:[%s13469_s1 + $0xa0] sm:$0x3] %vm864_vm9, %v843_v4  ;;  %1310 = vrot.lane.b32.xlu1 %v6792_v20, %s6074_s5  ;;  %v7696_v2 = vrot.slane %v1697_v62, 6 }
 0x149   :  { %868 = vst.msk [vmem:[%s13469_s1 + $0x80] sm:$0xfc] %vm862_vm8, %v843_v4  ;;  %1308 = vrot.lane.b32.xlu0 %v6794_v21, %s6074_s5  ;;  %v7698_v4 = vrot.slane %v1696_v63, 6 }
 0x14a   :  { %v849_v3 = vpop.permute.xlu1 %848 }
 0x14b   :  { %v847_v5 = vpop.permute.xlu0 %846  ;;  %874 = vst.msk [vmem:[%s13469_s1 + $0x140] sm:$0xfc] %vm862_vm8, %v849_v3 }
 0x14c   :  { %875 = vst.msk [vmem:[%s13469_s1 + $0x160] sm:$0x3] %vm864_vm9, %v849_v3  ;;  %873 = vst.msk [vmem:[%s13469_s1 + $0x120] sm:$0x3] %vm864_vm9, %v847_v5  ;;  %1314 = vrot.lane.b32.xlu1 %v6816_v26, %s6074_s5 }
 0x14d   :  { %872 = vst.msk [vmem:[%s13469_s1 + $0x100] sm:$0xfc] %vm862_vm8, %v847_v5  ;;  %1312 = vrot.lane.b32.xlu0 %v6818_v27, %s6074_s5 }
 0x14e   :  { %v853_v6 = vpop.permute.xlu1 %852 }
 0x14f   :  { %v851_v7 = vpop.permute.xlu0 %850  ;;  %878 = vst.msk [vmem:[%s13469_s1 + $0x1c0] sm:$0xfc] %vm862_vm8, %v853_v6 }
 0x150   :  { %879 = vst.msk [vmem:[%s13469_s1 + $0x1e0] sm:$0x3] %vm864_vm9, %v853_v6  ;;  %877 = vst.msk [vmem:[%s13469_s1 + $0x1a0] sm:$0x3] %vm864_vm9, %v851_v7  ;;  %1368 = vrot.lane.b32.xlu1 %v6744_v8, %s6075_s9  ;;  %vm1394_vm9 = vcmask 1042384  }
 0x151   :  { %876 = vst.msk [vmem:[%s13469_s1 + $0x180] sm:$0xfc] %vm862_vm8, %v851_v7  ;;  %1366 = vrot.lane.b32.xlu0 %v6746_v9, %s6075_s9  ;;  %vm1390_vm8 = vcmask 1048530  }
 0x152   :  { %v907_v10 = vpop.permute.xlu1 %906 }
 0x153   :  { %v905_v11 = vpop.permute.xlu0 %904  ;;  %932 = vst.msk [vmem:[%s13469_s1 + $0x40] sm:$0xfc] %vm928_vm10, %v907_v10 }
 0x154   :  { %933 = vst.msk [vmem:[%s13469_s1 + $0x60] sm:$0x3] %vm930_vm11, %v907_v10  ;;  %931 = vst.msk [vmem:[%s13469_s1 + $0x20] sm:$0x3] %vm930_vm11, %v905_v11  ;;  %1372 = vrot.lane.b32.xlu1 %v6768_v14, %s6075_s9 }
 0x155   :  { %929 = vst.msk [vmem:[%s13469_s1] sm:$0xfc] %vm928_vm10, %v905_v11  ;;  %1370 = vrot.lane.b32.xlu0 %v6770_v15, %s6075_s9 }
 0x156   :  { %v911_v12 = vpop.permute.xlu1 %910 }
 0x157   :  { %v909_v13 = vpop.permute.xlu0 %908  ;;  %936 = vst.msk [vmem:[%s13469_s1 + $0xc0] sm:$0xfc] %vm928_vm10, %v911_v12 }
 0x158   :  { %937 = vst.msk [vmem:[%s13469_s1 + $0xe0] sm:$0x3] %vm930_vm11, %v911_v12  ;;  %935 = vst.msk [vmem:[%s13469_s1 + $0xa0] sm:$0x3] %vm930_vm11, %v909_v13  ;;  %1376 = vrot.lane.b32.xlu1 %v6792_v20, %s6075_s9 }
 0x159   :  { %934 = vst.msk [vmem:[%s13469_s1 + $0x80] sm:$0xfc] %vm928_vm10, %v909_v13  ;;  %1374 = vrot.lane.b32.xlu0 %v6794_v21, %s6075_s9 }
 0x15a   :  { %v915_v16 = vpop.permute.xlu1 %914 }
 0x15b   :  { %v913_v17 = vpop.permute.xlu0 %912  ;;  %940 = vst.msk [vmem:[%s13469_s1 + $0x140] sm:$0xfc] %vm928_vm10, %v915_v16 }
 0x15c   :  { %941 = vst.msk [vmem:[%s13469_s1 + $0x160] sm:$0x3] %vm930_vm11, %v915_v16  ;;  %939 = vst.msk [vmem:[%s13469_s1 + $0x120] sm:$0x3] %vm930_vm11, %v913_v17  ;;  %1380 = vrot.lane.b32.xlu1 %v6816_v26, %s6075_s9 }
 0x15d   :  { %938 = vst.msk [vmem:[%s13469_s1 + $0x100] sm:$0xfc] %vm928_vm10, %v913_v17  ;;  %1378 = vrot.lane.b32.xlu0 %v6818_v27, %s6075_s9  ;;  %s6079_s9 = smov 63  }
 0x15e   :  { %v919_v18 = vpop.permute.xlu1 %918 }
 0x15f   :  { %v917_v19 = vpop.permute.xlu0 %916  ;;  %944 = vst.msk [vmem:[%s13469_s1 + $0x1c0] sm:$0xfc] %vm928_vm10, %v919_v18 }
 0x160   :  { %945 = vst.msk [vmem:[%s13469_s1 + $0x1e0] sm:$0x3] %vm930_vm11, %v919_v18  ;;  %943 = vst.msk [vmem:[%s13469_s1 + $0x1a0] sm:$0x3] %vm930_vm11, %v917_v19  ;;  %1452 = vrot.lane.b32.xlu1 %v6744_v8, %s6074_s5  ;;  %vm1396_vm11 = vcmask 74752  }
 0x161   :  { %942 = vst.msk [vmem:[%s13469_s1 + $0x180] sm:$0xfc] %vm928_vm10, %v917_v19  ;;  %1450 = vrot.lane.b32.xlu0 %v6746_v9, %s6074_s5  ;;  %vm1392_vm10 = vcmask 80898  }
 0x162   :  { %v973_v22 = vpop.permute.xlu1 %972 }
 0x163   :  { %v971_v23 = vpop.permute.xlu0 %970  ;;  %998 = vst.msk [vmem:[%s13469_s1 + $0x40] sm:$0xfc] %vm994_vm12, %v973_v22 }
 0x164   :  { %999 = vst.msk [vmem:[%s13469_s1 + $0x60] sm:$0x3] %vm996_vm13, %v973_v22  ;;  %997 = vst.msk [vmem:[%s13469_s1 + $0x20] sm:$0x3] %vm996_vm13, %v971_v23  ;;  %1456 = vrot.lane.b32.xlu1 %v6768_v14, %s6074_s5 }
 0x165   :  { %995 = vst.msk [vmem:[%s13469_s1] sm:$0xfc] %vm994_vm12, %v971_v23  ;;  %1454 = vrot.lane.b32.xlu0 %v6770_v15, %s6074_s5 }
 0x166   :  { %v977_v24 = vpop.permute.xlu1 %976 }
 0x167   :  { %v975_v25 = vpop.permute.xlu0 %974  ;;  %1002 = vst.msk [vmem:[%s13469_s1 + $0xc0] sm:$0xfc] %vm994_vm12, %v977_v24 }
 0x168   :  { %1003 = vst.msk [vmem:[%s13469_s1 + $0xe0] sm:$0x3] %vm996_vm13, %v977_v24  ;;  %1001 = vst.msk [vmem:[%s13469_s1 + $0xa0] sm:$0x3] %vm996_vm13, %v975_v25  ;;  %1460 = vrot.lane.b32.xlu1 %v6792_v20, %s6074_s5 }
 0x169   :  { %1000 = vst.msk [vmem:[%s13469_s1 + $0x80] sm:$0xfc] %vm994_vm12, %v975_v25  ;;  %1458 = vrot.lane.b32.xlu0 %v6794_v21, %s6074_s5 }
 0x16a   :  { %v981_v28 = vpop.permute.xlu1 %980 }
 0x16b   :  { %v979_v29 = vpop.permute.xlu0 %978  ;;  %1006 = vst.msk [vmem:[%s13469_s1 + $0x140] sm:$0xfc] %vm994_vm12, %v981_v28 }
 0x16c   :  { %1007 = vst.msk [vmem:[%s13469_s1 + $0x160] sm:$0x3] %vm996_vm13, %v981_v28  ;;  %1005 = vst.msk [vmem:[%s13469_s1 + $0x120] sm:$0x3] %vm996_vm13, %v979_v29  ;;  %1464 = vrot.lane.b32.xlu1 %v6816_v26, %s6074_s5 }
 0x16d   :  { %1004 = vst.msk [vmem:[%s13469_s1 + $0x100] sm:$0xfc] %vm994_vm12, %v979_v29  ;;  %1462 = vrot.lane.b32.xlu0 %v6818_v27, %s6074_s5  ;;  %s6080_s5 = smov 65  }
 0x16e   :  { %v985_v30 = vpop.permute.xlu1 %984 }
 0x16f   :  { %v983_v31 = vpop.permute.xlu0 %982  ;;  %1010 = vst.msk [vmem:[%s13469_s1 + $0x1c0] sm:$0xfc] %vm994_vm12, %v985_v30 }
 0x170   :  { %1011 = vst.msk [vmem:[%s13469_s1 + $0x1e0] sm:$0x3] %vm996_vm13, %v985_v30  ;;  %1009 = vst.msk [vmem:[%s13469_s1 + $0x1a0] sm:$0x3] %vm996_vm13, %v983_v31  ;;  %1518 = vrot.lane.b32.xlu1 %v6744_v8, %s6073_s2  ;;  %vm1476_vm13 = vcmask 993224  }
 0x171   :  { %1008 = vst.msk [vmem:[%s13469_s1 + $0x180] sm:$0xfc] %vm994_vm12, %v983_v31  ;;  %1516 = vrot.lane.b32.xlu0 %v6746_v9, %s6073_s2  ;;  %vm1474_vm12 = vcmask 999370  }
 0x172   :  { %v1039_v32 = vpop.permute.xlu1 %1038 }
 0x173   :  { %v1037_v33 = vpop.permute.xlu0 %1036  ;;  %1064 = vst.msk [vmem:[%s13469_s1 + $0x40] sm:$0xfc] %vm1060_vm14, %v1039_v32 }
 0x174   :  { %1065 = vst.msk [vmem:[%s13469_s1 + $0x60] sm:$0x3] %vm1062_vm15, %v1039_v32  ;;  %1063 = vst.msk [vmem:[%s13469_s1 + $0x20] sm:$0x3] %vm1062_vm15, %v1037_v33  ;;  %1522 = vrot.lane.b32.xlu1 %v6768_v14, %s6073_s2 }
 0x175   :  { %1061 = vst.msk [vmem:[%s13469_s1] sm:$0xfc] %vm1060_vm14, %v1037_v33  ;;  %1520 = vrot.lane.b32.xlu0 %v6770_v15, %s6073_s2 }
 0x176   :  { %v1043_v34 = vpop.permute.xlu1 %1042 }
 0x177   :  { %v1041_v35 = vpop.permute.xlu0 %1040  ;;  %1068 = vst.msk [vmem:[%s13469_s1 + $0xc0] sm:$0xfc] %vm1060_vm14, %v1043_v34 }
 0x178   :  { %1069 = vst.msk [vmem:[%s13469_s1 + $0xe0] sm:$0x3] %vm1062_vm15, %v1043_v34  ;;  %1067 = vst.msk [vmem:[%s13469_s1 + $0xa0] sm:$0x3] %vm1062_vm15, %v1041_v35  ;;  %1526 = vrot.lane.b32.xlu1 %v6792_v20, %s6073_s2 }
 0x179   :  { %1066 = vst.msk [vmem:[%s13469_s1 + $0x80] sm:$0xfc] %vm1060_vm14, %v1041_v35  ;;  %1524 = vrot.lane.b32.xlu0 %v6794_v21, %s6073_s2 }
 0x17a   :  { %v1047_v36 = vpop.permute.xlu1 %1046 }
 0x17b   :  { %v1045_v37 = vpop.permute.xlu0 %1044  ;;  %1072 = vst.msk [vmem:[%s13469_s1 + $0x140] sm:$0xfc] %vm1060_vm14, %v1047_v36 }
 0x17c   :  { %1073 = vst.msk [vmem:[%s13469_s1 + $0x160] sm:$0x3] %vm1062_vm15, %v1047_v36  ;;  %1071 = vst.msk [vmem:[%s13469_s1 + $0x120] sm:$0x3] %vm1062_vm15, %v1045_v37  ;;  %1530 = vrot.lane.b32.xlu1 %v6816_v26, %s6073_s2 }
 0x17d   :  { %1070 = vst.msk [vmem:[%s13469_s1 + $0x100] sm:$0xfc] %vm1060_vm14, %v1045_v37  ;;  %1528 = vrot.lane.b32.xlu0 %v6818_v27, %s6073_s2 }
 0x17e   :  { %v1051_v38 = vpop.permute.xlu1 %1050 }
 0x17f   :  { %v1049_v39 = vpop.permute.xlu0 %1048  ;;  %1076 = vst.msk [vmem:[%s13469_s1 + $0x1c0] sm:$0xfc] %vm1060_vm14, %v1051_v38 }
 0x180   :  { %1077 = vst.msk [vmem:[%s13469_s1 + $0x1e0] sm:$0x3] %vm1062_vm15, %v1051_v38  ;;  %1075 = vst.msk [vmem:[%s13469_s1 + $0x1a0] sm:$0x3] %vm1062_vm15, %v1049_v39  ;;  %1584 = vrot.lane.b32.xlu1 %v6744_v8, %s6076_s21  ;;  %vm1542_vm15 = vcmask 985024  }
 0x181   :  { %1074 = vst.msk [vmem:[%s13469_s1 + $0x180] sm:$0xfc] %vm1060_vm14, %v1049_v39  ;;  %1582 = vrot.lane.b32.xlu0 %v6746_v9, %s6076_s21  ;;  %vm1540_vm14 = vcmask 991170  }
 0x182   :  { %v1105_v40 = vpop.permute.xlu1 %1104 }
 0x183   :  { %v1103_v41 = vpop.permute.xlu0 %1102  ;;  %1130 = vst.msk [vmem:[%s13469_s1 + $0x40] sm:$0xfc] %vm1126_vm0, %v1105_v40 }
 0x184   :  { %1131 = vst.msk [vmem:[%s13469_s1 + $0x60] sm:$0x3] %vm1128_vm1, %v1105_v40  ;;  %1129 = vst.msk [vmem:[%s13469_s1 + $0x20] sm:$0x3] %vm1128_vm1, %v1103_v41  ;;  %1588 = vrot.lane.b32.xlu1 %v6768_v14, %s6076_s21 }
 0x185   :  { %1127 = vst.msk [vmem:[%s13469_s1] sm:$0xfc] %vm1126_vm0, %v1103_v41  ;;  %1586 = vrot.lane.b32.xlu0 %v6770_v15, %s6076_s21 }
 0x186   :  { %v1109_v42 = vpop.permute.xlu1 %1108 }
 0x187   :  { %v1107_v43 = vpop.permute.xlu0 %1106  ;;  %1134 = vst.msk [vmem:[%s13469_s1 + $0xc0] sm:$0xfc] %vm1126_vm0, %v1109_v42 }
 0x188   :  { %1135 = vst.msk [vmem:[%s13469_s1 + $0xe0] sm:$0x3] %vm1128_vm1, %v1109_v42  ;;  %1133 = vst.msk [vmem:[%s13469_s1 + $0xa0] sm:$0x3] %vm1128_vm1, %v1107_v43  ;;  %1592 = vrot.lane.b32.xlu1 %v6792_v20, %s6076_s21 }
 0x189   :  { %1132 = vst.msk [vmem:[%s13469_s1 + $0x80] sm:$0xfc] %vm1126_vm0, %v1107_v43  ;;  %1590 = vrot.lane.b32.xlu0 %v6794_v21, %s6076_s21 }
 0x18a   :  { %v1113_v44 = vpop.permute.xlu1 %1112 }
 0x18b   :  { %v1111_v45 = vpop.permute.xlu0 %1110  ;;  %1138 = vst.msk [vmem:[%s13469_s1 + $0x140] sm:$0xfc] %vm1126_vm0, %v1113_v44 }
 0x18c   :  { %1139 = vst.msk [vmem:[%s13469_s1 + $0x160] sm:$0x3] %vm1128_vm1, %v1113_v44  ;;  %1137 = vst.msk [vmem:[%s13469_s1 + $0x120] sm:$0x3] %vm1128_vm1, %v1111_v45  ;;  %1596 = vrot.lane.b32.xlu1 %v6816_v26, %s6076_s21 }
 0x18d   :  { %1136 = vst.msk [vmem:[%s13469_s1 + $0x100] sm:$0xfc] %vm1126_vm0, %v1111_v45  ;;  %1594 = vrot.lane.b32.xlu0 %v6818_v27, %s6076_s21 }
 0x18e   :  { %v1117_v46 = vpop.permute.xlu1 %1116 }
 0x18f   :  { %v1115_v47 = vpop.permute.xlu0 %1114  ;;  %1142 = vst.msk [vmem:[%s13469_s1 + $0x1c0] sm:$0xfc] %vm1126_vm0, %v1117_v46 }
 0x190   :  { %1143 = vst.msk [vmem:[%s13469_s1 + $0x1e0] sm:$0x3] %vm1128_vm1, %v1117_v46  ;;  %1141 = vst.msk [vmem:[%s13469_s1 + $0x1a0] sm:$0x3] %vm1128_vm1, %v1115_v47  ;;  %1650 = vrot.lane.b32.xlu1 %v6744_v8, %s6077_s25  ;;  %vm1608_vm1 = vcmask 83024  }
 0x191   :  { %1140 = vst.msk [vmem:[%s13469_s1 + $0x180] sm:$0xfc] %vm1126_vm0, %v1115_v47  ;;  %1648 = vrot.lane.b32.xlu0 %v6746_v9, %s6077_s25  ;;  %vm1606_vm0 = vcmask 89170  }
 0x192   :  { %v1171_v48 = vpop.permute.xlu1 %1170 }
 0x193   :  { %v1169_v49 = vpop.permute.xlu0 %1168  ;;  %1196 = vst.msk [vmem:[%s13469_s1 + $0x40] sm:$0xfc] %vm1192_vm2, %v1171_v48 }
 0x194   :  { %1197 = vst.msk [vmem:[%s13469_s1 + $0x60] sm:$0x3] %vm1194_vm3, %v1171_v48  ;;  %1195 = vst.msk [vmem:[%s13469_s1 + $0x20] sm:$0x3] %vm1194_vm3, %v1169_v49  ;;  %1654 = vrot.lane.b32.xlu1 %v6768_v14, %s6077_s25  ;;  %v1691_v14 = vld [vmem:[#allocation2 + $0x10] sm:$0xff] }
 0x195   :  { %1193 = vst.msk [vmem:[%s13469_s1] sm:$0xfc] %vm1192_vm2, %v1169_v49  ;;  %1652 = vrot.lane.b32.xlu0 %v6770_v15, %s6077_s25  ;;  %v1690_v15 = vld [vmem:[#allocation2] sm:$0xff] }
 0x196   :  { %v1175_v8 = vpop.permute.xlu1 %1174 }
 0x197   :  { %v1173_v9 = vpop.permute.xlu0 %1172  ;;  %1200 = vst.msk [vmem:[%s13469_s1 + $0xc0] sm:$0xfc] %vm1192_vm2, %v1175_v8 }
 0x198   :  { %1201 = vst.msk [vmem:[%s13469_s1 + $0xe0] sm:$0x3] %vm1194_vm3, %v1175_v8  ;;  %1199 = vst.msk [vmem:[%s13469_s1 + $0xa0] sm:$0x3] %vm1194_vm3, %v1173_v9  ;;  %1658 = vrot.lane.b32.xlu1 %v6792_v20, %s6077_s25  ;;  %v7624_v20 = vrot.slane %v1691_v14, 6 }
 0x199   :  { %1198 = vst.msk [vmem:[%s13469_s1 + $0x80] sm:$0xfc] %vm1192_vm2, %v1173_v9  ;;  %1656 = vrot.lane.b32.xlu0 %v6794_v21, %s6077_s25  ;;  %v7626_v21 = vrot.slane %v1690_v15, 6 }
 0x19a   :  { %v1179_v50 = vpop.permute.xlu1 %1178 }
 0x19b   :  { %v1177_v51 = vpop.permute.xlu0 %1176  ;;  %1204 = vst.msk [vmem:[%s13469_s1 + $0x140] sm:$0xfc] %vm1192_vm2, %v1179_v50 }
 0x19c   :  { %1205 = vst.msk [vmem:[%s13469_s1 + $0x160] sm:$0x3] %vm1194_vm3, %v1179_v50  ;;  %1203 = vst.msk [vmem:[%s13469_s1 + $0x120] sm:$0x3] %vm1194_vm3, %v1177_v51  ;;  %1662 = vrot.lane.b32.xlu1 %v6816_v26, %s6077_s25  ;;  %v7648_v26 = vrot.slane %v1693_v52, 6 }
 0x19d   :  { %1202 = vst.msk [vmem:[%s13469_s1 + $0x100] sm:$0xfc] %vm1192_vm2, %v1177_v51  ;;  %1660 = vrot.lane.b32.xlu0 %v6818_v27, %s6077_s25  ;;  %v7650_v27 = vrot.slane %v1692_v53, 6 }
 0x19e   :  { %v1183_v54 = vpop.permute.xlu1 %1182 }
 0x19f   :  { %v1181_v55 = vpop.permute.xlu0 %1180  ;;  %1208 = vst.msk [vmem:[%s13469_s1 + $0x1c0] sm:$0xfc] %vm1192_vm2, %v1183_v54 }
 0x1a0   :  { %1209 = vst.msk [vmem:[%s13469_s1 + $0x1e0] sm:$0x3] %vm1194_vm3, %v1183_v54  ;;  %1207 = vst.msk [vmem:[%s13469_s1 + $0x1a0] sm:$0x3] %vm1194_vm3, %v1181_v55  ;;  %1716 = vrot.lane.b32.xlu1 %v7624_v20, %s6078_s30  ;;  %vm1674_vm3 = vcmask 91224  }
 0x1a1   :  { %1206 = vst.msk [vmem:[%s13469_s1 + $0x180] sm:$0xfc] %vm1192_vm2, %v1181_v55  ;;  %1714 = vrot.lane.b32.xlu0 %v7626_v21, %s6078_s30  ;;  %vm1672_vm2 = vcmask 97370  }
 0x1a2   :  { %v1237_v58 = vpop.permute.xlu1 %1236 }
 0x1a3   :  { %v1235_v59 = vpop.permute.xlu0 %1234  ;;  %1262 = vst.msk [vmem:[%s13469_s1 + $0x40] sm:$0xfc] %vm1258_vm4, %v1237_v58 }
 0x1a4   :  { %1263 = vst.msk [vmem:[%s13469_s1 + $0x60] sm:$0x3] %vm1260_vm5, %v1237_v58  ;;  %1261 = vst.msk [vmem:[%s13469_s1 + $0x20] sm:$0x3] %vm1260_vm5, %v1235_v59  ;;  %1720 = vrot.lane.b32.xlu1 %v7648_v26, %s6078_s30 }
 0x1a5   :  { %1259 = vst.msk [vmem:[%s13469_s1] sm:$0xfc] %vm1258_vm4, %v1235_v59  ;;  %1718 = vrot.lane.b32.xlu0 %v7650_v27, %s6078_s30 }
 0x1a6   :  { %v1241_v0 = vpop.permute.xlu1 %1240 }
 0x1a7   :  { %v1239_v1 = vpop.permute.xlu0 %1238  ;;  %1266 = vst.msk [vmem:[%s13469_s1 + $0xc0] sm:$0xfc] %vm1258_vm4, %v1241_v0 }
 0x1a8   :  { %1267 = vst.msk [vmem:[%s13469_s1 + $0xe0] sm:$0x3] %vm1260_vm5, %v1241_v0  ;;  %1265 = vst.msk [vmem:[%s13469_s1 + $0xa0] sm:$0x3] %vm1260_vm5, %v1239_v1  ;;  %1724 = vrot.lane.b32.xlu1 %v7672_v60, %s6078_s30 }
 0x1a9   :  { %1264 = vst.msk [vmem:[%s13469_s1 + $0x80] sm:$0xfc] %vm1258_vm4, %v1239_v1  ;;  %1722 = vrot.lane.b32.xlu0 %v7674_v61, %s6078_s30 }
 0x1aa   :  { %v1245_v3 = vpop.permute.xlu1 %1244 }
 0x1ab   :  { %v1243_v5 = vpop.permute.xlu0 %1242  ;;  %1270 = vst.msk [vmem:[%s13469_s1 + $0x140] sm:$0xfc] %vm1258_vm4, %v1245_v3 }
 0x1ac   :  { %1271 = vst.msk [vmem:[%s13469_s1 + $0x160] sm:$0x3] %vm1260_vm5, %v1245_v3  ;;  %1269 = vst.msk [vmem:[%s13469_s1 + $0x120] sm:$0x3] %vm1260_vm5, %v1243_v5  ;;  %1728 = vrot.lane.b32.xlu1 %v7696_v2, %s6078_s30 }
 0x1ad   :  { %1268 = vst.msk [vmem:[%s13469_s1 + $0x100] sm:$0xfc] %vm1258_vm4, %v1243_v5  ;;  %1726 = vrot.lane.b32.xlu0 %v7698_v4, %s6078_s30  ;;  %s6082_s30 = smov 67  }
 0x1ae   :  { %v1249_v6 = vpop.permute.xlu1 %1248 }
 0x1af   :  { %v1247_v7 = vpop.permute.xlu0 %1246  ;;  %1274 = vst.msk [vmem:[%s13469_s1 + $0x1c0] sm:$0xfc] %vm1258_vm4, %v1249_v6 }
 0x1b0   :  { %1275 = vst.msk [vmem:[%s13469_s1 + $0x1e0] sm:$0x3] %vm1260_vm5, %v1249_v6  ;;  %1273 = vst.msk [vmem:[%s13469_s1 + $0x1a0] sm:$0x3] %vm1260_vm5, %v1247_v7  ;;  %1782 = vrot.lane.b32.xlu1 %v7624_v20, %s6077_s25  ;;  %vm1740_vm5 = vcmask 238704  }
 0x1b1   :  { %1272 = vst.msk [vmem:[%s13469_s1 + $0x180] sm:$0xfc] %vm1258_vm4, %v1247_v7  ;;  %1780 = vrot.lane.b32.xlu0 %v7626_v21, %s6077_s25  ;;  %vm1738_vm4 = vcmask 244850  }
 0x1b2   :  { %v1303_v10 = vpop.permute.xlu1 %1302 }
 0x1b3   :  { %v1301_v11 = vpop.permute.xlu0 %1300  ;;  %1328 = vst.msk [vmem:[%s13469_s1 + $0x40] sm:$0xfc] %vm1324_vm6, %v1303_v10 }
 0x1b4   :  { %1329 = vst.msk [vmem:[%s13469_s1 + $0x60] sm:$0x3] %vm1326_vm7, %v1303_v10  ;;  %1327 = vst.msk [vmem:[%s13469_s1 + $0x20] sm:$0x3] %vm1326_vm7, %v1301_v11  ;;  %1786 = vrot.lane.b32.xlu1 %v7648_v26, %s6077_s25 }
 0x1b5   :  { %1325 = vst.msk [vmem:[%s13469_s1] sm:$0xfc] %vm1324_vm6, %v1301_v11  ;;  %1784 = vrot.lane.b32.xlu0 %v7650_v27, %s6077_s25 }
 0x1b6   :  { %v1307_v12 = vpop.permute.xlu1 %1306 }
 0x1b7   :  { %v1305_v13 = vpop.permute.xlu0 %1304  ;;  %1332 = vst.msk [vmem:[%s13469_s1 + $0xc0] sm:$0xfc] %vm1324_vm6, %v1307_v12 }
 0x1b8   :  { %1333 = vst.msk [vmem:[%s13469_s1 + $0xe0] sm:$0x3] %vm1326_vm7, %v1307_v12  ;;  %1331 = vst.msk [vmem:[%s13469_s1 + $0xa0] sm:$0x3] %vm1326_vm7, %v1305_v13  ;;  %1790 = vrot.lane.b32.xlu1 %v7672_v60, %s6077_s25 }
 0x1b9   :  { %1330 = vst.msk [vmem:[%s13469_s1 + $0x80] sm:$0xfc] %vm1324_vm6, %v1305_v13  ;;  %1788 = vrot.lane.b32.xlu0 %v7674_v61, %s6077_s25 }
 0x1ba   :  { %v1311_v16 = vpop.permute.xlu1 %1310 }
 0x1bb   :  { %v1309_v17 = vpop.permute.xlu0 %1308  ;;  %1336 = vst.msk [vmem:[%s13469_s1 + $0x140] sm:$0xfc] %vm1324_vm6, %v1311_v16 }
 0x1bc   :  { %1337 = vst.msk [vmem:[%s13469_s1 + $0x160] sm:$0x3] %vm1326_vm7, %v1311_v16  ;;  %1335 = vst.msk [vmem:[%s13469_s1 + $0x120] sm:$0x3] %vm1326_vm7, %v1309_v17  ;;  %1794 = vrot.lane.b32.xlu1 %v7696_v2, %s6077_s25 }
 0x1bd   :  { %1334 = vst.msk [vmem:[%s13469_s1 + $0x100] sm:$0xfc] %vm1324_vm6, %v1309_v17  ;;  %1792 = vrot.lane.b32.xlu0 %v7698_v4, %s6077_s25  ;;  %s6092_s25 = smov 81  }
 0x1be   :  { %v1315_v18 = vpop.permute.xlu1 %1314 }
 0x1bf   :  { %v1313_v19 = vpop.permute.xlu0 %1312  ;;  %1340 = vst.msk [vmem:[%s13469_s1 + $0x1c0] sm:$0xfc] %vm1324_vm6, %v1315_v18 }
 0x1c0   :  { %1341 = vst.msk [vmem:[%s13469_s1 + $0x1e0] sm:$0x3] %vm1326_vm7, %v1315_v18  ;;  %1339 = vst.msk [vmem:[%s13469_s1 + $0x1a0] sm:$0x3] %vm1326_vm7, %v1313_v19  ;;  %1848 = vrot.lane.b32.xlu1 %v7624_v20, %s6076_s21  ;;  %vm1806_vm7 = vcmask 107624  }
 0x1c1   :  { %1338 = vst.msk [vmem:[%s13469_s1 + $0x180] sm:$0xfc] %vm1324_vm6, %v1313_v19  ;;  %1846 = vrot.lane.b32.xlu0 %v7626_v21, %s6076_s21  ;;  %vm1804_vm6 = vcmask 113770  }
 0x1c2   :  { %v1369_v22 = vpop.permute.xlu1 %1368 }
 0x1c3   :  { %v1367_v23 = vpop.permute.xlu0 %1366  ;;  %1398 = vst.msk [vmem:[%s13469_s1 + $0x40] sm:$0xfc] %vm1390_vm8, %v1369_v22 }
 0x1c4   :  { %1400 = vst.msk [vmem:[%s13469_s1 + $0x60] sm:$0x3] %vm1394_vm9, %v1369_v22  ;;  %1395 = vst.msk [vmem:[%s13469_s1 + $0x20] sm:$0x3] %vm1394_vm9, %v1367_v23  ;;  %1852 = vrot.lane.b32.xlu1 %v7648_v26, %s6076_s21 }
 0x1c5   :  { %1391 = vst.msk [vmem:[%s13469_s1] sm:$0xfc] %vm1390_vm8, %v1367_v23  ;;  %1850 = vrot.lane.b32.xlu0 %v7650_v27, %s6076_s21 }
 0x1c6   :  { %1399 = vst.msk [vmem:[%s13469_s1 + $0x48] sm:$0xfc] %vm1392_vm10, %v1369_v22  ;;  %1393 = vst.msk [vmem:[%s13469_s1 + $0x8] sm:$0xfc] %vm1392_vm10, %v1367_v23  ;;  %v1373_v24 = vpop.permute.xlu1 %1372 }
 0x1c7   :  { %1401 = vst.msk [vmem:[%s13469_s1 + $0x68] sm:$0x3] %vm1396_vm11, %v1369_v22  ;;  %1397 = vst.msk [vmem:[%s13469_s1 + $0x28] sm:$0x3] %vm1396_vm11, %v1367_v23  ;;  %v1371_v25 = vpop.permute.xlu0 %1370 }
 0x1c8   :  { %1402 = vst.msk [vmem:[%s13469_s1 + $0x80] sm:$0xfc] %vm1390_vm8, %v1371_v25  ;;  %1406 = vst.msk [vmem:[%s13469_s1 + $0xc0] sm:$0xfc] %vm1390_vm8, %v1373_v24  ;;  %1856 = vrot.lane.b32.xlu1 %v7672_v60, %s6076_s21 }
 0x1c9   :  { %1404 = vst.msk [vmem:[%s13469_s1 + $0xa0] sm:$0x3] %vm1394_vm9, %v1371_v25  ;;  %1408 = vst.msk [vmem:[%s13469_s1 + $0xe0] sm:$0x3] %vm1394_vm9, %v1373_v24  ;;  %1854 = vrot.lane.b32.xlu0 %v7674_v61, %s6076_s21 }
 0x1ca   :  { %1403 = vst.msk [vmem:[%s13469_s1 + $0x88] sm:$0xfc] %vm1392_vm10, %v1371_v25  ;;  %1407 = vst.msk [vmem:[%s13469_s1 + $0xc8] sm:$0xfc] %vm1392_vm10, %v1373_v24  ;;  %v1377_v28 = vpop.permute.xlu1 %1376 }
 0x1cb   :  { %1405 = vst.msk [vmem:[%s13469_s1 + $0xa8] sm:$0x3] %vm1396_vm11, %v1371_v25  ;;  %1409 = vst.msk [vmem:[%s13469_s1 + $0xe8] sm:$0x3] %vm1396_vm11, %v1373_v24  ;;  %v1375_v29 = vpop.permute.xlu0 %1374 }
 0x1cc   :  { %1410 = vst.msk [vmem:[%s13469_s1 + $0x100] sm:$0xfc] %vm1390_vm8, %v1375_v29  ;;  %1414 = vst.msk [vmem:[%s13469_s1 + $0x140] sm:$0xfc] %vm1390_vm8, %v1377_v28  ;;  %1860 = vrot.lane.b32.xlu1 %v7696_v2, %s6076_s21 }
 0x1cd   :  { %1412 = vst.msk [vmem:[%s13469_s1 + $0x120] sm:$0x3] %vm1394_vm9, %v1375_v29  ;;  %1416 = vst.msk [vmem:[%s13469_s1 + $0x160] sm:$0x3] %vm1394_vm9, %v1377_v28  ;;  %1858 = vrot.lane.b32.xlu0 %v7698_v4, %s6076_s21 }
 0x1ce   :  { %1411 = vst.msk [vmem:[%s13469_s1 + $0x108] sm:$0xfc] %vm1392_vm10, %v1375_v29  ;;  %1415 = vst.msk [vmem:[%s13469_s1 + $0x148] sm:$0xfc] %vm1392_vm10, %v1377_v28  ;;  %v1381_v30 = vpop.permute.xlu1 %1380 }
 0x1cf   :  { %1413 = vst.msk [vmem:[%s13469_s1 + $0x128] sm:$0x3] %vm1396_vm11, %v1375_v29  ;;  %1417 = vst.msk [vmem:[%s13469_s1 + $0x168] sm:$0x3] %vm1396_vm11, %v1377_v28  ;;  %v1379_v31 = vpop.permute.xlu0 %1378  ;;  %v2353_v28 = vld [vmem:[#allocation2 + $0x30] sm:$0xff]  ;;  %v2352_v29 = vld [vmem:[#allocation2 + $0x20] sm:$0xff] }
 0x1d0   :  { %1418 = vst.msk [vmem:[%s13469_s1 + $0x180] sm:$0xfc] %vm1390_vm8, %v1379_v31  ;;  %1422 = vst.msk [vmem:[%s13469_s1 + $0x1c0] sm:$0xfc] %vm1390_vm8, %v1381_v30  ;;  %1914 = vrot.lane.b32.xlu1 %v7624_v20, %s6079_s9  ;;  %vm1870_vm8 = vcmask 105570  }
 0x1d1   :  { %1420 = vst.msk [vmem:[%s13469_s1 + $0x1a0] sm:$0x3] %vm1394_vm9, %v1379_v31  ;;  %1424 = vst.msk [vmem:[%s13469_s1 + $0x1e0] sm:$0x3] %vm1394_vm9, %v1381_v30  ;;  %1912 = vrot.lane.b32.xlu0 %v7626_v21, %s6079_s9  ;;  %vm1872_vm9 = vcmask 99424  }
 0x1d2   :  { %1419 = vst.msk [vmem:[%s13469_s1 + $0x188] sm:$0xfc] %vm1392_vm10, %v1379_v31  ;;  %1423 = vst.msk [vmem:[%s13469_s1 + $0x1c8] sm:$0xfc] %vm1392_vm10, %v1381_v30  ;;  %v1453_v32 = vpop.permute.xlu1 %1452  ;;  %vm1936_vm10 = vcmask 253170  }
 0x1d3   :  { %1421 = vst.msk [vmem:[%s13469_s1 + $0x1a8] sm:$0x3] %vm1396_vm11, %v1379_v31  ;;  %1425 = vst.msk [vmem:[%s13469_s1 + $0x1e8] sm:$0x3] %vm1396_vm11, %v1381_v30  ;;  %v1451_v33 = vpop.permute.xlu0 %1450  ;;  %vm1938_vm11 = vcmask 247024  }
 0x1d4   :  { %1478 = vst.msk [vmem:[%s13469_s1 + $0x40] sm:$0xfc] %vm1474_vm12, %v1453_v32  ;;  %1475 = vst.msk [vmem:[%s13469_s1] sm:$0xfc] %vm1474_vm12, %v1451_v33  ;;  %1918 = vrot.lane.b32.xlu1 %v7648_v26, %s6079_s9 }
 0x1d5   :  { %1479 = vst.msk [vmem:[%s13469_s1 + $0x60] sm:$0x3] %vm1476_vm13, %v1453_v32  ;;  %1477 = vst.msk [vmem:[%s13469_s1 + $0x20] sm:$0x3] %vm1476_vm13, %v1451_v33  ;;  %1916 = vrot.lane.b32.xlu0 %v7650_v27, %s6079_s9  ;;  %v2355_v32 = vld [vmem:[#allocation2 + $0x50] sm:$0xff]  ;;  %v2354_v33 = vld [vmem:[#allocation2 + $0x40] sm:$0xff] }
 0x1d6   :  { %v1457_v34 = vpop.permute.xlu1 %1456 }
 0x1d7   :  { %v1455_v35 = vpop.permute.xlu0 %1454  ;;  %1482 = vst.msk [vmem:[%s13469_s1 + $0xc0] sm:$0xfc] %vm1474_vm12, %v1457_v34 }
 0x1d8   :  { %1483 = vst.msk [vmem:[%s13469_s1 + $0xe0] sm:$0x3] %vm1476_vm13, %v1457_v34  ;;  %1481 = vst.msk [vmem:[%s13469_s1 + $0xa0] sm:$0x3] %vm1476_vm13, %v1455_v35  ;;  %1922 = vrot.lane.b32.xlu1 %v7672_v60, %s6079_s9 }
 0x1d9   :  { %1480 = vst.msk [vmem:[%s13469_s1 + $0x80] sm:$0xfc] %vm1474_vm12, %v1455_v35  ;;  %1920 = vrot.lane.b32.xlu0 %v7674_v61, %s6079_s9 }
 0x1da   :  { %v1461_v36 = vpop.permute.xlu1 %1460 }
 0x1db   :  { %v1459_v37 = vpop.permute.xlu0 %1458  ;;  %1486 = vst.msk [vmem:[%s13469_s1 + $0x140] sm:$0xfc] %vm1474_vm12, %v1461_v36 }
 0x1dc   :  { %1487 = vst.msk [vmem:[%s13469_s1 + $0x160] sm:$0x3] %vm1476_vm13, %v1461_v36  ;;  %1485 = vst.msk [vmem:[%s13469_s1 + $0x120] sm:$0x3] %vm1476_vm13, %v1459_v37  ;;  %1926 = vrot.lane.b32.xlu1 %v7696_v2, %s6079_s9  ;;  %v8544_v36 = vrot.slane %v2355_v32, 6 }
 0x1dd   :  { %1484 = vst.msk [vmem:[%s13469_s1 + $0x100] sm:$0xfc] %vm1474_vm12, %v1459_v37  ;;  %1924 = vrot.lane.b32.xlu0 %v7698_v4, %s6079_s9  ;;  %v8546_v37 = vrot.slane %v2354_v33, 6 }
 0x1de   :  { %v1465_v38 = vpop.permute.xlu1 %1464 }
 0x1df   :  { %v1463_v39 = vpop.permute.xlu0 %1462  ;;  %1490 = vst.msk [vmem:[%s13469_s1 + $0x1c0] sm:$0xfc] %vm1474_vm12, %v1465_v38 }
 0x1e0   :  { %1491 = vst.msk [vmem:[%s13469_s1 + $0x1e0] sm:$0x3] %vm1476_vm13, %v1465_v38  ;;  %1489 = vst.msk [vmem:[%s13469_s1 + $0x1a0] sm:$0x3] %vm1476_vm13, %v1463_v39  ;;  %1980 = vrot.lane.b32.xlu1 %v7624_v20, %s6080_s5  ;;  %v2357_v38 = vld [vmem:[#allocation2 + $0x70] sm:$0xff]  ;;  %vm2004_vm13 = vcmask 255224  }
 0x1e1   :  { %1488 = vst.msk [vmem:[%s13469_s1 + $0x180] sm:$0xfc] %vm1474_vm12, %v1463_v39  ;;  %1978 = vrot.lane.b32.xlu0 %v7626_v21, %s6080_s5  ;;  %v2356_v39 = vld [vmem:[#allocation2 + $0x60] sm:$0xff]  ;;  %vm2002_vm12 = vcmask 261370  }
 0x1e2   :  { %v1519_v40 = vpop.permute.xlu1 %1518 }
 0x1e3   :  { %v1517_v41 = vpop.permute.xlu0 %1516  ;;  %1544 = vst.msk [vmem:[%s13469_s1 + $0x40] sm:$0xfc] %vm1540_vm14, %v1519_v40 }
 0x1e4   :  { %1545 = vst.msk [vmem:[%s13469_s1 + $0x60] sm:$0x3] %vm1542_vm15, %v1519_v40  ;;  %1543 = vst.msk [vmem:[%s13469_s1 + $0x20] sm:$0x3] %vm1542_vm15, %v1517_v41  ;;  %1984 = vrot.lane.b32.xlu1 %v7648_v26, %s6080_s5 }
 0x1e5   :  { %1541 = vst.msk [vmem:[%s13469_s1] sm:$0xfc] %vm1540_vm14, %v1517_v41  ;;  %1982 = vrot.lane.b32.xlu0 %v7650_v27, %s6080_s5 }
 0x1e6   :  { %v1523_v42 = vpop.permute.xlu1 %1522 }
 0x1e7   :  { %v1521_v43 = vpop.permute.xlu0 %1520  ;;  %1548 = vst.msk [vmem:[%s13469_s1 + $0xc0] sm:$0xfc] %vm1540_vm14, %v1523_v42 }
 0x1e8   :  { %1549 = vst.msk [vmem:[%s13469_s1 + $0xe0] sm:$0x3] %vm1542_vm15, %v1523_v42  ;;  %1547 = vst.msk [vmem:[%s13469_s1 + $0xa0] sm:$0x3] %vm1542_vm15, %v1521_v43  ;;  %1988 = vrot.lane.b32.xlu1 %v7672_v60, %s6080_s5  ;;  %v8568_v42 = vrot.slane %v2357_v38, 6 }
 0x1e9   :  { %1546 = vst.msk [vmem:[%s13469_s1 + $0x80] sm:$0xfc] %vm1540_vm14, %v1521_v43  ;;  %1986 = vrot.lane.b32.xlu0 %v7674_v61, %s6080_s5  ;;  %v8570_v43 = vrot.slane %v2356_v39, 6 }
 0x1ea   :  { %v1527_v44 = vpop.permute.xlu1 %1526 }
 0x1eb   :  { %v1525_v45 = vpop.permute.xlu0 %1524  ;;  %1552 = vst.msk [vmem:[%s13469_s1 + $0x140] sm:$0xfc] %vm1540_vm14, %v1527_v44 }
 0x1ec   :  { %1553 = vst.msk [vmem:[%s13469_s1 + $0x160] sm:$0x3] %vm1542_vm15, %v1527_v44  ;;  %1551 = vst.msk [vmem:[%s13469_s1 + $0x120] sm:$0x3] %vm1542_vm15, %v1525_v45  ;;  %1992 = vrot.lane.b32.xlu1 %v7696_v2, %s6080_s5 }
 0x1ed   :  { %1550 = vst.msk [vmem:[%s13469_s1 + $0x100] sm:$0xfc] %vm1540_vm14, %v1525_v45  ;;  %1990 = vrot.lane.b32.xlu0 %v7698_v4, %s6080_s5 }
 0x1ee   :  { %v1531_v46 = vpop.permute.xlu1 %1530 }
 0x1ef   :  { %v1529_v47 = vpop.permute.xlu0 %1528  ;;  %1556 = vst.msk [vmem:[%s13469_s1 + $0x1c0] sm:$0xfc] %vm1540_vm14, %v1531_v46 }
 0x1f0   :  { %1557 = vst.msk [vmem:[%s13469_s1 + $0x1e0] sm:$0x3] %vm1542_vm15, %v1531_v46  ;;  %1555 = vst.msk [vmem:[%s13469_s1 + $0x1a0] sm:$0x3] %vm1542_vm15, %v1529_v47  ;;  %2046 = vrot.lane.b32.xlu1 %v7624_v20, %s6081_s23  ;;  %vm2070_vm15 = vcmask 402704  }
 0x1f1   :  { %1554 = vst.msk [vmem:[%s13469_s1 + $0x180] sm:$0xfc] %vm1540_vm14, %v1529_v47  ;;  %2044 = vrot.lane.b32.xlu0 %v7626_v21, %s6081_s23  ;;  %vm2068_vm14 = vcmask 408850  }
 0x1f2   :  { %v1585_v48 = vpop.permute.xlu1 %1584 }
 0x1f3   :  { %v1583_v49 = vpop.permute.xlu0 %1582  ;;  %1610 = vst.msk [vmem:[%s13469_s1 + $0x48] sm:$0xfc] %vm1606_vm0, %v1585_v48 }
 0x1f4   :  { %1611 = vst.msk [vmem:[%s13469_s1 + $0x68] sm:$0x3] %vm1608_vm1, %v1585_v48  ;;  %1609 = vst.msk [vmem:[%s13469_s1 + $0x28] sm:$0x3] %vm1608_vm1, %v1583_v49  ;;  %2050 = vrot.lane.b32.xlu1 %v7648_v26, %s6081_s23 }
 0x1f5   :  { %1607 = vst.msk [vmem:[%s13469_s1 + $0x8] sm:$0xfc] %vm1606_vm0, %v1583_v49  ;;  %2048 = vrot.lane.b32.xlu0 %v7650_v27, %s6081_s23 }
 0x1f6   :  { %v1589_v8 = vpop.permute.xlu1 %1588 }
 0x1f7   :  { %v1587_v9 = vpop.permute.xlu0 %1586  ;;  %1614 = vst.msk [vmem:[%s13469_s1 + $0xc8] sm:$0xfc] %vm1606_vm0, %v1589_v8 }
 0x1f8   :  { %1615 = vst.msk [vmem:[%s13469_s1 + $0xe8] sm:$0x3] %vm1608_vm1, %v1589_v8  ;;  %1613 = vst.msk [vmem:[%s13469_s1 + $0xa8] sm:$0x3] %vm1608_vm1, %v1587_v9  ;;  %2054 = vrot.lane.b32.xlu1 %v7672_v60, %s6081_s23 }
 0x1f9   :  { %1612 = vst.msk [vmem:[%s13469_s1 + $0x88] sm:$0xfc] %vm1606_vm0, %v1587_v9  ;;  %2052 = vrot.lane.b32.xlu0 %v7674_v61, %s6081_s23 }
 0x1fa   :  { %v1593_v14 = vpop.permute.xlu1 %1592 }
 0x1fb   :  { %v1591_v15 = vpop.permute.xlu0 %1590  ;;  %1618 = vst.msk [vmem:[%s13469_s1 + $0x148] sm:$0xfc] %vm1606_vm0, %v1593_v14 }
 0x1fc   :  { %1619 = vst.msk [vmem:[%s13469_s1 + $0x168] sm:$0x3] %vm1608_vm1, %v1593_v14  ;;  %1617 = vst.msk [vmem:[%s13469_s1 + $0x128] sm:$0x3] %vm1608_vm1, %v1591_v15  ;;  %2058 = vrot.lane.b32.xlu1 %v7696_v2, %s6081_s23 }
 0x1fd   :  { %1616 = vst.msk [vmem:[%s13469_s1 + $0x108] sm:$0xfc] %vm1606_vm0, %v1591_v15  ;;  %2056 = vrot.lane.b32.xlu0 %v7698_v4, %s6081_s23  ;;  %s6099_s23 = smov 90  }
 0x1fe   :  { %v1597_v50 = vpop.permute.xlu1 %1596 }
 0x1ff   :  { %v1595_v51 = vpop.permute.xlu0 %1594  ;;  %1622 = vst.msk [vmem:[%s13469_s1 + $0x1c8] sm:$0xfc] %vm1606_vm0, %v1597_v50 }
 0x200   :  { %1623 = vst.msk [vmem:[%s13469_s1 + $0x1e8] sm:$0x3] %vm1608_vm1, %v1597_v50  ;;  %1621 = vst.msk [vmem:[%s13469_s1 + $0x1a8] sm:$0x3] %vm1608_vm1, %v1595_v51  ;;  %2112 = vrot.lane.b32.xlu1 %v7624_v20, %s6080_s5  ;;  %vm2136_vm1 = vcmask 271624  }
 0x201   :  { %1620 = vst.msk [vmem:[%s13469_s1 + $0x188] sm:$0xfc] %vm1606_vm0, %v1595_v51  ;;  %2110 = vrot.lane.b32.xlu0 %v7626_v21, %s6080_s5  ;;  %vm2134_vm0 = vcmask 277770  }
 0x202   :  { %v1651_v52 = vpop.permute.xlu1 %1650 }
 0x203   :  { %v1649_v53 = vpop.permute.xlu0 %1648  ;;  %1676 = vst.msk [vmem:[%s13469_s1 + $0x48] sm:$0xfc] %vm1672_vm2, %v1651_v52 }
 0x204   :  { %1677 = vst.msk [vmem:[%s13469_s1 + $0x68] sm:$0x3] %vm1674_vm3, %v1651_v52  ;;  %1675 = vst.msk [vmem:[%s13469_s1 + $0x28] sm:$0x3] %vm1674_vm3, %v1649_v53  ;;  %2116 = vrot.lane.b32.xlu1 %v7648_v26, %s6080_s5 }
 0x205   :  { %1673 = vst.msk [vmem:[%s13469_s1 + $0x8] sm:$0xfc] %vm1672_vm2, %v1649_v53  ;;  %2114 = vrot.lane.b32.xlu0 %v7650_v27, %s6080_s5 }
 0x206   :  { %v1655_v54 = vpop.permute.xlu1 %1654 }
 0x207   :  { %v1653_v55 = vpop.permute.xlu0 %1652  ;;  %1680 = vst.msk [vmem:[%s13469_s1 + $0xc8] sm:$0xfc] %vm1672_vm2, %v1655_v54 }
 0x208   :  { %1681 = vst.msk [vmem:[%s13469_s1 + $0xe8] sm:$0x3] %vm1674_vm3, %v1655_v54  ;;  %1679 = vst.msk [vmem:[%s13469_s1 + $0xa8] sm:$0x3] %vm1674_vm3, %v1653_v55  ;;  %2120 = vrot.lane.b32.xlu1 %v7672_v60, %s6080_s5 }
 0x209   :  { %1678 = vst.msk [vmem:[%s13469_s1 + $0x88] sm:$0xfc] %vm1672_vm2, %v1653_v55  ;;  %2118 = vrot.lane.b32.xlu0 %v7674_v61, %s6080_s5 }
 0x20a   :  { %v1659_v56 = vpop.permute.xlu1 %1658 }
 0x20b   :  { %v1657_v57 = vpop.permute.xlu0 %1656  ;;  %1684 = vst.msk [vmem:[%s13469_s1 + $0x148] sm:$0xfc] %vm1672_vm2, %v1659_v56 }
 0x20c   :  { %1685 = vst.msk [vmem:[%s13469_s1 + $0x168] sm:$0x3] %vm1674_vm3, %v1659_v56  ;;  %1683 = vst.msk [vmem:[%s13469_s1 + $0x128] sm:$0x3] %vm1674_vm3, %v1657_v57  ;;  %2124 = vrot.lane.b32.xlu1 %v7696_v2, %s6080_s5 }
 0x20d   :  { %1682 = vst.msk [vmem:[%s13469_s1 + $0x108] sm:$0xfc] %vm1672_vm2, %v1657_v57  ;;  %2122 = vrot.lane.b32.xlu0 %v7698_v4, %s6080_s5  ;;  %s6114_s5 = smov 60  }
 0x20e   :  { %v1663_v58 = vpop.permute.xlu1 %1662 }
 0x20f   :  { %v1661_v59 = vpop.permute.xlu0 %1660  ;;  %1688 = vst.msk [vmem:[%s13469_s1 + $0x1c8] sm:$0xfc] %vm1672_vm2, %v1663_v58 }
 0x210   :  { %1689 = vst.msk [vmem:[%s13469_s1 + $0x1e8] sm:$0x3] %vm1674_vm3, %v1663_v58  ;;  %1687 = vst.msk [vmem:[%s13469_s1 + $0x1a8] sm:$0x3] %vm1674_vm3, %v1661_v59  ;;  %2178 = vrot.lane.b32.xlu1 %v7624_v20, %s6079_s9  ;;  %vm2202_vm3 = vcmask 263424  }
 0x211   :  { %1686 = vst.msk [vmem:[%s13469_s1 + $0x188] sm:$0xfc] %vm1672_vm2, %v1661_v59  ;;  %2176 = vrot.lane.b32.xlu0 %v7626_v21, %s6079_s9  ;;  %vm2200_vm2 = vcmask 269570  }
 0x212   :  { %v1717_v62 = vpop.permute.xlu1 %1716 }
 0x213   :  { %v1715_v63 = vpop.permute.xlu0 %1714  ;;  %1742 = vst.msk [vmem:[%s13469_s1 + $0x48] sm:$0xfc] %vm1738_vm4, %v1717_v62 }
 0x214   :  { %1743 = vst.msk [vmem:[%s13469_s1 + $0x68] sm:$0x3] %vm1740_vm5, %v1717_v62  ;;  %1741 = vst.msk [vmem:[%s13469_s1 + $0x28] sm:$0x3] %vm1740_vm5, %v1715_v63  ;;  %2182 = vrot.lane.b32.xlu1 %v7648_v26, %s6079_s9 }
 0x215   :  { %1739 = vst.msk [vmem:[%s13469_s1 + $0x8] sm:$0xfc] %vm1738_vm4, %v1715_v63  ;;  %2180 = vrot.lane.b32.xlu0 %v7650_v27, %s6079_s9 }
 0x216   :  { %v1721_v0 = vpop.permute.xlu1 %1720 }
 0x217   :  { %v1719_v1 = vpop.permute.xlu0 %1718  ;;  %1746 = vst.msk [vmem:[%s13469_s1 + $0xc8] sm:$0xfc] %vm1738_vm4, %v1721_v0 }
 0x218   :  { %1747 = vst.msk [vmem:[%s13469_s1 + $0xe8] sm:$0x3] %vm1740_vm5, %v1721_v0  ;;  %1745 = vst.msk [vmem:[%s13469_s1 + $0xa8] sm:$0x3] %vm1740_vm5, %v1719_v1  ;;  %2186 = vrot.lane.b32.xlu1 %v7672_v60, %s6079_s9 }
 0x219   :  { %1744 = vst.msk [vmem:[%s13469_s1 + $0x88] sm:$0xfc] %vm1738_vm4, %v1719_v1  ;;  %2184 = vrot.lane.b32.xlu0 %v7674_v61, %s6079_s9 }
 0x21a   :  { %v1725_v3 = vpop.permute.xlu1 %1724 }
 0x21b   :  { %v1723_v5 = vpop.permute.xlu0 %1722  ;;  %1750 = vst.msk [vmem:[%s13469_s1 + $0x148] sm:$0xfc] %vm1738_vm4, %v1725_v3 }
 0x21c   :  { %1751 = vst.msk [vmem:[%s13469_s1 + $0x168] sm:$0x3] %vm1740_vm5, %v1725_v3  ;;  %1749 = vst.msk [vmem:[%s13469_s1 + $0x128] sm:$0x3] %vm1740_vm5, %v1723_v5  ;;  %2190 = vrot.lane.b32.xlu1 %v7696_v2, %s6079_s9 }
 0x21d   :  { %1748 = vst.msk [vmem:[%s13469_s1 + $0x108] sm:$0xfc] %vm1738_vm4, %v1723_v5  ;;  %2188 = vrot.lane.b32.xlu0 %v7698_v4, %s6079_s9  ;;  %s6096_s9 = smov 86  }
 0x21e   :  { %v1729_v6 = vpop.permute.xlu1 %1728 }
 0x21f   :  { %v1727_v7 = vpop.permute.xlu0 %1726  ;;  %1754 = vst.msk [vmem:[%s13469_s1 + $0x1c8] sm:$0xfc] %vm1738_vm4, %v1729_v6 }
 0x220   :  { %1755 = vst.msk [vmem:[%s13469_s1 + $0x1e8] sm:$0x3] %vm1740_vm5, %v1729_v6  ;;  %1753 = vst.msk [vmem:[%s13469_s1 + $0x1a8] sm:$0x3] %vm1740_vm5, %v1727_v7  ;;  %2244 = vrot.lane.b32.xlu1 %v7624_v20, %s6082_s30  ;;  %vm2268_vm5 = vcmask 411024  }
 0x221   :  { %1752 = vst.msk [vmem:[%s13469_s1 + $0x188] sm:$0xfc] %vm1738_vm4, %v1727_v7  ;;  %2242 = vrot.lane.b32.xlu0 %v7626_v21, %s6082_s30  ;;  %vm2266_vm4 = vcmask 417170  }
 0x222   :  { %v1783_v10 = vpop.permute.xlu1 %1782 }
 0x223   :  { %v1781_v11 = vpop.permute.xlu0 %1780  ;;  %1808 = vst.msk [vmem:[%s13469_s1 + $0x48] sm:$0xfc] %vm1804_vm6, %v1783_v10 }
 0x224   :  { %1809 = vst.msk [vmem:[%s13469_s1 + $0x68] sm:$0x3] %vm1806_vm7, %v1783_v10  ;;  %1807 = vst.msk [vmem:[%s13469_s1 + $0x28] sm:$0x3] %vm1806_vm7, %v1781_v11  ;;  %2248 = vrot.lane.b32.xlu1 %v7648_v26, %s6082_s30 }
 0x225   :  { %1805 = vst.msk [vmem:[%s13469_s1 + $0x8] sm:$0xfc] %vm1804_vm6, %v1781_v11  ;;  %2246 = vrot.lane.b32.xlu0 %v7650_v27, %s6082_s30 }
 0x226   :  { %v1787_v12 = vpop.permute.xlu1 %1786 }
 0x227   :  { %v1785_v13 = vpop.permute.xlu0 %1784  ;;  %1812 = vst.msk [vmem:[%s13469_s1 + $0xc8] sm:$0xfc] %vm1804_vm6, %v1787_v12 }
 0x228   :  { %1813 = vst.msk [vmem:[%s13469_s1 + $0xe8] sm:$0x3] %vm1806_vm7, %v1787_v12  ;;  %1811 = vst.msk [vmem:[%s13469_s1 + $0xa8] sm:$0x3] %vm1806_vm7, %v1785_v13  ;;  %2252 = vrot.lane.b32.xlu1 %v7672_v60, %s6082_s30 }
 0x229   :  { %1810 = vst.msk [vmem:[%s13469_s1 + $0x88] sm:$0xfc] %vm1804_vm6, %v1785_v13  ;;  %2250 = vrot.lane.b32.xlu0 %v7674_v61, %s6082_s30 }
 0x22a   :  { %v1791_v16 = vpop.permute.xlu1 %1790 }
 0x22b   :  { %v1789_v17 = vpop.permute.xlu0 %1788  ;;  %1816 = vst.msk [vmem:[%s13469_s1 + $0x148] sm:$0xfc] %vm1804_vm6, %v1791_v16 }
 0x22c   :  { %1817 = vst.msk [vmem:[%s13469_s1 + $0x168] sm:$0x3] %vm1806_vm7, %v1791_v16  ;;  %1815 = vst.msk [vmem:[%s13469_s1 + $0x128] sm:$0x3] %vm1806_vm7, %v1789_v17  ;;  %2256 = vrot.lane.b32.xlu1 %v7696_v2, %s6082_s30  ;;  %v2681_v16 = vld [vmem:[#allocation2 + $0x18] sm:$0xff] }
 0x22d   :  { %1814 = vst.msk [vmem:[%s13469_s1 + $0x108] sm:$0xfc] %vm1804_vm6, %v1789_v17  ;;  %2254 = vrot.lane.b32.xlu0 %v7698_v4, %s6082_s30  ;;  %v2680_v17 = vld [vmem:[#allocation2 + $0x8] sm:$0xff] }
 0x22e   :  { %v1795_v18 = vpop.permute.xlu1 %1794 }
 0x22f   :  { %v1793_v19 = vpop.permute.xlu0 %1792  ;;  %1820 = vst.msk [vmem:[%s13469_s1 + $0x1c8] sm:$0xfc] %vm1804_vm6, %v1795_v18 }
 0x230   :  { %1821 = vst.msk [vmem:[%s13469_s1 + $0x1e8] sm:$0x3] %vm1806_vm7, %v1795_v18  ;;  %1819 = vst.msk [vmem:[%s13469_s1 + $0x1a8] sm:$0x3] %vm1806_vm7, %v1793_v19  ;;  %2310 = vrot.lane.b32.xlu1 %v7624_v20, %s6083_s24  ;;  %vm2334_vm7 = vcmask 419224  }
 0x231   :  { %1818 = vst.msk [vmem:[%s13469_s1 + $0x188] sm:$0xfc] %vm1804_vm6, %v1793_v19  ;;  %2308 = vrot.lane.b32.xlu0 %v7626_v21, %s6083_s24  ;;  %vm2332_vm6 = vcmask 425370  }
 0x232   :  { %v1849_v22 = vpop.permute.xlu1 %1848 }
 0x233   :  { %v1847_v23 = vpop.permute.xlu0 %1846  ;;  %1874 = vst.msk [vmem:[%s13469_s1 + $0x48] sm:$0xfc] %vm1870_vm8, %v1849_v22 }
 0x234   :  { %1875 = vst.msk [vmem:[%s13469_s1 + $0x68] sm:$0x3] %vm1872_vm9, %v1849_v22  ;;  %1873 = vst.msk [vmem:[%s13469_s1 + $0x28] sm:$0x3] %vm1872_vm9, %v1847_v23  ;;  %2314 = vrot.lane.b32.xlu1 %v7648_v26, %s6083_s24  ;;  %v2351_v26 = vld [vmem:[#allocation2 + $0x10] sm:$0xff]  ;;  %v8912_v22 = vrot.slane %v2681_v16, 6 }
 0x235   :  { %1871 = vst.msk [vmem:[%s13469_s1 + $0x8] sm:$0xfc] %vm1870_vm8, %v1847_v23  ;;  %2312 = vrot.lane.b32.xlu0 %v7650_v27, %s6083_s24  ;;  %v2350_v27 = vld [vmem:[#allocation2] sm:$0xff]  ;;  %v8914_v23 = vrot.slane %v2680_v17, 6 }
 0x236   :  { %v1853_v20 = vpop.permute.xlu1 %1852 }
 0x237   :  { %v1851_v21 = vpop.permute.xlu0 %1850  ;;  %1878 = vst.msk [vmem:[%s13469_s1 + $0xc8] sm:$0xfc] %vm1870_vm8, %v1853_v20 }
 0x238   :  { %1879 = vst.msk [vmem:[%s13469_s1 + $0xe8] sm:$0x3] %vm1872_vm9, %v1853_v20  ;;  %1877 = vst.msk [vmem:[%s13469_s1 + $0xa8] sm:$0x3] %vm1872_vm9, %v1851_v21  ;;  %2318 = vrot.lane.b32.xlu1 %v7672_v60, %s6083_s24  ;;  %v8496_v60 = vrot.slane %v2351_v26, 6  ;;  %v2683_v20 = vld [vmem:[#allocation2 + $0x38] sm:$0xff] }
 0x239   :  { %1876 = vst.msk [vmem:[%s13469_s1 + $0x88] sm:$0xfc] %vm1870_vm8, %v1851_v21  ;;  %2316 = vrot.lane.b32.xlu0 %v7674_v61, %s6083_s24  ;;  %v8498_v61 = vrot.slane %v2350_v27, 6  ;;  %v2682_v21 = vld [vmem:[#allocation2 + $0x28] sm:$0xff] }
 0x23a   :  { %v1857_v24 = vpop.permute.xlu1 %1856 }
 0x23b   :  { %v1855_v25 = vpop.permute.xlu0 %1854  ;;  %1882 = vst.msk [vmem:[%s13469_s1 + $0x148] sm:$0xfc] %vm1870_vm8, %v1857_v24 }
 0x23c   :  { %1883 = vst.msk [vmem:[%s13469_s1 + $0x168] sm:$0x3] %vm1872_vm9, %v1857_v24  ;;  %1881 = vst.msk [vmem:[%s13469_s1 + $0x128] sm:$0x3] %vm1872_vm9, %v1855_v25  ;;  %2322 = vrot.lane.b32.xlu1 %v7696_v2, %s6083_s24  ;;  %v8520_v2 = vrot.slane %v2353_v28, 6  ;;  %v8936_v24 = vrot.slane %v2683_v20, 6 }
 0x23d   :  { %1880 = vst.msk [vmem:[%s13469_s1 + $0x108] sm:$0xfc] %vm1870_vm8, %v1855_v25  ;;  %2320 = vrot.lane.b32.xlu0 %v7698_v4, %s6083_s24  ;;  %v8522_v4 = vrot.slane %v2352_v29, 6  ;;  %v8938_v25 = vrot.slane %v2682_v21, 6 }
 0x23e   :  { %v1861_v30 = vpop.permute.xlu1 %1860 }
 0x23f   :  { %v1859_v31 = vpop.permute.xlu0 %1858  ;;  %1886 = vst.msk [vmem:[%s13469_s1 + $0x1c8] sm:$0xfc] %vm1870_vm8, %v1861_v30 }
 0x240   :  { %1887 = vst.msk [vmem:[%s13469_s1 + $0x1e8] sm:$0x3] %vm1872_vm9, %v1861_v30  ;;  %1885 = vst.msk [vmem:[%s13469_s1 + $0x1a8] sm:$0x3] %vm1872_vm9, %v1859_v31  ;;  %2376 = vrot.lane.b32.xlu1 %v8496_v60, %s6084_s12  ;;  %vm2400_vm9 = vcmask 566704  }
 0x241   :  { %1884 = vst.msk [vmem:[%s13469_s1 + $0x188] sm:$0xfc] %vm1870_vm8, %v1859_v31  ;;  %2374 = vrot.lane.b32.xlu0 %v8498_v61, %s6084_s12  ;;  %vm2398_vm8 = vcmask 572850  }
 0x242   :  { %v1915_v34 = vpop.permute.xlu1 %1914 }
 0x243   :  { %v1913_v35 = vpop.permute.xlu0 %1912  ;;  %1940 = vst.msk [vmem:[%s13469_s1 + $0x48] sm:$0xfc] %vm1936_vm10, %v1915_v34 }
 0x244   :  { %1941 = vst.msk [vmem:[%s13469_s1 + $0x68] sm:$0x3] %vm1938_vm11, %v1915_v34  ;;  %1939 = vst.msk [vmem:[%s13469_s1 + $0x28] sm:$0x3] %vm1938_vm11, %v1913_v35  ;;  %2380 = vrot.lane.b32.xlu1 %v8520_v2, %s6084_s12 }
 0x245   :  { %1937 = vst.msk [vmem:[%s13469_s1 + $0x8] sm:$0xfc] %vm1936_vm10, %v1913_v35  ;;  %2378 = vrot.lane.b32.xlu0 %v8522_v4, %s6084_s12 }
 0x246   :  { %v1919_v40 = vpop.permute.xlu1 %1918 }
 0x247   :  { %v1917_v41 = vpop.permute.xlu0 %1916  ;;  %1944 = vst.msk [vmem:[%s13469_s1 + $0xc8] sm:$0xfc] %vm1936_vm10, %v1919_v40 }
 0x248   :  { %1945 = vst.msk [vmem:[%s13469_s1 + $0xe8] sm:$0x3] %vm1938_vm11, %v1919_v40  ;;  %1943 = vst.msk [vmem:[%s13469_s1 + $0xa8] sm:$0x3] %vm1938_vm11, %v1917_v41  ;;  %2384 = vrot.lane.b32.xlu1 %v8544_v36, %s6084_s12 }
 0x249   :  { %1942 = vst.msk [vmem:[%s13469_s1 + $0x88] sm:$0xfc] %vm1936_vm10, %v1917_v41  ;;  %2382 = vrot.lane.b32.xlu0 %v8546_v37, %s6084_s12 }
 0x24a   :  { %v1923_v44 = vpop.permute.xlu1 %1922 }
 0x24b   :  { %v1921_v45 = vpop.permute.xlu0 %1920  ;;  %1948 = vst.msk [vmem:[%s13469_s1 + $0x148] sm:$0xfc] %vm1936_vm10, %v1923_v44 }
 0x24c   :  { %1949 = vst.msk [vmem:[%s13469_s1 + $0x168] sm:$0x3] %vm1938_vm11, %v1923_v44  ;;  %1947 = vst.msk [vmem:[%s13469_s1 + $0x128] sm:$0x3] %vm1938_vm11, %v1921_v45  ;;  %2388 = vrot.lane.b32.xlu1 %v8568_v42, %s6084_s12 }
 0x24d   :  { %1946 = vst.msk [vmem:[%s13469_s1 + $0x108] sm:$0xfc] %vm1936_vm10, %v1921_v45  ;;  %2386 = vrot.lane.b32.xlu0 %v8570_v43, %s6084_s12  ;;  %s6097_s12 = smov 87  }
 0x24e   :  { %v1927_v46 = vpop.permute.xlu1 %1926 }
 0x24f   :  { %v1925_v47 = vpop.permute.xlu0 %1924  ;;  %1952 = vst.msk [vmem:[%s13469_s1 + $0x1c8] sm:$0xfc] %vm1936_vm10, %v1927_v46 }
 0x250   :  { %1953 = vst.msk [vmem:[%s13469_s1 + $0x1e8] sm:$0x3] %vm1938_vm11, %v1927_v46  ;;  %1951 = vst.msk [vmem:[%s13469_s1 + $0x1a8] sm:$0x3] %vm1938_vm11, %v1925_v47  ;;  %2442 = vrot.lane.b32.xlu1 %v8496_v60, %s6083_s24  ;;  %vm2466_vm11 = vcmask 435624  }
 0x251   :  { %1950 = vst.msk [vmem:[%s13469_s1 + $0x188] sm:$0xfc] %vm1936_vm10, %v1925_v47  ;;  %2440 = vrot.lane.b32.xlu0 %v8498_v61, %s6083_s24  ;;  %vm2464_vm10 = vcmask 441770  }
 0x252   :  { %v1981_v48 = vpop.permute.xlu1 %1980 }
 0x253   :  { %v1979_v49 = vpop.permute.xlu0 %1978  ;;  %2006 = vst.msk [vmem:[%s13469_s1 + $0x48] sm:$0xfc] %vm2002_vm12, %v1981_v48 }
 0x254   :  { %2007 = vst.msk [vmem:[%s13469_s1 + $0x68] sm:$0x3] %vm2004_vm13, %v1981_v48  ;;  %2005 = vst.msk [vmem:[%s13469_s1 + $0x28] sm:$0x3] %vm2004_vm13, %v1979_v49  ;;  %2446 = vrot.lane.b32.xlu1 %v8520_v2, %s6083_s24 }
 0x255   :  { %2003 = vst.msk [vmem:[%s13469_s1 + $0x8] sm:$0xfc] %vm2002_vm12, %v1979_v49  ;;  %2444 = vrot.lane.b32.xlu0 %v8522_v4, %s6083_s24 }
 0x256   :  { %v1985_v8 = vpop.permute.xlu1 %1984 }
 0x257   :  { %v1983_v9 = vpop.permute.xlu0 %1982  ;;  %2010 = vst.msk [vmem:[%s13469_s1 + $0xc8] sm:$0xfc] %vm2002_vm12, %v1985_v8 }
 0x258   :  { %2011 = vst.msk [vmem:[%s13469_s1 + $0xe8] sm:$0x3] %vm2004_vm13, %v1985_v8  ;;  %2009 = vst.msk [vmem:[%s13469_s1 + $0xa8] sm:$0x3] %vm2004_vm13, %v1983_v9  ;;  %2450 = vrot.lane.b32.xlu1 %v8544_v36, %s6083_s24 }
 0x259   :  { %2008 = vst.msk [vmem:[%s13469_s1 + $0x88] sm:$0xfc] %vm2002_vm12, %v1983_v9  ;;  %2448 = vrot.lane.b32.xlu0 %v8546_v37, %s6083_s24 }
 0x25a   :  { %v1989_v14 = vpop.permute.xlu1 %1988 }
 0x25b   :  { %v1987_v15 = vpop.permute.xlu0 %1986  ;;  %2014 = vst.msk [vmem:[%s13469_s1 + $0x148] sm:$0xfc] %vm2002_vm12, %v1989_v14 }
 0x25c   :  { %2015 = vst.msk [vmem:[%s13469_s1 + $0x168] sm:$0x3] %vm2004_vm13, %v1989_v14  ;;  %2013 = vst.msk [vmem:[%s13469_s1 + $0x128] sm:$0x3] %vm2004_vm13, %v1987_v15  ;;  %2454 = vrot.lane.b32.xlu1 %v8568_v42, %s6083_s24 }
 0x25d   :  { %2012 = vst.msk [vmem:[%s13469_s1 + $0x108] sm:$0xfc] %vm2002_vm12, %v1987_v15  ;;  %2452 = vrot.lane.b32.xlu0 %v8570_v43, %s6083_s24 }
 0x25e   :  { %v1993_v50 = vpop.permute.xlu1 %1992 }
 0x25f   :  { %v1991_v51 = vpop.permute.xlu0 %1990  ;;  %2018 = vst.msk [vmem:[%s13469_s1 + $0x1c8] sm:$0xfc] %vm2002_vm12, %v1993_v50 }
 0x260   :  { %2019 = vst.msk [vmem:[%s13469_s1 + $0x1e8] sm:$0x3] %vm2004_vm13, %v1993_v50  ;;  %2017 = vst.msk [vmem:[%s13469_s1 + $0x1a8] sm:$0x3] %vm2004_vm13, %v1991_v51  ;;  %2508 = vrot.lane.b32.xlu1 %v8496_v60, %s6082_s30  ;;  %vm2532_vm13 = vcmask 427424  }
 0x261   :  { %2016 = vst.msk [vmem:[%s13469_s1 + $0x188] sm:$0xfc] %vm2002_vm12, %v1991_v51  ;;  %2506 = vrot.lane.b32.xlu0 %v8498_v61, %s6082_s30  ;;  %vm2530_vm12 = vcmask 433570  }
 0x262   :  { %v2047_v52 = vpop.permute.xlu1 %2046 }
 0x263   :  { %v2045_v53 = vpop.permute.xlu0 %2044  ;;  %2072 = vst.msk [vmem:[%s13469_s1 + $0x48] sm:$0xfc] %vm2068_vm14, %v2047_v52 }
 0x264   :  { %2073 = vst.msk [vmem:[%s13469_s1 + $0x68] sm:$0x3] %vm2070_vm15, %v2047_v52  ;;  %2071 = vst.msk [vmem:[%s13469_s1 + $0x28] sm:$0x3] %vm2070_vm15, %v2045_v53  ;;  %2512 = vrot.lane.b32.xlu1 %v8520_v2, %s6082_s30 }
 0x265   :  { %2069 = vst.msk [vmem:[%s13469_s1 + $0x8] sm:$0xfc] %vm2068_vm14, %v2045_v53  ;;  %2510 = vrot.lane.b32.xlu0 %v8522_v4, %s6082_s30 }
 0x266   :  { %v2051_v54 = vpop.permute.xlu1 %2050 }
 0x267   :  { %v2049_v55 = vpop.permute.xlu0 %2048  ;;  %2076 = vst.msk [vmem:[%s13469_s1 + $0xc8] sm:$0xfc] %vm2068_vm14, %v2051_v54 }
 0x268   :  { %2077 = vst.msk [vmem:[%s13469_s1 + $0xe8] sm:$0x3] %vm2070_vm15, %v2051_v54  ;;  %2075 = vst.msk [vmem:[%s13469_s1 + $0xa8] sm:$0x3] %vm2070_vm15, %v2049_v55  ;;  %2516 = vrot.lane.b32.xlu1 %v8544_v36, %s6082_s30 }
 0x269   :  { %2074 = vst.msk [vmem:[%s13469_s1 + $0x88] sm:$0xfc] %vm2068_vm14, %v2049_v55  ;;  %2514 = vrot.lane.b32.xlu0 %v8546_v37, %s6082_s30 }
 0x26a   :  { %v2055_v56 = vpop.permute.xlu1 %2054 }
 0x26b   :  { %v2053_v57 = vpop.permute.xlu0 %2052  ;;  %2080 = vst.msk [vmem:[%s13469_s1 + $0x148] sm:$0xfc] %vm2068_vm14, %v2055_v56 }
 0x26c   :  { %2081 = vst.msk [vmem:[%s13469_s1 + $0x168] sm:$0x3] %vm2070_vm15, %v2055_v56  ;;  %2079 = vst.msk [vmem:[%s13469_s1 + $0x128] sm:$0x3] %vm2070_vm15, %v2053_v57  ;;  %2520 = vrot.lane.b32.xlu1 %v8568_v42, %s6082_s30 }
 0x26d   :  { %2078 = vst.msk [vmem:[%s13469_s1 + $0x108] sm:$0xfc] %vm2068_vm14, %v2053_v57  ;;  %2518 = vrot.lane.b32.xlu0 %v8570_v43, %s6082_s30 }
 0x26e   :  { %v2059_v58 = vpop.permute.xlu1 %2058 }
 0x26f   :  { %v2057_v59 = vpop.permute.xlu0 %2056  ;;  %2084 = vst.msk [vmem:[%s13469_s1 + $0x1c8] sm:$0xfc] %vm2068_vm14, %v2059_v58 }
 0x270   :  { %2085 = vst.msk [vmem:[%s13469_s1 + $0x1e8] sm:$0x3] %vm2070_vm15, %v2059_v58  ;;  %2083 = vst.msk [vmem:[%s13469_s1 + $0x1a8] sm:$0x3] %vm2070_vm15, %v2057_v59  ;;  %2574 = vrot.lane.b32.xlu1 %v8496_v60, %s6085_s26  ;;  %vm2598_vm15 = vcmask 575024  }
 0x271   :  { %2082 = vst.msk [vmem:[%s13469_s1 + $0x188] sm:$0xfc] %vm2068_vm14, %v2057_v59  ;;  %2572 = vrot.lane.b32.xlu0 %v8498_v61, %s6085_s26  ;;  %vm2596_vm14 = vcmask 581170  }
 0x272   :  { %v2113_v62 = vpop.permute.xlu1 %2112 }
 0x273   :  { %v2111_v63 = vpop.permute.xlu0 %2110  ;;  %2138 = vst.msk [vmem:[%s13469_s1 + $0x48] sm:$0xfc] %vm2134_vm0, %v2113_v62 }
 0x274   :  { %2139 = vst.msk [vmem:[%s13469_s1 + $0x68] sm:$0x3] %vm2136_vm1, %v2113_v62  ;;  %2137 = vst.msk [vmem:[%s13469_s1 + $0x28] sm:$0x3] %vm2136_vm1, %v2111_v63  ;;  %2578 = vrot.lane.b32.xlu1 %v8520_v2, %s6085_s26 }
 0x275   :  { %2135 = vst.msk [vmem:[%s13469_s1 + $0x8] sm:$0xfc] %vm2134_vm0, %v2111_v63  ;;  %2576 = vrot.lane.b32.xlu0 %v8522_v4, %s6085_s26 }
 0x276   :  { %v2117_v0 = vpop.permute.xlu1 %2116 }
 0x277   :  { %v2115_v1 = vpop.permute.xlu0 %2114  ;;  %2142 = vst.msk [vmem:[%s13469_s1 + $0xc8] sm:$0xfc] %vm2134_vm0, %v2117_v0 }
 0x278   :  { %2143 = vst.msk [vmem:[%s13469_s1 + $0xe8] sm:$0x3] %vm2136_vm1, %v2117_v0  ;;  %2141 = vst.msk [vmem:[%s13469_s1 + $0xa8] sm:$0x3] %vm2136_vm1, %v2115_v1  ;;  %2582 = vrot.lane.b32.xlu1 %v8544_v36, %s6085_s26 }
 0x279   :  { %2140 = vst.msk [vmem:[%s13469_s1 + $0x88] sm:$0xfc] %vm2134_vm0, %v2115_v1  ;;  %2580 = vrot.lane.b32.xlu0 %v8546_v37, %s6085_s26 }
 0x27a   :  { %v2121_v3 = vpop.permute.xlu1 %2120 }
 0x27b   :  { %v2119_v5 = vpop.permute.xlu0 %2118  ;;  %2146 = vst.msk [vmem:[%s13469_s1 + $0x148] sm:$0xfc] %vm2134_vm0, %v2121_v3 }
 0x27c   :  { %2147 = vst.msk [vmem:[%s13469_s1 + $0x168] sm:$0x3] %vm2136_vm1, %v2121_v3  ;;  %2145 = vst.msk [vmem:[%s13469_s1 + $0x128] sm:$0x3] %vm2136_vm1, %v2119_v5  ;;  %2586 = vrot.lane.b32.xlu1 %v8568_v42, %s6085_s26 }
 0x27d   :  { %2144 = vst.msk [vmem:[%s13469_s1 + $0x108] sm:$0xfc] %vm2134_vm0, %v2119_v5  ;;  %2584 = vrot.lane.b32.xlu0 %v8570_v43, %s6085_s26 }
 0x27e   :  { %v2125_v6 = vpop.permute.xlu1 %2124 }
 0x27f   :  { %v2123_v7 = vpop.permute.xlu0 %2122  ;;  %2150 = vst.msk [vmem:[%s13469_s1 + $0x1c8] sm:$0xfc] %vm2134_vm0, %v2125_v6 }
 0x280   :  { %2151 = vst.msk [vmem:[%s13469_s1 + $0x1e8] sm:$0x3] %vm2136_vm1, %v2125_v6  ;;  %2149 = vst.msk [vmem:[%s13469_s1 + $0x1a8] sm:$0x3] %vm2136_vm1, %v2123_v7  ;;  %2640 = vrot.lane.b32.xlu1 %v8496_v60, %s6086_s28  ;;  %v2685_v60 = vld [vmem:[#allocation2 + $0x58] sm:$0xff]  ;;  %vm2664_vm1 = vcmask 583224  }
 0x281   :  { %2148 = vst.msk [vmem:[%s13469_s1 + $0x188] sm:$0xfc] %vm2134_vm0, %v2123_v7  ;;  %2638 = vrot.lane.b32.xlu0 %v8498_v61, %s6086_s28  ;;  %v2684_v61 = vld [vmem:[#allocation2 + $0x48] sm:$0xff]  ;;  %v8960_v30 = vrot.slane %v2685_v60, 6  ;;  %vm2662_vm0 = vcmask 589370  }
 0x282   :  { %v2179_v10 = vpop.permute.xlu1 %2178  ;;  %v8962_v31 = vrot.slane %v2684_v61, 6 }
 0x283   :  { %v2177_v11 = vpop.permute.xlu0 %2176  ;;  %2204 = vst.msk [vmem:[%s13469_s1 + $0x48] sm:$0xfc] %vm2200_vm2, %v2179_v10 }
 0x284   :  { %2205 = vst.msk [vmem:[%s13469_s1 + $0x68] sm:$0x3] %vm2202_vm3, %v2179_v10  ;;  %2203 = vst.msk [vmem:[%s13469_s1 + $0x28] sm:$0x3] %vm2202_vm3, %v2177_v11  ;;  %2644 = vrot.lane.b32.xlu1 %v8520_v2, %s6086_s28  ;;  %v2687_v2 = vld [vmem:[#allocation2 + $0x78] sm:$0xff] }
 0x285   :  { %2201 = vst.msk [vmem:[%s13469_s1 + $0x8] sm:$0xfc] %vm2200_vm2, %v2177_v11  ;;  %2642 = vrot.lane.b32.xlu0 %v8522_v4, %s6086_s28  ;;  %v2686_v4 = vld [vmem:[#allocation2 + $0x68] sm:$0xff]  ;;  %v8984_v34 = vrot.slane %v2687_v2, 6 }
 0x286   :  { %v2183_v12 = vpop.permute.xlu1 %2182  ;;  %v8986_v35 = vrot.slane %v2686_v4, 6 }
 0x287   :  { %v2181_v13 = vpop.permute.xlu0 %2180  ;;  %2208 = vst.msk [vmem:[%s13469_s1 + $0xc8] sm:$0xfc] %vm2200_vm2, %v2183_v12 }
 0x288   :  { %2209 = vst.msk [vmem:[%s13469_s1 + $0xe8] sm:$0x3] %vm2202_vm3, %v2183_v12  ;;  %2207 = vst.msk [vmem:[%s13469_s1 + $0xa8] sm:$0x3] %vm2202_vm3, %v2181_v13  ;;  %2648 = vrot.lane.b32.xlu1 %v8544_v36, %s6086_s28 }
 0x289   :  { %2206 = vst.msk [vmem:[%s13469_s1 + $0x88] sm:$0xfc] %vm2200_vm2, %v2181_v13  ;;  %2646 = vrot.lane.b32.xlu0 %v8546_v37, %s6086_s28 }
 0x28a   :  { %v2187_v18 = vpop.permute.xlu1 %2186 }
 0x28b   :  { %v2185_v19 = vpop.permute.xlu0 %2184  ;;  %2212 = vst.msk [vmem:[%s13469_s1 + $0x148] sm:$0xfc] %vm2200_vm2, %v2187_v18 }
 0x28c   :  { %2213 = vst.msk [vmem:[%s13469_s1 + $0x168] sm:$0x3] %vm2202_vm3, %v2187_v18  ;;  %2211 = vst.msk [vmem:[%s13469_s1 + $0x128] sm:$0x3] %vm2202_vm3, %v2185_v19  ;;  %2652 = vrot.lane.b32.xlu1 %v8568_v42, %s6086_s28 }
 0x28d   :  { %2210 = vst.msk [vmem:[%s13469_s1 + $0x108] sm:$0xfc] %vm2200_vm2, %v2185_v19  ;;  %2650 = vrot.lane.b32.xlu0 %v8570_v43, %s6086_s28 }
 0x28e   :  { %v2191_v26 = vpop.permute.xlu1 %2190 }
 0x28f   :  { %v2189_v27 = vpop.permute.xlu0 %2188  ;;  %2216 = vst.msk [vmem:[%s13469_s1 + $0x1c8] sm:$0xfc] %vm2200_vm2, %v2191_v26 }
 0x290   :  { %2217 = vst.msk [vmem:[%s13469_s1 + $0x1e8] sm:$0x3] %vm2202_vm3, %v2191_v26  ;;  %2215 = vst.msk [vmem:[%s13469_s1 + $0x1a8] sm:$0x3] %vm2202_vm3, %v2189_v27  ;;  %2706 = vrot.lane.b32.xlu1 %v8912_v22, %s6087_s29  ;;  %vm2730_vm3 = vcmask 730704  }
 0x291   :  { %2214 = vst.msk [vmem:[%s13469_s1 + $0x188] sm:$0xfc] %vm2200_vm2, %v2189_v27  ;;  %2704 = vrot.lane.b32.xlu0 %v8914_v23, %s6087_s29  ;;  %vm2728_vm2 = vcmask 736850  }
 0x292   :  { %v2245_v28 = vpop.permute.xlu1 %2244 }
 0x293   :  { %v2243_v29 = vpop.permute.xlu0 %2242  ;;  %2270 = vst.msk [vmem:[%s13469_s1 + $0x48] sm:$0xfc] %vm2266_vm4, %v2245_v28 }
 0x294   :  { %2271 = vst.msk [vmem:[%s13469_s1 + $0x68] sm:$0x3] %vm2268_vm5, %v2245_v28  ;;  %2269 = vst.msk [vmem:[%s13469_s1 + $0x28] sm:$0x3] %vm2268_vm5, %v2243_v29  ;;  %2710 = vrot.lane.b32.xlu1 %v8936_v24, %s6087_s29 }
 0x295   :  { %2267 = vst.msk [vmem:[%s13469_s1 + $0x8] sm:$0xfc] %vm2266_vm4, %v2243_v29  ;;  %2708 = vrot.lane.b32.xlu0 %v8938_v25, %s6087_s29 }
 0x296   :  { %v2249_v32 = vpop.permute.xlu1 %2248 }
 0x297   :  { %v2247_v33 = vpop.permute.xlu0 %2246  ;;  %2274 = vst.msk [vmem:[%s13469_s1 + $0xc8] sm:$0xfc] %vm2266_vm4, %v2249_v32 }
 0x298   :  { %2275 = vst.msk [vmem:[%s13469_s1 + $0xe8] sm:$0x3] %vm2268_vm5, %v2249_v32  ;;  %2273 = vst.msk [vmem:[%s13469_s1 + $0xa8] sm:$0x3] %vm2268_vm5, %v2247_v33  ;;  %2714 = vrot.lane.b32.xlu1 %v8960_v30, %s6087_s29 }
 0x299   :  { %2272 = vst.msk [vmem:[%s13469_s1 + $0x88] sm:$0xfc] %vm2266_vm4, %v2247_v33  ;;  %2712 = vrot.lane.b32.xlu0 %v8962_v31, %s6087_s29 }
 0x29a   :  { %v2253_v36 = vpop.permute.xlu1 %2252 }
 0x29b   :  { %v2251_v37 = vpop.permute.xlu0 %2250  ;;  %2278 = vst.msk [vmem:[%s13469_s1 + $0x148] sm:$0xfc] %vm2266_vm4, %v2253_v36 }
 0x29c   :  { %2279 = vst.msk [vmem:[%s13469_s1 + $0x168] sm:$0x3] %vm2268_vm5, %v2253_v36  ;;  %2277 = vst.msk [vmem:[%s13469_s1 + $0x128] sm:$0x3] %vm2268_vm5, %v2251_v37  ;;  %2718 = vrot.lane.b32.xlu1 %v8984_v34, %s6087_s29 }
 0x29d   :  { %2276 = vst.msk [vmem:[%s13469_s1 + $0x108] sm:$0xfc] %vm2266_vm4, %v2251_v37  ;;  %2716 = vrot.lane.b32.xlu0 %v8986_v35, %s6087_s29  ;;  %s6105_s29 = smov 98  }
 0x29e   :  { %v2257_v38 = vpop.permute.xlu1 %2256 }
 0x29f   :  { %v2255_v39 = vpop.permute.xlu0 %2254  ;;  %2282 = vst.msk [vmem:[%s13469_s1 + $0x1c8] sm:$0xfc] %vm2266_vm4, %v2257_v38 }
 0x2a0   :  { %2283 = vst.msk [vmem:[%s13469_s1 + $0x1e8] sm:$0x3] %vm2268_vm5, %v2257_v38  ;;  %2281 = vst.msk [vmem:[%s13469_s1 + $0x1a8] sm:$0x3] %vm2268_vm5, %v2255_v39  ;;  %2772 = vrot.lane.b32.xlu1 %v8912_v22, %s6086_s28  ;;  %vm2796_vm5 = vcmask 599624  }
 0x2a1   :  { %2280 = vst.msk [vmem:[%s13469_s1 + $0x188] sm:$0xfc] %vm2266_vm4, %v2255_v39  ;;  %2770 = vrot.lane.b32.xlu0 %v8914_v23, %s6086_s28  ;;  %vm2794_vm4 = vcmask 605770  }
 0x2a2   :  { %v2311_v40 = vpop.permute.xlu1 %2310 }
 0x2a3   :  { %v2309_v41 = vpop.permute.xlu0 %2308  ;;  %2336 = vst.msk [vmem:[%s13469_s1 + $0x48] sm:$0xfc] %vm2332_vm6, %v2311_v40 }
 0x2a4   :  { %2337 = vst.msk [vmem:[%s13469_s1 + $0x68] sm:$0x3] %vm2334_vm7, %v2311_v40  ;;  %2335 = vst.msk [vmem:[%s13469_s1 + $0x28] sm:$0x3] %vm2334_vm7, %v2309_v41  ;;  %2776 = vrot.lane.b32.xlu1 %v8936_v24, %s6086_s28 }
 0x2a5   :  { %2333 = vst.msk [vmem:[%s13469_s1 + $0x8] sm:$0xfc] %vm2332_vm6, %v2309_v41  ;;  %2774 = vrot.lane.b32.xlu0 %v8938_v25, %s6086_s28 }
 0x2a6   :  { %v2315_v42 = vpop.permute.xlu1 %2314 }
 0x2a7   :  { %v2313_v43 = vpop.permute.xlu0 %2312  ;;  %2340 = vst.msk [vmem:[%s13469_s1 + $0xc8] sm:$0xfc] %vm2332_vm6, %v2315_v42 }
 0x2a8   :  { %2341 = vst.msk [vmem:[%s13469_s1 + $0xe8] sm:$0x3] %vm2334_vm7, %v2315_v42  ;;  %2339 = vst.msk [vmem:[%s13469_s1 + $0xa8] sm:$0x3] %vm2334_vm7, %v2313_v43  ;;  %2780 = vrot.lane.b32.xlu1 %v8960_v30, %s6086_s28 }
 0x2a9   :  { %2338 = vst.msk [vmem:[%s13469_s1 + $0x88] sm:$0xfc] %vm2332_vm6, %v2313_v43  ;;  %2778 = vrot.lane.b32.xlu0 %v8962_v31, %s6086_s28 }
 0x2aa   :  { %v2319_v44 = vpop.permute.xlu1 %2318 }
 0x2ab   :  { %v2317_v45 = vpop.permute.xlu0 %2316  ;;  %2344 = vst.msk [vmem:[%s13469_s1 + $0x148] sm:$0xfc] %vm2332_vm6, %v2319_v44 }
 0x2ac   :  { %2345 = vst.msk [vmem:[%s13469_s1 + $0x168] sm:$0x3] %vm2334_vm7, %v2319_v44  ;;  %2343 = vst.msk [vmem:[%s13469_s1 + $0x128] sm:$0x3] %vm2334_vm7, %v2317_v45  ;;  %2784 = vrot.lane.b32.xlu1 %v8984_v34, %s6086_s28 }
 0x2ad   :  { %2342 = vst.msk [vmem:[%s13469_s1 + $0x108] sm:$0xfc] %vm2332_vm6, %v2317_v45  ;;  %2782 = vrot.lane.b32.xlu0 %v8986_v35, %s6086_s28  ;;  %s6101_s28 = smov 93  }
 0x2ae   :  { %v2323_v46 = vpop.permute.xlu1 %2322 }
 0x2af   :  { %v2321_v47 = vpop.permute.xlu0 %2320  ;;  %2348 = vst.msk [vmem:[%s13469_s1 + $0x1c8] sm:$0xfc] %vm2332_vm6, %v2323_v46 }
 0x2b0   :  { %2349 = vst.msk [vmem:[%s13469_s1 + $0x1e8] sm:$0x3] %vm2334_vm7, %v2323_v46  ;;  %2347 = vst.msk [vmem:[%s13469_s1 + $0x1a8] sm:$0x3] %vm2334_vm7, %v2321_v47  ;;  %2838 = vrot.lane.b32.xlu1 %v8912_v22, %s6085_s26  ;;  %vm2862_vm7 = vcmask 591424  }
 0x2b1   :  { %2346 = vst.msk [vmem:[%s13469_s1 + $0x188] sm:$0xfc] %vm2332_vm6, %v2321_v47  ;;  %2836 = vrot.lane.b32.xlu0 %v8914_v23, %s6085_s26  ;;  %vm2860_vm6 = vcmask 597570  }
 0x2b2   :  { %v2377_v48 = vpop.permute.xlu1 %2376 }
 0x2b3   :  { %v2375_v49 = vpop.permute.xlu0 %2374  ;;  %2402 = vst.msk [vmem:[%s13469_s1 + $0x48] sm:$0xfc] %vm2398_vm8, %v2377_v48 }
 0x2b4   :  { %2403 = vst.msk [vmem:[%s13469_s1 + $0x68] sm:$0x3] %vm2400_vm9, %v2377_v48  ;;  %2401 = vst.msk [vmem:[%s13469_s1 + $0x28] sm:$0x3] %vm2400_vm9, %v2375_v49  ;;  %2842 = vrot.lane.b32.xlu1 %v8936_v24, %s6085_s26 }
 0x2b5   :  { %2399 = vst.msk [vmem:[%s13469_s1 + $0x8] sm:$0xfc] %vm2398_vm8, %v2375_v49  ;;  %2840 = vrot.lane.b32.xlu0 %v8938_v25, %s6085_s26 }
 0x2b6   :  { %v2381_v8 = vpop.permute.xlu1 %2380 }
 0x2b7   :  { %v2379_v9 = vpop.permute.xlu0 %2378  ;;  %2406 = vst.msk [vmem:[%s13469_s1 + $0xc8] sm:$0xfc] %vm2398_vm8, %v2381_v8 }
 0x2b8   :  { %2407 = vst.msk [vmem:[%s13469_s1 + $0xe8] sm:$0x3] %vm2400_vm9, %v2381_v8  ;;  %2405 = vst.msk [vmem:[%s13469_s1 + $0xa8] sm:$0x3] %vm2400_vm9, %v2379_v9  ;;  %2846 = vrot.lane.b32.xlu1 %v8960_v30, %s6085_s26 }
 0x2b9   :  { %2404 = vst.msk [vmem:[%s13469_s1 + $0x88] sm:$0xfc] %vm2398_vm8, %v2379_v9  ;;  %2844 = vrot.lane.b32.xlu0 %v8962_v31, %s6085_s26 }
 0x2ba   :  { %v2385_v14 = vpop.permute.xlu1 %2384 }
 0x2bb   :  { %v2383_v15 = vpop.permute.xlu0 %2382  ;;  %2410 = vst.msk [vmem:[%s13469_s1 + $0x148] sm:$0xfc] %vm2398_vm8, %v2385_v14 }
 0x2bc   :  { %2411 = vst.msk [vmem:[%s13469_s1 + $0x168] sm:$0x3] %vm2400_vm9, %v2385_v14  ;;  %2409 = vst.msk [vmem:[%s13469_s1 + $0x128] sm:$0x3] %vm2400_vm9, %v2383_v15  ;;  %2850 = vrot.lane.b32.xlu1 %v8984_v34, %s6085_s26 }
 0x2bd   :  { %2408 = vst.msk [vmem:[%s13469_s1 + $0x108] sm:$0xfc] %vm2398_vm8, %v2383_v15  ;;  %2848 = vrot.lane.b32.xlu0 %v8986_v35, %s6085_s26 }
 0x2be   :  { %v2389_v50 = vpop.permute.xlu1 %2388 }
 0x2bf   :  { %v2387_v51 = vpop.permute.xlu0 %2386  ;;  %2414 = vst.msk [vmem:[%s13469_s1 + $0x1c8] sm:$0xfc] %vm2398_vm8, %v2389_v50 }
 0x2c0   :  { %2415 = vst.msk [vmem:[%s13469_s1 + $0x1e8] sm:$0x3] %vm2400_vm9, %v2389_v50  ;;  %2413 = vst.msk [vmem:[%s13469_s1 + $0x1a8] sm:$0x3] %vm2400_vm9, %v2387_v51  ;;  %2904 = vrot.lane.b32.xlu1 %v8912_v22, %s6088_s14  ;;  %vm2928_vm9 = vcmask 739024  }
 0x2c1   :  { %2412 = vst.msk [vmem:[%s13469_s1 + $0x188] sm:$0xfc] %vm2398_vm8, %v2387_v51  ;;  %2902 = vrot.lane.b32.xlu0 %v8914_v23, %s6088_s14  ;;  %vm2926_vm8 = vcmask 745170  }
 0x2c2   :  { %v2443_v52 = vpop.permute.xlu1 %2442 }
 0x2c3   :  { %v2441_v53 = vpop.permute.xlu0 %2440  ;;  %2468 = vst.msk [vmem:[%s13469_s1 + $0x48] sm:$0xfc] %vm2464_vm10, %v2443_v52 }
 0x2c4   :  { %2469 = vst.msk [vmem:[%s13469_s1 + $0x68] sm:$0x3] %vm2466_vm11, %v2443_v52  ;;  %2467 = vst.msk [vmem:[%s13469_s1 + $0x28] sm:$0x3] %vm2466_vm11, %v2441_v53  ;;  %2908 = vrot.lane.b32.xlu1 %v8936_v24, %s6088_s14 }
 0x2c5   :  { %2465 = vst.msk [vmem:[%s13469_s1 + $0x8] sm:$0xfc] %vm2464_vm10, %v2441_v53  ;;  %2906 = vrot.lane.b32.xlu0 %v8938_v25, %s6088_s14 }
 0x2c6   :  { %v2447_v54 = vpop.permute.xlu1 %2446 }
 0x2c7   :  { %v2445_v55 = vpop.permute.xlu0 %2444  ;;  %2472 = vst.msk [vmem:[%s13469_s1 + $0xc8] sm:$0xfc] %vm2464_vm10, %v2447_v54 }
 0x2c8   :  { %2473 = vst.msk [vmem:[%s13469_s1 + $0xe8] sm:$0x3] %vm2466_vm11, %v2447_v54  ;;  %2471 = vst.msk [vmem:[%s13469_s1 + $0xa8] sm:$0x3] %vm2466_vm11, %v2445_v55  ;;  %2912 = vrot.lane.b32.xlu1 %v8960_v30, %s6088_s14 }
 0x2c9   :  { %2470 = vst.msk [vmem:[%s13469_s1 + $0x88] sm:$0xfc] %vm2464_vm10, %v2445_v55  ;;  %2910 = vrot.lane.b32.xlu0 %v8962_v31, %s6088_s14 }
 0x2ca   :  { %v2451_v56 = vpop.permute.xlu1 %2450 }
 0x2cb   :  { %v2449_v57 = vpop.permute.xlu0 %2448  ;;  %2476 = vst.msk [vmem:[%s13469_s1 + $0x148] sm:$0xfc] %vm2464_vm10, %v2451_v56 }
 0x2cc   :  { %2477 = vst.msk [vmem:[%s13469_s1 + $0x168] sm:$0x3] %vm2466_vm11, %v2451_v56  ;;  %2475 = vst.msk [vmem:[%s13469_s1 + $0x128] sm:$0x3] %vm2466_vm11, %v2449_v57  ;;  %2916 = vrot.lane.b32.xlu1 %v8984_v34, %s6088_s14  ;;  %v3427_v56 = vld [vmem:[#allocation2 + $0x38] sm:$0xff] }
 0x2cd   :  { %2474 = vst.msk [vmem:[%s13469_s1 + $0x108] sm:$0xfc] %vm2464_vm10, %v2449_v57  ;;  %2914 = vrot.lane.b32.xlu0 %v8986_v35, %s6088_s14  ;;  %v3426_v57 = vld [vmem:[#allocation2 + $0x28] sm:$0xff] }
 0x2ce   :  { %v2455_v58 = vpop.permute.xlu1 %2454 }
 0x2cf   :  { %v2453_v59 = vpop.permute.xlu0 %2452  ;;  %2480 = vst.msk [vmem:[%s13469_s1 + $0x1c8] sm:$0xfc] %vm2464_vm10, %v2455_v58 }
 0x2d0   :  { %2481 = vst.msk [vmem:[%s13469_s1 + $0x1e8] sm:$0x3] %vm2466_vm11, %v2455_v58  ;;  %2479 = vst.msk [vmem:[%s13469_s1 + $0x1a8] sm:$0x3] %vm2466_vm11, %v2453_v59  ;;  %2970 = vrot.lane.b32.xlu1 %v8912_v22, %s6089_s18  ;;  %vm2994_vm11 = vcmask 747224  }
 0x2d1   :  { %2478 = vst.msk [vmem:[%s13469_s1 + $0x188] sm:$0xfc] %vm2464_vm10, %v2453_v59  ;;  %2968 = vrot.lane.b32.xlu0 %v8914_v23, %s6089_s18  ;;  %vm2992_vm10 = vcmask 753370  }
 0x2d2   :  { %v2509_v62 = vpop.permute.xlu1 %2508 }
 0x2d3   :  { %v2507_v63 = vpop.permute.xlu0 %2506  ;;  %2534 = vst.msk [vmem:[%s13469_s1 + $0x48] sm:$0xfc] %vm2530_vm12, %v2509_v62 }
 0x2d4   :  { %2535 = vst.msk [vmem:[%s13469_s1 + $0x68] sm:$0x3] %vm2532_vm13, %v2509_v62  ;;  %2533 = vst.msk [vmem:[%s13469_s1 + $0x28] sm:$0x3] %vm2532_vm13, %v2507_v63  ;;  %2974 = vrot.lane.b32.xlu1 %v8936_v24, %s6089_s18  ;;  %v3429_v62 = vld [vmem:[#allocation2 + $0x58] sm:$0xff] }
 0x2d5   :  { %2531 = vst.msk [vmem:[%s13469_s1 + $0x8] sm:$0xfc] %vm2530_vm12, %v2507_v63  ;;  %2972 = vrot.lane.b32.xlu0 %v8938_v25, %s6089_s18  ;;  %v3428_v63 = vld [vmem:[#allocation2 + $0x48] sm:$0xff] }
 0x2d6   :  { %v2513_v0 = vpop.permute.xlu1 %2512 }
 0x2d7   :  { %v2511_v1 = vpop.permute.xlu0 %2510  ;;  %2538 = vst.msk [vmem:[%s13469_s1 + $0xc8] sm:$0xfc] %vm2530_vm12, %v2513_v0 }
 0x2d8   :  { %2539 = vst.msk [vmem:[%s13469_s1 + $0xe8] sm:$0x3] %vm2532_vm13, %v2513_v0  ;;  %2537 = vst.msk [vmem:[%s13469_s1 + $0xa8] sm:$0x3] %vm2532_vm13, %v2511_v1  ;;  %2978 = vrot.lane.b32.xlu1 %v8960_v30, %s6089_s18 }
 0x2d9   :  { %2536 = vst.msk [vmem:[%s13469_s1 + $0x88] sm:$0xfc] %vm2530_vm12, %v2511_v1  ;;  %2976 = vrot.lane.b32.xlu0 %v8962_v31, %s6089_s18 }
 0x2da   :  { %v2517_v3 = vpop.permute.xlu1 %2516 }
 0x2db   :  { %v2515_v5 = vpop.permute.xlu0 %2514  ;;  %2542 = vst.msk [vmem:[%s13469_s1 + $0x148] sm:$0xfc] %vm2530_vm12, %v2517_v3 }
 0x2dc   :  { %2543 = vst.msk [vmem:[%s13469_s1 + $0x168] sm:$0x3] %vm2532_vm13, %v2517_v3  ;;  %2541 = vst.msk [vmem:[%s13469_s1 + $0x128] sm:$0x3] %vm2532_vm13, %v2515_v5  ;;  %2982 = vrot.lane.b32.xlu1 %v8984_v34, %s6089_s18  ;;  %v9840_v3 = vrot.slane %v3429_v62, 6 }
 0x2dd   :  { %2540 = vst.msk [vmem:[%s13469_s1 + $0x108] sm:$0xfc] %vm2530_vm12, %v2515_v5  ;;  %2980 = vrot.lane.b32.xlu0 %v8986_v35, %s6089_s18  ;;  %v9842_v5 = vrot.slane %v3428_v63, 6 }
 0x2de   :  { %v2521_v6 = vpop.permute.xlu1 %2520 }
 0x2df   :  { %v2519_v7 = vpop.permute.xlu0 %2518  ;;  %2546 = vst.msk [vmem:[%s13469_s1 + $0x1c8] sm:$0xfc] %vm2530_vm12, %v2521_v6 }
 0x2e0   :  { %2547 = vst.msk [vmem:[%s13469_s1 + $0x1e8] sm:$0x3] %vm2532_vm13, %v2521_v6  ;;  %2545 = vst.msk [vmem:[%s13469_s1 + $0x1a8] sm:$0x3] %vm2532_vm13, %v2519_v7  ;;  %3036 = vrot.lane.b32.xlu1 %v8912_v22, %s6090_s19  ;;  %v3431_v6 = vld [vmem:[#allocation2 + $0x78] sm:$0xff]  ;;  %vm3060_vm13 = vcmask 894704  }
 0x2e1   :  { %2544 = vst.msk [vmem:[%s13469_s1 + $0x188] sm:$0xfc] %vm2530_vm12, %v2519_v7  ;;  %3034 = vrot.lane.b32.xlu0 %v8914_v23, %s6090_s19  ;;  %v3430_v7 = vld [vmem:[#allocation2 + $0x68] sm:$0xff]  ;;  %vm3058_vm12 = vcmask 900850  }
 0x2e2   :  { %v2575_v10 = vpop.permute.xlu1 %2574 }
 0x2e3   :  { %v2573_v11 = vpop.permute.xlu0 %2572  ;;  %2600 = vst.msk [vmem:[%s13469_s1 + $0x48] sm:$0xfc] %vm2596_vm14, %v2575_v10 }
 0x2e4   :  { %2601 = vst.msk [vmem:[%s13469_s1 + $0x68] sm:$0x3] %vm2598_vm15, %v2575_v10  ;;  %2599 = vst.msk [vmem:[%s13469_s1 + $0x28] sm:$0x3] %vm2598_vm15, %v2573_v11  ;;  %3040 = vrot.lane.b32.xlu1 %v8936_v24, %s6090_s19 }
 0x2e5   :  { %2597 = vst.msk [vmem:[%s13469_s1 + $0x8] sm:$0xfc] %vm2596_vm14, %v2573_v11  ;;  %3038 = vrot.lane.b32.xlu0 %v8938_v25, %s6090_s19 }
 0x2e6   :  { %v2579_v12 = vpop.permute.xlu1 %2578 }
 0x2e7   :  { %v2577_v13 = vpop.permute.xlu0 %2576  ;;  %2604 = vst.msk [vmem:[%s13469_s1 + $0xc8] sm:$0xfc] %vm2596_vm14, %v2579_v12 }
 0x2e8   :  { %2605 = vst.msk [vmem:[%s13469_s1 + $0xe8] sm:$0x3] %vm2598_vm15, %v2579_v12  ;;  %2603 = vst.msk [vmem:[%s13469_s1 + $0xa8] sm:$0x3] %vm2598_vm15, %v2577_v13  ;;  %3044 = vrot.lane.b32.xlu1 %v8960_v30, %s6090_s19  ;;  %v9864_v12 = vrot.slane %v3431_v6, 6 }
 0x2e9   :  { %2602 = vst.msk [vmem:[%s13469_s1 + $0x88] sm:$0xfc] %vm2596_vm14, %v2577_v13  ;;  %3042 = vrot.lane.b32.xlu0 %v8962_v31, %s6090_s19  ;;  %v9866_v13 = vrot.slane %v3430_v7, 6 }
 0x2ea   :  { %v2583_v16 = vpop.permute.xlu1 %2582 }
 0x2eb   :  { %v2581_v17 = vpop.permute.xlu0 %2580  ;;  %2608 = vst.msk [vmem:[%s13469_s1 + $0x148] sm:$0xfc] %vm2596_vm14, %v2583_v16 }
 0x2ec   :  { %2609 = vst.msk [vmem:[%s13469_s1 + $0x168] sm:$0x3] %vm2598_vm15, %v2583_v16  ;;  %2607 = vst.msk [vmem:[%s13469_s1 + $0x128] sm:$0x3] %vm2598_vm15, %v2581_v17  ;;  %3048 = vrot.lane.b32.xlu1 %v8984_v34, %s6090_s19 }
 0x2ed   :  { %2606 = vst.msk [vmem:[%s13469_s1 + $0x108] sm:$0xfc] %vm2596_vm14, %v2581_v17  ;;  %3046 = vrot.lane.b32.xlu0 %v8986_v35, %s6090_s19  ;;  %s6108_s19 = smov 102  }
 0x2ee   :  { %v2587_v18 = vpop.permute.xlu1 %2586 }
 0x2ef   :  { %v2585_v19 = vpop.permute.xlu0 %2584  ;;  %2612 = vst.msk [vmem:[%s13469_s1 + $0x1c8] sm:$0xfc] %vm2596_vm14, %v2587_v18 }
 0x2f0   :  { %2613 = vst.msk [vmem:[%s13469_s1 + $0x1e8] sm:$0x3] %vm2598_vm15, %v2587_v18  ;;  %2611 = vst.msk [vmem:[%s13469_s1 + $0x1a8] sm:$0x3] %vm2598_vm15, %v2585_v19  ;;  %3102 = vrot.lane.b32.xlu1 %v8912_v22, %s6089_s18  ;;  %vm3126_vm15 = vcmask 763624  }
 0x2f1   :  { %2610 = vst.msk [vmem:[%s13469_s1 + $0x188] sm:$0xfc] %vm2596_vm14, %v2585_v19  ;;  %3100 = vrot.lane.b32.xlu0 %v8914_v23, %s6089_s18  ;;  %vm3124_vm14 = vcmask 769770  }
 0x2f2   :  { %v2641_v20 = vpop.permute.xlu1 %2640 }
 0x2f3   :  { %v2639_v21 = vpop.permute.xlu0 %2638  ;;  %2666 = vst.msk [vmem:[%s13469_s1 + $0x48] sm:$0xfc] %vm2662_vm0, %v2641_v20 }
 0x2f4   :  { %2667 = vst.msk [vmem:[%s13469_s1 + $0x68] sm:$0x3] %vm2664_vm1, %v2641_v20  ;;  %2665 = vst.msk [vmem:[%s13469_s1 + $0x28] sm:$0x3] %vm2664_vm1, %v2639_v21  ;;  %3106 = vrot.lane.b32.xlu1 %v8936_v24, %s6089_s18 }
 0x2f5   :  { %2663 = vst.msk [vmem:[%s13469_s1 + $0x8] sm:$0xfc] %vm2662_vm0, %v2639_v21  ;;  %3104 = vrot.lane.b32.xlu0 %v8938_v25, %s6089_s18 }
 0x2f6   :  { %v2645_v26 = vpop.permute.xlu1 %2644 }
 0x2f7   :  { %v2643_v27 = vpop.permute.xlu0 %2642  ;;  %2670 = vst.msk [vmem:[%s13469_s1 + $0xc8] sm:$0xfc] %vm2662_vm0, %v2645_v26 }
 0x2f8   :  { %2671 = vst.msk [vmem:[%s13469_s1 + $0xe8] sm:$0x3] %vm2664_vm1, %v2645_v26  ;;  %2669 = vst.msk [vmem:[%s13469_s1 + $0xa8] sm:$0x3] %vm2664_vm1, %v2643_v27  ;;  %3110 = vrot.lane.b32.xlu1 %v8960_v30, %s6089_s18 }
 0x2f9   :  { %2668 = vst.msk [vmem:[%s13469_s1 + $0x88] sm:$0xfc] %vm2662_vm0, %v2643_v27  ;;  %3108 = vrot.lane.b32.xlu0 %v8962_v31, %s6089_s18 }
 0x2fa   :  { %v2649_v60 = vpop.permute.xlu1 %2648 }
 0x2fb   :  { %v2647_v61 = vpop.permute.xlu0 %2646  ;;  %2674 = vst.msk [vmem:[%s13469_s1 + $0x148] sm:$0xfc] %vm2662_vm0, %v2649_v60 }
 0x2fc   :  { %2675 = vst.msk [vmem:[%s13469_s1 + $0x168] sm:$0x3] %vm2664_vm1, %v2649_v60  ;;  %2673 = vst.msk [vmem:[%s13469_s1 + $0x128] sm:$0x3] %vm2664_vm1, %v2647_v61  ;;  %3114 = vrot.lane.b32.xlu1 %v8984_v34, %s6089_s18 }
 0x2fd   :  { %2672 = vst.msk [vmem:[%s13469_s1 + $0x108] sm:$0xfc] %vm2662_vm0, %v2647_v61  ;;  %3112 = vrot.lane.b32.xlu0 %v8986_v35, %s6089_s18  ;;  %s6112_s18 = smov 20  }
 0x2fe   :  { %v2653_v28 = vpop.permute.xlu1 %2652 }
 0x2ff   :  { %v2651_v29 = vpop.permute.xlu0 %2650  ;;  %2678 = vst.msk [vmem:[%s13469_s1 + $0x1c8] sm:$0xfc] %vm2662_vm0, %v2653_v28 }
 0x300   :  { %2679 = vst.msk [vmem:[%s13469_s1 + $0x1e8] sm:$0x3] %vm2664_vm1, %v2653_v28  ;;  %2677 = vst.msk [vmem:[%s13469_s1 + $0x1a8] sm:$0x3] %vm2664_vm1, %v2651_v29  ;;  %3168 = vrot.lane.b32.xlu1 %v8912_v22, %s6088_s14  ;;  %vm3192_vm1 = vcmask 755424  }
 0x301   :  { %2676 = vst.msk [vmem:[%s13469_s1 + $0x188] sm:$0xfc] %vm2662_vm0, %v2651_v29  ;;  %3166 = vrot.lane.b32.xlu0 %v8914_v23, %s6088_s14  ;;  %vm3190_vm0 = vcmask 761570  }
 0x302   :  { %v2707_v2 = vpop.permute.xlu1 %2706 }
 0x303   :  { %v2705_v4 = vpop.permute.xlu0 %2704  ;;  %2732 = vst.msk [vmem:[%s13469_s1 + $0x48] sm:$0xfc] %vm2728_vm2, %v2707_v2 }
 0x304   :  { %2733 = vst.msk [vmem:[%s13469_s1 + $0x68] sm:$0x3] %vm2730_vm3, %v2707_v2  ;;  %2731 = vst.msk [vmem:[%s13469_s1 + $0x28] sm:$0x3] %vm2730_vm3, %v2705_v4  ;;  %3172 = vrot.lane.b32.xlu1 %v8936_v24, %s6088_s14 }
 0x305   :  { %2729 = vst.msk [vmem:[%s13469_s1 + $0x8] sm:$0xfc] %vm2728_vm2, %v2705_v4  ;;  %3170 = vrot.lane.b32.xlu0 %v8938_v25, %s6088_s14 }
 0x306   :  { %v2711_v32 = vpop.permute.xlu1 %2710 }
 0x307   :  { %v2709_v33 = vpop.permute.xlu0 %2708  ;;  %2736 = vst.msk [vmem:[%s13469_s1 + $0xc8] sm:$0xfc] %vm2728_vm2, %v2711_v32 }
 0x308   :  { %2737 = vst.msk [vmem:[%s13469_s1 + $0xe8] sm:$0x3] %vm2730_vm3, %v2711_v32  ;;  %2735 = vst.msk [vmem:[%s13469_s1 + $0xa8] sm:$0x3] %vm2730_vm3, %v2709_v33  ;;  %3176 = vrot.lane.b32.xlu1 %v8960_v30, %s6088_s14 }
 0x309   :  { %2734 = vst.msk [vmem:[%s13469_s1 + $0x88] sm:$0xfc] %vm2728_vm2, %v2709_v33  ;;  %3174 = vrot.lane.b32.xlu0 %v8962_v31, %s6088_s14 }
 0x30a   :  { %v2715_v36 = vpop.permute.xlu1 %2714 }
 0x30b   :  { %v2713_v37 = vpop.permute.xlu0 %2712  ;;  %2740 = vst.msk [vmem:[%s13469_s1 + $0x148] sm:$0xfc] %vm2728_vm2, %v2715_v36 }
 0x30c   :  { %2741 = vst.msk [vmem:[%s13469_s1 + $0x168] sm:$0x3] %vm2730_vm3, %v2715_v36  ;;  %2739 = vst.msk [vmem:[%s13469_s1 + $0x128] sm:$0x3] %vm2730_vm3, %v2713_v37  ;;  %3180 = vrot.lane.b32.xlu1 %v8984_v34, %s6088_s14 }
 0x30d   :  { %2738 = vst.msk [vmem:[%s13469_s1 + $0x108] sm:$0xfc] %vm2728_vm2, %v2713_v37  ;;  %3178 = vrot.lane.b32.xlu0 %v8986_v35, %s6088_s14 }
 0x30e   :  { %v2719_v38 = vpop.permute.xlu1 %2718 }
 0x30f   :  { %v2717_v39 = vpop.permute.xlu0 %2716  ;;  %2744 = vst.msk [vmem:[%s13469_s1 + $0x1c8] sm:$0xfc] %vm2728_vm2, %v2719_v38 }
 0x310   :  { %2745 = vst.msk [vmem:[%s13469_s1 + $0x1e8] sm:$0x3] %vm2730_vm3, %v2719_v38  ;;  %2743 = vst.msk [vmem:[%s13469_s1 + $0x1a8] sm:$0x3] %vm2730_vm3, %v2717_v39  ;;  %3234 = vrot.lane.b32.xlu1 %v8912_v22, %s6091_s6  ;;  %vm3258_vm3 = vcmask 903024  }
 0x311   :  { %2742 = vst.msk [vmem:[%s13469_s1 + $0x188] sm:$0xfc] %vm2728_vm2, %v2717_v39  ;;  %3232 = vrot.lane.b32.xlu0 %v8914_v23, %s6091_s6  ;;  %vm3256_vm2 = vcmask 909170  }
 0x312   :  { %v2773_v40 = vpop.permute.xlu1 %2772 }
 0x313   :  { %v2771_v41 = vpop.permute.xlu0 %2770  ;;  %2798 = vst.msk [vmem:[%s13469_s1 + $0x48] sm:$0xfc] %vm2794_vm4, %v2773_v40 }
 0x314   :  { %2799 = vst.msk [vmem:[%s13469_s1 + $0x68] sm:$0x3] %vm2796_vm5, %v2773_v40  ;;  %2797 = vst.msk [vmem:[%s13469_s1 + $0x28] sm:$0x3] %vm2796_vm5, %v2771_v41  ;;  %3238 = vrot.lane.b32.xlu1 %v8936_v24, %s6091_s6 }
 0x315   :  { %2795 = vst.msk [vmem:[%s13469_s1 + $0x8] sm:$0xfc] %vm2794_vm4, %v2771_v41  ;;  %3236 = vrot.lane.b32.xlu0 %v8938_v25, %s6091_s6 }
 0x316   :  { %v2777_v42 = vpop.permute.xlu1 %2776 }
 0x317   :  { %v2775_v43 = vpop.permute.xlu0 %2774  ;;  %2802 = vst.msk [vmem:[%s13469_s1 + $0xc8] sm:$0xfc] %vm2794_vm4, %v2777_v42 }
 0x318   :  { %2803 = vst.msk [vmem:[%s13469_s1 + $0xe8] sm:$0x3] %vm2796_vm5, %v2777_v42  ;;  %2801 = vst.msk [vmem:[%s13469_s1 + $0xa8] sm:$0x3] %vm2796_vm5, %v2775_v43  ;;  %3242 = vrot.lane.b32.xlu1 %v8960_v30, %s6091_s6 }
 0x319   :  { %2800 = vst.msk [vmem:[%s13469_s1 + $0x88] sm:$0xfc] %vm2794_vm4, %v2775_v43  ;;  %3240 = vrot.lane.b32.xlu0 %v8962_v31, %s6091_s6 }
 0x31a   :  { %v2781_v44 = vpop.permute.xlu1 %2780 }
 0x31b   :  { %v2779_v45 = vpop.permute.xlu0 %2778  ;;  %2806 = vst.msk [vmem:[%s13469_s1 + $0x148] sm:$0xfc] %vm2794_vm4, %v2781_v44 }
 0x31c   :  { %2807 = vst.msk [vmem:[%s13469_s1 + $0x168] sm:$0x3] %vm2796_vm5, %v2781_v44  ;;  %2805 = vst.msk [vmem:[%s13469_s1 + $0x128] sm:$0x3] %vm2796_vm5, %v2779_v45  ;;  %3246 = vrot.lane.b32.xlu1 %v8984_v34, %s6091_s6 }
 0x31d   :  { %2804 = vst.msk [vmem:[%s13469_s1 + $0x108] sm:$0xfc] %vm2794_vm4, %v2779_v45  ;;  %3244 = vrot.lane.b32.xlu0 %v8986_v35, %s6091_s6 }
 0x31e   :  { %v2785_v46 = vpop.permute.xlu1 %2784 }
 0x31f   :  { %v2783_v47 = vpop.permute.xlu0 %2782  ;;  %2810 = vst.msk [vmem:[%s13469_s1 + $0x1c8] sm:$0xfc] %vm2794_vm4, %v2785_v46 }
 0x320   :  { %2811 = vst.msk [vmem:[%s13469_s1 + $0x1e8] sm:$0x3] %vm2796_vm5, %v2785_v46  ;;  %2809 = vst.msk [vmem:[%s13469_s1 + $0x1a8] sm:$0x3] %vm2796_vm5, %v2783_v47  ;;  %3300 = vrot.lane.b32.xlu1 %v8912_v22, %s6092_s25  ;;  %vm3324_vm5 = vcmask 911224  }
 0x321   :  { %2808 = vst.msk [vmem:[%s13469_s1 + $0x188] sm:$0xfc] %vm2794_vm4, %v2783_v47  ;;  %3298 = vrot.lane.b32.xlu0 %v8914_v23, %s6092_s25  ;;  %vm3322_vm4 = vcmask 917370  }
 0x322   :  { %v2839_v48 = vpop.permute.xlu1 %2838 }
 0x323   :  { %v2837_v49 = vpop.permute.xlu0 %2836  ;;  %2864 = vst.msk [vmem:[%s13469_s1 + $0x48] sm:$0xfc] %vm2860_vm6, %v2839_v48 }
 0x324   :  { %2865 = vst.msk [vmem:[%s13469_s1 + $0x68] sm:$0x3] %vm2862_vm7, %v2839_v48  ;;  %2863 = vst.msk [vmem:[%s13469_s1 + $0x28] sm:$0x3] %vm2862_vm7, %v2837_v49  ;;  %3304 = vrot.lane.b32.xlu1 %v8936_v24, %s6092_s25 }
 0x325   :  { %2861 = vst.msk [vmem:[%s13469_s1 + $0x8] sm:$0xfc] %vm2860_vm6, %v2837_v49  ;;  %3302 = vrot.lane.b32.xlu0 %v8938_v25, %s6092_s25 }
 0x326   :  { %v2843_v8 = vpop.permute.xlu1 %2842 }
 0x327   :  { %v2841_v9 = vpop.permute.xlu0 %2840  ;;  %2868 = vst.msk [vmem:[%s13469_s1 + $0xc8] sm:$0xfc] %vm2860_vm6, %v2843_v8 }
 0x328   :  { %2869 = vst.msk [vmem:[%s13469_s1 + $0xe8] sm:$0x3] %vm2862_vm7, %v2843_v8  ;;  %2867 = vst.msk [vmem:[%s13469_s1 + $0xa8] sm:$0x3] %vm2862_vm7, %v2841_v9  ;;  %3308 = vrot.lane.b32.xlu1 %v8960_v30, %s6092_s25 }
 0x329   :  { %2866 = vst.msk [vmem:[%s13469_s1 + $0x88] sm:$0xfc] %vm2860_vm6, %v2841_v9  ;;  %3306 = vrot.lane.b32.xlu0 %v8962_v31, %s6092_s25 }
 0x32a   :  { %v2847_v14 = vpop.permute.xlu1 %2846 }
 0x32b   :  { %v2845_v15 = vpop.permute.xlu0 %2844  ;;  %2872 = vst.msk [vmem:[%s13469_s1 + $0x148] sm:$0xfc] %vm2860_vm6, %v2847_v14 }
 0x32c   :  { %2873 = vst.msk [vmem:[%s13469_s1 + $0x168] sm:$0x3] %vm2862_vm7, %v2847_v14  ;;  %2871 = vst.msk [vmem:[%s13469_s1 + $0x128] sm:$0x3] %vm2862_vm7, %v2845_v15  ;;  %3312 = vrot.lane.b32.xlu1 %v8984_v34, %s6092_s25 }
 0x32d   :  { %2870 = vst.msk [vmem:[%s13469_s1 + $0x108] sm:$0xfc] %vm2860_vm6, %v2845_v15  ;;  %3310 = vrot.lane.b32.xlu0 %v8986_v35, %s6092_s25 }
 0x32e   :  { %v2851_v50 = vpop.permute.xlu1 %2850 }
 0x32f   :  { %v2849_v51 = vpop.permute.xlu0 %2848  ;;  %2876 = vst.msk [vmem:[%s13469_s1 + $0x1c8] sm:$0xfc] %vm2860_vm6, %v2851_v50 }
 0x330   :  { %2877 = vst.msk [vmem:[%s13469_s1 + $0x1e8] sm:$0x3] %vm2862_vm7, %v2851_v50  ;;  %2875 = vst.msk [vmem:[%s13469_s1 + $0x1a8] sm:$0x3] %vm2862_vm7, %v2849_v51  ;;  %3366 = vrot.lane.b32.xlu1 %v8912_v22, %s6093_s13  ;;  %vm3392_vm7 = vcmask 1042320  }
 0x331   :  { %2874 = vst.msk [vmem:[%s13469_s1 + $0x188] sm:$0xfc] %vm2860_vm6, %v2849_v51  ;;  %3364 = vrot.lane.b32.xlu0 %v8914_v23, %s6093_s13  ;;  %vm3388_vm6 = vcmask 1048466  }
 0x332   :  { %v2905_v52 = vpop.permute.xlu1 %2904 }
 0x333   :  { %v2903_v53 = vpop.permute.xlu0 %2902  ;;  %2930 = vst.msk [vmem:[%s13469_s1 + $0x48] sm:$0xfc] %vm2926_vm8, %v2905_v52 }
 0x334   :  { %2931 = vst.msk [vmem:[%s13469_s1 + $0x68] sm:$0x3] %vm2928_vm9, %v2905_v52  ;;  %2929 = vst.msk [vmem:[%s13469_s1 + $0x28] sm:$0x3] %vm2928_vm9, %v2903_v53  ;;  %3370 = vrot.lane.b32.xlu1 %v8936_v24, %s6093_s13  ;;  %v3425_v24 = vld [vmem:[#allocation2 + $0x18] sm:$0xff] }
 0x335   :  { %2927 = vst.msk [vmem:[%s13469_s1 + $0x8] sm:$0xfc] %vm2926_vm8, %v2903_v53  ;;  %3368 = vrot.lane.b32.xlu0 %v8938_v25, %s6093_s13  ;;  %v3424_v25 = vld [vmem:[#allocation2 + $0x8] sm:$0xff] }
 0x336   :  { %v2909_v22 = vpop.permute.xlu1 %2908 }
 0x337   :  { %v2907_v23 = vpop.permute.xlu0 %2906  ;;  %2934 = vst.msk [vmem:[%s13469_s1 + $0xc8] sm:$0xfc] %vm2926_vm8, %v2909_v22 }
 0x338   :  { %2935 = vst.msk [vmem:[%s13469_s1 + $0xe8] sm:$0x3] %vm2928_vm9, %v2909_v22  ;;  %2933 = vst.msk [vmem:[%s13469_s1 + $0xa8] sm:$0x3] %vm2928_vm9, %v2907_v23  ;;  %3374 = vrot.lane.b32.xlu1 %v8960_v30, %s6093_s13  ;;  %v9792_v30 = vrot.slane %v3425_v24, 6 }
 0x339   :  { %2932 = vst.msk [vmem:[%s13469_s1 + $0x88] sm:$0xfc] %vm2926_vm8, %v2907_v23  ;;  %3372 = vrot.lane.b32.xlu0 %v8962_v31, %s6093_s13  ;;  %v9794_v31 = vrot.slane %v3424_v25, 6 }
 0x33a   :  { %v2913_v54 = vpop.permute.xlu1 %2912 }
 0x33b   :  { %v2911_v55 = vpop.permute.xlu0 %2910  ;;  %2938 = vst.msk [vmem:[%s13469_s1 + $0x148] sm:$0xfc] %vm2926_vm8, %v2913_v54 }
 0x33c   :  { %2939 = vst.msk [vmem:[%s13469_s1 + $0x168] sm:$0x3] %vm2928_vm9, %v2913_v54  ;;  %2937 = vst.msk [vmem:[%s13469_s1 + $0x128] sm:$0x3] %vm2928_vm9, %v2911_v55  ;;  %3378 = vrot.lane.b32.xlu1 %v8984_v34, %s6093_s13  ;;  %v9816_v34 = vrot.slane %v3427_v56, 6 }
 0x33d   :  { %2936 = vst.msk [vmem:[%s13469_s1 + $0x108] sm:$0xfc] %vm2926_vm8, %v2911_v55  ;;  %3376 = vrot.lane.b32.xlu0 %v8986_v35, %s6093_s13  ;;  %v9818_v35 = vrot.slane %v3426_v57, 6 }
 0x33e   :  { %v2917_v58 = vpop.permute.xlu1 %2916 }
 0x33f   :  { %v2915_v59 = vpop.permute.xlu0 %2914  ;;  %2942 = vst.msk [vmem:[%s13469_s1 + $0x1c8] sm:$0xfc] %vm2926_vm8, %v2917_v58 }
 0x340   :  { %2943 = vst.msk [vmem:[%s13469_s1 + $0x1e8] sm:$0x3] %vm2928_vm9, %v2917_v58  ;;  %2941 = vst.msk [vmem:[%s13469_s1 + $0x1a8] sm:$0x3] %vm2928_vm9, %v2915_v59  ;;  %3450 = vrot.lane.b32.xlu1 %v9792_v30, %s6092_s25  ;;  %vm3394_vm9 = vcmask 9216  }
 0x341   :  { %2940 = vst.msk [vmem:[%s13469_s1 + $0x188] sm:$0xfc] %vm2926_vm8, %v2915_v59  ;;  %3448 = vrot.lane.b32.xlu0 %v9794_v31, %s6092_s25  ;;  %vm3390_vm8 = vcmask 15362  }
 0x342   :  { %v2971_v0 = vpop.permute.xlu1 %2970 }
 0x343   :  { %v2969_v1 = vpop.permute.xlu0 %2968  ;;  %2996 = vst.msk [vmem:[%s13469_s1 + $0x48] sm:$0xfc] %vm2992_vm10, %v2971_v0 }
 0x344   :  { %2997 = vst.msk [vmem:[%s13469_s1 + $0x68] sm:$0x3] %vm2994_vm11, %v2971_v0  ;;  %2995 = vst.msk [vmem:[%s13469_s1 + $0x28] sm:$0x3] %vm2994_vm11, %v2969_v1  ;;  %3454 = vrot.lane.b32.xlu1 %v9816_v34, %s6092_s25 }
 0x345   :  { %2993 = vst.msk [vmem:[%s13469_s1 + $0x8] sm:$0xfc] %vm2992_vm10, %v2969_v1  ;;  %3452 = vrot.lane.b32.xlu0 %v9818_v35, %s6092_s25 }
 0x346   :  { %v2975_v10 = vpop.permute.xlu1 %2974 }
 0x347   :  { %v2973_v11 = vpop.permute.xlu0 %2972  ;;  %3000 = vst.msk [vmem:[%s13469_s1 + $0xc8] sm:$0xfc] %vm2992_vm10, %v2975_v10 }
 0x348   :  { %3001 = vst.msk [vmem:[%s13469_s1 + $0xe8] sm:$0x3] %vm2994_vm11, %v2975_v10  ;;  %2999 = vst.msk [vmem:[%s13469_s1 + $0xa8] sm:$0x3] %vm2994_vm11, %v2973_v11  ;;  %3458 = vrot.lane.b32.xlu1 %v9840_v3, %s6092_s25 }
 0x349   :  { %2998 = vst.msk [vmem:[%s13469_s1 + $0x88] sm:$0xfc] %vm2992_vm10, %v2973_v11  ;;  %3456 = vrot.lane.b32.xlu0 %v9842_v5, %s6092_s25 }
 0x34a   :  { %v2979_v16 = vpop.permute.xlu1 %2978 }
 0x34b   :  { %v2977_v17 = vpop.permute.xlu0 %2976  ;;  %3004 = vst.msk [vmem:[%s13469_s1 + $0x148] sm:$0xfc] %vm2992_vm10, %v2979_v16 }
 0x34c   :  { %3005 = vst.msk [vmem:[%s13469_s1 + $0x168] sm:$0x3] %vm2994_vm11, %v2979_v16  ;;  %3003 = vst.msk [vmem:[%s13469_s1 + $0x128] sm:$0x3] %vm2994_vm11, %v2977_v17  ;;  %3462 = vrot.lane.b32.xlu1 %v9864_v12, %s6092_s25 }
 0x34d   :  { %3002 = vst.msk [vmem:[%s13469_s1 + $0x108] sm:$0xfc] %vm2992_vm10, %v2977_v17  ;;  %3460 = vrot.lane.b32.xlu0 %v9866_v13, %s6092_s25  ;;  %s6098_s25 = smov 89  }
 0x34e   :  { %v2983_v18 = vpop.permute.xlu1 %2982 }
 0x34f   :  { %v2981_v19 = vpop.permute.xlu0 %2980  ;;  %3008 = vst.msk [vmem:[%s13469_s1 + $0x1c8] sm:$0xfc] %vm2992_vm10, %v2983_v18 }
 0x350   :  { %3009 = vst.msk [vmem:[%s13469_s1 + $0x1e8] sm:$0x3] %vm2994_vm11, %v2983_v18  ;;  %3007 = vst.msk [vmem:[%s13469_s1 + $0x1a8] sm:$0x3] %vm2994_vm11, %v2981_v19  ;;  %3516 = vrot.lane.b32.xlu1 %v9792_v30, %s6091_s6  ;;  %vm3474_vm11 = vcmask 927624  }
 0x351   :  { %3006 = vst.msk [vmem:[%s13469_s1 + $0x188] sm:$0xfc] %vm2992_vm10, %v2981_v19  ;;  %3514 = vrot.lane.b32.xlu0 %v9794_v31, %s6091_s6  ;;  %vm3472_vm10 = vcmask 933770  }
 0x352   :  { %v3037_v20 = vpop.permute.xlu1 %3036 }
 0x353   :  { %v3035_v21 = vpop.permute.xlu0 %3034  ;;  %3062 = vst.msk [vmem:[%s13469_s1 + $0x48] sm:$0xfc] %vm3058_vm12, %v3037_v20 }
 0x354   :  { %3063 = vst.msk [vmem:[%s13469_s1 + $0x68] sm:$0x3] %vm3060_vm13, %v3037_v20  ;;  %3061 = vst.msk [vmem:[%s13469_s1 + $0x28] sm:$0x3] %vm3060_vm13, %v3035_v21  ;;  %3520 = vrot.lane.b32.xlu1 %v9816_v34, %s6091_s6 }
 0x355   :  { %3059 = vst.msk [vmem:[%s13469_s1 + $0x8] sm:$0xfc] %vm3058_vm12, %v3035_v21  ;;  %3518 = vrot.lane.b32.xlu0 %v9818_v35, %s6091_s6 }
 0x356   :  { %v3041_v26 = vpop.permute.xlu1 %3040 }
 0x357   :  { %v3039_v27 = vpop.permute.xlu0 %3038  ;;  %3066 = vst.msk [vmem:[%s13469_s1 + $0xc8] sm:$0xfc] %vm3058_vm12, %v3041_v26 }
 0x358   :  { %3067 = vst.msk [vmem:[%s13469_s1 + $0xe8] sm:$0x3] %vm3060_vm13, %v3041_v26  ;;  %3065 = vst.msk [vmem:[%s13469_s1 + $0xa8] sm:$0x3] %vm3060_vm13, %v3039_v27  ;;  %3524 = vrot.lane.b32.xlu1 %v9840_v3, %s6091_s6 }
 0x359   :  { %3064 = vst.msk [vmem:[%s13469_s1 + $0x88] sm:$0xfc] %vm3058_vm12, %v3039_v27  ;;  %3522 = vrot.lane.b32.xlu0 %v9842_v5, %s6091_s6 }
 0x35a   :  { %v3045_v60 = vpop.permute.xlu1 %3044 }
 0x35b   :  { %v3043_v61 = vpop.permute.xlu0 %3042  ;;  %3070 = vst.msk [vmem:[%s13469_s1 + $0x148] sm:$0xfc] %vm3058_vm12, %v3045_v60 }
 0x35c   :  { %3071 = vst.msk [vmem:[%s13469_s1 + $0x168] sm:$0x3] %vm3060_vm13, %v3045_v60  ;;  %3069 = vst.msk [vmem:[%s13469_s1 + $0x128] sm:$0x3] %vm3060_vm13, %v3043_v61  ;;  %3528 = vrot.lane.b32.xlu1 %v9864_v12, %s6091_s6 }
 0x35d   :  { %3068 = vst.msk [vmem:[%s13469_s1 + $0x108] sm:$0xfc] %vm3058_vm12, %v3043_v61  ;;  %3526 = vrot.lane.b32.xlu0 %v9866_v13, %s6091_s6 }
 0x35e   :  { %v3049_v28 = vpop.permute.xlu1 %3048 }
 0x35f   :  { %v3047_v29 = vpop.permute.xlu0 %3046  ;;  %3074 = vst.msk [vmem:[%s13469_s1 + $0x1c8] sm:$0xfc] %vm3058_vm12, %v3049_v28 }
 0x360   :  { %3075 = vst.msk [vmem:[%s13469_s1 + $0x1e8] sm:$0x3] %vm3060_vm13, %v3049_v28  ;;  %3073 = vst.msk [vmem:[%s13469_s1 + $0x1a8] sm:$0x3] %vm3060_vm13, %v3047_v29  ;;  %3582 = vrot.lane.b32.xlu1 %v9792_v30, %s6094_s27  ;;  %vm3540_vm13 = vcmask 919424  }
 0x361   :  { %3072 = vst.msk [vmem:[%s13469_s1 + $0x188] sm:$0xfc] %vm3058_vm12, %v3047_v29  ;;  %3580 = vrot.lane.b32.xlu0 %v9794_v31, %s6094_s27  ;;  %vm3538_vm12 = vcmask 925570  }
 0x362   :  { %v3103_v2 = vpop.permute.xlu1 %3102 }
 0x363   :  { %v3101_v4 = vpop.permute.xlu0 %3100  ;;  %3128 = vst.msk [vmem:[%s13469_s1 + $0x48] sm:$0xfc] %vm3124_vm14, %v3103_v2 }
 0x364   :  { %3129 = vst.msk [vmem:[%s13469_s1 + $0x68] sm:$0x3] %vm3126_vm15, %v3103_v2  ;;  %3127 = vst.msk [vmem:[%s13469_s1 + $0x28] sm:$0x3] %vm3126_vm15, %v3101_v4  ;;  %3586 = vrot.lane.b32.xlu1 %v9816_v34, %s6094_s27 }
 0x365   :  { %3125 = vst.msk [vmem:[%s13469_s1 + $0x8] sm:$0xfc] %vm3124_vm14, %v3101_v4  ;;  %3584 = vrot.lane.b32.xlu0 %v9818_v35, %s6094_s27 }
 0x366   :  { %v3107_v32 = vpop.permute.xlu1 %3106 }
 0x367   :  { %v3105_v33 = vpop.permute.xlu0 %3104  ;;  %3132 = vst.msk [vmem:[%s13469_s1 + $0xc8] sm:$0xfc] %vm3124_vm14, %v3107_v32 }
 0x368   :  { %3133 = vst.msk [vmem:[%s13469_s1 + $0xe8] sm:$0x3] %vm3126_vm15, %v3107_v32  ;;  %3131 = vst.msk [vmem:[%s13469_s1 + $0xa8] sm:$0x3] %vm3126_vm15, %v3105_v33  ;;  %3590 = vrot.lane.b32.xlu1 %v9840_v3, %s6094_s27 }
 0x369   :  { %3130 = vst.msk [vmem:[%s13469_s1 + $0x88] sm:$0xfc] %vm3124_vm14, %v3105_v33  ;;  %3588 = vrot.lane.b32.xlu0 %v9842_v5, %s6094_s27 }
 0x36a   :  { %v3111_v36 = vpop.permute.xlu1 %3110 }
 0x36b   :  { %v3109_v37 = vpop.permute.xlu0 %3108  ;;  %3136 = vst.msk [vmem:[%s13469_s1 + $0x148] sm:$0xfc] %vm3124_vm14, %v3111_v36 }
 0x36c   :  { %3137 = vst.msk [vmem:[%s13469_s1 + $0x168] sm:$0x3] %vm3126_vm15, %v3111_v36  ;;  %3135 = vst.msk [vmem:[%s13469_s1 + $0x128] sm:$0x3] %vm3126_vm15, %v3109_v37  ;;  %3594 = vrot.lane.b32.xlu1 %v9864_v12, %s6094_s27  ;;  %v4087_v36 = vld [vmem:[#allocation2 + $0x38] sm:$0xff] }
 0x36d   :  { %3134 = vst.msk [vmem:[%s13469_s1 + $0x108] sm:$0xfc] %vm3124_vm14, %v3109_v37  ;;  %3592 = vrot.lane.b32.xlu0 %v9866_v13, %s6094_s27  ;;  %v4086_v37 = vld [vmem:[#allocation2 + $0x28] sm:$0xff] }
 0x36e   :  { %v3115_v38 = vpop.permute.xlu1 %3114 }
 0x36f   :  { %v3113_v39 = vpop.permute.xlu0 %3112  ;;  %3140 = vst.msk [vmem:[%s13469_s1 + $0x1c8] sm:$0xfc] %vm3124_vm14, %v3115_v38 }
 0x370   :  { %3141 = vst.msk [vmem:[%s13469_s1 + $0x1e8] sm:$0x3] %vm3126_vm15, %v3115_v38  ;;  %3139 = vst.msk [vmem:[%s13469_s1 + $0x1a8] sm:$0x3] %vm3126_vm15, %v3113_v39  ;;  %3648 = vrot.lane.b32.xlu1 %v9792_v30, %s6095_s10  ;;  %vm3606_vm15 = vcmask 17424  }
 0x371   :  { %3138 = vst.msk [vmem:[%s13469_s1 + $0x188] sm:$0xfc] %vm3124_vm14, %v3113_v39  ;;  %3646 = vrot.lane.b32.xlu0 %v9794_v31, %s6095_s10  ;;  %vm3604_vm14 = vcmask 23570  }
 0x372   :  { %v3169_v40 = vpop.permute.xlu1 %3168 }
 0x373   :  { %v3167_v41 = vpop.permute.xlu0 %3166  ;;  %3194 = vst.msk [vmem:[%s13469_s1 + $0x48] sm:$0xfc] %vm3190_vm0, %v3169_v40 }
 0x374   :  { %3195 = vst.msk [vmem:[%s13469_s1 + $0x68] sm:$0x3] %vm3192_vm1, %v3169_v40  ;;  %3193 = vst.msk [vmem:[%s13469_s1 + $0x28] sm:$0x3] %vm3192_vm1, %v3167_v41  ;;  %3652 = vrot.lane.b32.xlu1 %v9816_v34, %s6095_s10  ;;  %v4089_v40 = vld [vmem:[#allocation2 + $0x58] sm:$0xff] }
 0x375   :  { %3191 = vst.msk [vmem:[%s13469_s1 + $0x8] sm:$0xfc] %vm3190_vm0, %v3167_v41  ;;  %3650 = vrot.lane.b32.xlu0 %v9818_v35, %s6095_s10  ;;  %v4088_v41 = vld [vmem:[#allocation2 + $0x48] sm:$0xff] }
 0x376   :  { %v3173_v42 = vpop.permute.xlu1 %3172 }
 0x377   :  { %v3171_v43 = vpop.permute.xlu0 %3170  ;;  %3198 = vst.msk [vmem:[%s13469_s1 + $0xc8] sm:$0xfc] %vm3190_vm0, %v3173_v42 }
 0x378   :  { %3199 = vst.msk [vmem:[%s13469_s1 + $0xe8] sm:$0x3] %vm3192_vm1, %v3173_v42  ;;  %3197 = vst.msk [vmem:[%s13469_s1 + $0xa8] sm:$0x3] %vm3192_vm1, %v3171_v43  ;;  %3656 = vrot.lane.b32.xlu1 %v9840_v3, %s6095_s10 }
 0x379   :  { %3196 = vst.msk [vmem:[%s13469_s1 + $0x88] sm:$0xfc] %vm3190_vm0, %v3171_v43  ;;  %3654 = vrot.lane.b32.xlu0 %v9842_v5, %s6095_s10 }
 0x37a   :  { %v3177_v44 = vpop.permute.xlu1 %3176 }
 0x37b   :  { %v3175_v45 = vpop.permute.xlu0 %3174  ;;  %3202 = vst.msk [vmem:[%s13469_s1 + $0x148] sm:$0xfc] %vm3190_vm0, %v3177_v44 }
 0x37c   :  { %3203 = vst.msk [vmem:[%s13469_s1 + $0x168] sm:$0x3] %vm3192_vm1, %v3177_v44  ;;  %3201 = vst.msk [vmem:[%s13469_s1 + $0x128] sm:$0x3] %vm3192_vm1, %v3175_v45  ;;  %3660 = vrot.lane.b32.xlu1 %v9864_v12, %s6095_s10  ;;  %v10704_v44 = vrot.slane %v4089_v40, 6 }
 0x37d   :  { %3200 = vst.msk [vmem:[%s13469_s1 + $0x108] sm:$0xfc] %vm3190_vm0, %v3175_v45  ;;  %3658 = vrot.lane.b32.xlu0 %v9866_v13, %s6095_s10  ;;  %v10706_v45 = vrot.slane %v4088_v41, 6 }
 0x37e   :  { %v3181_v46 = vpop.permute.xlu1 %3180 }
 0x37f   :  { %v3179_v47 = vpop.permute.xlu0 %3178  ;;  %3206 = vst.msk [vmem:[%s13469_s1 + $0x1c8] sm:$0xfc] %vm3190_vm0, %v3181_v46 }
 0x380   :  { %3207 = vst.msk [vmem:[%s13469_s1 + $0x1e8] sm:$0x3] %vm3192_vm1, %v3181_v46  ;;  %3205 = vst.msk [vmem:[%s13469_s1 + $0x1a8] sm:$0x3] %vm3192_vm1, %v3179_v47  ;;  %3714 = vrot.lane.b32.xlu1 %v9792_v30, %s6096_s9  ;;  %vm3672_vm1 = vcmask 25624   ;;  %v4091_v46 = vld [vmem:[#allocation2 + $0x78] sm:$0xff] }
 0x381   :  { %3204 = vst.msk [vmem:[%s13469_s1 + $0x188] sm:$0xfc] %vm3190_vm0, %v3179_v47  ;;  %3712 = vrot.lane.b32.xlu0 %v9794_v31, %s6096_s9  ;;  %vm3670_vm0 = vcmask 31770   ;;  %v4090_v47 = vld [vmem:[#allocation2 + $0x68] sm:$0xff] }
 0x382   :  { %v3235_v48 = vpop.permute.xlu1 %3234 }
 0x383   :  { %v3233_v49 = vpop.permute.xlu0 %3232  ;;  %3260 = vst.msk [vmem:[%s13469_s1 + $0x48] sm:$0xfc] %vm3256_vm2, %v3235_v48 }
 0x384   :  { %3261 = vst.msk [vmem:[%s13469_s1 + $0x68] sm:$0x3] %vm3258_vm3, %v3235_v48  ;;  %3259 = vst.msk [vmem:[%s13469_s1 + $0x28] sm:$0x3] %vm3258_vm3, %v3233_v49  ;;  %3718 = vrot.lane.b32.xlu1 %v9816_v34, %s6096_s9 }
 0x385   :  { %3257 = vst.msk [vmem:[%s13469_s1 + $0x8] sm:$0xfc] %vm3256_vm2, %v3233_v49  ;;  %3716 = vrot.lane.b32.xlu0 %v9818_v35, %s6096_s9 }
 0x386   :  { %v3239_v8 = vpop.permute.xlu1 %3238 }
 0x387   :  { %v3237_v9 = vpop.permute.xlu0 %3236  ;;  %3264 = vst.msk [vmem:[%s13469_s1 + $0xc8] sm:$0xfc] %vm3256_vm2, %v3239_v8 }
 0x388   :  { %3265 = vst.msk [vmem:[%s13469_s1 + $0xe8] sm:$0x3] %vm3258_vm3, %v3239_v8  ;;  %3263 = vst.msk [vmem:[%s13469_s1 + $0xa8] sm:$0x3] %vm3258_vm3, %v3237_v9  ;;  %3722 = vrot.lane.b32.xlu1 %v9840_v3, %s6096_s9  ;;  %v10728_v8 = vrot.slane %v4091_v46, 6 }
 0x389   :  { %3262 = vst.msk [vmem:[%s13469_s1 + $0x88] sm:$0xfc] %vm3256_vm2, %v3237_v9  ;;  %3720 = vrot.lane.b32.xlu0 %v9842_v5, %s6096_s9  ;;  %v10730_v9 = vrot.slane %v4090_v47, 6 }
 0x38a   :  { %v3243_v14 = vpop.permute.xlu1 %3242 }
 0x38b   :  { %v3241_v15 = vpop.permute.xlu0 %3240  ;;  %3268 = vst.msk [vmem:[%s13469_s1 + $0x148] sm:$0xfc] %vm3256_vm2, %v3243_v14 }
 0x38c   :  { %3269 = vst.msk [vmem:[%s13469_s1 + $0x168] sm:$0x3] %vm3258_vm3, %v3243_v14  ;;  %3267 = vst.msk [vmem:[%s13469_s1 + $0x128] sm:$0x3] %vm3258_vm3, %v3241_v15  ;;  %3726 = vrot.lane.b32.xlu1 %v9864_v12, %s6096_s9 }
 0x38d   :  { %3266 = vst.msk [vmem:[%s13469_s1 + $0x108] sm:$0xfc] %vm3256_vm2, %v3241_v15  ;;  %3724 = vrot.lane.b32.xlu0 %v9866_v13, %s6096_s9  ;;  %s6100_s9 = smov 91  }
 0x38e   :  { %v3247_v50 = vpop.permute.xlu1 %3246 }
 0x38f   :  { %v3245_v51 = vpop.permute.xlu0 %3244  ;;  %3272 = vst.msk [vmem:[%s13469_s1 + $0x1c8] sm:$0xfc] %vm3256_vm2, %v3247_v50 }
 0x390   :  { %3273 = vst.msk [vmem:[%s13469_s1 + $0x1e8] sm:$0x3] %vm3258_vm3, %v3247_v50  ;;  %3271 = vst.msk [vmem:[%s13469_s1 + $0x1a8] sm:$0x3] %vm3258_vm3, %v3245_v51  ;;  %3780 = vrot.lane.b32.xlu1 %v9792_v30, %s6095_s10  ;;  %vm3738_vm3 = vcmask 173104  }
 0x391   :  { %3270 = vst.msk [vmem:[%s13469_s1 + $0x188] sm:$0xfc] %vm3256_vm2, %v3245_v51  ;;  %3778 = vrot.lane.b32.xlu0 %v9794_v31, %s6095_s10  ;;  %vm3736_vm2 = vcmask 179250  }
 0x392   :  { %v3301_v52 = vpop.permute.xlu1 %3300 }
 0x393   :  { %v3299_v53 = vpop.permute.xlu0 %3298  ;;  %3326 = vst.msk [vmem:[%s13469_s1 + $0x48] sm:$0xfc] %vm3322_vm4, %v3301_v52 }
 0x394   :  { %3327 = vst.msk [vmem:[%s13469_s1 + $0x68] sm:$0x3] %vm3324_vm5, %v3301_v52  ;;  %3325 = vst.msk [vmem:[%s13469_s1 + $0x28] sm:$0x3] %vm3324_vm5, %v3299_v53  ;;  %3784 = vrot.lane.b32.xlu1 %v9816_v34, %s6095_s10 }
 0x395   :  { %3323 = vst.msk [vmem:[%s13469_s1 + $0x8] sm:$0xfc] %vm3322_vm4, %v3299_v53  ;;  %3782 = vrot.lane.b32.xlu0 %v9818_v35, %s6095_s10 }
 0x396   :  { %v3305_v22 = vpop.permute.xlu1 %3304 }
 0x397   :  { %v3303_v23 = vpop.permute.xlu0 %3302  ;;  %3330 = vst.msk [vmem:[%s13469_s1 + $0xc8] sm:$0xfc] %vm3322_vm4, %v3305_v22 }
 0x398   :  { %3331 = vst.msk [vmem:[%s13469_s1 + $0xe8] sm:$0x3] %vm3324_vm5, %v3305_v22  ;;  %3329 = vst.msk [vmem:[%s13469_s1 + $0xa8] sm:$0x3] %vm3324_vm5, %v3303_v23  ;;  %3788 = vrot.lane.b32.xlu1 %v9840_v3, %s6095_s10 }
 0x399   :  { %3328 = vst.msk [vmem:[%s13469_s1 + $0x88] sm:$0xfc] %vm3322_vm4, %v3303_v23  ;;  %3786 = vrot.lane.b32.xlu0 %v9842_v5, %s6095_s10 }
 0x39a   :  { %v3309_v24 = vpop.permute.xlu1 %3308 }
 0x39b   :  { %v3307_v25 = vpop.permute.xlu0 %3306  ;;  %3334 = vst.msk [vmem:[%s13469_s1 + $0x148] sm:$0xfc] %vm3322_vm4, %v3309_v24 }
 0x39c   :  { %3335 = vst.msk [vmem:[%s13469_s1 + $0x168] sm:$0x3] %vm3324_vm5, %v3309_v24  ;;  %3333 = vst.msk [vmem:[%s13469_s1 + $0x128] sm:$0x3] %vm3324_vm5, %v3307_v25  ;;  %3792 = vrot.lane.b32.xlu1 %v9864_v12, %s6095_s10 }
 0x39d   :  { %3332 = vst.msk [vmem:[%s13469_s1 + $0x108] sm:$0xfc] %vm3322_vm4, %v3307_v25  ;;  %3790 = vrot.lane.b32.xlu0 %v9866_v13, %s6095_s10 }
 0x39e   :  { %v3313_v54 = vpop.permute.xlu1 %3312 }
 0x39f   :  { %v3311_v55 = vpop.permute.xlu0 %3310  ;;  %3338 = vst.msk [vmem:[%s13469_s1 + $0x1c8] sm:$0xfc] %vm3322_vm4, %v3313_v54 }
 0x3a0   :  { %3339 = vst.msk [vmem:[%s13469_s1 + $0x1e8] sm:$0x3] %vm3324_vm5, %v3313_v54  ;;  %3337 = vst.msk [vmem:[%s13469_s1 + $0x1a8] sm:$0x3] %vm3324_vm5, %v3311_v55  ;;  %3846 = vrot.lane.b32.xlu1 %v9792_v30, %s6094_s27  ;;  %vm3804_vm5 = vcmask 42024  }
 0x3a1   :  { %3336 = vst.msk [vmem:[%s13469_s1 + $0x188] sm:$0xfc] %vm3322_vm4, %v3311_v55  ;;  %3844 = vrot.lane.b32.xlu0 %v9794_v31, %s6094_s27  ;;  %vm3802_vm4 = vcmask 48170  }
 0x3a2   :  { %v3367_v56 = vpop.permute.xlu1 %3366 }
 0x3a3   :  { %v3365_v57 = vpop.permute.xlu0 %3364  ;;  %3396 = vst.msk [vmem:[%s13469_s1 + $0x48] sm:$0xfc] %vm3388_vm6, %v3367_v56 }
 0x3a4   :  { %3398 = vst.msk [vmem:[%s13469_s1 + $0x68] sm:$0x3] %vm3392_vm7, %v3367_v56  ;;  %3393 = vst.msk [vmem:[%s13469_s1 + $0x28] sm:$0x3] %vm3392_vm7, %v3365_v57  ;;  %3850 = vrot.lane.b32.xlu1 %v9816_v34, %s6094_s27 }
 0x3a5   :  { %3389 = vst.msk [vmem:[%s13469_s1 + $0x8] sm:$0xfc] %vm3388_vm6, %v3365_v57  ;;  %3848 = vrot.lane.b32.xlu0 %v9818_v35, %s6094_s27 }
 0x3a6   :  { %3397 = vst.msk [vmem:[%s13469_s1 + $0x50] sm:$0xfc] %vm3390_vm8, %v3367_v56  ;;  %3391 = vst.msk [vmem:[%s13469_s1 + $0x10] sm:$0xfc] %vm3390_vm8, %v3365_v57  ;;  %v3371_v58 = vpop.permute.xlu1 %3370 }
 0x3a7   :  { %3399 = vst.msk [vmem:[%s13469_s1 + $0x70] sm:$0x3] %vm3394_vm9, %v3367_v56  ;;  %3395 = vst.msk [vmem:[%s13469_s1 + $0x30] sm:$0x3] %vm3394_vm9, %v3365_v57  ;;  %v3369_v59 = vpop.permute.xlu0 %3368 }
 0x3a8   :  { %3400 = vst.msk [vmem:[%s13469_s1 + $0x88] sm:$0xfc] %vm3388_vm6, %v3369_v59  ;;  %3404 = vst.msk [vmem:[%s13469_s1 + $0xc8] sm:$0xfc] %vm3388_vm6, %v3371_v58  ;;  %3854 = vrot.lane.b32.xlu1 %v9840_v3, %s6094_s27 }
 0x3a9   :  { %3402 = vst.msk [vmem:[%s13469_s1 + $0xa8] sm:$0x3] %vm3392_vm7, %v3369_v59  ;;  %3406 = vst.msk [vmem:[%s13469_s1 + $0xe8] sm:$0x3] %vm3392_vm7, %v3371_v58  ;;  %3852 = vrot.lane.b32.xlu0 %v9842_v5, %s6094_s27 }
 0x3aa   :  { %3401 = vst.msk [vmem:[%s13469_s1 + $0x90] sm:$0xfc] %vm3390_vm8, %v3369_v59  ;;  %3405 = vst.msk [vmem:[%s13469_s1 + $0xd0] sm:$0xfc] %vm3390_vm8, %v3371_v58  ;;  %v3375_v62 = vpop.permute.xlu1 %3374 }
 0x3ab   :  { %3403 = vst.msk [vmem:[%s13469_s1 + $0xb0] sm:$0x3] %vm3394_vm9, %v3369_v59  ;;  %3407 = vst.msk [vmem:[%s13469_s1 + $0xf0] sm:$0x3] %vm3394_vm9, %v3371_v58  ;;  %v3373_v63 = vpop.permute.xlu0 %3372 }
 0x3ac   :  { %3408 = vst.msk [vmem:[%s13469_s1 + $0x108] sm:$0xfc] %vm3388_vm6, %v3373_v63  ;;  %3412 = vst.msk [vmem:[%s13469_s1 + $0x148] sm:$0xfc] %vm3388_vm6, %v3375_v62  ;;  %3858 = vrot.lane.b32.xlu1 %v9864_v12, %s6094_s27 }
 0x3ad   :  { %3410 = vst.msk [vmem:[%s13469_s1 + $0x128] sm:$0x3] %vm3392_vm7, %v3373_v63  ;;  %3414 = vst.msk [vmem:[%s13469_s1 + $0x168] sm:$0x3] %vm3392_vm7, %v3375_v62  ;;  %3856 = vrot.lane.b32.xlu0 %v9866_v13, %s6094_s27 }
 0x3ae   :  { %3409 = vst.msk [vmem:[%s13469_s1 + $0x110] sm:$0xfc] %vm3390_vm8, %v3373_v63  ;;  %3413 = vst.msk [vmem:[%s13469_s1 + $0x150] sm:$0xfc] %vm3390_vm8, %v3375_v62  ;;  %v3379_v0 = vpop.permute.xlu1 %3378 }
 0x3af   :  { %3411 = vst.msk [vmem:[%s13469_s1 + $0x130] sm:$0x3] %vm3394_vm9, %v3373_v63  ;;  %3415 = vst.msk [vmem:[%s13469_s1 + $0x170] sm:$0x3] %vm3394_vm9, %v3375_v62  ;;  %v3377_v1 = vpop.permute.xlu0 %3376 }
 0x3b0   :  { %3416 = vst.msk [vmem:[%s13469_s1 + $0x188] sm:$0xfc] %vm3388_vm6, %v3377_v1  ;;  %3420 = vst.msk [vmem:[%s13469_s1 + $0x1c8] sm:$0xfc] %vm3388_vm6, %v3379_v0  ;;  %3912 = vrot.lane.b32.xlu1 %v9792_v30, %s6097_s12  ;;  %vm3868_vm6 = vcmask 39970  }
 0x3b1   :  { %3418 = vst.msk [vmem:[%s13469_s1 + $0x1a8] sm:$0x3] %vm3392_vm7, %v3377_v1  ;;  %3422 = vst.msk [vmem:[%s13469_s1 + $0x1e8] sm:$0x3] %vm3392_vm7, %v3379_v0  ;;  %3910 = vrot.lane.b32.xlu0 %v9794_v31, %s6097_s12  ;;  %vm3870_vm7 = vcmask 33824  }
 0x3b2   :  { %3417 = vst.msk [vmem:[%s13469_s1 + $0x190] sm:$0xfc] %vm3390_vm8, %v3377_v1  ;;  %3421 = vst.msk [vmem:[%s13469_s1 + $0x1d0] sm:$0xfc] %vm3390_vm8, %v3379_v0  ;;  %v3451_v6 = vpop.permute.xlu1 %3450  ;;  %vm3934_vm8 = vcmask 187570  }
 0x3b3   :  { %3419 = vst.msk [vmem:[%s13469_s1 + $0x1b0] sm:$0x3] %vm3394_vm9, %v3377_v1  ;;  %3423 = vst.msk [vmem:[%s13469_s1 + $0x1f0] sm:$0x3] %vm3394_vm9, %v3379_v0  ;;  %v3449_v7 = vpop.permute.xlu0 %3448  ;;  %vm3936_vm9 = vcmask 181424  }
 0x3b4   :  { %3476 = vst.msk [vmem:[%s13469_s1 + $0x48] sm:$0xfc] %vm3472_vm10, %v3451_v6  ;;  %3473 = vst.msk [vmem:[%s13469_s1 + $0x8] sm:$0xfc] %vm3472_vm10, %v3449_v7  ;;  %3916 = vrot.lane.b32.xlu1 %v9816_v34, %s6097_s12 }
 0x3b5   :  { %3477 = vst.msk [vmem:[%s13469_s1 + $0x68] sm:$0x3] %vm3474_vm11, %v3451_v6  ;;  %3475 = vst.msk [vmem:[%s13469_s1 + $0x28] sm:$0x3] %vm3474_vm11, %v3449_v7  ;;  %3914 = vrot.lane.b32.xlu0 %v9818_v35, %s6097_s12 }
 0x3b6   :  { %v3455_v10 = vpop.permute.xlu1 %3454 }
 0x3b7   :  { %v3453_v11 = vpop.permute.xlu0 %3452  ;;  %3480 = vst.msk [vmem:[%s13469_s1 + $0xc8] sm:$0xfc] %vm3472_vm10, %v3455_v10 }
 0x3b8   :  { %3481 = vst.msk [vmem:[%s13469_s1 + $0xe8] sm:$0x3] %vm3474_vm11, %v3455_v10  ;;  %3479 = vst.msk [vmem:[%s13469_s1 + $0xa8] sm:$0x3] %vm3474_vm11, %v3453_v11  ;;  %3920 = vrot.lane.b32.xlu1 %v9840_v3, %s6097_s12 }
 0x3b9   :  { %3478 = vst.msk [vmem:[%s13469_s1 + $0x88] sm:$0xfc] %vm3472_vm10, %v3453_v11  ;;  %3918 = vrot.lane.b32.xlu0 %v9842_v5, %s6097_s12 }
 0x3ba   :  { %v3459_v16 = vpop.permute.xlu1 %3458 }
 0x3bb   :  { %v3457_v17 = vpop.permute.xlu0 %3456  ;;  %3484 = vst.msk [vmem:[%s13469_s1 + $0x148] sm:$0xfc] %vm3472_vm10, %v3459_v16 }
 0x3bc   :  { %3485 = vst.msk [vmem:[%s13469_s1 + $0x168] sm:$0x3] %vm3474_vm11, %v3459_v16  ;;  %3483 = vst.msk [vmem:[%s13469_s1 + $0x128] sm:$0x3] %vm3474_vm11, %v3457_v17  ;;  %3924 = vrot.lane.b32.xlu1 %v9864_v12, %s6097_s12 }
 0x3bd   :  { %3482 = vst.msk [vmem:[%s13469_s1 + $0x108] sm:$0xfc] %vm3472_vm10, %v3457_v17  ;;  %3922 = vrot.lane.b32.xlu0 %v9866_v13, %s6097_s12 }
 0x3be   :  { %v3463_v18 = vpop.permute.xlu1 %3462 }
 0x3bf   :  { %v3461_v19 = vpop.permute.xlu0 %3460  ;;  %3488 = vst.msk [vmem:[%s13469_s1 + $0x1c8] sm:$0xfc] %vm3472_vm10, %v3463_v18 }
 0x3c0   :  { %3489 = vst.msk [vmem:[%s13469_s1 + $0x1e8] sm:$0x3] %vm3474_vm11, %v3463_v18  ;;  %3487 = vst.msk [vmem:[%s13469_s1 + $0x1a8] sm:$0x3] %vm3474_vm11, %v3461_v19  ;;  %3978 = vrot.lane.b32.xlu1 %v9792_v30, %s6098_s25  ;;  %vm4002_vm11 = vcmask 189624  }
 0x3c1   :  { %3486 = vst.msk [vmem:[%s13469_s1 + $0x188] sm:$0xfc] %vm3472_vm10, %v3461_v19  ;;  %3976 = vrot.lane.b32.xlu0 %v9794_v31, %s6098_s25  ;;  %vm4000_vm10 = vcmask 195770  }
 0x3c2   :  { %v3517_v20 = vpop.permute.xlu1 %3516 }
 0x3c3   :  { %v3515_v21 = vpop.permute.xlu0 %3514  ;;  %3542 = vst.msk [vmem:[%s13469_s1 + $0x48] sm:$0xfc] %vm3538_vm12, %v3517_v20 }
 0x3c4   :  { %3543 = vst.msk [vmem:[%s13469_s1 + $0x68] sm:$0x3] %vm3540_vm13, %v3517_v20  ;;  %3541 = vst.msk [vmem:[%s13469_s1 + $0x28] sm:$0x3] %vm3540_vm13, %v3515_v21  ;;  %3982 = vrot.lane.b32.xlu1 %v9816_v34, %s6098_s25 }
 0x3c5   :  { %3539 = vst.msk [vmem:[%s13469_s1 + $0x8] sm:$0xfc] %vm3538_vm12, %v3515_v21  ;;  %3980 = vrot.lane.b32.xlu0 %v9818_v35, %s6098_s25 }
 0x3c6   :  { %v3521_v26 = vpop.permute.xlu1 %3520 }
 0x3c7   :  { %v3519_v27 = vpop.permute.xlu0 %3518  ;;  %3546 = vst.msk [vmem:[%s13469_s1 + $0xc8] sm:$0xfc] %vm3538_vm12, %v3521_v26 }
 0x3c8   :  { %3547 = vst.msk [vmem:[%s13469_s1 + $0xe8] sm:$0x3] %vm3540_vm13, %v3521_v26  ;;  %3545 = vst.msk [vmem:[%s13469_s1 + $0xa8] sm:$0x3] %vm3540_vm13, %v3519_v27  ;;  %3986 = vrot.lane.b32.xlu1 %v9840_v3, %s6098_s25 }
 0x3c9   :  { %3544 = vst.msk [vmem:[%s13469_s1 + $0x88] sm:$0xfc] %vm3538_vm12, %v3519_v27  ;;  %3984 = vrot.lane.b32.xlu0 %v9842_v5, %s6098_s25 }
 0x3ca   :  { %v3525_v60 = vpop.permute.xlu1 %3524 }
 0x3cb   :  { %v3523_v61 = vpop.permute.xlu0 %3522  ;;  %3550 = vst.msk [vmem:[%s13469_s1 + $0x148] sm:$0xfc] %vm3538_vm12, %v3525_v60 }
 0x3cc   :  { %3551 = vst.msk [vmem:[%s13469_s1 + $0x168] sm:$0x3] %vm3540_vm13, %v3525_v60  ;;  %3549 = vst.msk [vmem:[%s13469_s1 + $0x128] sm:$0x3] %vm3540_vm13, %v3523_v61  ;;  %3990 = vrot.lane.b32.xlu1 %v9864_v12, %s6098_s25 }
 0x3cd   :  { %3548 = vst.msk [vmem:[%s13469_s1 + $0x108] sm:$0xfc] %vm3538_vm12, %v3523_v61  ;;  %3988 = vrot.lane.b32.xlu0 %v9866_v13, %s6098_s25 }
 0x3ce   :  { %v3529_v28 = vpop.permute.xlu1 %3528 }
 0x3cf   :  { %v3527_v29 = vpop.permute.xlu0 %3526  ;;  %3554 = vst.msk [vmem:[%s13469_s1 + $0x1c8] sm:$0xfc] %vm3538_vm12, %v3529_v28 }
 0x3d0   :  { %3555 = vst.msk [vmem:[%s13469_s1 + $0x1e8] sm:$0x3] %vm3540_vm13, %v3529_v28  ;;  %3553 = vst.msk [vmem:[%s13469_s1 + $0x1a8] sm:$0x3] %vm3540_vm13, %v3527_v29  ;;  %4044 = vrot.lane.b32.xlu1 %v9792_v30, %s6099_s23  ;;  %vm4068_vm13 = vcmask 337104  }
 0x3d1   :  { %3552 = vst.msk [vmem:[%s13469_s1 + $0x188] sm:$0xfc] %vm3538_vm12, %v3527_v29  ;;  %4042 = vrot.lane.b32.xlu0 %v9794_v31, %s6099_s23  ;;  %vm4066_vm12 = vcmask 343250  }
 0x3d2   :  { %v3583_v2 = vpop.permute.xlu1 %3582 }
 0x3d3   :  { %v3581_v4 = vpop.permute.xlu0 %3580  ;;  %3608 = vst.msk [vmem:[%s13469_s1 + $0x50] sm:$0xfc] %vm3604_vm14, %v3583_v2 }
 0x3d4   :  { %3609 = vst.msk [vmem:[%s13469_s1 + $0x70] sm:$0x3] %vm3606_vm15, %v3583_v2  ;;  %3607 = vst.msk [vmem:[%s13469_s1 + $0x30] sm:$0x3] %vm3606_vm15, %v3581_v4  ;;  %4048 = vrot.lane.b32.xlu1 %v9816_v34, %s6099_s23  ;;  %v4085_v34 = vld [vmem:[#allocation2 + $0x18] sm:$0xff] }
 0x3d5   :  { %3605 = vst.msk [vmem:[%s13469_s1 + $0x10] sm:$0xfc] %vm3604_vm14, %v3581_v4  ;;  %4046 = vrot.lane.b32.xlu0 %v9818_v35, %s6099_s23  ;;  %v4084_v35 = vld [vmem:[#allocation2 + $0x8] sm:$0xff] }
 0x3d6   :  { %v3587_v30 = vpop.permute.xlu1 %3586 }
 0x3d7   :  { %v3585_v31 = vpop.permute.xlu0 %3584  ;;  %3612 = vst.msk [vmem:[%s13469_s1 + $0xd0] sm:$0xfc] %vm3604_vm14, %v3587_v30 }
 0x3d8   :  { %3613 = vst.msk [vmem:[%s13469_s1 + $0xf0] sm:$0x3] %vm3606_vm15, %v3587_v30  ;;  %3611 = vst.msk [vmem:[%s13469_s1 + $0xb0] sm:$0x3] %vm3606_vm15, %v3585_v31  ;;  %4052 = vrot.lane.b32.xlu1 %v9840_v3, %s6099_s23  ;;  %v10656_v3 = vrot.slane %v4085_v34, 6 }
 0x3d9   :  { %3610 = vst.msk [vmem:[%s13469_s1 + $0x90] sm:$0xfc] %vm3604_vm14, %v3585_v31  ;;  %4050 = vrot.lane.b32.xlu0 %v9842_v5, %s6099_s23  ;;  %v10658_v5 = vrot.slane %v4084_v35, 6 }
 0x3da   :  { %v3591_v32 = vpop.permute.xlu1 %3590 }
 0x3db   :  { %v3589_v33 = vpop.permute.xlu0 %3588  ;;  %3616 = vst.msk [vmem:[%s13469_s1 + $0x150] sm:$0xfc] %vm3604_vm14, %v3591_v32 }
 0x3dc   :  { %3617 = vst.msk [vmem:[%s13469_s1 + $0x170] sm:$0x3] %vm3606_vm15, %v3591_v32  ;;  %3615 = vst.msk [vmem:[%s13469_s1 + $0x130] sm:$0x3] %vm3606_vm15, %v3589_v33  ;;  %4056 = vrot.lane.b32.xlu1 %v9864_v12, %s6099_s23  ;;  %v10680_v12 = vrot.slane %v4087_v36, 6 }
 0x3dd   :  { %3614 = vst.msk [vmem:[%s13469_s1 + $0x110] sm:$0xfc] %vm3604_vm14, %v3589_v33  ;;  %4054 = vrot.lane.b32.xlu0 %v9866_v13, %s6099_s23  ;;  %v10682_v13 = vrot.slane %v4086_v37, 6  ;;  %s6103_s23 = smov 95  }
 0x3de   :  { %v3595_v38 = vpop.permute.xlu1 %3594 }
 0x3df   :  { %v3593_v39 = vpop.permute.xlu0 %3592  ;;  %3620 = vst.msk [vmem:[%s13469_s1 + $0x1d0] sm:$0xfc] %vm3604_vm14, %v3595_v38 }
 0x3e0   :  { %3621 = vst.msk [vmem:[%s13469_s1 + $0x1f0] sm:$0x3] %vm3606_vm15, %v3595_v38  ;;  %3619 = vst.msk [vmem:[%s13469_s1 + $0x1b0] sm:$0x3] %vm3606_vm15, %v3593_v39  ;;  %4110 = vrot.lane.b32.xlu1 %v10656_v3, %s6098_s25  ;;  %vm4134_vm15 = vcmask 206024  }
 0x3e1   :  { %3618 = vst.msk [vmem:[%s13469_s1 + $0x190] sm:$0xfc] %vm3604_vm14, %v3593_v39  ;;  %4108 = vrot.lane.b32.xlu0 %v10658_v5, %s6098_s25  ;;  %vm4132_vm14 = vcmask 212170  }
 0x3e2   :  { %v3649_v42 = vpop.permute.xlu1 %3648 }
 0x3e3   :  { %v3647_v43 = vpop.permute.xlu0 %3646  ;;  %3674 = vst.msk [vmem:[%s13469_s1 + $0x50] sm:$0xfc] %vm3670_vm0, %v3649_v42 }
 0x3e4   :  { %3675 = vst.msk [vmem:[%s13469_s1 + $0x70] sm:$0x3] %vm3672_vm1, %v3649_v42  ;;  %3673 = vst.msk [vmem:[%s13469_s1 + $0x30] sm:$0x3] %vm3672_vm1, %v3647_v43  ;;  %4114 = vrot.lane.b32.xlu1 %v10680_v12, %s6098_s25 }
 0x3e5   :  { %3671 = vst.msk [vmem:[%s13469_s1 + $0x10] sm:$0xfc] %vm3670_vm0, %v3647_v43  ;;  %4112 = vrot.lane.b32.xlu0 %v10682_v13, %s6098_s25 }
 0x3e6   :  { %v3653_v48 = vpop.permute.xlu1 %3652 }
 0x3e7   :  { %v3651_v49 = vpop.permute.xlu0 %3650  ;;  %3678 = vst.msk [vmem:[%s13469_s1 + $0xd0] sm:$0xfc] %vm3670_vm0, %v3653_v48 }
 0x3e8   :  { %3679 = vst.msk [vmem:[%s13469_s1 + $0xf0] sm:$0x3] %vm3672_vm1, %v3653_v48  ;;  %3677 = vst.msk [vmem:[%s13469_s1 + $0xb0] sm:$0x3] %vm3672_vm1, %v3651_v49  ;;  %4118 = vrot.lane.b32.xlu1 %v10704_v44, %s6098_s25 }
 0x3e9   :  { %3676 = vst.msk [vmem:[%s13469_s1 + $0x90] sm:$0xfc] %vm3670_vm0, %v3651_v49  ;;  %4116 = vrot.lane.b32.xlu0 %v10706_v45, %s6098_s25 }
 0x3ea   :  { %v3657_v14 = vpop.permute.xlu1 %3656 }
 0x3eb   :  { %v3655_v15 = vpop.permute.xlu0 %3654  ;;  %3682 = vst.msk [vmem:[%s13469_s1 + $0x150] sm:$0xfc] %vm3670_vm0, %v3657_v14 }
 0x3ec   :  { %3683 = vst.msk [vmem:[%s13469_s1 + $0x170] sm:$0x3] %vm3672_vm1, %v3657_v14  ;;  %3681 = vst.msk [vmem:[%s13469_s1 + $0x130] sm:$0x3] %vm3672_vm1, %v3655_v15  ;;  %4122 = vrot.lane.b32.xlu1 %v10728_v8, %s6098_s25 }
 0x3ed   :  { %3680 = vst.msk [vmem:[%s13469_s1 + $0x110] sm:$0xfc] %vm3670_vm0, %v3655_v15  ;;  %4120 = vrot.lane.b32.xlu0 %v10730_v9, %s6098_s25 }
 0x3ee   :  { %v3661_v50 = vpop.permute.xlu1 %3660 }
 0x3ef   :  { %v3659_v51 = vpop.permute.xlu0 %3658  ;;  %3686 = vst.msk [vmem:[%s13469_s1 + $0x1d0] sm:$0xfc] %vm3670_vm0, %v3661_v50 }
 0x3f0   :  { %3687 = vst.msk [vmem:[%s13469_s1 + $0x1f0] sm:$0x3] %vm3672_vm1, %v3661_v50  ;;  %3685 = vst.msk [vmem:[%s13469_s1 + $0x1b0] sm:$0x3] %vm3672_vm1, %v3659_v51  ;;  %4176 = vrot.lane.b32.xlu1 %v10656_v3, %s6097_s12  ;;  %vm4200_vm1 = vcmask 197824  }
 0x3f1   :  { %3684 = vst.msk [vmem:[%s13469_s1 + $0x190] sm:$0xfc] %vm3670_vm0, %v3659_v51  ;;  %4174 = vrot.lane.b32.xlu0 %v10658_v5, %s6097_s12  ;;  %vm4198_vm0 = vcmask 203970  }
 0x3f2   :  { %v3715_v52 = vpop.permute.xlu1 %3714 }
 0x3f3   :  { %v3713_v53 = vpop.permute.xlu0 %3712  ;;  %3740 = vst.msk [vmem:[%s13469_s1 + $0x50] sm:$0xfc] %vm3736_vm2, %v3715_v52 }
 0x3f4   :  { %3741 = vst.msk [vmem:[%s13469_s1 + $0x70] sm:$0x3] %vm3738_vm3, %v3715_v52  ;;  %3739 = vst.msk [vmem:[%s13469_s1 + $0x30] sm:$0x3] %vm3738_vm3, %v3713_v53  ;;  %4180 = vrot.lane.b32.xlu1 %v10680_v12, %s6097_s12 }
 0x3f5   :  { %3737 = vst.msk [vmem:[%s13469_s1 + $0x10] sm:$0xfc] %vm3736_vm2, %v3713_v53  ;;  %4178 = vrot.lane.b32.xlu0 %v10682_v13, %s6097_s12 }
 0x3f6   :  { %v3719_v22 = vpop.permute.xlu1 %3718 }
 0x3f7   :  { %v3717_v23 = vpop.permute.xlu0 %3716  ;;  %3744 = vst.msk [vmem:[%s13469_s1 + $0xd0] sm:$0xfc] %vm3736_vm2, %v3719_v22 }
 0x3f8   :  { %3745 = vst.msk [vmem:[%s13469_s1 + $0xf0] sm:$0x3] %vm3738_vm3, %v3719_v22  ;;  %3743 = vst.msk [vmem:[%s13469_s1 + $0xb0] sm:$0x3] %vm3738_vm3, %v3717_v23  ;;  %4184 = vrot.lane.b32.xlu1 %v10704_v44, %s6097_s12 }
 0x3f9   :  { %3742 = vst.msk [vmem:[%s13469_s1 + $0x90] sm:$0xfc] %vm3736_vm2, %v3717_v23  ;;  %4182 = vrot.lane.b32.xlu0 %v10706_v45, %s6097_s12 }
 0x3fa   :  { %v3723_v24 = vpop.permute.xlu1 %3722 }
 0x3fb   :  { %v3721_v25 = vpop.permute.xlu0 %3720  ;;  %3748 = vst.msk [vmem:[%s13469_s1 + $0x150] sm:$0xfc] %vm3736_vm2, %v3723_v24 }
 0x3fc   :  { %3749 = vst.msk [vmem:[%s13469_s1 + $0x170] sm:$0x3] %vm3738_vm3, %v3723_v24  ;;  %3747 = vst.msk [vmem:[%s13469_s1 + $0x130] sm:$0x3] %vm3738_vm3, %v3721_v25  ;;  %4188 = vrot.lane.b32.xlu1 %v10728_v8, %s6097_s12 }
 0x3fd   :  { %3746 = vst.msk [vmem:[%s13469_s1 + $0x110] sm:$0xfc] %vm3736_vm2, %v3721_v25  ;;  %4186 = vrot.lane.b32.xlu0 %v10730_v9, %s6097_s12 }
 0x3fe   :  { %v3727_v54 = vpop.permute.xlu1 %3726 }
 0x3ff   :  { %v3725_v55 = vpop.permute.xlu0 %3724  ;;  %3752 = vst.msk [vmem:[%s13469_s1 + $0x1d0] sm:$0xfc] %vm3736_vm2, %v3727_v54 }
 0x400   :  { %3753 = vst.msk [vmem:[%s13469_s1 + $0x1f0] sm:$0x3] %vm3738_vm3, %v3727_v54  ;;  %3751 = vst.msk [vmem:[%s13469_s1 + $0x1b0] sm:$0x3] %vm3738_vm3, %v3725_v55  ;;  %4242 = vrot.lane.b32.xlu1 %v10656_v3, %s6100_s9  ;;  %vm4266_vm3 = vcmask 345424  }
 0x401   :  { %3750 = vst.msk [vmem:[%s13469_s1 + $0x190] sm:$0xfc] %vm3736_vm2, %v3725_v55  ;;  %4240 = vrot.lane.b32.xlu0 %v10658_v5, %s6100_s9  ;;  %vm4264_vm2 = vcmask 351570  }
 0x402   :  { %v3781_v56 = vpop.permute.xlu1 %3780 }
 0x403   :  { %v3779_v57 = vpop.permute.xlu0 %3778  ;;  %3806 = vst.msk [vmem:[%s13469_s1 + $0x50] sm:$0xfc] %vm3802_vm4, %v3781_v56 }
 0x404   :  { %3807 = vst.msk [vmem:[%s13469_s1 + $0x70] sm:$0x3] %vm3804_vm5, %v3781_v56  ;;  %3805 = vst.msk [vmem:[%s13469_s1 + $0x30] sm:$0x3] %vm3804_vm5, %v3779_v57  ;;  %4246 = vrot.lane.b32.xlu1 %v10680_v12, %s6100_s9 }
 0x405   :  { %3803 = vst.msk [vmem:[%s13469_s1 + $0x10] sm:$0xfc] %vm3802_vm4, %v3779_v57  ;;  %4244 = vrot.lane.b32.xlu0 %v10682_v13, %s6100_s9 }
 0x406   :  { %v3785_v58 = vpop.permute.xlu1 %3784 }
 0x407   :  { %v3783_v59 = vpop.permute.xlu0 %3782  ;;  %3810 = vst.msk [vmem:[%s13469_s1 + $0xd0] sm:$0xfc] %vm3802_vm4, %v3785_v58 }
 0x408   :  { %3811 = vst.msk [vmem:[%s13469_s1 + $0xf0] sm:$0x3] %vm3804_vm5, %v3785_v58  ;;  %3809 = vst.msk [vmem:[%s13469_s1 + $0xb0] sm:$0x3] %vm3804_vm5, %v3783_v59  ;;  %4250 = vrot.lane.b32.xlu1 %v10704_v44, %s6100_s9 }
 0x409   :  { %3808 = vst.msk [vmem:[%s13469_s1 + $0x90] sm:$0xfc] %vm3802_vm4, %v3783_v59  ;;  %4248 = vrot.lane.b32.xlu0 %v10706_v45, %s6100_s9 }
 0x40a   :  { %v3789_v62 = vpop.permute.xlu1 %3788 }
 0x40b   :  { %v3787_v63 = vpop.permute.xlu0 %3786  ;;  %3814 = vst.msk [vmem:[%s13469_s1 + $0x150] sm:$0xfc] %vm3802_vm4, %v3789_v62 }
 0x40c   :  { %3815 = vst.msk [vmem:[%s13469_s1 + $0x170] sm:$0x3] %vm3804_vm5, %v3789_v62  ;;  %3813 = vst.msk [vmem:[%s13469_s1 + $0x130] sm:$0x3] %vm3804_vm5, %v3787_v63  ;;  %4254 = vrot.lane.b32.xlu1 %v10728_v8, %s6100_s9 }
 0x40d   :  { %3812 = vst.msk [vmem:[%s13469_s1 + $0x110] sm:$0xfc] %vm3802_vm4, %v3787_v63  ;;  %4252 = vrot.lane.b32.xlu0 %v10730_v9, %s6100_s9 }
 0x40e   :  { %v3793_v0 = vpop.permute.xlu1 %3792 }
 0x40f   :  { %v3791_v1 = vpop.permute.xlu0 %3790  ;;  %3818 = vst.msk [vmem:[%s13469_s1 + $0x1d0] sm:$0xfc] %vm3802_vm4, %v3793_v0 }
 0x410   :  { %3819 = vst.msk [vmem:[%s13469_s1 + $0x1f0] sm:$0x3] %vm3804_vm5, %v3793_v0  ;;  %3817 = vst.msk [vmem:[%s13469_s1 + $0x1b0] sm:$0x3] %vm3804_vm5, %v3791_v1  ;;  %4308 = vrot.lane.b32.xlu1 %v10656_v3, %s6101_s28  ;;  %vm4332_vm5 = vcmask 353624  }
 0x411   :  { %3816 = vst.msk [vmem:[%s13469_s1 + $0x190] sm:$0xfc] %vm3802_vm4, %v3791_v1  ;;  %4306 = vrot.lane.b32.xlu0 %v10658_v5, %s6101_s28  ;;  %vm4330_vm4 = vcmask 359770  }
 0x412   :  { %v3847_v6 = vpop.permute.xlu1 %3846 }
 0x413   :  { %v3845_v7 = vpop.permute.xlu0 %3844  ;;  %3872 = vst.msk [vmem:[%s13469_s1 + $0x50] sm:$0xfc] %vm3868_vm6, %v3847_v6 }
 0x414   :  { %3873 = vst.msk [vmem:[%s13469_s1 + $0x70] sm:$0x3] %vm3870_vm7, %v3847_v6  ;;  %3871 = vst.msk [vmem:[%s13469_s1 + $0x30] sm:$0x3] %vm3870_vm7, %v3845_v7  ;;  %4312 = vrot.lane.b32.xlu1 %v10680_v12, %s6101_s28 }
 0x415   :  { %3869 = vst.msk [vmem:[%s13469_s1 + $0x10] sm:$0xfc] %vm3868_vm6, %v3845_v7  ;;  %4310 = vrot.lane.b32.xlu0 %v10682_v13, %s6101_s28 }
 0x416   :  { %v3851_v10 = vpop.permute.xlu1 %3850 }
 0x417   :  { %v3849_v11 = vpop.permute.xlu0 %3848  ;;  %3876 = vst.msk [vmem:[%s13469_s1 + $0xd0] sm:$0xfc] %vm3868_vm6, %v3851_v10 }
 0x418   :  { %3877 = vst.msk [vmem:[%s13469_s1 + $0xf0] sm:$0x3] %vm3870_vm7, %v3851_v10  ;;  %3875 = vst.msk [vmem:[%s13469_s1 + $0xb0] sm:$0x3] %vm3870_vm7, %v3849_v11  ;;  %4316 = vrot.lane.b32.xlu1 %v10704_v44, %s6101_s28 }
 0x419   :  { %3874 = vst.msk [vmem:[%s13469_s1 + $0x90] sm:$0xfc] %vm3868_vm6, %v3849_v11  ;;  %4314 = vrot.lane.b32.xlu0 %v10706_v45, %s6101_s28 }
 0x41a   :  { %v3855_v16 = vpop.permute.xlu1 %3854 }
 0x41b   :  { %v3853_v17 = vpop.permute.xlu0 %3852  ;;  %3880 = vst.msk [vmem:[%s13469_s1 + $0x150] sm:$0xfc] %vm3868_vm6, %v3855_v16 }
 0x41c   :  { %3881 = vst.msk [vmem:[%s13469_s1 + $0x170] sm:$0x3] %vm3870_vm7, %v3855_v16  ;;  %3879 = vst.msk [vmem:[%s13469_s1 + $0x130] sm:$0x3] %vm3870_vm7, %v3853_v17  ;;  %4320 = vrot.lane.b32.xlu1 %v10728_v8, %s6101_s28  ;;  %v4813_v16 = vld [vmem:[#allocation2 + $0x38] sm:$0xff] }
 0x41d   :  { %3878 = vst.msk [vmem:[%s13469_s1 + $0x110] sm:$0xfc] %vm3868_vm6, %v3853_v17  ;;  %4318 = vrot.lane.b32.xlu0 %v10730_v9, %s6101_s28  ;;  %v4812_v17 = vld [vmem:[#allocation2 + $0x28] sm:$0xff] }
 0x41e   :  { %v3859_v18 = vpop.permute.xlu1 %3858 }
 0x41f   :  { %v3857_v19 = vpop.permute.xlu0 %3856  ;;  %3884 = vst.msk [vmem:[%s13469_s1 + $0x1d0] sm:$0xfc] %vm3868_vm6, %v3859_v18 }
 0x420   :  { %3885 = vst.msk [vmem:[%s13469_s1 + $0x1f0] sm:$0x3] %vm3870_vm7, %v3859_v18  ;;  %3883 = vst.msk [vmem:[%s13469_s1 + $0x1b0] sm:$0x3] %vm3870_vm7, %v3857_v19  ;;  %4374 = vrot.lane.b32.xlu1 %v10656_v3, %s6102_s16  ;;  %vm4398_vm7 = vcmask 501104  }
 0x421   :  { %3882 = vst.msk [vmem:[%s13469_s1 + $0x190] sm:$0xfc] %vm3868_vm6, %v3857_v19  ;;  %4372 = vrot.lane.b32.xlu0 %v10658_v5, %s6102_s16  ;;  %vm4396_vm6 = vcmask 507250  }
 0x422   :  { %v3913_v20 = vpop.permute.xlu1 %3912 }
 0x423   :  { %v3911_v21 = vpop.permute.xlu0 %3910  ;;  %3938 = vst.msk [vmem:[%s13469_s1 + $0x50] sm:$0xfc] %vm3934_vm8, %v3913_v20 }
 0x424   :  { %3939 = vst.msk [vmem:[%s13469_s1 + $0x70] sm:$0x3] %vm3936_vm9, %v3913_v20  ;;  %3937 = vst.msk [vmem:[%s13469_s1 + $0x30] sm:$0x3] %vm3936_vm9, %v3911_v21  ;;  %4378 = vrot.lane.b32.xlu1 %v10680_v12, %s6102_s16  ;;  %v4815_v20 = vld [vmem:[#allocation2 + $0x58] sm:$0xff] }
 0x425   :  { %3935 = vst.msk [vmem:[%s13469_s1 + $0x10] sm:$0xfc] %vm3934_vm8, %v3911_v21  ;;  %4376 = vrot.lane.b32.xlu0 %v10682_v13, %s6102_s16  ;;  %v4814_v21 = vld [vmem:[#allocation2 + $0x48] sm:$0xff] }
 0x426   :  { %v3917_v26 = vpop.permute.xlu1 %3916 }
 0x427   :  { %v3915_v27 = vpop.permute.xlu0 %3914  ;;  %3942 = vst.msk [vmem:[%s13469_s1 + $0xd0] sm:$0xfc] %vm3934_vm8, %v3917_v26 }
 0x428   :  { %3943 = vst.msk [vmem:[%s13469_s1 + $0xf0] sm:$0x3] %vm3936_vm9, %v3917_v26  ;;  %3941 = vst.msk [vmem:[%s13469_s1 + $0xb0] sm:$0x3] %vm3936_vm9, %v3915_v27  ;;  %4382 = vrot.lane.b32.xlu1 %v10704_v44, %s6102_s16 }
 0x429   :  { %3940 = vst.msk [vmem:[%s13469_s1 + $0x90] sm:$0xfc] %vm3934_vm8, %v3915_v27  ;;  %4380 = vrot.lane.b32.xlu0 %v10706_v45, %s6102_s16 }
 0x42a   :  { %v3921_v60 = vpop.permute.xlu1 %3920 }
 0x42b   :  { %v3919_v61 = vpop.permute.xlu0 %3918  ;;  %3946 = vst.msk [vmem:[%s13469_s1 + $0x150] sm:$0xfc] %vm3934_vm8, %v3921_v60 }
 0x42c   :  { %3947 = vst.msk [vmem:[%s13469_s1 + $0x170] sm:$0x3] %vm3936_vm9, %v3921_v60  ;;  %3945 = vst.msk [vmem:[%s13469_s1 + $0x130] sm:$0x3] %vm3936_vm9, %v3919_v61  ;;  %4386 = vrot.lane.b32.xlu1 %v10728_v8, %s6102_s16  ;;  %v11584_v60 = vrot.slane %v4815_v20, 6 }
 0x42d   :  { %3944 = vst.msk [vmem:[%s13469_s1 + $0x110] sm:$0xfc] %vm3934_vm8, %v3919_v61  ;;  %4384 = vrot.lane.b32.xlu0 %v10730_v9, %s6102_s16  ;;  %v11586_v61 = vrot.slane %v4814_v21, 6 }
 0x42e   :  { %v3925_v28 = vpop.permute.xlu1 %3924 }
 0x42f   :  { %v3923_v29 = vpop.permute.xlu0 %3922  ;;  %3950 = vst.msk [vmem:[%s13469_s1 + $0x1d0] sm:$0xfc] %vm3934_vm8, %v3925_v28 }
 0x430   :  { %3951 = vst.msk [vmem:[%s13469_s1 + $0x1f0] sm:$0x3] %vm3936_vm9, %v3925_v28  ;;  %3949 = vst.msk [vmem:[%s13469_s1 + $0x1b0] sm:$0x3] %vm3936_vm9, %v3923_v29  ;;  %4440 = vrot.lane.b32.xlu1 %v10656_v3, %s6101_s28  ;;  %v4817_v28 = vld [vmem:[#allocation2 + $0x78] sm:$0xff]  ;;  %vm4464_vm9 = vcmask 370024  }
 0x431   :  { %3948 = vst.msk [vmem:[%s13469_s1 + $0x190] sm:$0xfc] %vm3934_vm8, %v3923_v29  ;;  %4438 = vrot.lane.b32.xlu0 %v10658_v5, %s6101_s28  ;;  %v4816_v29 = vld [vmem:[#allocation2 + $0x68] sm:$0xff]  ;;  %vm4462_vm8 = vcmask 376170  }
 0x432   :  { %v3979_v2 = vpop.permute.xlu1 %3978 }
 0x433   :  { %v3977_v4 = vpop.permute.xlu0 %3976  ;;  %4004 = vst.msk [vmem:[%s13469_s1 + $0x50] sm:$0xfc] %vm4000_vm10, %v3979_v2 }
 0x434   :  { %4005 = vst.msk [vmem:[%s13469_s1 + $0x70] sm:$0x3] %vm4002_vm11, %v3979_v2  ;;  %4003 = vst.msk [vmem:[%s13469_s1 + $0x30] sm:$0x3] %vm4002_vm11, %v3977_v4  ;;  %4444 = vrot.lane.b32.xlu1 %v10680_v12, %s6101_s28 }
 0x435   :  { %4001 = vst.msk [vmem:[%s13469_s1 + $0x10] sm:$0xfc] %vm4000_vm10, %v3977_v4  ;;  %4442 = vrot.lane.b32.xlu0 %v10682_v13, %s6101_s28 }
 0x436   :  { %v3983_v30 = vpop.permute.xlu1 %3982 }
 0x437   :  { %v3981_v31 = vpop.permute.xlu0 %3980  ;;  %4008 = vst.msk [vmem:[%s13469_s1 + $0xd0] sm:$0xfc] %vm4000_vm10, %v3983_v30 }
 0x438   :  { %4009 = vst.msk [vmem:[%s13469_s1 + $0xf0] sm:$0x3] %vm4002_vm11, %v3983_v30  ;;  %4007 = vst.msk [vmem:[%s13469_s1 + $0xb0] sm:$0x3] %vm4002_vm11, %v3981_v31  ;;  %4448 = vrot.lane.b32.xlu1 %v10704_v44, %s6101_s28  ;;  %v11608_v30 = vrot.slane %v4817_v28, 6 }
 0x439   :  { %4006 = vst.msk [vmem:[%s13469_s1 + $0x90] sm:$0xfc] %vm4000_vm10, %v3981_v31  ;;  %4446 = vrot.lane.b32.xlu0 %v10706_v45, %s6101_s28  ;;  %v11610_v31 = vrot.slane %v4816_v29, 6 }
 0x43a   :  { %v3987_v34 = vpop.permute.xlu1 %3986 }
 0x43b   :  { %v3985_v35 = vpop.permute.xlu0 %3984  ;;  %4012 = vst.msk [vmem:[%s13469_s1 + $0x150] sm:$0xfc] %vm4000_vm10, %v3987_v34 }
 0x43c   :  { %4013 = vst.msk [vmem:[%s13469_s1 + $0x170] sm:$0x3] %vm4002_vm11, %v3987_v34  ;;  %4011 = vst.msk [vmem:[%s13469_s1 + $0x130] sm:$0x3] %vm4002_vm11, %v3985_v35  ;;  %4452 = vrot.lane.b32.xlu1 %v10728_v8, %s6101_s28 }
 0x43d   :  { %4010 = vst.msk [vmem:[%s13469_s1 + $0x110] sm:$0xfc] %vm4000_vm10, %v3985_v35  ;;  %4450 = vrot.lane.b32.xlu0 %v10730_v9, %s6101_s28 }
 0x43e   :  { %v3991_v32 = vpop.permute.xlu1 %3990 }
 0x43f   :  { %v3989_v33 = vpop.permute.xlu0 %3988  ;;  %4016 = vst.msk [vmem:[%s13469_s1 + $0x1d0] sm:$0xfc] %vm4000_vm10, %v3991_v32 }
 0x440   :  { %4017 = vst.msk [vmem:[%s13469_s1 + $0x1f0] sm:$0x3] %vm4002_vm11, %v3991_v32  ;;  %4015 = vst.msk [vmem:[%s13469_s1 + $0x1b0] sm:$0x3] %vm4002_vm11, %v3989_v33  ;;  %4506 = vrot.lane.b32.xlu1 %v10656_v3, %s6100_s9  ;;  %vm4530_vm11 = vcmask 361824  }
 0x441   :  { %4014 = vst.msk [vmem:[%s13469_s1 + $0x190] sm:$0xfc] %vm4000_vm10, %v3989_v33  ;;  %4504 = vrot.lane.b32.xlu0 %v10658_v5, %s6100_s9  ;;  %vm4528_vm10 = vcmask 367970  }
 0x442   :  { %v4045_v36 = vpop.permute.xlu1 %4044 }
 0x443   :  { %v4043_v37 = vpop.permute.xlu0 %4042  ;;  %4070 = vst.msk [vmem:[%s13469_s1 + $0x50] sm:$0xfc] %vm4066_vm12, %v4045_v36 }
 0x444   :  { %4071 = vst.msk [vmem:[%s13469_s1 + $0x70] sm:$0x3] %vm4068_vm13, %v4045_v36  ;;  %4069 = vst.msk [vmem:[%s13469_s1 + $0x30] sm:$0x3] %vm4068_vm13, %v4043_v37  ;;  %4510 = vrot.lane.b32.xlu1 %v10680_v12, %s6100_s9 }
 0x445   :  { %4067 = vst.msk [vmem:[%s13469_s1 + $0x10] sm:$0xfc] %vm4066_vm12, %v4043_v37  ;;  %4508 = vrot.lane.b32.xlu0 %v10682_v13, %s6100_s9 }
 0x446   :  { %v4049_v38 = vpop.permute.xlu1 %4048 }
 0x447   :  { %v4047_v39 = vpop.permute.xlu0 %4046  ;;  %4074 = vst.msk [vmem:[%s13469_s1 + $0xd0] sm:$0xfc] %vm4066_vm12, %v4049_v38 }
 0x448   :  { %4075 = vst.msk [vmem:[%s13469_s1 + $0xf0] sm:$0x3] %vm4068_vm13, %v4049_v38  ;;  %4073 = vst.msk [vmem:[%s13469_s1 + $0xb0] sm:$0x3] %vm4068_vm13, %v4047_v39  ;;  %4514 = vrot.lane.b32.xlu1 %v10704_v44, %s6100_s9 }
 0x449   :  { %4072 = vst.msk [vmem:[%s13469_s1 + $0x90] sm:$0xfc] %vm4066_vm12, %v4047_v39  ;;  %4512 = vrot.lane.b32.xlu0 %v10706_v45, %s6100_s9 }
 0x44a   :  { %v4053_v40 = vpop.permute.xlu1 %4052 }
 0x44b   :  { %v4051_v41 = vpop.permute.xlu0 %4050  ;;  %4078 = vst.msk [vmem:[%s13469_s1 + $0x150] sm:$0xfc] %vm4066_vm12, %v4053_v40 }
 0x44c   :  { %4079 = vst.msk [vmem:[%s13469_s1 + $0x170] sm:$0x3] %vm4068_vm13, %v4053_v40  ;;  %4077 = vst.msk [vmem:[%s13469_s1 + $0x130] sm:$0x3] %vm4068_vm13, %v4051_v41  ;;  %4518 = vrot.lane.b32.xlu1 %v10728_v8, %s6100_s9 }
 0x44d   :  { %4076 = vst.msk [vmem:[%s13469_s1 + $0x110] sm:$0xfc] %vm4066_vm12, %v4051_v41  ;;  %4516 = vrot.lane.b32.xlu0 %v10730_v9, %s6100_s9 }
 0x44e   :  { %v4057_v42 = vpop.permute.xlu1 %4056 }
 0x44f   :  { %v4055_v43 = vpop.permute.xlu0 %4054  ;;  %4082 = vst.msk [vmem:[%s13469_s1 + $0x1d0] sm:$0xfc] %vm4066_vm12, %v4057_v42 }
 0x450   :  { %4083 = vst.msk [vmem:[%s13469_s1 + $0x1f0] sm:$0x3] %vm4068_vm13, %v4057_v42  ;;  %4081 = vst.msk [vmem:[%s13469_s1 + $0x1b0] sm:$0x3] %vm4068_vm13, %v4055_v43  ;;  %4572 = vrot.lane.b32.xlu1 %v10656_v3, %s6103_s23  ;;  %vm4596_vm13 = vcmask 509424  }
 0x451   :  { %4080 = vst.msk [vmem:[%s13469_s1 + $0x190] sm:$0xfc] %vm4066_vm12, %v4055_v43  ;;  %4570 = vrot.lane.b32.xlu0 %v10658_v5, %s6103_s23  ;;  %vm4594_vm12 = vcmask 515570  }
 0x452   :  { %v4111_v46 = vpop.permute.xlu1 %4110 }
 0x453   :  { %v4109_v47 = vpop.permute.xlu0 %4108  ;;  %4136 = vst.msk [vmem:[%s13469_s1 + $0x50] sm:$0xfc] %vm4132_vm14, %v4111_v46 }
 0x454   :  { %4137 = vst.msk [vmem:[%s13469_s1 + $0x70] sm:$0x3] %vm4134_vm15, %v4111_v46  ;;  %4135 = vst.msk [vmem:[%s13469_s1 + $0x30] sm:$0x3] %vm4134_vm15, %v4109_v47  ;;  %4576 = vrot.lane.b32.xlu1 %v10680_v12, %s6103_s23 }
 0x455   :  { %4133 = vst.msk [vmem:[%s13469_s1 + $0x10] sm:$0xfc] %vm4132_vm14, %v4109_v47  ;;  %4574 = vrot.lane.b32.xlu0 %v10682_v13, %s6103_s23 }
 0x456   :  { %v4115_v48 = vpop.permute.xlu1 %4114 }
 0x457   :  { %v4113_v49 = vpop.permute.xlu0 %4112  ;;  %4140 = vst.msk [vmem:[%s13469_s1 + $0xd0] sm:$0xfc] %vm4132_vm14, %v4115_v48 }
 0x458   :  { %4141 = vst.msk [vmem:[%s13469_s1 + $0xf0] sm:$0x3] %vm4134_vm15, %v4115_v48  ;;  %4139 = vst.msk [vmem:[%s13469_s1 + $0xb0] sm:$0x3] %vm4134_vm15, %v4113_v49  ;;  %4580 = vrot.lane.b32.xlu1 %v10704_v44, %s6103_s23 }
 0x459   :  { %4138 = vst.msk [vmem:[%s13469_s1 + $0x90] sm:$0xfc] %vm4132_vm14, %v4113_v49  ;;  %4578 = vrot.lane.b32.xlu0 %v10706_v45, %s6103_s23 }
 0x45a   :  { %v4119_v14 = vpop.permute.xlu1 %4118 }
 0x45b   :  { %v4117_v15 = vpop.permute.xlu0 %4116  ;;  %4144 = vst.msk [vmem:[%s13469_s1 + $0x150] sm:$0xfc] %vm4132_vm14, %v4119_v14 }
 0x45c   :  { %4145 = vst.msk [vmem:[%s13469_s1 + $0x170] sm:$0x3] %vm4134_vm15, %v4119_v14  ;;  %4143 = vst.msk [vmem:[%s13469_s1 + $0x130] sm:$0x3] %vm4134_vm15, %v4117_v15  ;;  %4584 = vrot.lane.b32.xlu1 %v10728_v8, %s6103_s23 }
 0x45d   :  { %4142 = vst.msk [vmem:[%s13469_s1 + $0x110] sm:$0xfc] %vm4132_vm14, %v4117_v15  ;;  %4582 = vrot.lane.b32.xlu0 %v10730_v9, %s6103_s23 }
 0x45e   :  { %v4123_v50 = vpop.permute.xlu1 %4122 }
 0x45f   :  { %v4121_v51 = vpop.permute.xlu0 %4120  ;;  %4148 = vst.msk [vmem:[%s13469_s1 + $0x1d0] sm:$0xfc] %vm4132_vm14, %v4123_v50 }
 0x460   :  { %4149 = vst.msk [vmem:[%s13469_s1 + $0x1f0] sm:$0x3] %vm4134_vm15, %v4123_v50  ;;  %4147 = vst.msk [vmem:[%s13469_s1 + $0x1b0] sm:$0x3] %vm4134_vm15, %v4121_v51  ;;  %4638 = vrot.lane.b32.xlu1 %v10656_v3, %s6104_s4  ;;  %vm4662_vm15 = vcmask 517624  }
 0x461   :  { %4146 = vst.msk [vmem:[%s13469_s1 + $0x190] sm:$0xfc] %vm4132_vm14, %v4121_v51  ;;  %4636 = vrot.lane.b32.xlu0 %v10658_v5, %s6104_s4  ;;  %vm4660_vm14 = vcmask 523770  }
 0x462   :  { %v4177_v52 = vpop.permute.xlu1 %4176 }
 0x463   :  { %v4175_v53 = vpop.permute.xlu0 %4174  ;;  %4202 = vst.msk [vmem:[%s13469_s1 + $0x50] sm:$0xfc] %vm4198_vm0, %v4177_v52 }
 0x464   :  { %4203 = vst.msk [vmem:[%s13469_s1 + $0x70] sm:$0x3] %vm4200_vm1, %v4177_v52  ;;  %4201 = vst.msk [vmem:[%s13469_s1 + $0x30] sm:$0x3] %vm4200_vm1, %v4175_v53  ;;  %4642 = vrot.lane.b32.xlu1 %v10680_v12, %s6104_s4 }
 0x465   :  { %4199 = vst.msk [vmem:[%s13469_s1 + $0x10] sm:$0xfc] %vm4198_vm0, %v4175_v53  ;;  %4640 = vrot.lane.b32.xlu0 %v10682_v13, %s6104_s4 }
 0x466   :  { %v4181_v22 = vpop.permute.xlu1 %4180 }
 0x467   :  { %v4179_v23 = vpop.permute.xlu0 %4178  ;;  %4206 = vst.msk [vmem:[%s13469_s1 + $0xd0] sm:$0xfc] %vm4198_vm0, %v4181_v22 }
 0x468   :  { %4207 = vst.msk [vmem:[%s13469_s1 + $0xf0] sm:$0x3] %vm4200_vm1, %v4181_v22  ;;  %4205 = vst.msk [vmem:[%s13469_s1 + $0xb0] sm:$0x3] %vm4200_vm1, %v4179_v23  ;;  %4646 = vrot.lane.b32.xlu1 %v10704_v44, %s6104_s4 }
 0x469   :  { %4204 = vst.msk [vmem:[%s13469_s1 + $0x90] sm:$0xfc] %vm4198_vm0, %v4179_v23  ;;  %4644 = vrot.lane.b32.xlu0 %v10706_v45, %s6104_s4 }
 0x46a   :  { %v4185_v24 = vpop.permute.xlu1 %4184 }
 0x46b   :  { %v4183_v25 = vpop.permute.xlu0 %4182  ;;  %4210 = vst.msk [vmem:[%s13469_s1 + $0x150] sm:$0xfc] %vm4198_vm0, %v4185_v24 }
 0x46c   :  { %4211 = vst.msk [vmem:[%s13469_s1 + $0x170] sm:$0x3] %vm4200_vm1, %v4185_v24  ;;  %4209 = vst.msk [vmem:[%s13469_s1 + $0x130] sm:$0x3] %vm4200_vm1, %v4183_v25  ;;  %4650 = vrot.lane.b32.xlu1 %v10728_v8, %s6104_s4 }
 0x46d   :  { %4208 = vst.msk [vmem:[%s13469_s1 + $0x110] sm:$0xfc] %vm4198_vm0, %v4183_v25  ;;  %4648 = vrot.lane.b32.xlu0 %v10730_v9, %s6104_s4 }
 0x46e   :  { %v4189_v54 = vpop.permute.xlu1 %4188 }
 0x46f   :  { %v4187_v55 = vpop.permute.xlu0 %4186  ;;  %4214 = vst.msk [vmem:[%s13469_s1 + $0x1d0] sm:$0xfc] %vm4198_vm0, %v4189_v54 }
 0x470   :  { %4215 = vst.msk [vmem:[%s13469_s1 + $0x1f0] sm:$0x3] %vm4200_vm1, %v4189_v54  ;;  %4213 = vst.msk [vmem:[%s13469_s1 + $0x1b0] sm:$0x3] %vm4200_vm1, %v4187_v55  ;;  %4704 = vrot.lane.b32.xlu1 %v10656_v3, %s6105_s29  ;;  %vm4728_vm1 = vcmask 665104  }
 0x471   :  { %4212 = vst.msk [vmem:[%s13469_s1 + $0x190] sm:$0xfc] %vm4198_vm0, %v4187_v55  ;;  %4702 = vrot.lane.b32.xlu0 %v10658_v5, %s6105_s29  ;;  %vm4726_vm0 = vcmask 671250  }
 0x472   :  { %v4243_v56 = vpop.permute.xlu1 %4242 }
 0x473   :  { %v4241_v57 = vpop.permute.xlu0 %4240  ;;  %4268 = vst.msk [vmem:[%s13469_s1 + $0x50] sm:$0xfc] %vm4264_vm2, %v4243_v56 }
 0x474   :  { %4269 = vst.msk [vmem:[%s13469_s1 + $0x70] sm:$0x3] %vm4266_vm3, %v4243_v56  ;;  %4267 = vst.msk [vmem:[%s13469_s1 + $0x30] sm:$0x3] %vm4266_vm3, %v4241_v57  ;;  %4708 = vrot.lane.b32.xlu1 %v10680_v12, %s6105_s29 }
 0x475   :  { %4265 = vst.msk [vmem:[%s13469_s1 + $0x10] sm:$0xfc] %vm4264_vm2, %v4241_v57  ;;  %4706 = vrot.lane.b32.xlu0 %v10682_v13, %s6105_s29 }
 0x476   :  { %v4247_v58 = vpop.permute.xlu1 %4246 }
 0x477   :  { %v4245_v59 = vpop.permute.xlu0 %4244  ;;  %4272 = vst.msk [vmem:[%s13469_s1 + $0xd0] sm:$0xfc] %vm4264_vm2, %v4247_v58 }
 0x478   :  { %4273 = vst.msk [vmem:[%s13469_s1 + $0xf0] sm:$0x3] %vm4266_vm3, %v4247_v58  ;;  %4271 = vst.msk [vmem:[%s13469_s1 + $0xb0] sm:$0x3] %vm4266_vm3, %v4245_v59  ;;  %4712 = vrot.lane.b32.xlu1 %v10704_v44, %s6105_s29 }
 0x479   :  { %4270 = vst.msk [vmem:[%s13469_s1 + $0x90] sm:$0xfc] %vm4264_vm2, %v4245_v59  ;;  %4710 = vrot.lane.b32.xlu0 %v10706_v45, %s6105_s29 }
 0x47a   :  { %v4251_v62 = vpop.permute.xlu1 %4250 }
 0x47b   :  { %v4249_v63 = vpop.permute.xlu0 %4248  ;;  %4276 = vst.msk [vmem:[%s13469_s1 + $0x150] sm:$0xfc] %vm4264_vm2, %v4251_v62 }
 0x47c   :  { %4277 = vst.msk [vmem:[%s13469_s1 + $0x170] sm:$0x3] %vm4266_vm3, %v4251_v62  ;;  %4275 = vst.msk [vmem:[%s13469_s1 + $0x130] sm:$0x3] %vm4266_vm3, %v4249_v63  ;;  %4716 = vrot.lane.b32.xlu1 %v10728_v8, %s6105_s29 }
 0x47d   :  { %4274 = vst.msk [vmem:[%s13469_s1 + $0x110] sm:$0xfc] %vm4264_vm2, %v4249_v63  ;;  %4714 = vrot.lane.b32.xlu0 %v10730_v9, %s6105_s29  ;;  %s6110_s29 = smov 105  }
 0x47e   :  { %v4255_v0 = vpop.permute.xlu1 %4254 }
 0x47f   :  { %v4253_v1 = vpop.permute.xlu0 %4252  ;;  %4280 = vst.msk [vmem:[%s13469_s1 + $0x1d0] sm:$0xfc] %vm4264_vm2, %v4255_v0 }
 0x480   :  { %4281 = vst.msk [vmem:[%s13469_s1 + $0x1f0] sm:$0x3] %vm4266_vm3, %v4255_v0  ;;  %4279 = vst.msk [vmem:[%s13469_s1 + $0x1b0] sm:$0x3] %vm4266_vm3, %v4253_v1  ;;  %4770 = vrot.lane.b32.xlu1 %v10656_v3, %s6104_s4  ;;  %vm4794_vm3 = vcmask 534024  }
 0x481   :  { %4278 = vst.msk [vmem:[%s13469_s1 + $0x190] sm:$0xfc] %vm4264_vm2, %v4253_v1  ;;  %4768 = vrot.lane.b32.xlu0 %v10658_v5, %s6104_s4  ;;  %vm4792_vm2 = vcmask 540170  }
 0x482   :  { %v4309_v6 = vpop.permute.xlu1 %4308 }
 0x483   :  { %v4307_v7 = vpop.permute.xlu0 %4306  ;;  %4334 = vst.msk [vmem:[%s13469_s1 + $0x50] sm:$0xfc] %vm4330_vm4, %v4309_v6 }
 0x484   :  { %4335 = vst.msk [vmem:[%s13469_s1 + $0x70] sm:$0x3] %vm4332_vm5, %v4309_v6  ;;  %4333 = vst.msk [vmem:[%s13469_s1 + $0x30] sm:$0x3] %vm4332_vm5, %v4307_v7  ;;  %4774 = vrot.lane.b32.xlu1 %v10680_v12, %s6104_s4  ;;  %v4811_v12 = vld [vmem:[#allocation2 + $0x18] sm:$0xff] }
 0x485   :  { %4331 = vst.msk [vmem:[%s13469_s1 + $0x10] sm:$0xfc] %vm4330_vm4, %v4307_v7  ;;  %4772 = vrot.lane.b32.xlu0 %v10682_v13, %s6104_s4  ;;  %v4810_v13 = vld [vmem:[#allocation2 + $0x8] sm:$0xff] }
 0x486   :  { %v4313_v3 = vpop.permute.xlu1 %4312 }
 0x487   :  { %v4311_v5 = vpop.permute.xlu0 %4310  ;;  %4338 = vst.msk [vmem:[%s13469_s1 + $0xd0] sm:$0xfc] %vm4330_vm4, %v4313_v3 }
 0x488   :  { %4339 = vst.msk [vmem:[%s13469_s1 + $0xf0] sm:$0x3] %vm4332_vm5, %v4313_v3  ;;  %4337 = vst.msk [vmem:[%s13469_s1 + $0xb0] sm:$0x3] %vm4332_vm5, %v4311_v5  ;;  %4778 = vrot.lane.b32.xlu1 %v10704_v44, %s6104_s4  ;;  %v11536_v44 = vrot.slane %v4811_v12, 6 }
 0x489   :  { %4336 = vst.msk [vmem:[%s13469_s1 + $0x90] sm:$0xfc] %vm4330_vm4, %v4311_v5  ;;  %4776 = vrot.lane.b32.xlu0 %v10706_v45, %s6104_s4  ;;  %v11538_v45 = vrot.slane %v4810_v13, 6 }
 0x48a   :  { %v4317_v10 = vpop.permute.xlu1 %4316 }
 0x48b   :  { %v4315_v11 = vpop.permute.xlu0 %4314  ;;  %4342 = vst.msk [vmem:[%s13469_s1 + $0x150] sm:$0xfc] %vm4330_vm4, %v4317_v10 }
 0x48c   :  { %4343 = vst.msk [vmem:[%s13469_s1 + $0x170] sm:$0x3] %vm4332_vm5, %v4317_v10  ;;  %4341 = vst.msk [vmem:[%s13469_s1 + $0x130] sm:$0x3] %vm4332_vm5, %v4315_v11  ;;  %4782 = vrot.lane.b32.xlu1 %v10728_v8, %s6104_s4  ;;  %v11560_v8 = vrot.slane %v4813_v16, 6 }
 0x48d   :  { %4340 = vst.msk [vmem:[%s13469_s1 + $0x110] sm:$0xfc] %vm4330_vm4, %v4315_v11  ;;  %4780 = vrot.lane.b32.xlu0 %v10730_v9, %s6104_s4  ;;  %v11562_v9 = vrot.slane %v4812_v17, 6 }
 0x48e   :  { %v4321_v18 = vpop.permute.xlu1 %4320 }
 0x48f   :  { %v4319_v19 = vpop.permute.xlu0 %4318  ;;  %4346 = vst.msk [vmem:[%s13469_s1 + $0x1d0] sm:$0xfc] %vm4330_vm4, %v4321_v18 }
 0x490   :  { %4347 = vst.msk [vmem:[%s13469_s1 + $0x1f0] sm:$0x3] %vm4332_vm5, %v4321_v18  ;;  %4345 = vst.msk [vmem:[%s13469_s1 + $0x1b0] sm:$0x3] %vm4332_vm5, %v4319_v19  ;;  %4836 = vrot.lane.b32.xlu1 %v11536_v44, %s6103_s23  ;;  %vm4860_vm5 = vcmask 525824  }
 0x491   :  { %4344 = vst.msk [vmem:[%s13469_s1 + $0x190] sm:$0xfc] %vm4330_vm4, %v4319_v19  ;;  %4834 = vrot.lane.b32.xlu0 %v11538_v45, %s6103_s23  ;;  %vm4858_vm4 = vcmask 531970  }
 0x492   :  { %v4375_v26 = vpop.permute.xlu1 %4374 }
 0x493   :  { %v4373_v27 = vpop.permute.xlu0 %4372  ;;  %4400 = vst.msk [vmem:[%s13469_s1 + $0x50] sm:$0xfc] %vm4396_vm6, %v4375_v26 }
 0x494   :  { %4401 = vst.msk [vmem:[%s13469_s1 + $0x70] sm:$0x3] %vm4398_vm7, %v4375_v26  ;;  %4399 = vst.msk [vmem:[%s13469_s1 + $0x30] sm:$0x3] %vm4398_vm7, %v4373_v27  ;;  %4840 = vrot.lane.b32.xlu1 %v11560_v8, %s6103_s23 }
 0x495   :  { %4397 = vst.msk [vmem:[%s13469_s1 + $0x10] sm:$0xfc] %vm4396_vm6, %v4373_v27  ;;  %4838 = vrot.lane.b32.xlu0 %v11562_v9, %s6103_s23 }
 0x496   :  { %v4379_v2 = vpop.permute.xlu1 %4378 }
 0x497   :  { %v4377_v4 = vpop.permute.xlu0 %4376  ;;  %4404 = vst.msk [vmem:[%s13469_s1 + $0xd0] sm:$0xfc] %vm4396_vm6, %v4379_v2 }
 0x498   :  { %4405 = vst.msk [vmem:[%s13469_s1 + $0xf0] sm:$0x3] %vm4398_vm7, %v4379_v2  ;;  %4403 = vst.msk [vmem:[%s13469_s1 + $0xb0] sm:$0x3] %vm4398_vm7, %v4377_v4  ;;  %4844 = vrot.lane.b32.xlu1 %v11584_v60, %s6103_s23  ;;  %v5339_v2 = vld [vmem:[%s13469_s1 + $0x20] sm:$0x3] }
 0x499   :  { %4402 = vst.msk [vmem:[%s13469_s1 + $0x90] sm:$0xfc] %vm4396_vm6, %v4377_v4  ;;  %4842 = vrot.lane.b32.xlu0 %v11586_v61, %s6103_s23  ;;  %v5338_v4 = vld [vmem:[%s13469_s1] sm:$0xfc] }
 0x49a   :  { %v4383_v34 = vpop.permute.xlu1 %4382 }
 0x49b   :  { %v4381_v35 = vpop.permute.xlu0 %4380  ;;  %4408 = vst.msk [vmem:[%s13469_s1 + $0x150] sm:$0xfc] %vm4396_vm6, %v4383_v34 }
 0x49c   :  { %4409 = vst.msk [vmem:[%s13469_s1 + $0x170] sm:$0x3] %vm4398_vm7, %v4383_v34  ;;  %4407 = vst.msk [vmem:[%s13469_s1 + $0x130] sm:$0x3] %vm4398_vm7, %v4381_v35  ;;  %4848 = vrot.lane.b32.xlu1 %v11608_v30, %s6103_s23  ;;  %v5341_v34 = vld [vmem:[%s13469_s1 + $0x60] sm:$0x3] }
 0x49d   :  { %4406 = vst.msk [vmem:[%s13469_s1 + $0x110] sm:$0xfc] %vm4396_vm6, %v4381_v35  ;;  %4846 = vrot.lane.b32.xlu0 %v11610_v31, %s6103_s23  ;;  %s6111_s23 = smov 108   ;;  %v5340_v35 = vld [vmem:[%s13469_s1 + $0x40] sm:$0xfc] }
 0x49e   :  { %v4387_v32 = vpop.permute.xlu1 %4386 }
 0x49f   :  { %v4385_v33 = vpop.permute.xlu0 %4384  ;;  %4412 = vst.msk [vmem:[%s13469_s1 + $0x1d0] sm:$0xfc] %vm4396_vm6, %v4387_v32 }
 0x4a0   :  { %4413 = vst.msk [vmem:[%s13469_s1 + $0x1f0] sm:$0x3] %vm4398_vm7, %v4387_v32  ;;  %4411 = vst.msk [vmem:[%s13469_s1 + $0x1b0] sm:$0x3] %vm4398_vm7, %v4385_v33  ;;  %4902 = vrot.lane.b32.xlu1 %v11536_v44, %s6106_s15  ;;  %vm4926_vm7 = vcmask 673424  }
 0x4a1   :  { %4410 = vst.msk [vmem:[%s13469_s1 + $0x190] sm:$0xfc] %vm4396_vm6, %v4385_v33  ;;  %4900 = vrot.lane.b32.xlu0 %v11538_v45, %s6106_s15  ;;  %vm4924_vm6 = vcmask 679570  }
 0x4a2   :  { %v4441_v36 = vpop.permute.xlu1 %4440 }
 0x4a3   :  { %v4439_v37 = vpop.permute.xlu0 %4438  ;;  %4466 = vst.msk [vmem:[%s13469_s1 + $0x50] sm:$0xfc] %vm4462_vm8, %v4441_v36 }
 0x4a4   :  { %4467 = vst.msk [vmem:[%s13469_s1 + $0x70] sm:$0x3] %vm4464_vm9, %v4441_v36  ;;  %4465 = vst.msk [vmem:[%s13469_s1 + $0x30] sm:$0x3] %vm4464_vm9, %v4439_v37  ;;  %4906 = vrot.lane.b32.xlu1 %v11560_v8, %s6106_s15  ;;  %v5343_v36 = vld [vmem:[%s13469_s1 + $0xa0] sm:$0x3] }
 0x4a5   :  { %4463 = vst.msk [vmem:[%s13469_s1 + $0x10] sm:$0xfc] %vm4462_vm8, %v4439_v37  ;;  %4904 = vrot.lane.b32.xlu0 %v11562_v9, %s6106_s15  ;;  %v5342_v37 = vld [vmem:[%s13469_s1 + $0x80] sm:$0xfc] }
 0x4a6   :  { %v4445_v38 = vpop.permute.xlu1 %4444 }
 0x4a7   :  { %v4443_v39 = vpop.permute.xlu0 %4442  ;;  %4470 = vst.msk [vmem:[%s13469_s1 + $0xd0] sm:$0xfc] %vm4462_vm8, %v4445_v38 }
 0x4a8   :  { %4471 = vst.msk [vmem:[%s13469_s1 + $0xf0] sm:$0x3] %vm4464_vm9, %v4445_v38  ;;  %4469 = vst.msk [vmem:[%s13469_s1 + $0xb0] sm:$0x3] %vm4464_vm9, %v4443_v39  ;;  %4910 = vrot.lane.b32.xlu1 %v11584_v60, %s6106_s15 }
 0x4a9   :  { %4468 = vst.msk [vmem:[%s13469_s1 + $0x90] sm:$0xfc] %vm4462_vm8, %v4443_v39  ;;  %4908 = vrot.lane.b32.xlu0 %v11586_v61, %s6106_s15 }
 0x4aa   :  { %v4449_v40 = vpop.permute.xlu1 %4448 }
 0x4ab   :  { %v4447_v41 = vpop.permute.xlu0 %4446  ;;  %4474 = vst.msk [vmem:[%s13469_s1 + $0x150] sm:$0xfc] %vm4462_vm8, %v4449_v40 }
 0x4ac   :  { %4475 = vst.msk [vmem:[%s13469_s1 + $0x170] sm:$0x3] %vm4464_vm9, %v4449_v40  ;;  %4473 = vst.msk [vmem:[%s13469_s1 + $0x130] sm:$0x3] %vm4464_vm9, %v4447_v41  ;;  %4914 = vrot.lane.b32.xlu1 %v11608_v30, %s6106_s15  ;;  %v5345_v40 = vld [vmem:[%s13469_s1 + $0xe0] sm:$0x3] }
 0x4ad   :  { %4472 = vst.msk [vmem:[%s13469_s1 + $0x110] sm:$0xfc] %vm4462_vm8, %v4447_v41  ;;  %4912 = vrot.lane.b32.xlu0 %v11610_v31, %s6106_s15  ;;  %v5344_v41 = vld [vmem:[%s13469_s1 + $0xc0] sm:$0xfc] }
 0x4ae   :  { %v4453_v42 = vpop.permute.xlu1 %4452 }
 0x4af   :  { %v4451_v43 = vpop.permute.xlu0 %4450  ;;  %4478 = vst.msk [vmem:[%s13469_s1 + $0x1d0] sm:$0xfc] %vm4462_vm8, %v4453_v42 }
 0x4b0   :  { %4479 = vst.msk [vmem:[%s13469_s1 + $0x1f0] sm:$0x3] %vm4464_vm9, %v4453_v42  ;;  %4477 = vst.msk [vmem:[%s13469_s1 + $0x1b0] sm:$0x3] %vm4464_vm9, %v4451_v43  ;;  %4968 = vrot.lane.b32.xlu1 %v11536_v44, %s6107_s22  ;;  %vm4992_vm9 = vcmask 681624  }
 0x4b1   :  { %4476 = vst.msk [vmem:[%s13469_s1 + $0x190] sm:$0xfc] %vm4462_vm8, %v4451_v43  ;;  %4966 = vrot.lane.b32.xlu0 %v11538_v45, %s6107_s22  ;;  %vm4990_vm8 = vcmask 687770  }
 0x4b2   :  { %v4507_v46 = vpop.permute.xlu1 %4506 }
 0x4b3   :  { %v4505_v47 = vpop.permute.xlu0 %4504  ;;  %4532 = vst.msk [vmem:[%s13469_s1 + $0x50] sm:$0xfc] %vm4528_vm10, %v4507_v46 }
 0x4b4   :  { %4533 = vst.msk [vmem:[%s13469_s1 + $0x70] sm:$0x3] %vm4530_vm11, %v4507_v46  ;;  %4531 = vst.msk [vmem:[%s13469_s1 + $0x30] sm:$0x3] %vm4530_vm11, %v4505_v47  ;;  %4972 = vrot.lane.b32.xlu1 %v11560_v8, %s6107_s22  ;;  %v5347_v46 = vld [vmem:[%s13469_s1 + $0x120] sm:$0x3] }
 0x4b5   :  { %4529 = vst.msk [vmem:[%s13469_s1 + $0x10] sm:$0xfc] %vm4528_vm10, %v4505_v47  ;;  %4970 = vrot.lane.b32.xlu0 %v11562_v9, %s6107_s22  ;;  %v5346_v47 = vld [vmem:[%s13469_s1 + $0x100] sm:$0xfc] }
 0x4b6   :  { %v4511_v48 = vpop.permute.xlu1 %4510 }
 0x4b7   :  { %v4509_v49 = vpop.permute.xlu0 %4508  ;;  %4536 = vst.msk [vmem:[%s13469_s1 + $0xd0] sm:$0xfc] %vm4528_vm10, %v4511_v48 }
 0x4b8   :  { %4537 = vst.msk [vmem:[%s13469_s1 + $0xf0] sm:$0x3] %vm4530_vm11, %v4511_v48  ;;  %4535 = vst.msk [vmem:[%s13469_s1 + $0xb0] sm:$0x3] %vm4530_vm11, %v4509_v49  ;;  %4976 = vrot.lane.b32.xlu1 %v11584_v60, %s6107_s22 }
 0x4b9   :  { %4534 = vst.msk [vmem:[%s13469_s1 + $0x90] sm:$0xfc] %vm4528_vm10, %v4509_v49  ;;  %4974 = vrot.lane.b32.xlu0 %v11586_v61, %s6107_s22 }
 0x4ba   :  { %v4515_v14 = vpop.permute.xlu1 %4514 }
 0x4bb   :  { %v4513_v15 = vpop.permute.xlu0 %4512  ;;  %4540 = vst.msk [vmem:[%s13469_s1 + $0x150] sm:$0xfc] %vm4528_vm10, %v4515_v14 }
 0x4bc   :  { %4541 = vst.msk [vmem:[%s13469_s1 + $0x170] sm:$0x3] %vm4530_vm11, %v4515_v14  ;;  %4539 = vst.msk [vmem:[%s13469_s1 + $0x130] sm:$0x3] %vm4530_vm11, %v4513_v15  ;;  %4980 = vrot.lane.b32.xlu1 %v11608_v30, %s6107_s22  ;;  %v5349_v14 = vld [vmem:[%s13469_s1 + $0x160] sm:$0x3] }
 0x4bd   :  { %4538 = vst.msk [vmem:[%s13469_s1 + $0x110] sm:$0xfc] %vm4528_vm10, %v4513_v15  ;;  %4978 = vrot.lane.b32.xlu0 %v11610_v31, %s6107_s22  ;;  %v5348_v15 = vld [vmem:[%s13469_s1 + $0x140] sm:$0xfc] }
 0x4be   :  { %v4519_v50 = vpop.permute.xlu1 %4518 }
 0x4bf   :  { %v4517_v51 = vpop.permute.xlu0 %4516  ;;  %4544 = vst.msk [vmem:[%s13469_s1 + $0x1d0] sm:$0xfc] %vm4528_vm10, %v4519_v50 }
 0x4c0   :  { %4545 = vst.msk [vmem:[%s13469_s1 + $0x1f0] sm:$0x3] %vm4530_vm11, %v4519_v50  ;;  %4543 = vst.msk [vmem:[%s13469_s1 + $0x1b0] sm:$0x3] %vm4530_vm11, %v4517_v51  ;;  %5034 = vrot.lane.b32.xlu1 %v11536_v44, %s6108_s19  ;;  %vm5058_vm11 = vcmask 829104  }
 0x4c1   :  { %4542 = vst.msk [vmem:[%s13469_s1 + $0x190] sm:$0xfc] %vm4528_vm10, %v4517_v51  ;;  %5032 = vrot.lane.b32.xlu0 %v11538_v45, %s6108_s19  ;;  %vm5056_vm10 = vcmask 835250  }
 0x4c2   :  { %v4573_v52 = vpop.permute.xlu1 %4572 }
 0x4c3   :  { %v4571_v53 = vpop.permute.xlu0 %4570  ;;  %4598 = vst.msk [vmem:[%s13469_s1 + $0x50] sm:$0xfc] %vm4594_vm12, %v4573_v52 }
 0x4c4   :  { %4599 = vst.msk [vmem:[%s13469_s1 + $0x70] sm:$0x3] %vm4596_vm13, %v4573_v52  ;;  %4597 = vst.msk [vmem:[%s13469_s1 + $0x30] sm:$0x3] %vm4596_vm13, %v4571_v53  ;;  %5038 = vrot.lane.b32.xlu1 %v11560_v8, %s6108_s19  ;;  %v5351_v52 = vld [vmem:[%s13469_s1 + $0x1a0] sm:$0x3] }
 0x4c5   :  { %4595 = vst.msk [vmem:[%s13469_s1 + $0x10] sm:$0xfc] %vm4594_vm12, %v4571_v53  ;;  %5036 = vrot.lane.b32.xlu0 %v11562_v9, %s6108_s19  ;;  %v5350_v53 = vld [vmem:[%s13469_s1 + $0x180] sm:$0xfc] }
 0x4c6   :  { %v4577_v22 = vpop.permute.xlu1 %4576 }
 0x4c7   :  { %v4575_v23 = vpop.permute.xlu0 %4574  ;;  %4602 = vst.msk [vmem:[%s13469_s1 + $0xd0] sm:$0xfc] %vm4594_vm12, %v4577_v22 }
 0x4c8   :  { %4603 = vst.msk [vmem:[%s13469_s1 + $0xf0] sm:$0x3] %vm4596_vm13, %v4577_v22  ;;  %4601 = vst.msk [vmem:[%s13469_s1 + $0xb0] sm:$0x3] %vm4596_vm13, %v4575_v23  ;;  %5042 = vrot.lane.b32.xlu1 %v11584_v60, %s6108_s19 }
 0x4c9   :  { %4600 = vst.msk [vmem:[%s13469_s1 + $0x90] sm:$0xfc] %vm4594_vm12, %v4575_v23  ;;  %5040 = vrot.lane.b32.xlu0 %v11586_v61, %s6108_s19 }
 0x4ca   :  { %v4581_v24 = vpop.permute.xlu1 %4580 }
 0x4cb   :  { %v4579_v25 = vpop.permute.xlu0 %4578  ;;  %4606 = vst.msk [vmem:[%s13469_s1 + $0x150] sm:$0xfc] %vm4594_vm12, %v4581_v24 }
 0x4cc   :  { %4607 = vst.msk [vmem:[%s13469_s1 + $0x170] sm:$0x3] %vm4596_vm13, %v4581_v24  ;;  %4605 = vst.msk [vmem:[%s13469_s1 + $0x130] sm:$0x3] %vm4596_vm13, %v4579_v25  ;;  %5046 = vrot.lane.b32.xlu1 %v11608_v30, %s6108_s19  ;;  %v5353_v24 = vld [vmem:[%s13469_s1 + $0x1e0] sm:$0x3] }
 0x4cd   :  { %4604 = vst.msk [vmem:[%s13469_s1 + $0x110] sm:$0xfc] %vm4594_vm12, %v4579_v25  ;;  %5044 = vrot.lane.b32.xlu0 %v11610_v31, %s6108_s19  ;;  %v5352_v25 = vld [vmem:[%s13469_s1 + $0x1c0] sm:$0xfc] }
 0x4ce   :  { %v4585_v54 = vpop.permute.xlu1 %4584 }
 0x4cf   :  { %v4583_v55 = vpop.permute.xlu0 %4582  ;;  %4610 = vst.msk [vmem:[%s13469_s1 + $0x1d0] sm:$0xfc] %vm4594_vm12, %v4585_v54 }
 0x4d0   :  { %4611 = vst.msk [vmem:[%s13469_s1 + $0x1f0] sm:$0x3] %vm4596_vm13, %v4585_v54  ;;  %4609 = vst.msk [vmem:[%s13469_s1 + $0x1b0] sm:$0x3] %vm4596_vm13, %v4583_v55  ;;  %5100 = vrot.lane.b32.xlu1 %v11536_v44, %s6107_s22  ;;  %vm5124_vm13 = vcmask 698024  }
 0x4d1   :  { %4608 = vst.msk [vmem:[%s13469_s1 + $0x190] sm:$0xfc] %vm4594_vm12, %v4583_v55  ;;  %5098 = vrot.lane.b32.xlu0 %v11538_v45, %s6107_s22  ;;  %vm5122_vm12 = vcmask 704170  }
 0x4d2   :  { %v4639_v56 = vpop.permute.xlu1 %4638 }
 0x4d3   :  { %v4637_v57 = vpop.permute.xlu0 %4636  ;;  %4664 = vst.msk [vmem:[%s13469_s1 + $0x50] sm:$0xfc] %vm4660_vm14, %v4639_v56 }
 0x4d4   :  { %4665 = vst.msk [vmem:[%s13469_s1 + $0x70] sm:$0x3] %vm4662_vm15, %v4639_v56  ;;  %4663 = vst.msk [vmem:[%s13469_s1 + $0x30] sm:$0x3] %vm4662_vm15, %v4637_v57  ;;  %5104 = vrot.lane.b32.xlu1 %v11560_v8, %s6107_s22 }
 0x4d5   :  { %4661 = vst.msk [vmem:[%s13469_s1 + $0x10] sm:$0xfc] %vm4660_vm14, %v4637_v57  ;;  %5102 = vrot.lane.b32.xlu0 %v11562_v9, %s6107_s22 }
 0x4d6   :  { %v4643_v58 = vpop.permute.xlu1 %4642 }
 0x4d7   :  { %v4641_v59 = vpop.permute.xlu0 %4640  ;;  %4668 = vst.msk [vmem:[%s13469_s1 + $0xd0] sm:$0xfc] %vm4660_vm14, %v4643_v58 }
 0x4d8   :  { %4669 = vst.msk [vmem:[%s13469_s1 + $0xf0] sm:$0x3] %vm4662_vm15, %v4643_v58  ;;  %4667 = vst.msk [vmem:[%s13469_s1 + $0xb0] sm:$0x3] %vm4662_vm15, %v4641_v59  ;;  %5108 = vrot.lane.b32.xlu1 %v11584_v60, %s6107_s22 }
 0x4d9   :  { %4666 = vst.msk [vmem:[%s13469_s1 + $0x90] sm:$0xfc] %vm4660_vm14, %v4641_v59  ;;  %5106 = vrot.lane.b32.xlu0 %v11586_v61, %s6107_s22 }
 0x4da   :  { %v4647_v62 = vpop.permute.xlu1 %4646 }
 0x4db   :  { %v4645_v63 = vpop.permute.xlu0 %4644  ;;  %4672 = vst.msk [vmem:[%s13469_s1 + $0x150] sm:$0xfc] %vm4660_vm14, %v4647_v62 }
 0x4dc   :  { %4673 = vst.msk [vmem:[%s13469_s1 + $0x170] sm:$0x3] %vm4662_vm15, %v4647_v62  ;;  %4671 = vst.msk [vmem:[%s13469_s1 + $0x130] sm:$0x3] %vm4662_vm15, %v4645_v63  ;;  %5112 = vrot.lane.b32.xlu1 %v11608_v30, %s6107_s22 }
 0x4dd   :  { %4670 = vst.msk [vmem:[%s13469_s1 + $0x110] sm:$0xfc] %vm4660_vm14, %v4645_v63  ;;  %5110 = vrot.lane.b32.xlu0 %v11610_v31, %s6107_s22 }
 0x4de   :  { %v4651_v0 = vpop.permute.xlu1 %4650 }
 0x4df   :  { %v4649_v1 = vpop.permute.xlu0 %4648  ;;  %4676 = vst.msk [vmem:[%s13469_s1 + $0x1d0] sm:$0xfc] %vm4660_vm14, %v4651_v0 }
 0x4e0   :  { %4677 = vst.msk [vmem:[%s13469_s1 + $0x1f0] sm:$0x3] %vm4662_vm15, %v4651_v0  ;;  %4675 = vst.msk [vmem:[%s13469_s1 + $0x1b0] sm:$0x3] %vm4662_vm15, %v4649_v1  ;;  %5166 = vrot.lane.b32.xlu1 %v11536_v44, %s6106_s15  ;;  %vm5190_vm15 = vcmask 689824  }
 0x4e1   :  { %4674 = vst.msk [vmem:[%s13469_s1 + $0x190] sm:$0xfc] %vm4660_vm14, %v4649_v1  ;;  %5164 = vrot.lane.b32.xlu0 %v11538_v45, %s6106_s15  ;;  %vm5188_vm14 = vcmask 695970  }
 0x4e2   :  { %v4705_v6 = vpop.permute.xlu1 %4704 }
 0x4e3   :  { %v4703_v7 = vpop.permute.xlu0 %4702  ;;  %4730 = vst.msk [vmem:[%s13469_s1 + $0x50] sm:$0xfc] %vm4726_vm0, %v4705_v6 }
 0x4e4   :  { %4731 = vst.msk [vmem:[%s13469_s1 + $0x70] sm:$0x3] %vm4728_vm1, %v4705_v6  ;;  %4729 = vst.msk [vmem:[%s13469_s1 + $0x30] sm:$0x3] %vm4728_vm1, %v4703_v7  ;;  %5170 = vrot.lane.b32.xlu1 %v11560_v8, %s6106_s15 }
 0x4e5   :  { %4727 = vst.msk [vmem:[%s13469_s1 + $0x10] sm:$0xfc] %vm4726_vm0, %v4703_v7  ;;  %5168 = vrot.lane.b32.xlu0 %v11562_v9, %s6106_s15 }
 0x4e6   :  { %v4709_v3 = vpop.permute.xlu1 %4708 }
 0x4e7   :  { %v4707_v5 = vpop.permute.xlu0 %4706  ;;  %4734 = vst.msk [vmem:[%s13469_s1 + $0xd0] sm:$0xfc] %vm4726_vm0, %v4709_v3 }
 0x4e8   :  { %4735 = vst.msk [vmem:[%s13469_s1 + $0xf0] sm:$0x3] %vm4728_vm1, %v4709_v3  ;;  %4733 = vst.msk [vmem:[%s13469_s1 + $0xb0] sm:$0x3] %vm4728_vm1, %v4707_v5  ;;  %5174 = vrot.lane.b32.xlu1 %v11584_v60, %s6106_s15 }
 0x4e9   :  { %4732 = vst.msk [vmem:[%s13469_s1 + $0x90] sm:$0xfc] %vm4726_vm0, %v4707_v5  ;;  %5172 = vrot.lane.b32.xlu0 %v11586_v61, %s6106_s15 }
 0x4ea   :  { %v4713_v12 = vpop.permute.xlu1 %4712 }
 0x4eb   :  { %v4711_v13 = vpop.permute.xlu0 %4710  ;;  %4738 = vst.msk [vmem:[%s13469_s1 + $0x150] sm:$0xfc] %vm4726_vm0, %v4713_v12 }
 0x4ec   :  { %4739 = vst.msk [vmem:[%s13469_s1 + $0x170] sm:$0x3] %vm4728_vm1, %v4713_v12  ;;  %4737 = vst.msk [vmem:[%s13469_s1 + $0x130] sm:$0x3] %vm4728_vm1, %v4711_v13  ;;  %5178 = vrot.lane.b32.xlu1 %v11608_v30, %s6106_s15 }
 0x4ed   :  { %4736 = vst.msk [vmem:[%s13469_s1 + $0x110] sm:$0xfc] %vm4726_vm0, %v4711_v13  ;;  %5176 = vrot.lane.b32.xlu0 %v11610_v31, %s6106_s15 }
 0x4ee   :  { %v4717_v10 = vpop.permute.xlu1 %4716 }
 0x4ef   :  { %v4715_v11 = vpop.permute.xlu0 %4714  ;;  %4742 = vst.msk [vmem:[%s13469_s1 + $0x1d0] sm:$0xfc] %vm4726_vm0, %v4717_v10 }
 0x4f0   :  { %4743 = vst.msk [vmem:[%s13469_s1 + $0x1f0] sm:$0x3] %vm4728_vm1, %v4717_v10  ;;  %4741 = vst.msk [vmem:[%s13469_s1 + $0x1b0] sm:$0x3] %vm4728_vm1, %v4715_v11  ;;  %5232 = vrot.lane.b32.xlu1 %v11536_v44, %s6109_s8  ;;  %vm5256_vm1 = vcmask 837424  }
 0x4f1   :  { %4740 = vst.msk [vmem:[%s13469_s1 + $0x190] sm:$0xfc] %vm4726_vm0, %v4715_v11  ;;  %5230 = vrot.lane.b32.xlu0 %v11538_v45, %s6109_s8  ;;  %vm5254_vm0 = vcmask 843570  }
 0x4f2   :  { %v4771_v16 = vpop.permute.xlu1 %4770 }
 0x4f3   :  { %v4769_v17 = vpop.permute.xlu0 %4768  ;;  %4796 = vst.msk [vmem:[%s13469_s1 + $0x50] sm:$0xfc] %vm4792_vm2, %v4771_v16 }
 0x4f4   :  { %4797 = vst.msk [vmem:[%s13469_s1 + $0x70] sm:$0x3] %vm4794_vm3, %v4771_v16  ;;  %4795 = vst.msk [vmem:[%s13469_s1 + $0x30] sm:$0x3] %vm4794_vm3, %v4769_v17  ;;  %5236 = vrot.lane.b32.xlu1 %v11560_v8, %s6109_s8 }
 0x4f5   :  { %4793 = vst.msk [vmem:[%s13469_s1 + $0x10] sm:$0xfc] %vm4792_vm2, %v4769_v17  ;;  %5234 = vrot.lane.b32.xlu0 %v11562_v9, %s6109_s8 }
 0x4f6   :  { %v4775_v18 = vpop.permute.xlu1 %4774 }
 0x4f7   :  { %v4773_v19 = vpop.permute.xlu0 %4772  ;;  %4800 = vst.msk [vmem:[%s13469_s1 + $0xd0] sm:$0xfc] %vm4792_vm2, %v4775_v18 }
 0x4f8   :  { %4801 = vst.msk [vmem:[%s13469_s1 + $0xf0] sm:$0x3] %vm4794_vm3, %v4775_v18  ;;  %4799 = vst.msk [vmem:[%s13469_s1 + $0xb0] sm:$0x3] %vm4794_vm3, %v4773_v19  ;;  %5240 = vrot.lane.b32.xlu1 %v11584_v60, %s6109_s8 }
 0x4f9   :  { %4798 = vst.msk [vmem:[%s13469_s1 + $0x90] sm:$0xfc] %vm4792_vm2, %v4773_v19  ;;  %5238 = vrot.lane.b32.xlu0 %v11586_v61, %s6109_s8 }
 0x4fa   :  { %v4779_v20 = vpop.permute.xlu1 %4778 }
 0x4fb   :  { %v4777_v21 = vpop.permute.xlu0 %4776  ;;  %4804 = vst.msk [vmem:[%s13469_s1 + $0x150] sm:$0xfc] %vm4792_vm2, %v4779_v20 }
 0x4fc   :  { %4805 = vst.msk [vmem:[%s13469_s1 + $0x170] sm:$0x3] %vm4794_vm3, %v4779_v20  ;;  %4803 = vst.msk [vmem:[%s13469_s1 + $0x130] sm:$0x3] %vm4794_vm3, %v4777_v21  ;;  %5244 = vrot.lane.b32.xlu1 %v11608_v30, %s6109_s8 }
 0x4fd   :  { %4802 = vst.msk [vmem:[%s13469_s1 + $0x110] sm:$0xfc] %vm4792_vm2, %v4777_v21  ;;  %5242 = vrot.lane.b32.xlu0 %v11610_v31, %s6109_s8 }
 0x4fe   :  { %v4783_v26 = vpop.permute.xlu1 %4782 }
 0x4ff   :  { %v4781_v27 = vpop.permute.xlu0 %4780  ;;  %4808 = vst.msk [vmem:[%s13469_s1 + $0x1d0] sm:$0xfc] %vm4792_vm2, %v4783_v26 }
 0x500   :  { %4809 = vst.msk [vmem:[%s13469_s1 + $0x1f0] sm:$0x3] %vm4794_vm3, %v4783_v26  ;;  %4807 = vst.msk [vmem:[%s13469_s1 + $0x1b0] sm:$0x3] %vm4794_vm3, %v4781_v27  ;;  %5298 = vrot.lane.b32.xlu1 %v11536_v44, %s6110_s29  ;;  %vm5322_vm3 = vcmask 845624  }
 0x501   :  { %4806 = vst.msk [vmem:[%s13469_s1 + $0x190] sm:$0xfc] %vm4792_vm2, %v4781_v27  ;;  %5296 = vrot.lane.b32.xlu0 %v11538_v45, %s6110_s29  ;;  %vm5320_vm2 = vcmask 851770  }
 0x502   :  { %v4837_v28 = vpop.permute.xlu1 %4836 }
 0x503   :  { %v4835_v29 = vpop.permute.xlu0 %4834  ;;  %4862 = vst.msk [vmem:[%s13469_s1 + $0x50] sm:$0xfc] %vm4858_vm4, %v4837_v28 }
 0x504   :  { %4863 = vst.msk [vmem:[%s13469_s1 + $0x70] sm:$0x3] %vm4860_vm5, %v4837_v28  ;;  %4861 = vst.msk [vmem:[%s13469_s1 + $0x30] sm:$0x3] %vm4860_vm5, %v4835_v29  ;;  %5302 = vrot.lane.b32.xlu1 %v11560_v8, %s6110_s29 }
 0x505   :  { %4859 = vst.msk [vmem:[%s13469_s1 + $0x10] sm:$0xfc] %vm4858_vm4, %v4835_v29  ;;  %5300 = vrot.lane.b32.xlu0 %v11562_v9, %s6110_s29 }
 0x506   :  { %v4841_v44 = vpop.permute.xlu1 %4840 }
 0x507   :  { %v4839_v45 = vpop.permute.xlu0 %4838  ;;  %4866 = vst.msk [vmem:[%s13469_s1 + $0xd0] sm:$0xfc] %vm4858_vm4, %v4841_v44 }
 0x508   :  { %4867 = vst.msk [vmem:[%s13469_s1 + $0xf0] sm:$0x3] %vm4860_vm5, %v4841_v44  ;;  %4865 = vst.msk [vmem:[%s13469_s1 + $0xb0] sm:$0x3] %vm4860_vm5, %v4839_v45  ;;  %5306 = vrot.lane.b32.xlu1 %v11584_v60, %s6110_s29 }
 0x509   :  { %4864 = vst.msk [vmem:[%s13469_s1 + $0x90] sm:$0xfc] %vm4858_vm4, %v4839_v45  ;;  %5304 = vrot.lane.b32.xlu0 %v11586_v61, %s6110_s29 }
 0x50a   :  { %v4845_v8 = vpop.permute.xlu1 %4844 }
 0x50b   :  { %v4843_v9 = vpop.permute.xlu0 %4842  ;;  %4870 = vst.msk [vmem:[%s13469_s1 + $0x150] sm:$0xfc] %vm4858_vm4, %v4845_v8 }
 0x50c   :  { %4871 = vst.msk [vmem:[%s13469_s1 + $0x170] sm:$0x3] %vm4860_vm5, %v4845_v8  ;;  %4869 = vst.msk [vmem:[%s13469_s1 + $0x130] sm:$0x3] %vm4860_vm5, %v4843_v9  ;;  %5310 = vrot.lane.b32.xlu1 %v11608_v30, %s6110_s29 }
 0x50d   :  { %4868 = vst.msk [vmem:[%s13469_s1 + $0x110] sm:$0xfc] %vm4858_vm4, %v4843_v9  ;;  %5308 = vrot.lane.b32.xlu0 %v11610_v31, %s6110_s29 }
 0x50e   :  { %v4849_v60 = vpop.permute.xlu1 %4848 }
 0x50f   :  { %v4847_v61 = vpop.permute.xlu0 %4846  ;;  %4874 = vst.msk [vmem:[%s13469_s1 + $0x1d0] sm:$0xfc] %vm4858_vm4, %v4849_v60 }
 0x510   :  { %4875 = vst.msk [vmem:[%s13469_s1 + $0x1f0] sm:$0x3] %vm4860_vm5, %v4849_v60  ;;  %4873 = vst.msk [vmem:[%s13469_s1 + $0x1b0] sm:$0x3] %vm4860_vm5, %v4847_v61  ;;  %5372 = vrot.lane.b32.xlu1 %v5339_v2, %s6111_s23  ;;  %vm5418_vm5 = vcmask 326818  }
 0x511   :  { %4872 = vst.msk [vmem:[%s13469_s1 + $0x190] sm:$0xfc] %vm4858_vm4, %v4847_v61  ;;  %5370 = vrot.lane.b32.xlu0 %v5338_v4, %s6111_s23  ;;  %vm5420_vm4 = vcmask 320672  }
 0x512   :  { %v4903_v30 = vpop.permute.xlu1 %4902 }
 0x513   :  { %v4901_v31 = vpop.permute.xlu0 %4900  ;;  %4928 = vst.msk [vmem:[%s13469_s1 + $0x50] sm:$0xfc] %vm4924_vm6, %v4903_v30 }
 0x514   :  { %4929 = vst.msk [vmem:[%s13469_s1 + $0x70] sm:$0x3] %vm4926_vm7, %v4903_v30  ;;  %4927 = vst.msk [vmem:[%s13469_s1 + $0x30] sm:$0x3] %vm4926_vm7, %v4901_v31  ;;  %5376 = vrot.lane.b32.xlu1 %v5341_v34, %s6111_s23 }
 0x515   :  { %4925 = vst.msk [vmem:[%s13469_s1 + $0x10] sm:$0xfc] %vm4924_vm6, %v4901_v31  ;;  %5374 = vrot.lane.b32.xlu0 %v5340_v35, %s6111_s23 }
 0x516   :  { %v4907_v32 = vpop.permute.xlu1 %4906 }
 0x517   :  { %v4905_v33 = vpop.permute.xlu0 %4904  ;;  %4932 = vst.msk [vmem:[%s13469_s1 + $0xd0] sm:$0xfc] %vm4924_vm6, %v4907_v32 }
 0x518   :  { %4933 = vst.msk [vmem:[%s13469_s1 + $0xf0] sm:$0x3] %vm4926_vm7, %v4907_v32  ;;  %4931 = vst.msk [vmem:[%s13469_s1 + $0xb0] sm:$0x3] %vm4926_vm7, %v4905_v33  ;;  %5380 = vrot.lane.b32.xlu1 %v5343_v36, %s6111_s23 }
 0x519   :  { %4930 = vst.msk [vmem:[%s13469_s1 + $0x90] sm:$0xfc] %vm4924_vm6, %v4905_v33  ;;  %5378 = vrot.lane.b32.xlu0 %v5342_v37, %s6111_s23 }
 0x51a   :  { %v4911_v38 = vpop.permute.xlu1 %4910 }
 0x51b   :  { %v4909_v39 = vpop.permute.xlu0 %4908  ;;  %4936 = vst.msk [vmem:[%s13469_s1 + $0x150] sm:$0xfc] %vm4924_vm6, %v4911_v38 }
 0x51c   :  { %4937 = vst.msk [vmem:[%s13469_s1 + $0x170] sm:$0x3] %vm4926_vm7, %v4911_v38  ;;  %4935 = vst.msk [vmem:[%s13469_s1 + $0x130] sm:$0x3] %vm4926_vm7, %v4909_v39  ;;  %5384 = vrot.lane.b32.xlu1 %v5345_v40, %s6111_s23 }
 0x51d   :  { %4934 = vst.msk [vmem:[%s13469_s1 + $0x110] sm:$0xfc] %vm4924_vm6, %v4909_v39  ;;  %5382 = vrot.lane.b32.xlu0 %v5344_v41, %s6111_s23 }
 0x51e   :  { %v4915_v42 = vpop.permute.xlu1 %4914 }
 0x51f   :  { %v4913_v43 = vpop.permute.xlu0 %4912  ;;  %4940 = vst.msk [vmem:[%s13469_s1 + $0x1d0] sm:$0xfc] %vm4924_vm6, %v4915_v42 }
 0x520   :  { %4941 = vst.msk [vmem:[%s13469_s1 + $0x1f0] sm:$0x3] %vm4926_vm7, %v4915_v42  ;;  %4939 = vst.msk [vmem:[%s13469_s1 + $0x1b0] sm:$0x3] %vm4926_vm7, %v4913_v43  ;;  %5388 = vrot.lane.b32.xlu1 %v5347_v46, %s6111_s23  ;;  %vm5614_vm7 = vcmask 1015618  }
 0x521   :  { %4938 = vst.msk [vmem:[%s13469_s1 + $0x190] sm:$0xfc] %vm4924_vm6, %v4913_v43  ;;  %5386 = vrot.lane.b32.xlu0 %v5346_v47, %s6111_s23  ;;  %vm5616_vm6 = vcmask 1009472  }
 0x522   :  { %v4969_v48 = vpop.permute.xlu1 %4968 }
 0x523   :  { %v4967_v49 = vpop.permute.xlu0 %4966  ;;  %4994 = vst.msk [vmem:[%s13469_s1 + $0x50] sm:$0xfc] %vm4990_vm8, %v4969_v48 }
 0x524   :  { %4995 = vst.msk [vmem:[%s13469_s1 + $0x70] sm:$0x3] %vm4992_vm9, %v4969_v48  ;;  %4993 = vst.msk [vmem:[%s13469_s1 + $0x30] sm:$0x3] %vm4992_vm9, %v4967_v49  ;;  %5392 = vrot.lane.b32.xlu1 %v5349_v14, %s6111_s23 }
 0x525   :  { %4991 = vst.msk [vmem:[%s13469_s1 + $0x10] sm:$0xfc] %vm4990_vm8, %v4967_v49  ;;  %5390 = vrot.lane.b32.xlu0 %v5348_v15, %s6111_s23 }
 0x526   :  { %v4973_v50 = vpop.permute.xlu1 %4972 }
 0x527   :  { %v4971_v51 = vpop.permute.xlu0 %4970  ;;  %4998 = vst.msk [vmem:[%s13469_s1 + $0xd0] sm:$0xfc] %vm4990_vm8, %v4973_v50 }
 0x528   :  { %4999 = vst.msk [vmem:[%s13469_s1 + $0xf0] sm:$0x3] %vm4992_vm9, %v4973_v50  ;;  %4997 = vst.msk [vmem:[%s13469_s1 + $0xb0] sm:$0x3] %vm4992_vm9, %v4971_v51  ;;  %5396 = vrot.lane.b32.xlu1 %v5351_v52, %s6111_s23 }
 0x529   :  { %4996 = vst.msk [vmem:[%s13469_s1 + $0x90] sm:$0xfc] %vm4990_vm8, %v4971_v51  ;;  %5394 = vrot.lane.b32.xlu0 %v5350_v53, %s6111_s23 }
 0x52a   :  { %v4977_v22 = vpop.permute.xlu1 %4976 }
 0x52b   :  { %v4975_v23 = vpop.permute.xlu0 %4974  ;;  %5002 = vst.msk [vmem:[%s13469_s1 + $0x150] sm:$0xfc] %vm4990_vm8, %v4977_v22 }
 0x52c   :  { %5003 = vst.msk [vmem:[%s13469_s1 + $0x170] sm:$0x3] %vm4992_vm9, %v4977_v22  ;;  %5001 = vst.msk [vmem:[%s13469_s1 + $0x130] sm:$0x3] %vm4992_vm9, %v4975_v23  ;;  %5400 = vrot.lane.b32.xlu1 %v5353_v24, %s6111_s23 }
 0x52d   :  { %5000 = vst.msk [vmem:[%s13469_s1 + $0x110] sm:$0xfc] %vm4990_vm8, %v4975_v23  ;;  %5398 = vrot.lane.b32.xlu0 %v5352_v25, %s6111_s23 }
 0x52e   :  { %v4981_v54 = vpop.permute.xlu1 %4980 }
 0x52f   :  { %v4979_v55 = vpop.permute.xlu0 %4978  ;;  %5006 = vst.msk [vmem:[%s13469_s1 + $0x1d0] sm:$0xfc] %vm4990_vm8, %v4981_v54 }
 0x530   :  { %5007 = vst.msk [vmem:[%s13469_s1 + $0x1f0] sm:$0x3] %vm4992_vm9, %v4981_v54  ;;  %5005 = vst.msk [vmem:[%s13469_s1 + $0x1b0] sm:$0x3] %vm4992_vm9, %v4979_v55  ;;  %vm5516_vm9 = vcmask 162818  }
 0x531   :  { %5004 = vst.msk [vmem:[%s13469_s1 + $0x190] sm:$0xfc] %vm4990_vm8, %v4979_v55  ;;  %vm5518_vm8 = vcmask 156672  }
 0x532   :  { %v5035_v56 = vpop.permute.xlu1 %5034 }
 0x533   :  { %v5033_v57 = vpop.permute.xlu0 %5032  ;;  %5060 = vst.msk [vmem:[%s13469_s1 + $0x50] sm:$0xfc] %vm5056_vm10, %v5035_v56 }
 0x534   :  { %5061 = vst.msk [vmem:[%s13469_s1 + $0x70] sm:$0x3] %vm5058_vm11, %v5035_v56  ;;  %5059 = vst.msk [vmem:[%s13469_s1 + $0x30] sm:$0x3] %vm5058_vm11, %v5033_v57 }
 0x535   :  { %5057 = vst.msk [vmem:[%s13469_s1 + $0x10] sm:$0xfc] %vm5056_vm10, %v5033_v57 }
 0x536   :  { %v5039_v58 = vpop.permute.xlu1 %5038 }
 0x537   :  { %v5037_v59 = vpop.permute.xlu0 %5036  ;;  %5064 = vst.msk [vmem:[%s13469_s1 + $0xd0] sm:$0xfc] %vm5056_vm10, %v5039_v58 }
 0x538   :  { %5065 = vst.msk [vmem:[%s13469_s1 + $0xf0] sm:$0x3] %vm5058_vm11, %v5039_v58  ;;  %5063 = vst.msk [vmem:[%s13469_s1 + $0xb0] sm:$0x3] %vm5058_vm11, %v5037_v59 }
 0x539   :  { %5062 = vst.msk [vmem:[%s13469_s1 + $0x90] sm:$0xfc] %vm5056_vm10, %v5037_v59 }
 0x53a   :  { %v5043_v62 = vpop.permute.xlu1 %5042 }
 0x53b   :  { %v5041_v63 = vpop.permute.xlu0 %5040  ;;  %5068 = vst.msk [vmem:[%s13469_s1 + $0x150] sm:$0xfc] %vm5056_vm10, %v5043_v62 }
 0x53c   :  { %5069 = vst.msk [vmem:[%s13469_s1 + $0x170] sm:$0x3] %vm5058_vm11, %v5043_v62  ;;  %5067 = vst.msk [vmem:[%s13469_s1 + $0x130] sm:$0x3] %vm5058_vm11, %v5041_v63 }
 0x53d   :  { %5066 = vst.msk [vmem:[%s13469_s1 + $0x110] sm:$0xfc] %vm5056_vm10, %v5041_v63 }
 0x53e   :  { %v5047_v0 = vpop.permute.xlu1 %5046 }
 0x53f   :  { %v5045_v1 = vpop.permute.xlu0 %5044  ;;  %5072 = vst.msk [vmem:[%s13469_s1 + $0x1d0] sm:$0xfc] %vm5056_vm10, %v5047_v0 }
 0x540   :  { %5073 = vst.msk [vmem:[%s13469_s1 + $0x1f0] sm:$0x3] %vm5058_vm11, %v5047_v0  ;;  %5071 = vst.msk [vmem:[%s13469_s1 + $0x1b0] sm:$0x3] %vm5058_vm11, %v5045_v1  ;;  %vm5718_vm11 = vcmask 123904  }
 0x541   :  { %5070 = vst.msk [vmem:[%s13469_s1 + $0x190] sm:$0xfc] %vm5056_vm10, %v5045_v1  ;;  %vm5716_vm10 = vcmask 1042400  }
 0x542   :  { %v5101_v6 = vpop.permute.xlu1 %5100 }
 0x543   :  { %v5099_v7 = vpop.permute.xlu0 %5098  ;;  %5126 = vst.msk [vmem:[%s13469_s1 + $0x50] sm:$0xfc] %vm5122_vm12, %v5101_v6 }
 0x544   :  { %5127 = vst.msk [vmem:[%s13469_s1 + $0x70] sm:$0x3] %vm5124_vm13, %v5101_v6  ;;  %5125 = vst.msk [vmem:[%s13469_s1 + $0x30] sm:$0x3] %vm5124_vm13, %v5099_v7 }
 0x545   :  { %5123 = vst.msk [vmem:[%s13469_s1 + $0x10] sm:$0xfc] %vm5122_vm12, %v5099_v7 }
 0x546   :  { %v5105_v3 = vpop.permute.xlu1 %5104 }
 0x547   :  { %v5103_v5 = vpop.permute.xlu0 %5102  ;;  %5130 = vst.msk [vmem:[%s13469_s1 + $0xd0] sm:$0xfc] %vm5122_vm12, %v5105_v3 }
 0x548   :  { %5131 = vst.msk [vmem:[%s13469_s1 + $0xf0] sm:$0x3] %vm5124_vm13, %v5105_v3  ;;  %5129 = vst.msk [vmem:[%s13469_s1 + $0xb0] sm:$0x3] %vm5124_vm13, %v5103_v5 }
 0x549   :  { %5128 = vst.msk [vmem:[%s13469_s1 + $0x90] sm:$0xfc] %vm5122_vm12, %v5103_v5 }
 0x54a   :  { %v5109_v12 = vpop.permute.xlu1 %5108 }
 0x54b   :  { %v5107_v13 = vpop.permute.xlu0 %5106  ;;  %5134 = vst.msk [vmem:[%s13469_s1 + $0x150] sm:$0xfc] %vm5122_vm12, %v5109_v12 }
 0x54c   :  { %5135 = vst.msk [vmem:[%s13469_s1 + $0x170] sm:$0x3] %vm5124_vm13, %v5109_v12  ;;  %5133 = vst.msk [vmem:[%s13469_s1 + $0x130] sm:$0x3] %vm5124_vm13, %v5107_v13 }
 0x54d   :  { %5132 = vst.msk [vmem:[%s13469_s1 + $0x110] sm:$0xfc] %vm5122_vm12, %v5107_v13 }
 0x54e   :  { %v5113_v10 = vpop.permute.xlu1 %5112 }
 0x54f   :  { %v5111_v11 = vpop.permute.xlu0 %5110  ;;  %5138 = vst.msk [vmem:[%s13469_s1 + $0x1d0] sm:$0xfc] %vm5122_vm12, %v5113_v10 }
 0x550   :  { %5139 = vst.msk [vmem:[%s13469_s1 + $0x1f0] sm:$0x3] %vm5124_vm13, %v5113_v10  ;;  %5137 = vst.msk [vmem:[%s13469_s1 + $0x1b0] sm:$0x3] %vm5124_vm13, %v5111_v11  ;;  %vm5714_vm13 = vcmask 130050  }
 0x551   :  { %5136 = vst.msk [vmem:[%s13469_s1 + $0x190] sm:$0xfc] %vm5122_vm12, %v5111_v11  ;;  %vm5712_vm12 = vcmask 1048546  }
 0x552   :  { %v5167_v16 = vpop.permute.xlu1 %5166 }
 0x553   :  { %v5165_v17 = vpop.permute.xlu0 %5164  ;;  %5192 = vst.msk [vmem:[%s13469_s1 + $0x50] sm:$0xfc] %vm5188_vm14, %v5167_v16 }
 0x554   :  { %5193 = vst.msk [vmem:[%s13469_s1 + $0x70] sm:$0x3] %vm5190_vm15, %v5167_v16  ;;  %5191 = vst.msk [vmem:[%s13469_s1 + $0x30] sm:$0x3] %vm5190_vm15, %v5165_v17 }
 0x555   :  { %5189 = vst.msk [vmem:[%s13469_s1 + $0x10] sm:$0xfc] %vm5188_vm14, %v5165_v17 }
 0x556   :  { %v5171_v18 = vpop.permute.xlu1 %5170 }
 0x557   :  { %v5169_v19 = vpop.permute.xlu0 %5168  ;;  %5196 = vst.msk [vmem:[%s13469_s1 + $0xd0] sm:$0xfc] %vm5188_vm14, %v5171_v18 }
 0x558   :  { %5197 = vst.msk [vmem:[%s13469_s1 + $0xf0] sm:$0x3] %vm5190_vm15, %v5171_v18  ;;  %5195 = vst.msk [vmem:[%s13469_s1 + $0xb0] sm:$0x3] %vm5190_vm15, %v5169_v19 }
 0x559   :  { %5194 = vst.msk [vmem:[%s13469_s1 + $0x90] sm:$0xfc] %vm5188_vm14, %v5169_v19 }
 0x55a   :  { %v5175_v20 = vpop.permute.xlu1 %5174 }
 0x55b   :  { %v5173_v21 = vpop.permute.xlu0 %5172  ;;  %5200 = vst.msk [vmem:[%s13469_s1 + $0x150] sm:$0xfc] %vm5188_vm14, %v5175_v20 }
 0x55c   :  { %5201 = vst.msk [vmem:[%s13469_s1 + $0x170] sm:$0x3] %vm5190_vm15, %v5175_v20  ;;  %5199 = vst.msk [vmem:[%s13469_s1 + $0x130] sm:$0x3] %vm5190_vm15, %v5173_v21 }
 0x55d   :  { %5198 = vst.msk [vmem:[%s13469_s1 + $0x110] sm:$0xfc] %vm5188_vm14, %v5173_v21 }
 0x55e   :  { %v5179_v26 = vpop.permute.xlu1 %5178 }
 0x55f   :  { %v5177_v27 = vpop.permute.xlu0 %5176  ;;  %5204 = vst.msk [vmem:[%s13469_s1 + $0x1d0] sm:$0xfc] %vm5188_vm14, %v5179_v26 }
 0x560   :  { %5205 = vst.msk [vmem:[%s13469_s1 + $0x1f0] sm:$0x3] %vm5190_vm15, %v5179_v26  ;;  %5203 = vst.msk [vmem:[%s13469_s1 + $0x1b0] sm:$0x3] %vm5190_vm15, %v5177_v27 }
 0x561   :  { %5202 = vst.msk [vmem:[%s13469_s1 + $0x190] sm:$0xfc] %vm5188_vm14, %v5177_v27 }
 0x562   :  { %v5233_v28 = vpop.permute.xlu1 %5232 }
 0x563   :  { %v5231_v29 = vpop.permute.xlu0 %5230  ;;  %5258 = vst.msk [vmem:[%s13469_s1 + $0x50] sm:$0xfc] %vm5254_vm0, %v5233_v28 }
 0x564   :  { %5259 = vst.msk [vmem:[%s13469_s1 + $0x70] sm:$0x3] %vm5256_vm1, %v5233_v28  ;;  %5257 = vst.msk [vmem:[%s13469_s1 + $0x30] sm:$0x3] %vm5256_vm1, %v5231_v29 }
 0x565   :  { %5255 = vst.msk [vmem:[%s13469_s1 + $0x10] sm:$0xfc] %vm5254_vm0, %v5231_v29 }
 0x566   :  { %v5237_v44 = vpop.permute.xlu1 %5236 }
 0x567   :  { %v5235_v45 = vpop.permute.xlu0 %5234  ;;  %5262 = vst.msk [vmem:[%s13469_s1 + $0xd0] sm:$0xfc] %vm5254_vm0, %v5237_v44 }
 0x568   :  { %5263 = vst.msk [vmem:[%s13469_s1 + $0xf0] sm:$0x3] %vm5256_vm1, %v5237_v44  ;;  %5261 = vst.msk [vmem:[%s13469_s1 + $0xb0] sm:$0x3] %vm5256_vm1, %v5235_v45 }
 0x569   :  { %5260 = vst.msk [vmem:[%s13469_s1 + $0x90] sm:$0xfc] %vm5254_vm0, %v5235_v45 }
 0x56a   :  { %v5241_v8 = vpop.permute.xlu1 %5240 }
 0x56b   :  { %v5239_v9 = vpop.permute.xlu0 %5238  ;;  %5266 = vst.msk [vmem:[%s13469_s1 + $0x150] sm:$0xfc] %vm5254_vm0, %v5241_v8 }
 0x56c   :  { %5267 = vst.msk [vmem:[%s13469_s1 + $0x170] sm:$0x3] %vm5256_vm1, %v5241_v8  ;;  %5265 = vst.msk [vmem:[%s13469_s1 + $0x130] sm:$0x3] %vm5256_vm1, %v5239_v9 }
 0x56d   :  { %5264 = vst.msk [vmem:[%s13469_s1 + $0x110] sm:$0xfc] %vm5254_vm0, %v5239_v9 }
 0x56e   :  { %v5245_v60 = vpop.permute.xlu1 %5244 }
 0x56f   :  { %v5243_v61 = vpop.permute.xlu0 %5242  ;;  %5270 = vst.msk [vmem:[%s13469_s1 + $0x1d0] sm:$0xfc] %vm5254_vm0, %v5245_v60 }
 0x570   :  { %5271 = vst.msk [vmem:[%s13469_s1 + $0x1f0] sm:$0x3] %vm5256_vm1, %v5245_v60  ;;  %5269 = vst.msk [vmem:[%s13469_s1 + $0x1b0] sm:$0x3] %vm5256_vm1, %v5243_v61 }
 0x571   :  { %5268 = vst.msk [vmem:[%s13469_s1 + $0x190] sm:$0xfc] %vm5254_vm0, %v5243_v61 }
 0x572   :  { %v5299_v2 = vpop.permute.xlu1 %5298 }
 0x573   :  { %v5297_v4 = vpop.permute.xlu0 %5296  ;;  %5324 = vst.msk [vmem:[%s13469_s1 + $0x50] sm:$0xfc] %vm5320_vm2, %v5299_v2 }
 0x574   :  { %5325 = vst.msk [vmem:[%s13469_s1 + $0x70] sm:$0x3] %vm5322_vm3, %v5299_v2  ;;  %5323 = vst.msk [vmem:[%s13469_s1 + $0x30] sm:$0x3] %vm5322_vm3, %v5297_v4 }
 0x575   :  { %5321 = vst.msk [vmem:[%s13469_s1 + $0x10] sm:$0xfc] %vm5320_vm2, %v5297_v4 }
 0x576   :  { %v5303_v30 = vpop.permute.xlu1 %5302 }
 0x577   :  { %v5301_v31 = vpop.permute.xlu0 %5300  ;;  %5328 = vst.msk [vmem:[%s13469_s1 + $0xd0] sm:$0xfc] %vm5320_vm2, %v5303_v30 }
 0x578   :  { %5329 = vst.msk [vmem:[%s13469_s1 + $0xf0] sm:$0x3] %vm5322_vm3, %v5303_v30  ;;  %5327 = vst.msk [vmem:[%s13469_s1 + $0xb0] sm:$0x3] %vm5322_vm3, %v5301_v31 }
 0x579   :  { %5326 = vst.msk [vmem:[%s13469_s1 + $0x90] sm:$0xfc] %vm5320_vm2, %v5301_v31 }
 0x57a   :  { %v5307_v34 = vpop.permute.xlu1 %5306  ;;  %v5536_v37 = vld [vmem:[%s13469_s1 + $0x50] sm:$0xfc] }
 0x57b   :  { %v5305_v35 = vpop.permute.xlu0 %5304  ;;  %v5535_v32 = vld [vmem:[%s13469_s1 + $0x30] sm:$0x3]  ;;  %5332 = vst.msk [vmem:[%s13469_s1 + $0x150] sm:$0xfc] %vm5320_vm2, %v5307_v34 }
 0x57c   :  { %v5534_v33 = vld [vmem:[%s13469_s1 + $0x10] sm:$0xfc]  ;;  %5333 = vst.msk [vmem:[%s13469_s1 + $0x170] sm:$0x3] %vm5322_vm3, %v5307_v34  ;;  %5331 = vst.msk [vmem:[%s13469_s1 + $0x130] sm:$0x3] %vm5322_vm3, %v5305_v35  ;;  %5568 = vrot.lane.b32.xlu1 %v5535_v32, %s6112_s18 }
 0x57d   :  { %5330 = vst.msk [vmem:[%s13469_s1 + $0x110] sm:$0xfc] %vm5320_vm2, %v5305_v35  ;;  %5566 = vrot.lane.b32.xlu0 %v5534_v33, %s6112_s18  ;;  %v5537_v36 = vld [vmem:[%s13469_s1 + $0x70] sm:$0x3] }
 0x57e   :  { %v5311_v38 = vpop.permute.xlu1 %5310  ;;  %v5540_v47 = vld [vmem:[%s13469_s1 + $0xd0] sm:$0xfc] }
 0x57f   :  { %v5309_v39 = vpop.permute.xlu0 %5308  ;;  %5336 = vst.msk [vmem:[%s13469_s1 + $0x1d0] sm:$0xfc] %vm5320_vm2, %v5311_v38  ;;  %v5539_v40 = vld [vmem:[%s13469_s1 + $0xb0] sm:$0x3] }
 0x580   :  { %5337 = vst.msk [vmem:[%s13469_s1 + $0x1f0] sm:$0x3] %vm5322_vm3, %v5311_v38  ;;  %5335 = vst.msk [vmem:[%s13469_s1 + $0x1b0] sm:$0x3] %vm5322_vm3, %v5309_v39  ;;  %5572 = vrot.lane.b32.xlu1 %v5537_v36, %s6112_s18  ;;  %v5538_v41 = vld [vmem:[%s13469_s1 + $0x90] sm:$0xfc] }
 0x581   :  { %5334 = vst.msk [vmem:[%s13469_s1 + $0x190] sm:$0xfc] %vm5320_vm2, %v5309_v39  ;;  %5570 = vrot.lane.b32.xlu0 %v5536_v37, %s6112_s18  ;;  %v5541_v46 = vld [vmem:[%s13469_s1 + $0xf0] sm:$0x3] }
 0x582   :  { %v5373_v42 = vpop.permute.xlu1 %5372  ;;  %v5544_v53 = vld [vmem:[%s13469_s1 + $0x150] sm:$0xfc] }
 0x583   :  { %v5371_v43 = vpop.permute.xlu0 %5370  ;;  %5421 = vst.msk [vmem:[%s13469_s1 + $0x20] sm:$0x3] %vm5420_vm4, %v5373_v42  ;;  %v5543_v14 = vld [vmem:[%s13469_s1 + $0x130] sm:$0x3] }
 0x584   :  { %5419 = vst.msk [vmem:[%s13469_s1] sm:$0xfc] %vm5418_vm5, %v5371_v43  ;;  %5576 = vrot.lane.b32.xlu1 %v5539_v40, %s6112_s18  ;;  %v5542_v15 = vld [vmem:[%s13469_s1 + $0x110] sm:$0xfc]  ;;  %v5545_v52 = vld [vmem:[%s13469_s1 + $0x170] sm:$0x3] }
 0x585   :  { %5574 = vrot.lane.b32.xlu0 %v5538_v41, %s6112_s18 }
 0x586   :  { %v5377_v48 = vpop.permute.xlu1 %5376  ;;  %v5548_v57 = vld [vmem:[%s13469_s1 + $0x1d0] sm:$0xfc] }
 0x587   :  { %v5375_v49 = vpop.permute.xlu0 %5374  ;;  %5423 = vst.msk [vmem:[%s13469_s1 + $0x60] sm:$0x3] %vm5420_vm4, %v5377_v48  ;;  %v5547_v24 = vld [vmem:[%s13469_s1 + $0x1b0] sm:$0x3] }
 0x588   :  { %5422 = vst.msk [vmem:[%s13469_s1 + $0x40] sm:$0xfc] %vm5418_vm5, %v5375_v49  ;;  %5580 = vrot.lane.b32.xlu1 %v5541_v46, %s6112_s18  ;;  %v5546_v25 = vld [vmem:[%s13469_s1 + $0x190] sm:$0xfc]  ;;  %v5549_v56 = vld [vmem:[%s13469_s1 + $0x1f0] sm:$0x3] }
 0x589   :  { %5578 = vrot.lane.b32.xlu0 %v5540_v47, %s6112_s18 }
 0x58a   :  { %v5381_v50 = vpop.permute.xlu1 %5380  ;;  %v5437_v0 = vld [vmem:[%s13469_s1 + $0x20] sm:$0x3] }
 0x58b   :  { %v5379_v51 = vpop.permute.xlu0 %5378  ;;  %5425 = vst.msk [vmem:[%s13469_s1 + $0xa0] sm:$0x3] %vm5420_vm4, %v5381_v50  ;;  %v5436_v1 = vld [vmem:[%s13469_s1] sm:$0xfc] }
 0x58c   :  { %5424 = vst.msk [vmem:[%s13469_s1 + $0x80] sm:$0xfc] %vm5418_vm5, %v5379_v51  ;;  %5584 = vrot.lane.b32.xlu1 %v5543_v14, %s6112_s18 }
 0x58d   :  { %5582 = vrot.lane.b32.xlu0 %v5542_v15, %s6112_s18 }
 0x58e   :  { %v5385_v22 = vpop.permute.xlu1 %5384  ;;  %v5439_v3 = vld [vmem:[%s13469_s1 + $0x60] sm:$0x3] }
 0x58f   :  { %v5383_v23 = vpop.permute.xlu0 %5382  ;;  %5427 = vst.msk [vmem:[%s13469_s1 + $0xe0] sm:$0x3] %vm5420_vm4, %v5385_v22  ;;  %v5438_v5 = vld [vmem:[%s13469_s1 + $0x40] sm:$0xfc] }
 0x590   :  { %5426 = vst.msk [vmem:[%s13469_s1 + $0xc0] sm:$0xfc] %vm5418_vm5, %v5383_v23  ;;  %5588 = vrot.lane.b32.xlu1 %v5545_v52, %s6112_s18 }
 0x591   :  { %5586 = vrot.lane.b32.xlu0 %v5544_v53, %s6112_s18 }
 0x592   :  { %v5389_v54 = vpop.permute.xlu1 %5388  ;;  %v5441_v12 = vld [vmem:[%s13469_s1 + $0xa0] sm:$0x3] }
 0x593   :  { %v5387_v55 = vpop.permute.xlu0 %5386  ;;  %5429 = vst.msk [vmem:[%s13469_s1 + $0x120] sm:$0x3] %vm5420_vm4, %v5389_v54  ;;  %v5440_v13 = vld [vmem:[%s13469_s1 + $0x80] sm:$0xfc] }
 0x594   :  { %5428 = vst.msk [vmem:[%s13469_s1 + $0x100] sm:$0xfc] %vm5418_vm5, %v5387_v55  ;;  %5592 = vrot.lane.b32.xlu1 %v5547_v24, %s6112_s18 }
 0x595   :  { %5590 = vrot.lane.b32.xlu0 %v5546_v25, %s6112_s18 }
 0x596   :  { %v5393_v58 = vpop.permute.xlu1 %5392  ;;  %v5443_v10 = vld [vmem:[%s13469_s1 + $0xe0] sm:$0x3] }
 0x597   :  { %v5391_v59 = vpop.permute.xlu0 %5390  ;;  %5431 = vst.msk [vmem:[%s13469_s1 + $0x160] sm:$0x3] %vm5420_vm4, %v5393_v58  ;;  %v5442_v11 = vld [vmem:[%s13469_s1 + $0xc0] sm:$0xfc] }
 0x598   :  { %5430 = vst.msk [vmem:[%s13469_s1 + $0x140] sm:$0xfc] %vm5418_vm5, %v5391_v59  ;;  %5596 = vrot.lane.b32.xlu1 %v5549_v56, %s6112_s18 }
 0x599   :  { %5594 = vrot.lane.b32.xlu0 %v5548_v57, %s6112_s18  ;;  %s6113_s18 = smov 68  }
 0x59a   :  { %v5397_v62 = vpop.permute.xlu1 %5396  ;;  %v5445_v16 = vld [vmem:[%s13469_s1 + $0x120] sm:$0x3] }
 0x59b   :  { %v5395_v63 = vpop.permute.xlu0 %5394  ;;  %5433 = vst.msk [vmem:[%s13469_s1 + $0x1a0] sm:$0x3] %vm5420_vm4, %v5397_v62  ;;  %v5444_v17 = vld [vmem:[%s13469_s1 + $0x100] sm:$0xfc] }
 0x59c   :  { %5432 = vst.msk [vmem:[%s13469_s1 + $0x180] sm:$0xfc] %vm5418_vm5, %v5395_v63  ;;  %5470 = vrot.lane.b32.xlu1 %v5437_v0, %s6113_s18 }
 0x59d   :  { %5468 = vrot.lane.b32.xlu0 %v5436_v1, %s6113_s18 }
 0x59e   :  { %v5401_v6 = vpop.permute.xlu1 %5400  ;;  %v5447_v18 = vld [vmem:[%s13469_s1 + $0x160] sm:$0x3] }
 0x59f   :  { %v5399_v7 = vpop.permute.xlu0 %5398  ;;  %5435 = vst.msk [vmem:[%s13469_s1 + $0x1e0] sm:$0x3] %vm5420_vm4, %v5401_v6  ;;  %v5446_v19 = vld [vmem:[%s13469_s1 + $0x140] sm:$0xfc] }
 0x5a0   :  { %5434 = vst.msk [vmem:[%s13469_s1 + $0x1c0] sm:$0xfc] %vm5418_vm5, %v5399_v7  ;;  %5474 = vrot.lane.b32.xlu1 %v5439_v3, %s6113_s18  ;;  %v5764_v3 = vlaneseq }
 0x5a1   :  { %5472 = vrot.lane.b32.xlu0 %v5438_v5, %s6113_s18 }
 0x5a2   :  { %v5449_v20 = vld [vmem:[%s13469_s1 + $0x1a0] sm:$0x3]  ;;  %vm13112_vm14 = vcmp.lt.s32.totalorder %v5764_v3, 400 }
 0x5a3   :  { %v5448_v21 = vld [vmem:[%s13469_s1 + $0x180] sm:$0xfc] }
 0x5a4   :  { %5478 = vrot.lane.b32.xlu1 %v5441_v12, %s6113_s18 }
 0x5a5   :  { %5476 = vrot.lane.b32.xlu0 %v5440_v13, %s6113_s18 }
 0x5a6   :  { %v5451_v26 = vld [vmem:[%s13469_s1 + $0x1e0] sm:$0x3] }
 0x5a7   :  { %v5450_v27 = vld [vmem:[%s13469_s1 + $0x1c0] sm:$0xfc] }
 0x5a8   :  { %5482 = vrot.lane.b32.xlu1 %v5443_v10, %s6113_s18 }
 0x5a9   :  { %5480 = vrot.lane.b32.xlu0 %v5442_v11, %s6113_s18 }
 0x5ac   :  { %5486 = vrot.lane.b32.xlu1 %v5445_v16, %s6113_s18 }
 0x5ad   :  { %5484 = vrot.lane.b32.xlu0 %v5444_v17, %s6113_s18 }
 0x5b0   :  { %5490 = vrot.lane.b32.xlu1 %v5447_v18, %s6113_s18 }
 0x5b1   :  { %5488 = vrot.lane.b32.xlu0 %v5446_v19, %s6113_s18 }
 0x5b4   :  { %5494 = vrot.lane.b32.xlu1 %v5449_v20, %s6113_s18 }
 0x5b5   :  { %5492 = vrot.lane.b32.xlu0 %v5448_v21, %s6113_s18 }
 0x5b8   :  { %5498 = vrot.lane.b32.xlu1 %v5451_v26, %s6113_s18 }
 0x5b9   :  { %5496 = vrot.lane.b32.xlu0 %v5450_v27, %s6113_s18 }
 0x5ee   :  { %v5569_v28 = vpop.permute.xlu1 %5568 }
 0x5ef   :  { %v5567_v29 = vpop.permute.xlu0 %5566  ;;  %5617 = vst.msk [vmem:[%s13469_s1 + $0x30] sm:$0x3] %vm5616_vm6, %v5569_v28 }
 0x5f0   :  { %5615 = vst.msk [vmem:[%s13469_s1 + $0x10] sm:$0xfc] %vm5614_vm7, %v5567_v29 }
 0x5f2   :  { %v5573_v44 = vpop.permute.xlu1 %5572 }
 0x5f3   :  { %v5571_v45 = vpop.permute.xlu0 %5570  ;;  %5619 = vst.msk [vmem:[%s13469_s1 + $0x70] sm:$0x3] %vm5616_vm6, %v5573_v44 }
 0x5f4   :  { %5618 = vst.msk [vmem:[%s13469_s1 + $0x50] sm:$0xfc] %vm5614_vm7, %v5571_v45 }
 0x5f6   :  { %v5577_v8 = vpop.permute.xlu1 %5576  ;;  %v5633_v60 = vld [vmem:[%s13469_s1 + $0x30] sm:$0x3] }
 0x5f7   :  { %v5575_v9 = vpop.permute.xlu0 %5574  ;;  %v5632_v61 = vld [vmem:[%s13469_s1 + $0x10] sm:$0xfc]  ;;  %5621 = vst.msk [vmem:[%s13469_s1 + $0xb0] sm:$0x3] %vm5616_vm6, %v5577_v8  ;;  %5666 = vrot.lane.b32.xlu1 %v5633_v60, %s6114_s5 }
 0x5f8   :  { %5620 = vst.msk [vmem:[%s13469_s1 + $0x90] sm:$0xfc] %vm5614_vm7, %v5575_v9  ;;  %5664 = vrot.lane.b32.xlu0 %v5632_v61, %s6114_s5 }
 0x5fa   :  { %v5581_v2 = vpop.permute.xlu1 %5580  ;;  %v5635_v30 = vld [vmem:[%s13469_s1 + $0x70] sm:$0x3] }
 0x5fb   :  { %v5579_v4 = vpop.permute.xlu0 %5578  ;;  %v5634_v31 = vld [vmem:[%s13469_s1 + $0x50] sm:$0xfc]  ;;  %5623 = vst.msk [vmem:[%s13469_s1 + $0xf0] sm:$0x3] %vm5616_vm6, %v5581_v2  ;;  %5670 = vrot.lane.b32.xlu1 %v5635_v30, %s6114_s5 }
 0x5fc   :  { %5622 = vst.msk [vmem:[%s13469_s1 + $0xd0] sm:$0xfc] %vm5614_vm7, %v5579_v4  ;;  %5668 = vrot.lane.b32.xlu0 %v5634_v31, %s6114_s5 }
 0x5fe   :  { %v5585_v34 = vpop.permute.xlu1 %5584  ;;  %v5637_v32 = vld [vmem:[%s13469_s1 + $0xb0] sm:$0x3] }
 0x5ff   :  { %v5583_v35 = vpop.permute.xlu0 %5582  ;;  %v5636_v33 = vld [vmem:[%s13469_s1 + $0x90] sm:$0xfc]  ;;  %5625 = vst.msk [vmem:[%s13469_s1 + $0x130] sm:$0x3] %vm5616_vm6, %v5585_v34  ;;  %5674 = vrot.lane.b32.xlu1 %v5637_v32, %s6114_s5 }
 0x600   :  { %5624 = vst.msk [vmem:[%s13469_s1 + $0x110] sm:$0xfc] %vm5614_vm7, %v5583_v35  ;;  %5672 = vrot.lane.b32.xlu0 %v5636_v33, %s6114_s5 }
 0x602   :  { %v5589_v36 = vpop.permute.xlu1 %5588  ;;  %v5639_v38 = vld [vmem:[%s13469_s1 + $0xf0] sm:$0x3] }
 0x603   :  { %v5587_v37 = vpop.permute.xlu0 %5586  ;;  %v5638_v39 = vld [vmem:[%s13469_s1 + $0xd0] sm:$0xfc]  ;;  %5627 = vst.msk [vmem:[%s13469_s1 + $0x170] sm:$0x3] %vm5616_vm6, %v5589_v36  ;;  %5678 = vrot.lane.b32.xlu1 %v5639_v38, %s6114_s5 }
 0x604   :  { %5626 = vst.msk [vmem:[%s13469_s1 + $0x150] sm:$0xfc] %vm5614_vm7, %v5587_v37  ;;  %5676 = vrot.lane.b32.xlu0 %v5638_v39, %s6114_s5 }
 0x606   :  { %v5593_v40 = vpop.permute.xlu1 %5592  ;;  %v5641_v42 = vld [vmem:[%s13469_s1 + $0x130] sm:$0x3] }
 0x607   :  { %v5591_v41 = vpop.permute.xlu0 %5590  ;;  %v5640_v43 = vld [vmem:[%s13469_s1 + $0x110] sm:$0xfc]  ;;  %5629 = vst.msk [vmem:[%s13469_s1 + $0x1b0] sm:$0x3] %vm5616_vm6, %v5593_v40  ;;  %5682 = vrot.lane.b32.xlu1 %v5641_v42, %s6114_s5 }
 0x608   :  { %5628 = vst.msk [vmem:[%s13469_s1 + $0x190] sm:$0xfc] %vm5614_vm7, %v5591_v41  ;;  %5680 = vrot.lane.b32.xlu0 %v5640_v43, %s6114_s5 }
 0x60a   :  { %v5597_v46 = vpop.permute.xlu1 %5596  ;;  %v5643_v48 = vld [vmem:[%s13469_s1 + $0x170] sm:$0x3] }
 0x60b   :  { %v5595_v47 = vpop.permute.xlu0 %5594  ;;  %v5642_v49 = vld [vmem:[%s13469_s1 + $0x150] sm:$0xfc]  ;;  %5631 = vst.msk [vmem:[%s13469_s1 + $0x1f0] sm:$0x3] %vm5616_vm6, %v5597_v46  ;;  %5686 = vrot.lane.b32.xlu1 %v5643_v48, %s6114_s5 }
 0x60c   :  { %5630 = vst.msk [vmem:[%s13469_s1 + $0x1d0] sm:$0xfc] %vm5614_vm7, %v5595_v47  ;;  %5684 = vrot.lane.b32.xlu0 %v5642_v49, %s6114_s5 }
 0x60e   :  { %v5471_v14 = vpop.permute.xlu1 %5470  ;;  %v5645_v50 = vld [vmem:[%s13469_s1 + $0x1b0] sm:$0x3] }
 0x60f   :  { %v5469_v15 = vpop.permute.xlu0 %5468  ;;  %v5644_v51 = vld [vmem:[%s13469_s1 + $0x190] sm:$0xfc]  ;;  %5519 = vst.msk [vmem:[%s13469_s1 + $0x20] sm:$0x3] %vm5518_vm8, %v5471_v14  ;;  %5690 = vrot.lane.b32.xlu1 %v5645_v50, %s6114_s5 }
 0x610   :  { %5517 = vst.msk [vmem:[%s13469_s1] sm:$0xfc] %vm5516_vm9, %v5469_v15  ;;  %5688 = vrot.lane.b32.xlu0 %v5644_v51, %s6114_s5 }
 0x612   :  { %v5475_v52 = vpop.permute.xlu1 %5474  ;;  %v5647_v22 = vld [vmem:[%s13469_s1 + $0x1f0] sm:$0x3] }
 0x613   :  { %v5473_v53 = vpop.permute.xlu0 %5472  ;;  %v5646_v23 = vld [vmem:[%s13469_s1 + $0x1d0] sm:$0xfc]  ;;  %5521 = vst.msk [vmem:[%s13469_s1 + $0x60] sm:$0x3] %vm5518_vm8, %v5475_v52  ;;  %5694 = vrot.lane.b32.xlu1 %v5647_v22, %s6114_s5 }
 0x614   :  { %5520 = vst.msk [vmem:[%s13469_s1 + $0x40] sm:$0xfc] %vm5516_vm9, %v5473_v53  ;;  %5692 = vrot.lane.b32.xlu0 %v5646_v23, %s6114_s5 }
 0x616   :  { %v5479_v24 = vpop.permute.xlu1 %5478 }
 0x617   :  { %v5477_v25 = vpop.permute.xlu0 %5476  ;;  %5523 = vst.msk [vmem:[%s13469_s1 + $0xa0] sm:$0x3] %vm5518_vm8, %v5479_v24 }
 0x618   :  { %5522 = vst.msk [vmem:[%s13469_s1 + $0x80] sm:$0xfc] %vm5516_vm9, %v5477_v25 }
 0x61a   :  { %v5483_v54 = vpop.permute.xlu1 %5482 }
 0x61b   :  { %v5481_v55 = vpop.permute.xlu0 %5480  ;;  %5525 = vst.msk [vmem:[%s13469_s1 + $0xe0] sm:$0x3] %vm5518_vm8, %v5483_v54 }
 0x61c   :  { %5524 = vst.msk [vmem:[%s13469_s1 + $0xc0] sm:$0xfc] %vm5516_vm9, %v5481_v55 }
 0x61e   :  { %v5487_v56 = vpop.permute.xlu1 %5486 }
 0x61f   :  { %v5485_v57 = vpop.permute.xlu0 %5484  ;;  %5527 = vst.msk [vmem:[%s13469_s1 + $0x120] sm:$0x3] %vm5518_vm8, %v5487_v56 }
 0x620   :  { %5526 = vst.msk [vmem:[%s13469_s1 + $0x100] sm:$0xfc] %vm5516_vm9, %v5485_v57 }
 0x622   :  { %v5491_v58 = vpop.permute.xlu1 %5490 }
 0x623   :  { %v5489_v59 = vpop.permute.xlu0 %5488  ;;  %5529 = vst.msk [vmem:[%s13469_s1 + $0x160] sm:$0x3] %vm5518_vm8, %v5491_v58 }
 0x624   :  { %5528 = vst.msk [vmem:[%s13469_s1 + $0x140] sm:$0xfc] %vm5516_vm9, %v5489_v59 }
 0x626   :  { %v5495_v62 = vpop.permute.xlu1 %5494 }
 0x627   :  { %v5493_v63 = vpop.permute.xlu0 %5492  ;;  %5531 = vst.msk [vmem:[%s13469_s1 + $0x1a0] sm:$0x3] %vm5518_vm8, %v5495_v62 }
 0x628   :  { %5530 = vst.msk [vmem:[%s13469_s1 + $0x180] sm:$0xfc] %vm5516_vm9, %v5493_v63 }
 0x62a   :  { %v5499_v0 = vpop.permute.xlu1 %5498 }
 0x62b   :  { %v5497_v1 = vpop.permute.xlu0 %5496  ;;  %5533 = vst.msk [vmem:[%s13469_s1 + $0x1e0] sm:$0x3] %vm5518_vm8, %v5499_v0 }
 0x62c   :  { %5532 = vst.msk [vmem:[%s13469_s1 + $0x1c0] sm:$0xfc] %vm5516_vm9, %v5497_v1 }
 0x669   :  { %v5667_v6 = vpop.permute.xlu1 %5666 }
 0x66a   :  { %v5665_v7 = vpop.permute.xlu0 %5664  ;;  %5717 = vst.msk [vmem:[%s13469_s1 + $0x30] sm:$0x3] %vm5716_vm10, %v5667_v6 }
 0x66b   :  { %5719 = vst.msk [vmem:[%s13469_s1 + $0x38] sm:$0x3] %vm5718_vm11, %v5667_v6 }
 0x66c   :  { %5713 = vst.msk [vmem:[%s13469_s1 + $0x10] sm:$0xfc] %vm5712_vm12, %v5665_v7 }
 0x66d   :  { %5715 = vst.msk [vmem:[%s13469_s1 + $0x18] sm:$0xfc] %vm5714_vm13, %v5665_v7  ;;  %v5671_v5 = vpop.permute.xlu1 %5670 }
 0x66e   :  { %v5669_v12 = vpop.permute.xlu0 %5668  ;;  %5722 = vst.msk [vmem:[%s13469_s1 + $0x70] sm:$0x3] %vm5716_vm10, %v5671_v5 }
 0x66f   :  { %5723 = vst.msk [vmem:[%s13469_s1 + $0x78] sm:$0x3] %vm5718_vm11, %v5671_v5 }
 0x670   :  { %5720 = vst.msk [vmem:[%s13469_s1 + $0x50] sm:$0xfc] %vm5712_vm12, %v5669_v12 }
 0x671   :  { %5721 = vst.msk [vmem:[%s13469_s1 + $0x58] sm:$0xfc] %vm5714_vm13, %v5669_v12  ;;  %v5675_v16 = vpop.permute.xlu1 %5674 }
 0x672   :  { %v5947_v10 = vld [vmem:[%s13469_s1 + $0x21] ss:$8 sm:$0xf]  ;;  %v5963_v11 = vld [vmem:[%s13469_s1 + $0x20] ss:$8 sm:$0xf]  ;;  %v5673_v17 = vpop.permute.xlu0 %5672 }
 0x673   :  { %5955 = vst.msk [vmem:[%s13469_s1 + $0x22] ss:$8 sm:$0xf] %vm13112_vm14, %v5947_v10  ;;  %5971 = vst.msk [vmem:[%s13469_s1 + $0x23] ss:$8 sm:$0xf] %vm13112_vm14, %v5963_v11 }
 0x674   :  { %v5916_v18 = vld [vmem:[%s13469_s1 + $0x2] ss:$8 sm:$0xf]  ;;  %v5932_v19 = vld [vmem:[%s13469_s1 + $0x3] ss:$8 sm:$0xf] }
 0x675   :  { %5726 = vst.msk [vmem:[%s13469_s1 + $0xb0] sm:$0x3] %vm5716_vm10, %v5675_v16  ;;  %v5679_v26 = vpop.permute.xlu1 %5678 }
 0x676   :  { %5727 = vst.msk [vmem:[%s13469_s1 + $0xb8] sm:$0x3] %vm5718_vm11, %v5675_v16  ;;  %v5948_v20 = vld [vmem:[%s13469_s1 + $0x61] ss:$8 sm:$0xf]  ;;  %v5677_v27 = vpop.permute.xlu0 %5676 }
 0x677   :  { %5724 = vst.msk [vmem:[%s13469_s1 + $0x90] sm:$0xfc] %vm5712_vm12, %v5673_v17  ;;  %v5964_v21 = vld [vmem:[%s13469_s1 + $0x60] ss:$8 sm:$0xf] }
 0x678   :  { %5725 = vst.msk [vmem:[%s13469_s1 + $0x98] sm:$0xfc] %vm5714_vm13, %v5673_v17  ;;  %v5917_v28 = vld [vmem:[%s13469_s1 + $0x42] ss:$8 sm:$0xf] }
 0x679   :  { %5924 = vst.msk [vmem:[%s13469_s1 + $0x1] ss:$8 sm:$0xf] %vm13112_vm14, %v5916_v18  ;;  %5808 = vst.msk [vmem:[%s13469_s1] ss:$8 sm:$0xf] %vm13112_vm14, %v5932_v19  ;;  %v5683_v8 = vpop.permute.xlu1 %5682 }
 0x67a   :  { %5956 = vst.msk [vmem:[%s13469_s1 + $0x62] ss:$8 sm:$0xf] %vm13112_vm14, %v5948_v20  ;;  %5972 = vst.msk [vmem:[%s13469_s1 + $0x63] ss:$8 sm:$0xf] %vm13112_vm14, %v5964_v21  ;;  %v5681_v9 = vpop.permute.xlu0 %5680 }
 0x67b   :  { %v5933_v29 = vld [vmem:[%s13469_s1 + $0x43] ss:$8 sm:$0xf]  ;;  %5730 = vst.msk [vmem:[%s13469_s1 + $0xf0] sm:$0x3] %vm5716_vm10, %v5679_v26 }
 0x67c   :  { %5731 = vst.msk [vmem:[%s13469_s1 + $0xf8] sm:$0x3] %vm5718_vm11, %v5679_v26  ;;  %5735 = vst.msk [vmem:[%s13469_s1 + $0x138] sm:$0x3] %vm5718_vm11, %v5683_v8 }
 0x67d   :  { %5728 = vst.msk [vmem:[%s13469_s1 + $0xd0] sm:$0xfc] %vm5712_vm12, %v5677_v27  ;;  %v5949_v44 = vld [vmem:[%s13469_s1 + $0xa1] ss:$8 sm:$0xf]  ;;  %v5687_v30 = vpop.permute.xlu1 %5686 }
 0x67e   :  { %5729 = vst.msk [vmem:[%s13469_s1 + $0xd8] sm:$0xfc] %vm5714_vm13, %v5677_v27  ;;  %v5965_v45 = vld [vmem:[%s13469_s1 + $0xa0] ss:$8 sm:$0xf]  ;;  %v5685_v31 = vpop.permute.xlu0 %5684 }
 0x67f   :  { %5925 = vst.msk [vmem:[%s13469_s1 + $0x41] ss:$8 sm:$0xf] %vm13112_vm14, %v5917_v28  ;;  %5940 = vst.msk [vmem:[%s13469_s1 + $0x40] ss:$8 sm:$0xf] %vm13112_vm14, %v5933_v29 }
 0x680   :  { %5957 = vst.msk [vmem:[%s13469_s1 + $0xa2] ss:$8 sm:$0xf] %vm13112_vm14, %v5949_v44  ;;  %5973 = vst.msk [vmem:[%s13469_s1 + $0xa3] ss:$8 sm:$0xf] %vm13112_vm14, %v5965_v45 }
 0x681   :  { %v5918_v60 = vld [vmem:[%s13469_s1 + $0x82] ss:$8 sm:$0xf]  ;;  %v5934_v61 = vld [vmem:[%s13469_s1 + $0x83] ss:$8 sm:$0xf]  ;;  %v5691_v36 = vpop.permute.xlu1 %5690 }
 0x682   :  { %5734 = vst.msk [vmem:[%s13469_s1 + $0x130] sm:$0x3] %vm5716_vm10, %v5683_v8  ;;  %5738 = vst.msk [vmem:[%s13469_s1 + $0x170] sm:$0x3] %vm5716_vm10, %v5687_v30  ;;  %v5689_v37 = vpop.permute.xlu0 %5688 }
 0x683   :  { %5732 = vst.msk [vmem:[%s13469_s1 + $0x110] sm:$0xfc] %vm5712_vm12, %v5681_v9  ;;  %v5950_v2 = vld [vmem:[%s13469_s1 + $0xe1] ss:$8 sm:$0xf] }
 0x684   :  { %5733 = vst.msk [vmem:[%s13469_s1 + $0x118] sm:$0xfc] %vm5714_vm13, %v5681_v9  ;;  %v5966_v4 = vld [vmem:[%s13469_s1 + $0xe0] ss:$8 sm:$0xf] }
 0x685   :  { %5926 = vst.msk [vmem:[%s13469_s1 + $0x81] ss:$8 sm:$0xf] %vm13112_vm14, %v5918_v60  ;;  %5941 = vst.msk [vmem:[%s13469_s1 + $0x80] ss:$8 sm:$0xf] %vm13112_vm14, %v5934_v61  ;;  %v5695_v42 = vpop.permute.xlu1 %5694 }
 0x686   :  { %5958 = vst.msk [vmem:[%s13469_s1 + $0xe2] ss:$8 sm:$0xf] %vm13112_vm14, %v5950_v2  ;;  %5974 = vst.msk [vmem:[%s13469_s1 + $0xe3] ss:$8 sm:$0xf] %vm13112_vm14, %v5966_v4  ;;  %v5693_v43 = vpop.permute.xlu0 %5692 }
 0x687   :  { %v5919_v34 = vld [vmem:[%s13469_s1 + $0xc2] ss:$8 sm:$0xf]  ;;  %v5935_v35 = vld [vmem:[%s13469_s1 + $0xc3] ss:$8 sm:$0xf] }
 0x688   :  { %5739 = vst.msk [vmem:[%s13469_s1 + $0x178] sm:$0x3] %vm5718_vm11, %v5687_v30  ;;  %5743 = vst.msk [vmem:[%s13469_s1 + $0x1b8] sm:$0x3] %vm5718_vm11, %v5691_v36 }
 0x689   :  { %5736 = vst.msk [vmem:[%s13469_s1 + $0x150] sm:$0xfc] %vm5712_vm12, %v5685_v31  ;;  %v5951_v32 = vld [vmem:[%s13469_s1 + $0x121] ss:$8 sm:$0xf] }
 0x68a   :  { %5737 = vst.msk [vmem:[%s13469_s1 + $0x158] sm:$0xfc] %vm5714_vm13, %v5685_v31  ;;  %v5967_v33 = vld [vmem:[%s13469_s1 + $0x120] ss:$8 sm:$0xf] }
 0x68b   :  { %5927 = vst.msk [vmem:[%s13469_s1 + $0xc1] ss:$8 sm:$0xf] %vm13112_vm14, %v5919_v34  ;;  %5942 = vst.msk [vmem:[%s13469_s1 + $0xc0] ss:$8 sm:$0xf] %vm13112_vm14, %v5935_v35 }
 0x68c   :  { %5959 = vst.msk [vmem:[%s13469_s1 + $0x122] ss:$8 sm:$0xf] %vm13112_vm14, %v5951_v32  ;;  %5975 = vst.msk [vmem:[%s13469_s1 + $0x123] ss:$8 sm:$0xf] %vm13112_vm14, %v5967_v33 }
 0x68d   :  { %v5920_v38 = vld [vmem:[%s13469_s1 + $0x102] ss:$8 sm:$0xf]  ;;  %v5936_v39 = vld [vmem:[%s13469_s1 + $0x103] ss:$8 sm:$0xf] }
 0x68e   :  { %5742 = vst.msk [vmem:[%s13469_s1 + $0x1b0] sm:$0x3] %vm5716_vm10, %v5691_v36  ;;  %5746 = vst.msk [vmem:[%s13469_s1 + $0x1f0] sm:$0x3] %vm5716_vm10, %v5695_v42 }
 0x68f   :  { %5740 = vst.msk [vmem:[%s13469_s1 + $0x190] sm:$0xfc] %vm5712_vm12, %v5689_v37  ;;  %v5952_v40 = vld [vmem:[%s13469_s1 + $0x161] ss:$8 sm:$0xf] }
 0x690   :  { %5741 = vst.msk [vmem:[%s13469_s1 + $0x198] sm:$0xfc] %vm5714_vm13, %v5689_v37  ;;  %v5968_v41 = vld [vmem:[%s13469_s1 + $0x160] ss:$8 sm:$0xf] }
 0x691   :  { %5928 = vst.msk [vmem:[%s13469_s1 + $0x101] ss:$8 sm:$0xf] %vm13112_vm14, %v5920_v38  ;;  %5943 = vst.msk [vmem:[%s13469_s1 + $0x100] ss:$8 sm:$0xf] %vm13112_vm14, %v5936_v39 }
 0x692   :  { %5960 = vst.msk [vmem:[%s13469_s1 + $0x162] ss:$8 sm:$0xf] %vm13112_vm14, %v5952_v40  ;;  %5976 = vst.msk [vmem:[%s13469_s1 + $0x163] ss:$8 sm:$0xf] %vm13112_vm14, %v5968_v41 }
 0x693   :  { %v5921_v46 = vld [vmem:[%s13469_s1 + $0x142] ss:$8 sm:$0xf]  ;;  %v5937_v47 = vld [vmem:[%s13469_s1 + $0x143] ss:$8 sm:$0xf] }
 0x694   :  { %5747 = vst.msk [vmem:[%s13469_s1 + $0x1f8] sm:$0x3] %vm5718_vm11, %v5695_v42 }
 0x695   :  { %5744 = vst.msk [vmem:[%s13469_s1 + $0x1d0] sm:$0xfc] %vm5712_vm12, %v5693_v43  ;;  %v5953_v48 = vld [vmem:[%s13469_s1 + $0x1a1] ss:$8 sm:$0xf] }
 0x696   :  { %5745 = vst.msk [vmem:[%s13469_s1 + $0x1d8] sm:$0xfc] %vm5714_vm13, %v5693_v43  ;;  %v5969_v49 = vld [vmem:[%s13469_s1 + $0x1a0] ss:$8 sm:$0xf] }
 0x697   :  { %5929 = vst.msk [vmem:[%s13469_s1 + $0x141] ss:$8 sm:$0xf] %vm13112_vm14, %v5921_v46  ;;  %5944 = vst.msk [vmem:[%s13469_s1 + $0x140] ss:$8 sm:$0xf] %vm13112_vm14, %v5937_v47 }
 0x698   :  { %5961 = vst.msk [vmem:[%s13469_s1 + $0x1a2] ss:$8 sm:$0xf] %vm13112_vm14, %v5953_v48  ;;  %5977 = vst.msk [vmem:[%s13469_s1 + $0x1a3] ss:$8 sm:$0xf] %vm13112_vm14, %v5969_v49 }
 0x699   :  { %v5922_v14 = vld [vmem:[%s13469_s1 + $0x182] ss:$8 sm:$0xf]  ;;  %v5938_v15 = vld [vmem:[%s13469_s1 + $0x183] ss:$8 sm:$0xf] }
 0x69a   :  { %5930 = vst.msk [vmem:[%s13469_s1 + $0x181] ss:$8 sm:$0xf] %vm13112_vm14, %v5922_v14  ;;  %5945 = vst.msk [vmem:[%s13469_s1 + $0x180] ss:$8 sm:$0xf] %vm13112_vm14, %v5938_v15 }
 0x69b   :  { %v5954_v50 = vld [vmem:[%s13469_s1 + $0x1e1] ss:$8 sm:$0xf]  ;;  %v5970_v51 = vld [vmem:[%s13469_s1 + $0x1e0] ss:$8 sm:$0xf] }
 0x69c   :  { %5962 = vst.msk [vmem:[%s13469_s1 + $0x1e2] ss:$8 sm:$0xf] %vm13112_vm14, %v5954_v50  ;;  %5978 = vst.msk [vmem:[%s13469_s1 + $0x1e3] ss:$8 sm:$0xf] %vm13112_vm14, %v5970_v51 }
 0x69d   :  { %v5923_v52 = vld [vmem:[%s13469_s1 + $0x1c2] ss:$8 sm:$0xf]  ;;  %v5939_v53 = vld [vmem:[%s13469_s1 + $0x1c3] ss:$8 sm:$0xf] }
 0x69e   :  { %5931 = vst.msk [vmem:[%s13469_s1 + $0x1c1] ss:$8 sm:$0xf] %vm13112_vm14, %v5923_v52  ;;  %5946 = vst.msk [vmem:[%s13469_s1 + $0x1c0] ss:$8 sm:$0xf] %vm13112_vm14, %v5939_v53 }
 0x69f   :  { %5915 = vsyncpa [#allocation3], 1 }

</bundles_post_ra>
